<compile_context>
chip_gen: v5e
topology: v5e:2x2
jax: 0.10.0
libtpu: 0.0.40
codegen_flags: <defaults>
</compile_context>

<pallas_src>
import jax
import jax.numpy as jnp
from jax.experimental import pallas as pl
from jax.experimental.pallas import tpu as pltpu

BN_EPS = 1e-5
NUM_CLASSES = 48
IN_H, IN_W = 22, 38     # -> conv 20x36 -> pool 10x18 -> conv 8x16 -> pool 4x8


# ------------------------------- fused kernel ---------------------------------------

def _convnet_kernel(xp_ref, w1p_ref, b1_ref, w2p_ref, b2_ref, wc_ref, bc_ref,
                    out_ref, ph1_scr, lhs2_scr, h2_scr, fc_scr):
    f32 = jnp.float32
    n_img = out_ref.shape[0]

    # ---------------- stage 1: conv1 + BN + ReLU + maxpool(2,2) ----------------------
    # xp rows are (f, e, n, kh, jw): the 4x4 input patch of pooled output
    # (ph, pw) = (2*kh + f, 2*jw + e).  One MXU matmul per 2x2 pool-window phase with
    # the 3x3 (BN-folded) kernel zero-embedded into a (16, 32) RHS; max over phases.
    lhs1 = xp_ref[...]                                               # (4*N*45, 16)
    best1 = jnp.dot(lhs1, w1p_ref[0, :, :], preferred_element_type=f32)
    for q in range(1, 4):
        best1 = jnp.maximum(
            best1, jnp.dot(lhs1, w1p_ref[q, :, :], preferred_element_type=f32))
    # maxpool(relu(conv + b)) == relu(max(conv) + b)  (bias constant over the window)
    ph1_scr[...] = jnp.maximum(best1 + b1_ref[...], 0.0)             # rows (f,e,n,kh,jw)

    # ---------------- stage 2: conv2 + BN + ReLU + maxpool(2,2) ----------------------
    # Build one wide LHS: column block w = u*4 + v (u, v in 0..3) holds
    # pool1[n, :, 2*pi + u, 2*pj + v] at row (n, pi, pj).  Each copy below is a plain
    # contiguous (8, 32) slice of the parity-split pool1 output.
    for u in range(4):
        for v in range(4):
            par = (u % 2) * 2 + (v % 2)
            c0 = (u * 4 + v) * 32
            for n in range(n_img):
                for pi in range(4):
                    src = (par * n_img + n) * 45 + (pi + u // 2) * 9 + (v // 2)
                    dst = n * 32 + pi * 8
                    lhs2_scr[dst:dst + 8, c0:c0 + 32] = ph1_scr[src:src + 8, :]

    lhs2 = lhs2_scr[...]                                             # (N*32, 512)
    best2 = jnp.dot(lhs2, w2p_ref[0, :, :], preferred_element_type=f32)
    for q in range(1, 4):
        best2 = jnp.maximum(
            best2, jnp.dot(lhs2, w2p_ref[q, :, :], preferred_element_type=f32))
    h2_scr[...] = jnp.maximum(best2 + b2_ref[...], 0.0)   # (N*32, 32), rows (n, pi, pj)

    # ---------------- stage 3: fc (+ folded fc2), dropout2 = identity ----------------
    # Stage the (N*32, 32) pool2 output as a (N, 1024) lane-dense LHS (column index
    # s*32 + c), then a single MXU matmul against the folded fc->fc2 weight.
    for n in range(n_img):
        for s in range(32):
            fc_scr[n:n + 1, s * 32:(s + 1) * 32] = \
                h2_scr[n * 32 + s:n * 32 + s + 1, :]
    out_ref[...] = (jnp.dot(fc_scr[...], wc_ref[...], preferred_element_type=f32)
                    + bc_ref[...])                                   # lane-dense (N,128)


def _fused_forward(patches, w1p, b1, w2p, b2, wc, bc, *, n_img):
    return pl.pallas_call(
        _convnet_kernel,
        out_shape=jax.ShapeDtypeStruct((n_img, 128), jnp.float32),
        in_specs=[pl.BlockSpec(memory_space=pltpu.MemorySpace.VMEM) for _ in range(7)],
        out_specs=pl.BlockSpec(memory_space=pltpu.MemorySpace.VMEM),
        scratch_shapes=[
            pltpu.VMEM((4 * n_img * 45, 32), jnp.float32),   # parity-split pool1 output
            pltpu.VMEM((n_img * 32, 512), jnp.float32),      # conv2 wide LHS
            pltpu.VMEM((n_img * 32, 32), jnp.float32),       # pool2 output
            pltpu.VMEM((n_img, 1024), jnp.float32),          # fc LHS
        ],
    )(patches, w1p, b1, w2p, b2, wc, bc)


# ------------------------------- host-side glue --------------------------------------

def prepare_params(p):
    """One-time weight prep: fold BatchNorm (eval) into the convs, embed the conv
    kernels into pool-phase matmul RHSs, fold fc2 into fc (no nonlinearity between
    them; dropout2 is identity at inference), pad the classifier to 128 lanes."""
    f32 = jnp.float32
    hi = jax.lax.Precision.HIGHEST

    # conv1 (+BN) as 4 pool-phase RHSs over the 4x4 patch (K = 16).
    s1 = p["g1"] / jnp.sqrt(p["v1"] + BN_EPS)
    w1f = jnp.transpose(p["w1"][:, 0, :, :] * s1[:, None, None], (1, 2, 0))   # (3,3,32)
    b1 = ((p["b1"] - p["m1"]) * s1 + p["bt1"]).reshape(1, 32)
    w1p = jnp.zeros((4, 16, 32), f32)
    for qh in range(2):
        for qw in range(2):
            for di in range(3):
                for dj in range(3):
                    w1p = w1p.at[qh * 2 + qw,
                                 (qh + di) * 4 + (qw + dj), :].set(w1f[di, dj])

    # conv2 (+BN) as 4 pool-phase RHSs over the 16 window column blocks (K = 512).
    s2 = p["g2"] / jnp.sqrt(p["v2"] + BN_EPS)
    w2f = jnp.transpose(p["w2"], (2, 3, 1, 0)) * s2                        # (3,3,32,32)
    b2 = ((p["b2"] - p["m2"]) * s2 + p["bt2"]).reshape(1, 32)
    w2p = jnp.zeros((4, 16 * 32, 32), f32)
    for dh in range(2):
        for dw in range(2):
            for di in range(3):
                for dj in range(3):
                    blk = ((dh + di) * 4 + (dw + dj)) * 32
                    w2p = w2p.at[dh * 2 + dw, blk:blk + 32, :].set(w2f[di, dj])

    # fc weight is (128, 1024) with flat index k = c*32 + s (PyTorch NCHW flatten of
    # (N, 32, 4, 8)).  Reorder rows to s*32 + c, fold fc2, pad to 128 output lanes.
    w1024 = jnp.transpose(p["fc_w"].reshape(128, 32, 32), (2, 1, 0)).reshape(1024, 128)
    wc48 = jnp.dot(w1024, p["fc2_w"].T, precision=hi)                       # (1024, 48)
    wc = jnp.zeros((1024, 128), f32).at[:, :NUM_CLASSES].set(wc48)
    bc48 = jnp.dot(p["fc_b"], p["fc2_w"].T, precision=hi) + p["fc2_b"]
    bc = jnp.zeros((1, 128), f32).at[0, :NUM_CLASSES].set(bc48)
    return (w1p, b1, w2p, b2, wc, bc)


def convnet_forward(x_nchw, prep):
    n, c, h, w = x_nchw.shape
    assert (c, h, w) == (1, IN_H, IN_W)
    # Per-call prep (pure data movement, ~23 KB): extract the disjoint 4x4 stride-2
    # input patch feeding each pooled conv1 output, parity-split over (ph%2, pw%2) so
    # every in-kernel access is a plain contiguous slice.
    xs = x_nchw[:, 0]                                                 # (N, 22, 38)
    planes = []
    for f in range(2):
        for e in range(2):
            sub = xs[:, 2 * f:2 * f + 20, 2 * e:2 * e + 36]           # (N, 20, 36)
            pch = jnp.transpose(sub.reshape(n, 5, 4, 9, 4), (0, 1, 3, 2, 4))
            planes.append(pch.reshape(n, 45, 16))
    patches = jnp.stack(planes, axis=0).reshape(4 * n * 45, 16)       # rows (f,e,n,kh,jw)
    logits = _fused_forward(patches, *prep, n_img=n)
    return logits[:, :NUM_CLASSES]


def init_params(key, num_classes=NUM_CLASSES):
    ks = jax.random.split(key, 12)
    f32 = jnp.float32
    return {
        "w1": 0.1 * jax.random.normal(ks[0], (32, 1, 3, 3), f32),
        "b1": 0.1 * jax.random.normal(ks[1], (32,), f32),
        "g1": 1.0 + 0.1 * jax.random.normal(ks[2], (32,), f32),
        "bt1": 0.1 * jax.random.normal(ks[3], (32,), f32),
        "m1": 0.1 * jax.random.normal(ks[4], (32,), f32),
        "v1": jax.random.uniform(ks[5], (32,), f32, 0.5, 1.5),
        "w2": 0.05 * jax.random.normal(ks[6], (32, 32, 3, 3), f32),
        "b2": 0.1 * jax.random.normal(ks[7], (32,), f32),
        "g2": 1.0 + 0.1 * jax.random.normal(ks[8], (32,), f32),
        "bt2": 0.1 * jax.random.normal(ks[9], (32,), f32),
        "m2": 0.1 * jax.random.normal(ks[10], (32,), f32),
        "v2": jax.random.uniform(ks[11], (32,), f32, 0.5, 1.5),
        # PyTorch nn.Linear layout: (out_features, in_features)
        "fc_w": 0.05 * jax.random.normal(ks[0], (128, 4 * 8 * 32), f32),
        "fc_b": 0.05 * jax.random.normal(ks[1], (128,), f32),
        "fc2_w": 0.05 * jax.random.normal(ks[2], (num_classes, 128), f32),
        "fc2_b": 0.05 * jax.random.normal(ks[3], (num_classes,), f32),
    }


def reference_forward(x, p):
    """Pure-XLA reference with PyTorch eval-mode semantics, for verification."""
    hi = jax.lax.Precision.HIGHEST

    def block(y, w, b, g, bt, m, v):
        y = jax.lax.conv_general_dilated(y, w, (1, 1), "VALID",
                                         dimension_numbers=("NCHW", "OIHW", "NCHW"),
                                         precision=hi)
        y = y + b.reshape(1, -1, 1, 1)
        y = (y - m.reshape(1, -1, 1, 1)) * (g / jnp.sqrt(v + BN_EPS)).reshape(1, -1, 1, 1) \
            + bt.reshape(1, -1, 1, 1)
        y = jnp.maximum(y, 0.0)
        n, c, h, w_ = y.shape
        return y.reshape(n, c, h // 2, 2, w_ // 2, 2).max(axis=(3, 5))

    y = block(x, p["w1"], p["b1"], p["g1"], p["bt1"], p["m1"], p["v1"])
    y = block(y, p["w2"], p["b2"], p["g2"], p["bt2"], p["m2"], p["v2"])
    y = y.reshape(y.shape[0], -1)
    y = jnp.dot(y, p["fc_w"].T, precision=hi) + p["fc_b"]
    y = jnp.dot(y, p["fc2_w"].T, precision=hi) + p["fc2_b"]
    return y


if __name__ == "__main__":
    key = jax.random.PRNGKey(0)
    k_x, k_p = jax.random.split(key)
    x = jax.random.normal(k_x, (2, 1, IN_H, IN_W), jnp.float32)
    params = init_params(k_p)

    prep = prepare_params(params)            # one-time param prep, outside the jit
    fwd = jax.jit(convnet_forward)
    out = fwd(x, prep)
    jax.block_until_ready(out)
    assert out.shape == (2, NUM_CLASSES) and out.dtype == jnp.float32

    ref = reference_forward(x, params)
    assert jnp.allclose(out, ref, rtol=2e-2, atol=5e-2), \
        float(jnp.max(jnp.abs(out - ref)))
    print("KERNEL_OK")
</pallas_src>

<mosaic_0001>
module attributes {stable_mosaic.version = 11 : i64} {
  func.func @_convnet_kernel(%arg0: memref<360x16xf32, #tpu.memory_space<vmem>>, %arg1: memref<4x16x32xf32, #tpu.memory_space<vmem>>, %arg2: memref<1x32xf32, #tpu.memory_space<vmem>>, %arg3: memref<4x512x32xf32, #tpu.memory_space<vmem>>, %arg4: memref<1x32xf32, #tpu.memory_space<vmem>>, %arg5: memref<1024x128xf32, #tpu.memory_space<vmem>>, %arg6: memref<1x128xf32, #tpu.memory_space<vmem>>, %arg7: memref<2x128xf32, #tpu.memory_space<vmem>>, %arg8: memref<360x32xf32, #tpu.memory_space<vmem>>, %arg9: memref<64x512xf32, #tpu.memory_space<vmem>>, %arg10: memref<64x32xf32, #tpu.memory_space<vmem>>, %arg11: memref<2x1024xf32, #tpu.memory_space<vmem>>) attributes {dimension_semantics = [], scalar_prefetch = 0 : i64, scratch_operands = 4 : i64, tpu.core_type = #tpu.core_type<tc>} {
    %c0 = arith.constant 0 : index
    %c0_0 = arith.constant 0 : index
    %0 = vector.load %arg0[%c0, %c0_0] : memref<360x16xf32, #tpu.memory_space<vmem>>, vector<360x16xf32>
    %c0_1 = arith.constant 0 : index
    %c0_2 = arith.constant 0 : index
    %c0_3 = arith.constant 0 : index
    %1 = vector.load %arg1[%c0_1, %c0_2, %c0_3] : memref<4x16x32xf32, #tpu.memory_space<vmem>>, vector<1x16x32xf32>
    %2 = vector.shape_cast %1 : vector<1x16x32xf32> to vector<16x32xf32>
    %cst = arith.constant dense<0.000000e+00> : vector<360x32xf32>
    %3 = tpu.matmul %0, %2, %cst {dimension_numbers = #tpu.dot_dimension_numbers<[1], [0], [0], [1], [0, 0, 1, 1], [], []>} : vector<360x16xf32>, vector<16x32xf32>, vector<360x32xf32> -> vector<360x32xf32>
    %c1 = arith.constant 1 : index
    %c0_4 = arith.constant 0 : index
    %c0_5 = arith.constant 0 : index
    %4 = vector.load %arg1[%c1, %c0_4, %c0_5] : memref<4x16x32xf32, #tpu.memory_space<vmem>>, vector<1x16x32xf32>
    %5 = vector.shape_cast %4 : vector<1x16x32xf32> to vector<16x32xf32>
    %cst_6 = arith.constant dense<0.000000e+00> : vector<360x32xf32>
    %6 = tpu.matmul %0, %5, %cst_6 {dimension_numbers = #tpu.dot_dimension_numbers<[1], [0], [0], [1], [0, 0, 1, 1], [], []>} : vector<360x16xf32>, vector<16x32xf32>, vector<360x32xf32> -> vector<360x32xf32>
    %7 = arith.maximumf %3, %6 : vector<360x32xf32>
    %c2 = arith.constant 2 : index
    %c0_7 = arith.constant 0 : index
    %c0_8 = arith.constant 0 : index
    %8 = vector.load %arg1[%c2, %c0_7, %c0_8] : memref<4x16x32xf32, #tpu.memory_space<vmem>>, vector<1x16x32xf32>
    %9 = vector.shape_cast %8 : vector<1x16x32xf32> to vector<16x32xf32>
    %cst_9 = arith.constant dense<0.000000e+00> : vector<360x32xf32>
    %10 = tpu.matmul %0, %9, %cst_9 {dimension_numbers = #tpu.dot_dimension_numbers<[1], [0], [0], [1], [0, 0, 1, 1], [], []>} : vector<360x16xf32>, vector<16x32xf32>, vector<360x32xf32> -> vector<360x32xf32>
    %11 = arith.maximumf %7, %10 : vector<360x32xf32>
    %c3 = arith.constant 3 : index
    %c0_10 = arith.constant 0 : index
    %c0_11 = arith.constant 0 : index
    %12 = vector.load %arg1[%c3, %c0_10, %c0_11] : memref<4x16x32xf32, #tpu.memory_space<vmem>>, vector<1x16x32xf32>
    %13 = vector.shape_cast %12 : vector<1x16x32xf32> to vector<16x32xf32>
    %cst_12 = arith.constant dense<0.000000e+00> : vector<360x32xf32>
    %14 = tpu.matmul %0, %13, %cst_12 {dimension_numbers = #tpu.dot_dimension_numbers<[1], [0], [0], [1], [0, 0, 1, 1], [], []>} : vector<360x16xf32>, vector<16x32xf32>, vector<360x32xf32> -> vector<360x32xf32>
    %15 = arith.maximumf %11, %14 : vector<360x32xf32>
    %c0_13 = arith.constant 0 : index
    %c0_14 = arith.constant 0 : index
    %16 = vector.load %arg2[%c0_13, %c0_14] : memref<1x32xf32, #tpu.memory_space<vmem>>, vector<1x32xf32>
    %17 = vector.broadcast %16 : vector<1x32xf32> to vector<360x32xf32>
    %18 = arith.addf %15, %17 : vector<360x32xf32>
    %cst_15 = arith.constant 0.000000e+00 : f32
    %19 = vector.broadcast %cst_15 : f32 to vector<360x32xf32>
    %20 = arith.maximumf %18, %19 : vector<360x32xf32>
    %c0_16 = arith.constant 0 : index
    %c0_17 = arith.constant 0 : index
    %21 = vector.load %arg8[%c0_16, %c0_17] : memref<360x32xf32, #tpu.memory_space<vmem>>, vector<360x32xf32>
    tpu.vector_store %arg8[%c0_16, %c0_17], %20 {strides = array<i32>} : memref<360x32xf32, #tpu.memory_space<vmem>>, vector<360x32xf32>,
    %c0_18 = arith.constant 0 : index
    %c0_19 = arith.constant 0 : index
    %22 = vector.load %arg8[%c0_18, %c0_19] : memref<360x32xf32, #tpu.memory_space<vmem>>, vector<8x32xf32>
    %c0_20 = arith.constant 0 : index
    %c0_21 = arith.constant 0 : index
    %23 = vector.load %arg9[%c0_20, %c0_21] : memref<64x512xf32, #tpu.memory_space<vmem>>, vector<8x32xf32>
    tpu.vector_store %arg9[%c0_20, %c0_21], %22 {strides = array<i32>} : memref<64x512xf32, #tpu.memory_space<vmem>>, vector<8x32xf32>,
    %c9 = arith.constant 9 : index
    %c0_22 = arith.constant 0 : index
    %24 = vector.load %arg8[%c9, %c0_22] : memref<360x32xf32, #tpu.memory_space<vmem>>, vector<8x32xf32>
    %c8 = arith.constant 8 : index
    %c0_23 = arith.constant 0 : index
    %25 = vector.load %arg9[%c8, %c0_23] : memref<64x512xf32, #tpu.memory_space<vmem>>, vector<8x32xf32>
    tpu.vector_store %arg9[%c8, %c0_23], %24 {strides = array<i32>} : memref<64x512xf32, #tpu.memory_space<vmem>>, vector<8x32xf32>,
    %c18 = arith.constant 18 : index
    %c0_24 = arith.constant 0 : index
    %26 = vector.load %arg8[%c18, %c0_24] : memref<360x32xf32, #tpu.memory_space<vmem>>, vector<8x32xf32>
    %c16 = arith.constant 16 : index
    %c0_25 = arith.constant 0 : index
    %27 = vector.load %arg9[%c16, %c0_25] : memref<64x512xf32, #tpu.memory_space<vmem>>, vector<8x32xf32>
    tpu.vector_store %arg9[%c16, %c0_25], %26 {strides = array<i32>} : memref<64x512xf32, #tpu.memory_space<vmem>>, vector<8x32xf32>,
    %c27 = arith.constant 27 : index
    %c0_26 = arith.constant 0 : index
    %28 = vector.load %arg8[%c27, %c0_26] : memref<360x32xf32, #tpu.memory_space<vmem>>, vector<8x32xf32>
    %c24 = arith.constant 24 : index
    %c0_27 = arith.constant 0 : index
    %29 = vector.load %arg9[%c24, %c0_27] : memref<64x512xf32, #tpu.memory_space<vmem>>, vector<8x32xf32>
    tpu.vector_store %arg9[%c24, %c0_27], %28 {strides = array<i32>} : memref<64x512xf32, #tpu.memory_space<vmem>>, vector<8x32xf32>,
    %c45 = arith.constant 45 : index
    %c0_28 = arith.constant 0 : index
    %30 = vector.load %arg8[%c45, %c0_28] : memref<360x32xf32, #tpu.memory_space<vmem>>, vector<8x32xf32>
    %c32 = arith.constant 32 : index
    %c0_29 = arith.constant 0 : index
    %31 = vector.load %arg9[%c32, %c0_29] : memref<64x512xf32, #tpu.memory_space<vmem>>, vector<8x32xf32>
    tpu.vector_store %arg9[%c32, %c0_29], %30 {strides = array<i32>} : memref<64x512xf32, #tpu.memory_space<vmem>>, vector<8x32xf32>,
    %c54 = arith.constant 54 : index
    %c0_30 = arith.constant 0 : index
    %32 = vector.load %arg8[%c54, %c0_30] : memref<360x32xf32, #tpu.memory_space<vmem>>, vector<8x32xf32>
    %c40 = arith.constant 40 : index
    %c0_31 = arith.constant 0 : index
    %33 = vector.load %arg9[%c40, %c0_31] : memref<64x512xf32, #tpu.memory_space<vmem>>, vector<8x32xf32>
    tpu.vector_store %arg9[%c40, %c0_31], %32 {strides = array<i32>} : memref<64x512xf32, #tpu.memory_space<vmem>>, vector<8x32xf32>,
    %c63 = arith.constant 63 : index
    %c0_32 = arith.constant 0 : index
    %34 = vector.load %arg8[%c63, %c0_32] : memref<360x32xf32, #tpu.memory_space<vmem>>, vector<8x32xf32>
    %c48 = arith.constant 48 : index
    %c0_33 = arith.constant 0 : index
    %35 = vector.load %arg9[%c48, %c0_33] : memref<64x512xf32, #tpu.memory_space<vmem>>, vector<8x32xf32>
    tpu.vector_store %arg9[%c48, %c0_33], %34 {strides = array<i32>} : memref<64x512xf32, #tpu.memory_space<vmem>>, vector<8x32xf32>,
    %c72 = arith.constant 72 : index
    %c0_34 = arith.constant 0 : index
    %36 = vector.load %arg8[%c72, %c0_34] : memref<360x32xf32, #tpu.memory_space<vmem>>, vector<8x32xf32>
    %c56 = arith.constant 56 : index
    %c0_35 = arith.constant 0 : index
    %37 = vector.load %arg9[%c56, %c0_35] : memref<64x512xf32, #tpu.memory_space<vmem>>, vector<8x32xf32>
    tpu.vector_store %arg9[%c56, %c0_35], %36 {strides = array<i32>} : memref<64x512xf32, #tpu.memory_space<vmem>>, vector<8x32xf32>,
    %c90 = arith.constant 90 : index
    %c0_36 = arith.constant 0 : index
    %38 = vector.load %arg8[%c90, %c0_36] : memref<360x32xf32, #tpu.memory_space<vmem>>, vector<8x32xf32>
    %c0_37 = arith.constant 0 : index
    %c32_38 = arith.constant 32 : index
    %39 = vector.load %arg9[%c0_37, %c32_38] : memref<64x512xf32, #tpu.memory_space<vmem>>, vector<8x32xf32>
    tpu.vector_store %arg9[%c0_37, %c32_38], %38 {strides = array<i32>} : memref<64x512xf32, #tpu.memory_space<vmem>>, vector<8x32xf32>,
    %c99 = arith.constant 99 : index
    %c0_39 = arith.constant 0 : index
    %40 = vector.load %arg8[%c99, %c0_39] : memref<360x32xf32, #tpu.memory_space<vmem>>, vector<8x32xf32>
    %c8_40 = arith.constant 8 : index
    %c32_41 = arith.constant 32 : index
    %41 = vector.load %arg9[%c8_40, %c32_41] : memref<64x512xf32, #tpu.memory_space<vmem>>, vector<8x32xf32>
    tpu.vector_store %arg9[%c8_40, %c32_41], %40 {strides = array<i32>} : memref<64x512xf32, #tpu.memory_space<vmem>>, vector<8x32xf32>,
    %c108 = arith.constant 108 : index
    %c0_42 = arith.constant 0 : index
    %42 = vector.load %arg8[%c108, %c0_42] : memref<360x32xf32, #tpu.memory_space<vmem>>, vector<8x32xf32>
    %c16_43 = arith.constant 16 : index
    %c32_44 = arith.constant 32 : index
    %43 = vector.load %arg9[%c16_43, %c32_44] : memref<64x512xf32, #tpu.memory_space<vmem>>, vector<8x32xf32>
    tpu.vector_store %arg9[%c16_43, %c32_44], %42 {strides = array<i32>} : memref<64x512xf32, #tpu.memory_space<vmem>>, vector<8x32xf32>,
    %c117 = arith.constant 117 : index
    %c0_45 = arith.constant 0 : index
    %44 = vector.load %arg8[%c117, %c0_45] : memref<360x32xf32, #tpu.memory_space<vmem>>, vector<8x32xf32>
    %c24_46 = arith.constant 24 : index
    %c32_47 = arith.constant 32 : index
    %45 = vector.load %arg9[%c24_46, %c32_47] : memref<64x512xf32, #tpu.memory_space<vmem>>, vector<8x32xf32>
    tpu.vector_store %arg9[%c24_46, %c32_47], %44 {strides = array<i32>} : memref<64x512xf32, #tpu.memory_space<vmem>>, vector<8x32xf32>,
    %c135 = arith.constant 135 : index
    %c0_48 = arith.constant 0 : index
    %46 = vector.load %arg8[%c135, %c0_48] : memref<360x32xf32, #tpu.memory_space<vmem>>, vector<8x32xf32>
    %c32_49 = arith.constant 32 : index
    %c32_50 = arith.constant 32 : index
    %47 = vector.load %arg9[%c32_49, %c32_50] : memref<64x512xf32, #tpu.memory_space<vmem>>, vector<8x32xf32>
    tpu.vector_store %arg9[%c32_49, %c32_50], %46 {strides = array<i32>} : memref<64x512xf32, #tpu.memory_space<vmem>>, vector<8x32xf32>,
    %c144 = arith.constant 144 : index
    %c0_51 = arith.constant 0 : index
    %48 = vector.load %arg8[%c144, %c0_51] : memref<360x32xf32, #tpu.memory_space<vmem>>, vector<8x32xf32>
    %c40_52 = arith.constant 40 : index
    %c32_53 = arith.constant 32 : index
    %49 = vector.load %arg9[%c40_52, %c32_53] : memref<64x512xf32, #tpu.memory_space<vmem>>, vector<8x32xf32>
    tpu.vector_store %arg9[%c40_52, %c32_53], %48 {strides = array<i32>} : memref<64x512xf32, #tpu.memory_space<vmem>>, vector<8x32xf32>,
    %c153 = arith.constant 153 : index
    %c0_54 = arith.constant 0 : index
    %50 = vector.load %arg8[%c153, %c0_54] : memref<360x32xf32, #tpu.memory_space<vmem>>, vector<8x32xf32>
    %c48_55 = arith.constant 48 : index
    %c32_56 = arith.constant 32 : index
    %51 = vector.load %arg9[%c48_55, %c32_56] : memref<64x512xf32, #tpu.memory_space<vmem>>, vector<8x32xf32>
    tpu.vector_store %arg9[%c48_55, %c32_56], %50 {strides = array<i32>} : memref<64x512xf32, #tpu.memory_space<vmem>>, vector<8x32xf32>,
    %c162 = arith.constant 162 : index
    %c0_57 = arith.constant 0 : index
    %52 = vector.load %arg8[%c162, %c0_57] : memref<360x32xf32, #tpu.memory_space<vmem>>, vector<8x32xf32>
    %c56_58 = arith.constant 56 : index
    %c32_59 = arith.constant 32 : index
    %53 = vector.load %arg9[%c56_58, %c32_59] : memref<64x512xf32, #tpu.memory_space<vmem>>, vector<8x32xf32>
    tpu.vector_store %arg9[%c56_58, %c32_59], %52 {strides = array<i32>} : memref<64x512xf32, #tpu.memory_space<vmem>>, vector<8x32xf32>,
    %c1_60 = arith.constant 1 : index
    %c0_61 = arith.constant 0 : index
    %54 = vector.load %arg8[%c1_60, %c0_61] : memref<360x32xf32, #tpu.memory_space<vmem>>, vector<8x32xf32>
    %c0_62 = arith.constant 0 : index
    %c64 = arith.constant 64 : index
    %55 = vector.load %arg9[%c0_62, %c64] : memref<64x512xf32, #tpu.memory_space<vmem>>, vector<8x32xf32>
    tpu.vector_store %arg9[%c0_62, %c64], %54 {strides = array<i32>} : memref<64x512xf32, #tpu.memory_space<vmem>>, vector<8x32xf32>,
    %c10 = arith.constant 10 : index
    %c0_63 = arith.constant 0 : index
    %56 = vector.load %arg8[%c10, %c0_63] : memref<360x32xf32, #tpu.memory_space<vmem>>, vector<8x32xf32>
    %c8_64 = arith.constant 8 : index
    %c64_65 = arith.constant 64 : index
    %57 = vector.load %arg9[%c8_64, %c64_65] : memref<64x512xf32, #tpu.memory_space<vmem>>, vector<8x32xf32>
    tpu.vector_store %arg9[%c8_64, %c64_65], %56 {strides = array<i32>} : memref<64x512xf32, #tpu.memory_space<vmem>>, vector<8x32xf32>,
    %c19 = arith.constant 19 : index
    %c0_66 = arith.constant 0 : index
    %58 = vector.load %arg8[%c19, %c0_66] : memref<360x32xf32, #tpu.memory_space<vmem>>, vector<8x32xf32>
    %c16_67 = arith.constant 16 : index
    %c64_68 = arith.constant 64 : index
    %59 = vector.load %arg9[%c16_67, %c64_68] : memref<64x512xf32, #tpu.memory_space<vmem>>, vector<8x32xf32>
    tpu.vector_store %arg9[%c16_67, %c64_68], %58 {strides = array<i32>} : memref<64x512xf32, #tpu.memory_space<vmem>>, vector<8x32xf32>,
    %c28 = arith.constant 28 : index
    %c0_69 = arith.constant 0 : index
    %60 = vector.load %arg8[%c28, %c0_69] : memref<360x32xf32, #tpu.memory_space<vmem>>, vector<8x32xf32>
    %c24_70 = arith.constant 24 : index
    %c64_71 = arith.constant 64 : index
    %61 = vector.load %arg9[%c24_70, %c64_71] : memref<64x512xf32, #tpu.memory_space<vmem>>, vector<8x32xf32>
    tpu.vector_store %arg9[%c24_70, %c64_71], %60 {strides = array<i32>} : memref<64x512xf32, #tpu.memory_space<vmem>>, vector<8x32xf32>,
    %c46 = arith.constant 46 : index
    %c0_72 = arith.constant 0 : index
    %62 = vector.load %arg8[%c46, %c0_72] : memref<360x32xf32, #tpu.memory_space<vmem>>, vector<8x32xf32>
    %c32_73 = arith.constant 32 : index
    %c64_74 = arith.constant 64 : index
    %63 = vector.load %arg9[%c32_73, %c64_74] : memref<64x512xf32, #tpu.memory_space<vmem>>, vector<8x32xf32>
    tpu.vector_store %arg9[%c32_73, %c64_74], %62 {strides = array<i32>} : memref<64x512xf32, #tpu.memory_space<vmem>>, vector<8x32xf32>,
    %c55 = arith.constant 55 : index
    %c0_75 = arith.constant 0 : index
    %64 = vector.load %arg8[%c55, %c0_75] : memref<360x32xf32, #tpu.memory_space<vmem>>, vector<8x32xf32>
    %c40_76 = arith.constant 40 : index
    %c64_77 = arith.constant 64 : index
    %65 = vector.load %arg9[%c40_76, %c64_77] : memref<64x512xf32, #tpu.memory_space<vmem>>, vector<8x32xf32>
    tpu.vector_store %arg9[%c40_76, %c64_77], %64 {strides = array<i32>} : memref<64x512xf32, #tpu.memory_space<vmem>>, vector<8x32xf32>,
    %c64_78 = arith.constant 64 : index
    %c0_79 = arith.constant 0 : index
    %66 = vector.load %arg8[%c64_78, %c0_79] : memref<360x32xf32, #tpu.memory_space<vmem>>, vector<8x32xf32>
    %c48_80 = arith.constant 48 : index
    %c64_81 = arith.constant 64 : index
    %67 = vector.load %arg9[%c48_80, %c64_81] : memref<64x512xf32, #tpu.memory_space<vmem>>, vector<8x32xf32>
    tpu.vector_store %arg9[%c48_80, %c64_81], %66 {strides = array<i32>} : memref<64x512xf32, #tpu.memory_space<vmem>>, vector<8x32xf32>,
    %c73 = arith.constant 73 : index
    %c0_82 = arith.constant 0 : index
    %68 = vector.load %arg8[%c73, %c0_82] : memref<360x32xf32, #tpu.memory_space<vmem>>, vector<8x32xf32>
    %c56_83 = arith.constant 56 : index
    %c64_84 = arith.constant 64 : index
    %69 = vector.load %arg9[%c56_83, %c64_84] : memref<64x512xf32, #tpu.memory_space<vmem>>, vector<8x32xf32>
    tpu.vector_store %arg9[%c56_83, %c64_84], %68 {strides = array<i32>} : memref<64x512xf32, #tpu.memory_space<vmem>>, vector<8x32xf32>,
    %c91 = arith.constant 91 : index
    %c0_85 = arith.constant 0 : index
    %70 = vector.load %arg8[%c91, %c0_85] : memref<360x32xf32, #tpu.memory_space<vmem>>, vector<8x32xf32>
    %c0_86 = arith.constant 0 : index
    %c96 = arith.constant 96 : index
    %71 = vector.load %arg9[%c0_86, %c96] : memref<64x512xf32, #tpu.memory_space<vmem>>, vector<8x32xf32>
    tpu.vector_store %arg9[%c0_86, %c96], %70 {strides = array<i32>} : memref<64x512xf32, #tpu.memory_space<vmem>>, vector<8x32xf32>,
    %c100 = arith.constant 100 : index
    %c0_87 = arith.constant 0 : index
    %72 = vector.load %arg8[%c100, %c0_87] : memref<360x32xf32, #tpu.memory_space<vmem>>, vector<8x32xf32>
    %c8_88 = arith.constant 8 : index
    %c96_89 = arith.constant 96 : index
    %73 = vector.load %arg9[%c8_88, %c96_89] : memref<64x512xf32, #tpu.memory_space<vmem>>, vector<8x32xf32>
    tpu.vector_store %arg9[%c8_88, %c96_89], %72 {strides = array<i32>} : memref<64x512xf32, #tpu.memory_space<vmem>>, vector<8x32xf32>,
    %c109 = arith.constant 109 : index
    %c0_90 = arith.constant 0 : index
    %74 = vector.load %arg8[%c109, %c0_90] : memref<360x32xf32, #tpu.memory_space<vmem>>, vector<8x32xf32>
    %c16_91 = arith.constant 16 : index
    %c96_92 = arith.constant 96 : index
    %75 = vector.load %arg9[%c16_91, %c96_92] : memref<64x512xf32, #tpu.memory_space<vmem>>, vector<8x32xf32>
    tpu.vector_store %arg9[%c16_91, %c96_92], %74 {strides = array<i32>} : memref<64x512xf32, #tpu.memory_space<vmem>>, vector<8x32xf32>,
    %c118 = arith.constant 118 : index
    %c0_93 = arith.constant 0 : index
    %76 = vector.load %arg8[%c118, %c0_93] : memref<360x32xf32, #tpu.memory_space<vmem>>, vector<8x32xf32>
    %c24_94 = arith.constant 24 : index
    %c96_95 = arith.constant 96 : index
    %77 = vector.load %arg9[%c24_94, %c96_95] : memref<64x512xf32, #tpu.memory_space<vmem>>, vector<8x32xf32>
    tpu.vector_store %arg9[%c24_94, %c96_95], %76 {strides = array<i32>} : memref<64x512xf32, #tpu.memory_space<vmem>>, vector<8x32xf32>,
    %c136 = arith.constant 136 : index
    %c0_96 = arith.constant 0 : index
    %78 = vector.load %arg8[%c136, %c0_96] : memref<360x32xf32, #tpu.memory_space<vmem>>, vector<8x32xf32>
    %c32_97 = arith.constant 32 : index
    %c96_98 = arith.constant 96 : index
    %79 = vector.load %arg9[%c32_97, %c96_98] : memref<64x512xf32, #tpu.memory_space<vmem>>, vector<8x32xf32>
    tpu.vector_store %arg9[%c32_97, %c96_98], %78 {strides = array<i32>} : memref<64x512xf32, #tpu.memory_space<vmem>>, vector<8x32xf32>,
    %c145 = arith.constant 145 : index
    %c0_99 = arith.constant 0 : index
    %80 = vector.load %arg8[%c145, %c0_99] : memref<360x32xf32, #tpu.memory_space<vmem>>, vector<8x32xf32>
    %c40_100 = arith.constant 40 : index
    %c96_101 = arith.constant 96 : index
    %81 = vector.load %arg9[%c40_100, %c96_101] : memref<64x512xf32, #tpu.memory_space<vmem>>, vector<8x32xf32>
    tpu.vector_store %arg9[%c40_100, %c96_101], %80 {strides = array<i32>} : memref<64x512xf32, #tpu.memory_space<vmem>>, vector<8x32xf32>,
    %c154 = arith.constant 154 : index
    %c0_102 = arith.constant 0 : index
    %82 = vector.load %arg8[%c154, %c0_102] : memref<360x32xf32, #tpu.memory_space<vmem>>, vector<8x32xf32>
    %c48_103 = arith.constant 48 : index
    %c96_104 = arith.constant 96 : index
    %83 = vector.load %arg9[%c48_103, %c96_104] : memref<64x512xf32, #tpu.memory_space<vmem>>, vector<8x32xf32>
    tpu.vector_store %arg9[%c48_103, %c96_104], %82 {strides = array<i32>} : memref<64x512xf32, #tpu.memory_space<vmem>>, vector<8x32xf32>,
    %c163 = arith.constant 163 : index
    %c0_105 = arith.constant 0 : index
    %84 = vector.load %arg8[%c163, %c0_105] : memref<360x32xf32, #tpu.memory_space<vmem>>, vector<8x32xf32>
    %c56_106 = arith.constant 56 : index
    %c96_107 = arith.constant 96 : index
    %85 = vector.load %arg9[%c56_106, %c96_107] : memref<64x512xf32, #tpu.memory_space<vmem>>, vector<8x32xf32>
    tpu.vector_store %arg9[%c56_106, %c96_107], %84 {strides = array<i32>} : memref<64x512xf32, #tpu.memory_space<vmem>>, vector<8x32xf32>,
    %c180 = arith.constant 180 : index
    %c0_108 = arith.constant 0 : index
    %86 = vector.load %arg8[%c180, %c0_108] : memref<360x32xf32, #tpu.memory_space<vmem>>, vector<8x32xf32>
    %c0_109 = arith.constant 0 : index
    %c128 = arith.constant 128 : index
    %87 = vector.load %arg9[%c0_109, %c128] : memref<64x512xf32, #tpu.memory_space<vmem>>, vector<8x32xf32>
    tpu.vector_store %arg9[%c0_109, %c128], %86 {strides = array<i32>} : memref<64x512xf32, #tpu.memory_space<vmem>>, vector<8x32xf32>,
    %c189 = arith.constant 189 : index
    %c0_110 = arith.constant 0 : index
    %88 = vector.load %arg8[%c189, %c0_110] : memref<360x32xf32, #tpu.memory_space<vmem>>, vector<8x32xf32>
    %c8_111 = arith.constant 8 : index
    %c128_112 = arith.constant 128 : index
    %89 = vector.load %arg9[%c8_111, %c128_112] : memref<64x512xf32, #tpu.memory_space<vmem>>, vector<8x32xf32>
    tpu.vector_store %arg9[%c8_111, %c128_112], %88 {strides = array<i32>} : memref<64x512xf32, #tpu.memory_space<vmem>>, vector<8x32xf32>,
    %c198 = arith.constant 198 : index
    %c0_113 = arith.constant 0 : index
    %90 = vector.load %arg8[%c198, %c0_113] : memref<360x32xf32, #tpu.memory_space<vmem>>, vector<8x32xf32>
    %c16_114 = arith.constant 16 : index
    %c128_115 = arith.constant 128 : index
    %91 = vector.load %arg9[%c16_114, %c128_115] : memref<64x512xf32, #tpu.memory_space<vmem>>, vector<8x32xf32>
    tpu.vector_store %arg9[%c16_114, %c128_115], %90 {strides = array<i32>} : memref<64x512xf32, #tpu.memory_space<vmem>>, vector<8x32xf32>,
    %c207 = arith.constant 207 : index
    %c0_116 = arith.constant 0 : index
    %92 = vector.load %arg8[%c207, %c0_116] : memref<360x32xf32, #tpu.memory_space<vmem>>, vector<8x32xf32>
    %c24_117 = arith.constant 24 : index
    %c128_118 = arith.constant 128 : index
    %93 = vector.load %arg9[%c24_117, %c128_118] : memref<64x512xf32, #tpu.memory_space<vmem>>, vector<8x32xf32>
    tpu.vector_store %arg9[%c24_117, %c128_118], %92 {strides = array<i32>} : memref<64x512xf32, #tpu.memory_space<vmem>>, vector<8x32xf32>,
    %c225 = arith.constant 225 : index
    %c0_119 = arith.constant 0 : index
    %94 = vector.load %arg8[%c225, %c0_119] : memref<360x32xf32, #tpu.memory_space<vmem>>, vector<8x32xf32>
    %c32_120 = arith.constant 32 : index
    %c128_121 = arith.constant 128 : index
    %95 = vector.load %arg9[%c32_120, %c128_121] : memref<64x512xf32, #tpu.memory_space<vmem>>, vector<8x32xf32>
    tpu.vector_store %arg9[%c32_120, %c128_121], %94 {strides = array<i32>} : memref<64x512xf32, #tpu.memory_space<vmem>>, vector<8x32xf32>,
    %c234 = arith.constant 234 : index
    %c0_122 = arith.constant 0 : index
    %96 = vector.load %arg8[%c234, %c0_122] : memref<360x32xf32, #tpu.memory_space<vmem>>, vector<8x32xf32>
    %c40_123 = arith.constant 40 : index
    %c128_124 = arith.constant 128 : index
    %97 = vector.load %arg9[%c40_123, %c128_124] : memref<64x512xf32, #tpu.memory_space<vmem>>, vector<8x32xf32>
    tpu.vector_store %arg9[%c40_123, %c128_124], %96 {strides = array<i32>} : memref<64x512xf32, #tpu.memory_space<vmem>>, vector<8x32xf32>,
    %c243 = arith.constant 243 : index
    %c0_125 = arith.constant 0 : index
    %98 = vector.load %arg8[%c243, %c0_125] : memref<360x32xf32, #tpu.memory_space<vmem>>, vector<8x32xf32>
    %c48_126 = arith.constant 48 : index
    %c128_127 = arith.constant 128 : index
    %99 = vector.load %arg9[%c48_126, %c128_127] : memref<64x512xf32, #tpu.memory_space<vmem>>, vector<8x32xf32>
    tpu.vector_store %arg9[%c48_126, %c128_127], %98 {strides = array<i32>} : memref<64x512xf32, #tpu.memory_space<vmem>>, vector<8x32xf32>,
    %c252 = arith.constant 252 : index
    %c0_128 = arith.constant 0 : index
    %100 = vector.load %arg8[%c252, %c0_128] : memref<360x32xf32, #tpu.memory_space<vmem>>, vector<8x32xf32>
    %c56_129 = arith.constant 56 : index
    %c128_130 = arith.constant 128 : index
    %101 = vector.load %arg9[%c56_129, %c128_130] : memref<64x512xf32, #tpu.memory_space<vmem>>, vector<8x32xf32>
    tpu.vector_store %arg9[%c56_129, %c128_130], %100 {strides = array<i32>} : memref<64x512xf32, #tpu.memory_space<vmem>>, vector<8x32xf32>,
    %c270 = arith.constant 270 : index
    %c0_131 = arith.constant 0 : index
    %102 = vector.load %arg8[%c270, %c0_131] : memref<360x32xf32, #tpu.memory_space<vmem>>, vector<8x32xf32>
    %c0_132 = arith.constant 0 : index
    %c160 = arith.constant 160 : index
    %103 = vector.load %arg9[%c0_132, %c160] : memref<64x512xf32, #tpu.memory_space<vmem>>, vector<8x32xf32>
    tpu.vector_store %arg9[%c0_132, %c160], %102 {strides = array<i32>} : memref<64x512xf32, #tpu.memory_space<vmem>>, vector<8x32xf32>,
    %c279 = arith.constant 279 : index
    %c0_133 = arith.constant 0 : index
    %104 = vector.load %arg8[%c279, %c0_133] : memref<360x32xf32, #tpu.memory_space<vmem>>, vector<8x32xf32>
    %c8_134 = arith.constant 8 : index
    %c160_135 = arith.constant 160 : index
    %105 = vector.load %arg9[%c8_134, %c160_135] : memref<64x512xf32, #tpu.memory_space<vmem>>, vector<8x32xf32>
    tpu.vector_store %arg9[%c8_134, %c160_135], %104 {strides = array<i32>} : memref<64x512xf32, #tpu.memory_space<vmem>>, vector<8x32xf32>,
    %c288 = arith.constant 288 : index
    %c0_136 = arith.constant 0 : index
    %106 = vector.load %arg8[%c288, %c0_136] : memref<360x32xf32, #tpu.memory_space<vmem>>, vector<8x32xf32>
    %c16_137 = arith.constant 16 : index
    %c160_138 = arith.constant 160 : index
    %107 = vector.load %arg9[%c16_137, %c160_138] : memref<64x512xf32, #tpu.memory_space<vmem>>, vector<8x32xf32>
    tpu.vector_store %arg9[%c16_137, %c160_138], %106 {strides = array<i32>} : memref<64x512xf32, #tpu.memory_space<vmem>>, vector<8x32xf32>,
    %c297 = arith.constant 297 : index
    %c0_139 = arith.constant 0 : index
    %108 = vector.load %arg8[%c297, %c0_139] : memref<360x32xf32, #tpu.memory_space<vmem>>, vector<8x32xf32>
    %c24_140 = arith.constant 24 : index
    %c160_141 = arith.constant 160 : index
    %109 = vector.load %arg9[%c24_140, %c160_141] : memref<64x512xf32, #tpu.memory_space<vmem>>, vector<8x32xf32>
    tpu.vector_store %arg9[%c24_140, %c160_141], %108 {strides = array<i32>} : memref<64x512xf32, #tpu.memory_space<vmem>>, vector<8x32xf32>,
    %c315 = arith.constant 315 : index
    %c0_142 = arith.constant 0 : index
    %110 = vector.load %arg8[%c315, %c0_142] : memref<360x32xf32, #tpu.memory_space<vmem>>, vector<8x32xf32>
    %c32_143 = arith.constant 32 : index
    %c160_144 = arith.constant 160 : index
    %111 = vector.load %arg9[%c32_143, %c160_144] : memref<64x512xf32, #tpu.memory_space<vmem>>, vector<8x32xf32>
    tpu.vector_store %arg9[%c32_143, %c160_144], %110 {strides = array<i32>} : memref<64x512xf32, #tpu.memory_space<vmem>>, vector<8x32xf32>,
    %c324 = arith.constant 324 : index
    %c0_145 = arith.constant 0 : index
    %112 = vector.load %arg8[%c324, %c0_145] : memref<360x32xf32, #tpu.memory_space<vmem>>, vector<8x32xf32>
    %c40_146 = arith.constant 40 : index
    %c160_147 = arith.constant 160 : index
    %113 = vector.load %arg9[%c40_146, %c160_147] : memref<64x512xf32, #tpu.memory_space<vmem>>, vector<8x32xf32>
    tpu.vector_store %arg9[%c40_146, %c160_147], %112 {strides = array<i32>} : memref<64x512xf32, #tpu.memory_space<vmem>>, vector<8x32xf32>,
    %c333 = arith.constant 333 : index
    %c0_148 = arith.constant 0 : index
    %114 = vector.load %arg8[%c333, %c0_148] : memref<360x32xf32, #tpu.memory_space<vmem>>, vector<8x32xf32>
    %c48_149 = arith.constant 48 : index
    %c160_150 = arith.constant 160 : index
    %115 = vector.load %arg9[%c48_149, %c160_150] : memref<64x512xf32, #tpu.memory_space<vmem>>, vector<8x32xf32>
    tpu.vector_store %arg9[%c48_149, %c160_150], %114 {strides = array<i32>} : memref<64x512xf32, #tpu.memory_space<vmem>>, vector<8x32xf32>,
    %c342 = arith.constant 342 : index
    %c0_151 = arith.constant 0 : index
    %116 = vector.load %arg8[%c342, %c0_151] : memref<360x32xf32, #tpu.memory_space<vmem>>, vector<8x32xf32>
    %c56_152 = arith.constant 56 : index
    %c160_153 = arith.constant 160 : index
    %117 = vector.load %arg9[%c56_152, %c160_153] : memref<64x512xf32, #tpu.memory_space<vmem>>, vector<8x32xf32>
    tpu.vector_store %arg9[%c56_152, %c160_153], %116 {strides = array<i32>} : memref<64x512xf32, #tpu.memory_space<vmem>>, vector<8x32xf32>,
    %c181 = arith.constant 181 : index
    %c0_154 = arith.constant 0 : index
    %118 = vector.load %arg8[%c181, %c0_154] : memref<360x32xf32, #tpu.memory_space<vmem>>, vector<8x32xf32>
    %c0_155 = arith.constant 0 : index
    %c192 = arith.constant 192 : index
    %119 = vector.load %arg9[%c0_155, %c192] : memref<64x512xf32, #tpu.memory_space<vmem>>, vector<8x32xf32>
    tpu.vector_store %arg9[%c0_155, %c192], %118 {strides = array<i32>} : memref<64x512xf32, #tpu.memory_space<vmem>>, vector<8x32xf32>,
    %c190 = arith.constant 190 : index
    %c0_156 = arith.constant 0 : index
    %120 = vector.load %arg8[%c190, %c0_156] : memref<360x32xf32, #tpu.memory_space<vmem>>, vector<8x32xf32>
    %c8_157 = arith.constant 8 : index
    %c192_158 = arith.constant 192 : index
    %121 = vector.load %arg9[%c8_157, %c192_158] : memref<64x512xf32, #tpu.memory_space<vmem>>, vector<8x32xf32>
    tpu.vector_store %arg9[%c8_157, %c192_158], %120 {strides = array<i32>} : memref<64x512xf32, #tpu.memory_space<vmem>>, vector<8x32xf32>,
    %c199 = arith.constant 199 : index
    %c0_159 = arith.constant 0 : index
    %122 = vector.load %arg8[%c199, %c0_159] : memref<360x32xf32, #tpu.memory_space<vmem>>, vector<8x32xf32>
    %c16_160 = arith.constant 16 : index
    %c192_161 = arith.constant 192 : index
    %123 = vector.load %arg9[%c16_160, %c192_161] : memref<64x512xf32, #tpu.memory_space<vmem>>, vector<8x32xf32>
    tpu.vector_store %arg9[%c16_160, %c192_161], %122 {strides = array<i32>} : memref<64x512xf32, #tpu.memory_space<vmem>>, vector<8x32xf32>,
    %c208 = arith.constant 208 : index
    %c0_162 = arith.constant 0 : index
    %124 = vector.load %arg8[%c208, %c0_162] : memref<360x32xf32, #tpu.memory_space<vmem>>, vector<8x32xf32>
    %c24_163 = arith.constant 24 : index
    %c192_164 = arith.constant 192 : index
    %125 = vector.load %arg9[%c24_163, %c192_164] : memref<64x512xf32, #tpu.memory_space<vmem>>, vector<8x32xf32>
    tpu.vector_store %arg9[%c24_163, %c192_164], %124 {strides = array<i32>} : memref<64x512xf32, #tpu.memory_space<vmem>>, vector<8x32xf32>,
    %c226 = arith.constant 226 : index
    %c0_165 = arith.constant 0 : index
    %126 = vector.load %arg8[%c226, %c0_165] : memref<360x32xf32, #tpu.memory_space<vmem>>, vector<8x32xf32>
    %c32_166 = arith.constant 32 : index
    %c192_167 = arith.constant 192 : index
    %127 = vector.load %arg9[%c32_166, %c192_167] : memref<64x512xf32, #tpu.memory_space<vmem>>, vector<8x32xf32>
    tpu.vector_store %arg9[%c32_166, %c192_167], %126 {strides = array<i32>} : memref<64x512xf32, #tpu.memory_space<vmem>>, vector<8x32xf32>,
    %c235 = arith.constant 235 : index
    %c0_168 = arith.constant 0 : index
    %128 = vector.load %arg8[%c235, %c0_168] : memref<360x32xf32, #tpu.memory_space<vmem>>, vector<8x32xf32>
    %c40_169 = arith.constant 40 : index
    %c192_170 = arith.constant 192 : index
    %129 = vector.load %arg9[%c40_169, %c192_170] : memref<64x512xf32, #tpu.memory_space<vmem>>, vector<8x32xf32>
    tpu.vector_store %arg9[%c40_169, %c192_170], %128 {strides = array<i32>} : memref<64x512xf32, #tpu.memory_space<vmem>>, vector<8x32xf32>,
    %c244 = arith.constant 244 : index
    %c0_171 = arith.constant 0 : index
    %130 = vector.load %arg8[%c244, %c0_171] : memref<360x32xf32, #tpu.memory_space<vmem>>, vector<8x32xf32>
    %c48_172 = arith.constant 48 : index
    %c192_173 = arith.constant 192 : index
    %131 = vector.load %arg9[%c48_172, %c192_173] : memref<64x512xf32, #tpu.memory_space<vmem>>, vector<8x32xf32>
    tpu.vector_store %arg9[%c48_172, %c192_173], %130 {strides = array<i32>} : memref<64x512xf32, #tpu.memory_space<vmem>>, vector<8x32xf32>,
    %c253 = arith.constant 253 : index
    %c0_174 = arith.constant 0 : index
    %132 = vector.load %arg8[%c253, %c0_174] : memref<360x32xf32, #tpu.memory_space<vmem>>, vector<8x32xf32>
    %c56_175 = arith.constant 56 : index
    %c192_176 = arith.constant 192 : index
    %133 = vector.load %arg9[%c56_175, %c192_176] : memref<64x512xf32, #tpu.memory_space<vmem>>, vector<8x32xf32>
    tpu.vector_store %arg9[%c56_175, %c192_176], %132 {strides = array<i32>} : memref<64x512xf32, #tpu.memory_space<vmem>>, vector<8x32xf32>,
    %c271 = arith.constant 271 : index
    %c0_177 = arith.constant 0 : index
    %134 = vector.load %arg8[%c271, %c0_177] : memref<360x32xf32, #tpu.memory_space<vmem>>, vector<8x32xf32>
    %c0_178 = arith.constant 0 : index
    %c224 = arith.constant 224 : index
    %135 = vector.load %arg9[%c0_178, %c224] : memref<64x512xf32, #tpu.memory_space<vmem>>, vector<8x32xf32>
    tpu.vector_store %arg9[%c0_178, %c224], %134 {strides = array<i32>} : memref<64x512xf32, #tpu.memory_space<vmem>>, vector<8x32xf32>,
    %c280 = arith.constant 280 : index
    %c0_179 = arith.constant 0 : index
    %136 = vector.load %arg8[%c280, %c0_179] : memref<360x32xf32, #tpu.memory_space<vmem>>, vector<8x32xf32>
    %c8_180 = arith.constant 8 : index
    %c224_181 = arith.constant 224 : index
    %137 = vector.load %arg9[%c8_180, %c224_181] : memref<64x512xf32, #tpu.memory_space<vmem>>, vector<8x32xf32>
    tpu.vector_store %arg9[%c8_180, %c224_181], %136 {strides = array<i32>} : memref<64x512xf32, #tpu.memory_space<vmem>>, vector<8x32xf32>,
    %c289 = arith.constant 289 : index
    %c0_182 = arith.constant 0 : index
    %138 = vector.load %arg8[%c289, %c0_182] : memref<360x32xf32, #tpu.memory_space<vmem>>, vector<8x32xf32>
    %c16_183 = arith.constant 16 : index
    %c224_184 = arith.constant 224 : index
    %139 = vector.load %arg9[%c16_183, %c224_184] : memref<64x512xf32, #tpu.memory_space<vmem>>, vector<8x32xf32>
    tpu.vector_store %arg9[%c16_183, %c224_184], %138 {strides = array<i32>} : memref<64x512xf32, #tpu.memory_space<vmem>>, vector<8x32xf32>,
    %c298 = arith.constant 298 : index
    %c0_185 = arith.constant 0 : index
    %140 = vector.load %arg8[%c298, %c0_185] : memref<360x32xf32, #tpu.memory_space<vmem>>, vector<8x32xf32>
    %c24_186 = arith.constant 24 : index
    %c224_187 = arith.constant 224 : index
    %141 = vector.load %arg9[%c24_186, %c224_187] : memref<64x512xf32, #tpu.memory_space<vmem>>, vector<8x32xf32>
    tpu.vector_store %arg9[%c24_186, %c224_187], %140 {strides = array<i32>} : memref<64x512xf32, #tpu.memory_space<vmem>>, vector<8x32xf32>,
    %c316 = arith.constant 316 : index
    %c0_188 = arith.constant 0 : index
    %142 = vector.load %arg8[%c316, %c0_188] : memref<360x32xf32, #tpu.memory_space<vmem>>, vector<8x32xf32>
    %c32_189 = arith.constant 32 : index
    %c224_190 = arith.constant 224 : index
    %143 = vector.load %arg9[%c32_189, %c224_190] : memref<64x512xf32, #tpu.memory_space<vmem>>, vector<8x32xf32>
    tpu.vector_store %arg9[%c32_189, %c224_190], %142 {strides = array<i32>} : memref<64x512xf32, #tpu.memory_space<vmem>>, vector<8x32xf32>,
    %c325 = arith.constant 325 : index
    %c0_191 = arith.constant 0 : index
    %144 = vector.load %arg8[%c325, %c0_191] : memref<360x32xf32, #tpu.memory_space<vmem>>, vector<8x32xf32>
    %c40_192 = arith.constant 40 : index
    %c224_193 = arith.constant 224 : index
    %145 = vector.load %arg9[%c40_192, %c224_193] : memref<64x512xf32, #tpu.memory_space<vmem>>, vector<8x32xf32>
    tpu.vector_store %arg9[%c40_192, %c224_193], %144 {strides = array<i32>} : memref<64x512xf32, #tpu.memory_space<vmem>>, vector<8x32xf32>,
    %c334 = arith.constant 334 : index
    %c0_194 = arith.constant 0 : index
    %146 = vector.load %arg8[%c334, %c0_194] : memref<360x32xf32, #tpu.memory_space<vmem>>, vector<8x32xf32>
    %c48_195 = arith.constant 48 : index
    %c224_196 = arith.constant 224 : index
    %147 = vector.load %arg9[%c48_195, %c224_196] : memref<64x512xf32, #tpu.memory_space<vmem>>, vector<8x32xf32>
    tpu.vector_store %arg9[%c48_195, %c224_196], %146 {strides = array<i32>} : memref<64x512xf32, #tpu.memory_space<vmem>>, vector<8x32xf32>,
    %c343 = arith.constant 343 : index
    %c0_197 = arith.constant 0 : index
    %148 = vector.load %arg8[%c343, %c0_197] : memref<360x32xf32, #tpu.memory_space<vmem>>, vector<8x32xf32>
    %c56_198 = arith.constant 56 : index
    %c224_199 = arith.constant 224 : index
    %149 = vector.load %arg9[%c56_198, %c224_199] : memref<64x512xf32, #tpu.memory_space<vmem>>, vector<8x32xf32>
    tpu.vector_store %arg9[%c56_198, %c224_199], %148 {strides = array<i32>} : memref<64x512xf32, #tpu.memory_space<vmem>>, vector<8x32xf32>,
    %c9_200 = arith.constant 9 : index
    %c0_201 = arith.constant 0 : index
    %150 = vector.load %arg8[%c9_200, %c0_201] : memref<360x32xf32, #tpu.memory_space<vmem>>, vector<8x32xf32>
    %c0_202 = arith.constant 0 : index
    %c256 = arith.constant 256 : index
    %151 = vector.load %arg9[%c0_202, %c256] : memref<64x512xf32, #tpu.memory_space<vmem>>, vector<8x32xf32>
    tpu.vector_store %arg9[%c0_202, %c256], %150 {strides = array<i32>} : memref<64x512xf32, #tpu.memory_space<vmem>>, vector<8x32xf32>,
    %c18_203 = arith.constant 18 : index
    %c0_204 = arith.constant 0 : index
    %152 = vector.load %arg8[%c18_203, %c0_204] : memref<360x32xf32, #tpu.memory_space<vmem>>, vector<8x32xf32>
    %c8_205 = arith.constant 8 : index
    %c256_206 = arith.constant 256 : index
    %153 = vector.load %arg9[%c8_205, %c256_206] : memref<64x512xf32, #tpu.memory_space<vmem>>, vector<8x32xf32>
    tpu.vector_store %arg9[%c8_205, %c256_206], %152 {strides = array<i32>} : memref<64x512xf32, #tpu.memory_space<vmem>>, vector<8x32xf32>,
    %c27_207 = arith.constant 27 : index
    %c0_208 = arith.constant 0 : index
    %154 = vector.load %arg8[%c27_207, %c0_208] : memref<360x32xf32, #tpu.memory_space<vmem>>, vector<8x32xf32>
    %c16_209 = arith.constant 16 : index
    %c256_210 = arith.constant 256 : index
    %155 = vector.load %arg9[%c16_209, %c256_210] : memref<64x512xf32, #tpu.memory_space<vmem>>, vector<8x32xf32>
    tpu.vector_store %arg9[%c16_209, %c256_210], %154 {strides = array<i32>} : memref<64x512xf32, #tpu.memory_space<vmem>>, vector<8x32xf32>,
    %c36 = arith.constant 36 : index
    %c0_211 = arith.constant 0 : index
    %156 = vector.load %arg8[%c36, %c0_211] : memref<360x32xf32, #tpu.memory_space<vmem>>, vector<8x32xf32>
    %c24_212 = arith.constant 24 : index
    %c256_213 = arith.constant 256 : index
    %157 = vector.load %arg9[%c24_212, %c256_213] : memref<64x512xf32, #tpu.memory_space<vmem>>, vector<8x32xf32>
    tpu.vector_store %arg9[%c24_212, %c256_213], %156 {strides = array<i32>} : memref<64x512xf32, #tpu.memory_space<vmem>>, vector<8x32xf32>,
    %c54_214 = arith.constant 54 : index
    %c0_215 = arith.constant 0 : index
    %158 = vector.load %arg8[%c54_214, %c0_215] : memref<360x32xf32, #tpu.memory_space<vmem>>, vector<8x32xf32>
    %c32_216 = arith.constant 32 : index
    %c256_217 = arith.constant 256 : index
    %159 = vector.load %arg9[%c32_216, %c256_217] : memref<64x512xf32, #tpu.memory_space<vmem>>, vector<8x32xf32>
    tpu.vector_store %arg9[%c32_216, %c256_217], %158 {strides = array<i32>} : memref<64x512xf32, #tpu.memory_space<vmem>>, vector<8x32xf32>,
    %c63_218 = arith.constant 63 : index
    %c0_219 = arith.constant 0 : index
    %160 = vector.load %arg8[%c63_218, %c0_219] : memref<360x32xf32, #tpu.memory_space<vmem>>, vector<8x32xf32>
    %c40_220 = arith.constant 40 : index
    %c256_221 = arith.constant 256 : index
    %161 = vector.load %arg9[%c40_220, %c256_221] : memref<64x512xf32, #tpu.memory_space<vmem>>, vector<8x32xf32>
    tpu.vector_store %arg9[%c40_220, %c256_221], %160 {strides = array<i32>} : memref<64x512xf32, #tpu.memory_space<vmem>>, vector<8x32xf32>,
    %c72_222 = arith.constant 72 : index
    %c0_223 = arith.constant 0 : index
    %162 = vector.load %arg8[%c72_222, %c0_223] : memref<360x32xf32, #tpu.memory_space<vmem>>, vector<8x32xf32>
    %c48_224 = arith.constant 48 : index
    %c256_225 = arith.constant 256 : index
    %163 = vector.load %arg9[%c48_224, %c256_225] : memref<64x512xf32, #tpu.memory_space<vmem>>, vector<8x32xf32>
    tpu.vector_store %arg9[%c48_224, %c256_225], %162 {strides = array<i32>} : memref<64x512xf32, #tpu.memory_space<vmem>>, vector<8x32xf32>,
    %c81 = arith.constant 81 : index
    %c0_226 = arith.constant 0 : index
    %164 = vector.load %arg8[%c81, %c0_226] : memref<360x32xf32, #tpu.memory_space<vmem>>, vector<8x32xf32>
    %c56_227 = arith.constant 56 : index
    %c256_228 = arith.constant 256 : index
    %165 = vector.load %arg9[%c56_227, %c256_228] : memref<64x512xf32, #tpu.memory_space<vmem>>, vector<8x32xf32>
    tpu.vector_store %arg9[%c56_227, %c256_228], %164 {strides = array<i32>} : memref<64x512xf32, #tpu.memory_space<vmem>>, vector<8x32xf32>,
    %c99_229 = arith.constant 99 : index
    %c0_230 = arith.constant 0 : index
    %166 = vector.load %arg8[%c99_229, %c0_230] : memref<360x32xf32, #tpu.memory_space<vmem>>, vector<8x32xf32>
    %c0_231 = arith.constant 0 : index
    %c288_232 = arith.constant 288 : index
    %167 = vector.load %arg9[%c0_231, %c288_232] : memref<64x512xf32, #tpu.memory_space<vmem>>, vector<8x32xf32>
    tpu.vector_store %arg9[%c0_231, %c288_232], %166 {strides = array<i32>} : memref<64x512xf32, #tpu.memory_space<vmem>>, vector<8x32xf32>,
    %c108_233 = arith.constant 108 : index
    %c0_234 = arith.constant 0 : index
    %168 = vector.load %arg8[%c108_233, %c0_234] : memref<360x32xf32, #tpu.memory_space<vmem>>, vector<8x32xf32>
    %c8_235 = arith.constant 8 : index
    %c288_236 = arith.constant 288 : index
    %169 = vector.load %arg9[%c8_235, %c288_236] : memref<64x512xf32, #tpu.memory_space<vmem>>, vector<8x32xf32>
    tpu.vector_store %arg9[%c8_235, %c288_236], %168 {strides = array<i32>} : memref<64x512xf32, #tpu.memory_space<vmem>>, vector<8x32xf32>,
    %c117_237 = arith.constant 117 : index
    %c0_238 = arith.constant 0 : index
    %170 = vector.load %arg8[%c117_237, %c0_238] : memref<360x32xf32, #tpu.memory_space<vmem>>, vector<8x32xf32>
    %c16_239 = arith.constant 16 : index
    %c288_240 = arith.constant 288 : index
    %171 = vector.load %arg9[%c16_239, %c288_240] : memref<64x512xf32, #tpu.memory_space<vmem>>, vector<8x32xf32>
    tpu.vector_store %arg9[%c16_239, %c288_240], %170 {strides = array<i32>} : memref<64x512xf32, #tpu.memory_space<vmem>>, vector<8x32xf32>,
    %c126 = arith.constant 126 : index
    %c0_241 = arith.constant 0 : index
    %172 = vector.load %arg8[%c126, %c0_241] : memref<360x32xf32, #tpu.memory_space<vmem>>, vector<8x32xf32>
    %c24_242 = arith.constant 24 : index
    %c288_243 = arith.constant 288 : index
    %173 = vector.load %arg9[%c24_242, %c288_243] : memref<64x512xf32, #tpu.memory_space<vmem>>, vector<8x32xf32>
    tpu.vector_store %arg9[%c24_242, %c288_243], %172 {strides = array<i32>} : memref<64x512xf32, #tpu.memory_space<vmem>>, vector<8x32xf32>,
    %c144_244 = arith.constant 144 : index
    %c0_245 = arith.constant 0 : index
    %174 = vector.load %arg8[%c144_244, %c0_245] : memref<360x32xf32, #tpu.memory_space<vmem>>, vector<8x32xf32>
    %c32_246 = arith.constant 32 : index
    %c288_247 = arith.constant 288 : index
    %175 = vector.load %arg9[%c32_246, %c288_247] : memref<64x512xf32, #tpu.memory_space<vmem>>, vector<8x32xf32>
    tpu.vector_store %arg9[%c32_246, %c288_247], %174 {strides = array<i32>} : memref<64x512xf32, #tpu.memory_space<vmem>>, vector<8x32xf32>,
    %c153_248 = arith.constant 153 : index
    %c0_249 = arith.constant 0 : index
    %176 = vector.load %arg8[%c153_248, %c0_249] : memref<360x32xf32, #tpu.memory_space<vmem>>, vector<8x32xf32>
    %c40_250 = arith.constant 40 : index
    %c288_251 = arith.constant 288 : index
    %177 = vector.load %arg9[%c40_250, %c288_251] : memref<64x512xf32, #tpu.memory_space<vmem>>, vector<8x32xf32>
    tpu.vector_store %arg9[%c40_250, %c288_251], %176 {strides = array<i32>} : memref<64x512xf32, #tpu.memory_space<vmem>>, vector<8x32xf32>,
    %c162_252 = arith.constant 162 : index
    %c0_253 = arith.constant 0 : index
    %178 = vector.load %arg8[%c162_252, %c0_253] : memref<360x32xf32, #tpu.memory_space<vmem>>, vector<8x32xf32>
    %c48_254 = arith.constant 48 : index
    %c288_255 = arith.constant 288 : index
    %179 = vector.load %arg9[%c48_254, %c288_255] : memref<64x512xf32, #tpu.memory_space<vmem>>, vector<8x32xf32>
    tpu.vector_store %arg9[%c48_254, %c288_255], %178 {strides = array<i32>} : memref<64x512xf32, #tpu.memory_space<vmem>>, vector<8x32xf32>,
    %c171 = arith.constant 171 : index
    %c0_256 = arith.constant 0 : index
    %180 = vector.load %arg8[%c171, %c0_256] : memref<360x32xf32, #tpu.memory_space<vmem>>, vector<8x32xf32>
    %c56_257 = arith.constant 56 : index
    %c288_258 = arith.constant 288 : index
    %181 = vector.load %arg9[%c56_257, %c288_258] : memref<64x512xf32, #tpu.memory_space<vmem>>, vector<8x32xf32>
    tpu.vector_store %arg9[%c56_257, %c288_258], %180 {strides = array<i32>} : memref<64x512xf32, #tpu.memory_space<vmem>>, vector<8x32xf32>,
    %c10_259 = arith.constant 10 : index
    %c0_260 = arith.constant 0 : index
    %182 = vector.load %arg8[%c10_259, %c0_260] : memref<360x32xf32, #tpu.memory_space<vmem>>, vector<8x32xf32>
    %c0_261 = arith.constant 0 : index
    %c320 = arith.constant 320 : index
    %183 = vector.load %arg9[%c0_261, %c320] : memref<64x512xf32, #tpu.memory_space<vmem>>, vector<8x32xf32>
    tpu.vector_store %arg9[%c0_261, %c320], %182 {strides = array<i32>} : memref<64x512xf32, #tpu.memory_space<vmem>>, vector<8x32xf32>,
    %c19_262 = arith.constant 19 : index
    %c0_263 = arith.constant 0 : index
    %184 = vector.load %arg8[%c19_262, %c0_263] : memref<360x32xf32, #tpu.memory_space<vmem>>, vector<8x32xf32>
    %c8_264 = arith.constant 8 : index
    %c320_265 = arith.constant 320 : index
    %185 = vector.load %arg9[%c8_264, %c320_265] : memref<64x512xf32, #tpu.memory_space<vmem>>, vector<8x32xf32>
    tpu.vector_store %arg9[%c8_264, %c320_265], %184 {strides = array<i32>} : memref<64x512xf32, #tpu.memory_space<vmem>>, vector<8x32xf32>,
    %c28_266 = arith.constant 28 : index
    %c0_267 = arith.constant 0 : index
    %186 = vector.load %arg8[%c28_266, %c0_267] : memref<360x32xf32, #tpu.memory_space<vmem>>, vector<8x32xf32>
    %c16_268 = arith.constant 16 : index
    %c320_269 = arith.constant 320 : index
    %187 = vector.load %arg9[%c16_268, %c320_269] : memref<64x512xf32, #tpu.memory_space<vmem>>, vector<8x32xf32>
    tpu.vector_store %arg9[%c16_268, %c320_269], %186 {strides = array<i32>} : memref<64x512xf32, #tpu.memory_space<vmem>>, vector<8x32xf32>,
    %c37 = arith.constant 37 : index
    %c0_270 = arith.constant 0 : index
    %188 = vector.load %arg8[%c37, %c0_270] : memref<360x32xf32, #tpu.memory_space<vmem>>, vector<8x32xf32>
    %c24_271 = arith.constant 24 : index
    %c320_272 = arith.constant 320 : index
    %189 = vector.load %arg9[%c24_271, %c320_272] : memref<64x512xf32, #tpu.memory_space<vmem>>, vector<8x32xf32>
    tpu.vector_store %arg9[%c24_271, %c320_272], %188 {strides = array<i32>} : memref<64x512xf32, #tpu.memory_space<vmem>>, vector<8x32xf32>,
    %c55_273 = arith.constant 55 : index
    %c0_274 = arith.constant 0 : index
    %190 = vector.load %arg8[%c55_273, %c0_274] : memref<360x32xf32, #tpu.memory_space<vmem>>, vector<8x32xf32>
    %c32_275 = arith.constant 32 : index
    %c320_276 = arith.constant 320 : index
    %191 = vector.load %arg9[%c32_275, %c320_276] : memref<64x512xf32, #tpu.memory_space<vmem>>, vector<8x32xf32>
    tpu.vector_store %arg9[%c32_275, %c320_276], %190 {strides = array<i32>} : memref<64x512xf32, #tpu.memory_space<vmem>>, vector<8x32xf32>,
    %c64_277 = arith.constant 64 : index
    %c0_278 = arith.constant 0 : index
    %192 = vector.load %arg8[%c64_277, %c0_278] : memref<360x32xf32, #tpu.memory_space<vmem>>, vector<8x32xf32>
    %c40_279 = arith.constant 40 : index
    %c320_280 = arith.constant 320 : index
    %193 = vector.load %arg9[%c40_279, %c320_280] : memref<64x512xf32, #tpu.memory_space<vmem>>, vector<8x32xf32>
    tpu.vector_store %arg9[%c40_279, %c320_280], %192 {strides = array<i32>} : memref<64x512xf32, #tpu.memory_space<vmem>>, vector<8x32xf32>,
    %c73_281 = arith.constant 73 : index
    %c0_282 = arith.constant 0 : index
    %194 = vector.load %arg8[%c73_281, %c0_282] : memref<360x32xf32, #tpu.memory_space<vmem>>, vector<8x32xf32>
    %c48_283 = arith.constant 48 : index
    %c320_284 = arith.constant 320 : index
    %195 = vector.load %arg9[%c48_283, %c320_284] : memref<64x512xf32, #tpu.memory_space<vmem>>, vector<8x32xf32>
    tpu.vector_store %arg9[%c48_283, %c320_284], %194 {strides = array<i32>} : memref<64x512xf32, #tpu.memory_space<vmem>>, vector<8x32xf32>,
    %c82 = arith.constant 82 : index
    %c0_285 = arith.constant 0 : index
    %196 = vector.load %arg8[%c82, %c0_285] : memref<360x32xf32, #tpu.memory_space<vmem>>, vector<8x32xf32>
    %c56_286 = arith.constant 56 : index
    %c320_287 = arith.constant 320 : index
    %197 = vector.load %arg9[%c56_286, %c320_287] : memref<64x512xf32, #tpu.memory_space<vmem>>, vector<8x32xf32>
    tpu.vector_store %arg9[%c56_286, %c320_287], %196 {strides = array<i32>} : memref<64x512xf32, #tpu.memory_space<vmem>>, vector<8x32xf32>,
    %c100_288 = arith.constant 100 : index
    %c0_289 = arith.constant 0 : index
    %198 = vector.load %arg8[%c100_288, %c0_289] : memref<360x32xf32, #tpu.memory_space<vmem>>, vector<8x32xf32>
    %c0_290 = arith.constant 0 : index
    %c352 = arith.constant 352 : index
    %199 = vector.load %arg9[%c0_290, %c352] : memref<64x512xf32, #tpu.memory_space<vmem>>, vector<8x32xf32>
    tpu.vector_store %arg9[%c0_290, %c352], %198 {strides = array<i32>} : memref<64x512xf32, #tpu.memory_space<vmem>>, vector<8x32xf32>,
    %c109_291 = arith.constant 109 : index
    %c0_292 = arith.constant 0 : index
    %200 = vector.load %arg8[%c109_291, %c0_292] : memref<360x32xf32, #tpu.memory_space<vmem>>, vector<8x32xf32>
    %c8_293 = arith.constant 8 : index
    %c352_294 = arith.constant 352 : index
    %201 = vector.load %arg9[%c8_293, %c352_294] : memref<64x512xf32, #tpu.memory_space<vmem>>, vector<8x32xf32>
    tpu.vector_store %arg9[%c8_293, %c352_294], %200 {strides = array<i32>} : memref<64x512xf32, #tpu.memory_space<vmem>>, vector<8x32xf32>,
    %c118_295 = arith.constant 118 : index
    %c0_296 = arith.constant 0 : index
    %202 = vector.load %arg8[%c118_295, %c0_296] : memref<360x32xf32, #tpu.memory_space<vmem>>, vector<8x32xf32>
    %c16_297 = arith.constant 16 : index
    %c352_298 = arith.constant 352 : index
    %203 = vector.load %arg9[%c16_297, %c352_298] : memref<64x512xf32, #tpu.memory_space<vmem>>, vector<8x32xf32>
    tpu.vector_store %arg9[%c16_297, %c352_298], %202 {strides = array<i32>} : memref<64x512xf32, #tpu.memory_space<vmem>>, vector<8x32xf32>,
    %c127 = arith.constant 127 : index
    %c0_299 = arith.constant 0 : index
    %204 = vector.load %arg8[%c127, %c0_299] : memref<360x32xf32, #tpu.memory_space<vmem>>, vector<8x32xf32>
    %c24_300 = arith.constant 24 : index
    %c352_301 = arith.constant 352 : index
    %205 = vector.load %arg9[%c24_300, %c352_301] : memref<64x512xf32, #tpu.memory_space<vmem>>, vector<8x32xf32>
    tpu.vector_store %arg9[%c24_300, %c352_301], %204 {strides = array<i32>} : memref<64x512xf32, #tpu.memory_space<vmem>>, vector<8x32xf32>,
    %c145_302 = arith.constant 145 : index
    %c0_303 = arith.constant 0 : index
    %206 = vector.load %arg8[%c145_302, %c0_303] : memref<360x32xf32, #tpu.memory_space<vmem>>, vector<8x32xf32>
    %c32_304 = arith.constant 32 : index
    %c352_305 = arith.constant 352 : index
    %207 = vector.load %arg9[%c32_304, %c352_305] : memref<64x512xf32, #tpu.memory_space<vmem>>, vector<8x32xf32>
    tpu.vector_store %arg9[%c32_304, %c352_305], %206 {strides = array<i32>} : memref<64x512xf32, #tpu.memory_space<vmem>>, vector<8x32xf32>,
    %c154_306 = arith.constant 154 : index
    %c0_307 = arith.constant 0 : index
    %208 = vector.load %arg8[%c154_306, %c0_307] : memref<360x32xf32, #tpu.memory_space<vmem>>, vector<8x32xf32>
    %c40_308 = arith.constant 40 : index
    %c352_309 = arith.constant 352 : index
    %209 = vector.load %arg9[%c40_308, %c352_309] : memref<64x512xf32, #tpu.memory_space<vmem>>, vector<8x32xf32>
    tpu.vector_store %arg9[%c40_308, %c352_309], %208 {strides = array<i32>} : memref<64x512xf32, #tpu.memory_space<vmem>>, vector<8x32xf32>,
    %c163_310 = arith.constant 163 : index
    %c0_311 = arith.constant 0 : index
    %210 = vector.load %arg8[%c163_310, %c0_311] : memref<360x32xf32, #tpu.memory_space<vmem>>, vector<8x32xf32>
    %c48_312 = arith.constant 48 : index
    %c352_313 = arith.constant 352 : index
    %211 = vector.load %arg9[%c48_312, %c352_313] : memref<64x512xf32, #tpu.memory_space<vmem>>, vector<8x32xf32>
    tpu.vector_store %arg9[%c48_312, %c352_313], %210 {strides = array<i32>} : memref<64x512xf32, #tpu.memory_space<vmem>>, vector<8x32xf32>,
    %c172 = arith.constant 172 : index
    %c0_314 = arith.constant 0 : index
    %212 = vector.load %arg8[%c172, %c0_314] : memref<360x32xf32, #tpu.memory_space<vmem>>, vector<8x32xf32>
    %c56_315 = arith.constant 56 : index
    %c352_316 = arith.constant 352 : index
    %213 = vector.load %arg9[%c56_315, %c352_316] : memref<64x512xf32, #tpu.memory_space<vmem>>, vector<8x32xf32>
    tpu.vector_store %arg9[%c56_315, %c352_316], %212 {strides = array<i32>} : memref<64x512xf32, #tpu.memory_space<vmem>>, vector<8x32xf32>,
    %c189_317 = arith.constant 189 : index
    %c0_318 = arith.constant 0 : index
    %214 = vector.load %arg8[%c189_317, %c0_318] : memref<360x32xf32, #tpu.memory_space<vmem>>, vector<8x32xf32>
    %c0_319 = arith.constant 0 : index
    %c384 = arith.constant 384 : index
    %215 = vector.load %arg9[%c0_319, %c384] : memref<64x512xf32, #tpu.memory_space<vmem>>, vector<8x32xf32>
    tpu.vector_store %arg9[%c0_319, %c384], %214 {strides = array<i32>} : memref<64x512xf32, #tpu.memory_space<vmem>>, vector<8x32xf32>,
    %c198_320 = arith.constant 198 : index
    %c0_321 = arith.constant 0 : index
    %216 = vector.load %arg8[%c198_320, %c0_321] : memref<360x32xf32, #tpu.memory_space<vmem>>, vector<8x32xf32>
    %c8_322 = arith.constant 8 : index
    %c384_323 = arith.constant 384 : index
    %217 = vector.load %arg9[%c8_322, %c384_323] : memref<64x512xf32, #tpu.memory_space<vmem>>, vector<8x32xf32>
    tpu.vector_store %arg9[%c8_322, %c384_323], %216 {strides = array<i32>} : memref<64x512xf32, #tpu.memory_space<vmem>>, vector<8x32xf32>,
    %c207_324 = arith.constant 207 : index
    %c0_325 = arith.constant 0 : index
    %218 = vector.load %arg8[%c207_324, %c0_325] : memref<360x32xf32, #tpu.memory_space<vmem>>, vector<8x32xf32>
    %c16_326 = arith.constant 16 : index
    %c384_327 = arith.constant 384 : index
    %219 = vector.load %arg9[%c16_326, %c384_327] : memref<64x512xf32, #tpu.memory_space<vmem>>, vector<8x32xf32>
    tpu.vector_store %arg9[%c16_326, %c384_327], %218 {strides = array<i32>} : memref<64x512xf32, #tpu.memory_space<vmem>>, vector<8x32xf32>,
    %c216 = arith.constant 216 : index
    %c0_328 = arith.constant 0 : index
    %220 = vector.load %arg8[%c216, %c0_328] : memref<360x32xf32, #tpu.memory_space<vmem>>, vector<8x32xf32>
    %c24_329 = arith.constant 24 : index
    %c384_330 = arith.constant 384 : index
    %221 = vector.load %arg9[%c24_329, %c384_330] : memref<64x512xf32, #tpu.memory_space<vmem>>, vector<8x32xf32>
    tpu.vector_store %arg9[%c24_329, %c384_330], %220 {strides = array<i32>} : memref<64x512xf32, #tpu.memory_space<vmem>>, vector<8x32xf32>,
    %c234_331 = arith.constant 234 : index
    %c0_332 = arith.constant 0 : index
    %222 = vector.load %arg8[%c234_331, %c0_332] : memref<360x32xf32, #tpu.memory_space<vmem>>, vector<8x32xf32>
    %c32_333 = arith.constant 32 : index
    %c384_334 = arith.constant 384 : index
    %223 = vector.load %arg9[%c32_333, %c384_334] : memref<64x512xf32, #tpu.memory_space<vmem>>, vector<8x32xf32>
    tpu.vector_store %arg9[%c32_333, %c384_334], %222 {strides = array<i32>} : memref<64x512xf32, #tpu.memory_space<vmem>>, vector<8x32xf32>,
    %c243_335 = arith.constant 243 : index
    %c0_336 = arith.constant 0 : index
    %224 = vector.load %arg8[%c243_335, %c0_336] : memref<360x32xf32, #tpu.memory_space<vmem>>, vector<8x32xf32>
    %c40_337 = arith.constant 40 : index
    %c384_338 = arith.constant 384 : index
    %225 = vector.load %arg9[%c40_337, %c384_338] : memref<64x512xf32, #tpu.memory_space<vmem>>, vector<8x32xf32>
    tpu.vector_store %arg9[%c40_337, %c384_338], %224 {strides = array<i32>} : memref<64x512xf32, #tpu.memory_space<vmem>>, vector<8x32xf32>,
    %c252_339 = arith.constant 252 : index
    %c0_340 = arith.constant 0 : index
    %226 = vector.load %arg8[%c252_339, %c0_340] : memref<360x32xf32, #tpu.memory_space<vmem>>, vector<8x32xf32>
    %c48_341 = arith.constant 48 : index
    %c384_342 = arith.constant 384 : index
    %227 = vector.load %arg9[%c48_341, %c384_342] : memref<64x512xf32, #tpu.memory_space<vmem>>, vector<8x32xf32>
    tpu.vector_store %arg9[%c48_341, %c384_342], %226 {strides = array<i32>} : memref<64x512xf32, #tpu.memory_space<vmem>>, vector<8x32xf32>,
    %c261 = arith.constant 261 : index
    %c0_343 = arith.constant 0 : index
    %228 = vector.load %arg8[%c261, %c0_343] : memref<360x32xf32, #tpu.memory_space<vmem>>, vector<8x32xf32>
    %c56_344 = arith.constant 56 : index
    %c384_345 = arith.constant 384 : index
    %229 = vector.load %arg9[%c56_344, %c384_345] : memref<64x512xf32, #tpu.memory_space<vmem>>, vector<8x32xf32>
    tpu.vector_store %arg9[%c56_344, %c384_345], %228 {strides = array<i32>} : memref<64x512xf32, #tpu.memory_space<vmem>>, vector<8x32xf32>,
    %c279_346 = arith.constant 279 : index
    %c0_347 = arith.constant 0 : index
    %230 = vector.load %arg8[%c279_346, %c0_347] : memref<360x32xf32, #tpu.memory_space<vmem>>, vector<8x32xf32>
    %c0_348 = arith.constant 0 : index
    %c416 = arith.constant 416 : index
    %231 = vector.load %arg9[%c0_348, %c416] : memref<64x512xf32, #tpu.memory_space<vmem>>, vector<8x32xf32>
    tpu.vector_store %arg9[%c0_348, %c416], %230 {strides = array<i32>} : memref<64x512xf32, #tpu.memory_space<vmem>>, vector<8x32xf32>,
    %c288_349 = arith.constant 288 : index
    %c0_350 = arith.constant 0 : index
    %232 = vector.load %arg8[%c288_349, %c0_350] : memref<360x32xf32, #tpu.memory_space<vmem>>, vector<8x32xf32>
    %c8_351 = arith.constant 8 : index
    %c416_352 = arith.constant 416 : index
    %233 = vector.load %arg9[%c8_351, %c416_352] : memref<64x512xf32, #tpu.memory_space<vmem>>, vector<8x32xf32>
    tpu.vector_store %arg9[%c8_351, %c416_352], %232 {strides = array<i32>} : memref<64x512xf32, #tpu.memory_space<vmem>>, vector<8x32xf32>,
    %c297_353 = arith.constant 297 : index
    %c0_354 = arith.constant 0 : index
    %234 = vector.load %arg8[%c297_353, %c0_354] : memref<360x32xf32, #tpu.memory_space<vmem>>, vector<8x32xf32>
    %c16_355 = arith.constant 16 : index
    %c416_356 = arith.constant 416 : index
    %235 = vector.load %arg9[%c16_355, %c416_356] : memref<64x512xf32, #tpu.memory_space<vmem>>, vector<8x32xf32>
    tpu.vector_store %arg9[%c16_355, %c416_356], %234 {strides = array<i32>} : memref<64x512xf32, #tpu.memory_space<vmem>>, vector<8x32xf32>,
    %c306 = arith.constant 306 : index
    %c0_357 = arith.constant 0 : index
    %236 = vector.load %arg8[%c306, %c0_357] : memref<360x32xf32, #tpu.memory_space<vmem>>, vector<8x32xf32>
    %c24_358 = arith.constant 24 : index
    %c416_359 = arith.constant 416 : index
    %237 = vector.load %arg9[%c24_358, %c416_359] : memref<64x512xf32, #tpu.memory_space<vmem>>, vector<8x32xf32>
    tpu.vector_store %arg9[%c24_358, %c416_359], %236 {strides = array<i32>} : memref<64x512xf32, #tpu.memory_space<vmem>>, vector<8x32xf32>,
    %c324_360 = arith.constant 324 : index
    %c0_361 = arith.constant 0 : index
    %238 = vector.load %arg8[%c324_360, %c0_361] : memref<360x32xf32, #tpu.memory_space<vmem>>, vector<8x32xf32>
    %c32_362 = arith.constant 32 : index
    %c416_363 = arith.constant 416 : index
    %239 = vector.load %arg9[%c32_362, %c416_363] : memref<64x512xf32, #tpu.memory_space<vmem>>, vector<8x32xf32>
    tpu.vector_store %arg9[%c32_362, %c416_363], %238 {strides = array<i32>} : memref<64x512xf32, #tpu.memory_space<vmem>>, vector<8x32xf32>,
    %c333_364 = arith.constant 333 : index
    %c0_365 = arith.constant 0 : index
    %240 = vector.load %arg8[%c333_364, %c0_365] : memref<360x32xf32, #tpu.memory_space<vmem>>, vector<8x32xf32>
    %c40_366 = arith.constant 40 : index
    %c416_367 = arith.constant 416 : index
    %241 = vector.load %arg9[%c40_366, %c416_367] : memref<64x512xf32, #tpu.memory_space<vmem>>, vector<8x32xf32>
    tpu.vector_store %arg9[%c40_366, %c416_367], %240 {strides = array<i32>} : memref<64x512xf32, #tpu.memory_space<vmem>>, vector<8x32xf32>,
    %c342_368 = arith.constant 342 : index
    %c0_369 = arith.constant 0 : index
    %242 = vector.load %arg8[%c342_368, %c0_369] : memref<360x32xf32, #tpu.memory_space<vmem>>, vector<8x32xf32>
    %c48_370 = arith.constant 48 : index
    %c416_371 = arith.constant 416 : index
    %243 = vector.load %arg9[%c48_370, %c416_371] : memref<64x512xf32, #tpu.memory_space<vmem>>, vector<8x32xf32>
    tpu.vector_store %arg9[%c48_370, %c416_371], %242 {strides = array<i32>} : memref<64x512xf32, #tpu.memory_space<vmem>>, vector<8x32xf32>,
    %c351 = arith.constant 351 : index
    %c0_372 = arith.constant 0 : index
    %244 = vector.load %arg8[%c351, %c0_372] : memref<360x32xf32, #tpu.memory_space<vmem>>, vector<8x32xf32>
    %c56_373 = arith.constant 56 : index
    %c416_374 = arith.constant 416 : index
    %245 = vector.load %arg9[%c56_373, %c416_374] : memref<64x512xf32, #tpu.memory_space<vmem>>, vector<8x32xf32>
    tpu.vector_store %arg9[%c56_373, %c416_374], %244 {strides = array<i32>} : memref<64x512xf32, #tpu.memory_space<vmem>>, vector<8x32xf32>,
    %c190_375 = arith.constant 190 : index
    %c0_376 = arith.constant 0 : index
    %246 = vector.load %arg8[%c190_375, %c0_376] : memref<360x32xf32, #tpu.memory_space<vmem>>, vector<8x32xf32>
    %c0_377 = arith.constant 0 : index
    %c448 = arith.constant 448 : index
    %247 = vector.load %arg9[%c0_377, %c448] : memref<64x512xf32, #tpu.memory_space<vmem>>, vector<8x32xf32>
    tpu.vector_store %arg9[%c0_377, %c448], %246 {strides = array<i32>} : memref<64x512xf32, #tpu.memory_space<vmem>>, vector<8x32xf32>,
    %c199_378 = arith.constant 199 : index
    %c0_379 = arith.constant 0 : index
    %248 = vector.load %arg8[%c199_378, %c0_379] : memref<360x32xf32, #tpu.memory_space<vmem>>, vector<8x32xf32>
    %c8_380 = arith.constant 8 : index
    %c448_381 = arith.constant 448 : index
    %249 = vector.load %arg9[%c8_380, %c448_381] : memref<64x512xf32, #tpu.memory_space<vmem>>, vector<8x32xf32>
    tpu.vector_store %arg9[%c8_380, %c448_381], %248 {strides = array<i32>} : memref<64x512xf32, #tpu.memory_space<vmem>>, vector<8x32xf32>,
    %c208_382 = arith.constant 208 : index
    %c0_383 = arith.constant 0 : index
    %250 = vector.load %arg8[%c208_382, %c0_383] : memref<360x32xf32, #tpu.memory_space<vmem>>, vector<8x32xf32>
    %c16_384 = arith.constant 16 : index
    %c448_385 = arith.constant 448 : index
    %251 = vector.load %arg9[%c16_384, %c448_385] : memref<64x512xf32, #tpu.memory_space<vmem>>, vector<8x32xf32>
    tpu.vector_store %arg9[%c16_384, %c448_385], %250 {strides = array<i32>} : memref<64x512xf32, #tpu.memory_space<vmem>>, vector<8x32xf32>,
    %c217 = arith.constant 217 : index
    %c0_386 = arith.constant 0 : index
    %252 = vector.load %arg8[%c217, %c0_386] : memref<360x32xf32, #tpu.memory_space<vmem>>, vector<8x32xf32>
    %c24_387 = arith.constant 24 : index
    %c448_388 = arith.constant 448 : index
    %253 = vector.load %arg9[%c24_387, %c448_388] : memref<64x512xf32, #tpu.memory_space<vmem>>, vector<8x32xf32>
    tpu.vector_store %arg9[%c24_387, %c448_388], %252 {strides = array<i32>} : memref<64x512xf32, #tpu.memory_space<vmem>>, vector<8x32xf32>,
    %c235_389 = arith.constant 235 : index
    %c0_390 = arith.constant 0 : index
    %254 = vector.load %arg8[%c235_389, %c0_390] : memref<360x32xf32, #tpu.memory_space<vmem>>, vector<8x32xf32>
    %c32_391 = arith.constant 32 : index
    %c448_392 = arith.constant 448 : index
    %255 = vector.load %arg9[%c32_391, %c448_392] : memref<64x512xf32, #tpu.memory_space<vmem>>, vector<8x32xf32>
    tpu.vector_store %arg9[%c32_391, %c448_392], %254 {strides = array<i32>} : memref<64x512xf32, #tpu.memory_space<vmem>>, vector<8x32xf32>,
    %c244_393 = arith.constant 244 : index
    %c0_394 = arith.constant 0 : index
    %256 = vector.load %arg8[%c244_393, %c0_394] : memref<360x32xf32, #tpu.memory_space<vmem>>, vector<8x32xf32>
    %c40_395 = arith.constant 40 : index
    %c448_396 = arith.constant 448 : index
    %257 = vector.load %arg9[%c40_395, %c448_396] : memref<64x512xf32, #tpu.memory_space<vmem>>, vector<8x32xf32>
    tpu.vector_store %arg9[%c40_395, %c448_396], %256 {strides = array<i32>} : memref<64x512xf32, #tpu.memory_space<vmem>>, vector<8x32xf32>,
    %c253_397 = arith.constant 253 : index
    %c0_398 = arith.constant 0 : index
    %258 = vector.load %arg8[%c253_397, %c0_398] : memref<360x32xf32, #tpu.memory_space<vmem>>, vector<8x32xf32>
    %c48_399 = arith.constant 48 : index
    %c448_400 = arith.constant 448 : index
    %259 = vector.load %arg9[%c48_399, %c448_400] : memref<64x512xf32, #tpu.memory_space<vmem>>, vector<8x32xf32>
    tpu.vector_store %arg9[%c48_399, %c448_400], %258 {strides = array<i32>} : memref<64x512xf32, #tpu.memory_space<vmem>>, vector<8x32xf32>,
    %c262 = arith.constant 262 : index
    %c0_401 = arith.constant 0 : index
    %260 = vector.load %arg8[%c262, %c0_401] : memref<360x32xf32, #tpu.memory_space<vmem>>, vector<8x32xf32>
    %c56_402 = arith.constant 56 : index
    %c448_403 = arith.constant 448 : index
    %261 = vector.load %arg9[%c56_402, %c448_403] : memref<64x512xf32, #tpu.memory_space<vmem>>, vector<8x32xf32>
    tpu.vector_store %arg9[%c56_402, %c448_403], %260 {strides = array<i32>} : memref<64x512xf32, #tpu.memory_space<vmem>>, vector<8x32xf32>,
    %c280_404 = arith.constant 280 : index
    %c0_405 = arith.constant 0 : index
    %262 = vector.load %arg8[%c280_404, %c0_405] : memref<360x32xf32, #tpu.memory_space<vmem>>, vector<8x32xf32>
    %c0_406 = arith.constant 0 : index
    %c480 = arith.constant 480 : index
    %263 = vector.load %arg9[%c0_406, %c480] : memref<64x512xf32, #tpu.memory_space<vmem>>, vector<8x32xf32>
    tpu.vector_store %arg9[%c0_406, %c480], %262 {strides = array<i32>} : memref<64x512xf32, #tpu.memory_space<vmem>>, vector<8x32xf32>,
    %c289_407 = arith.constant 289 : index
    %c0_408 = arith.constant 0 : index
    %264 = vector.load %arg8[%c289_407, %c0_408] : memref<360x32xf32, #tpu.memory_space<vmem>>, vector<8x32xf32>
    %c8_409 = arith.constant 8 : index
    %c480_410 = arith.constant 480 : index
    %265 = vector.load %arg9[%c8_409, %c480_410] : memref<64x512xf32, #tpu.memory_space<vmem>>, vector<8x32xf32>
    tpu.vector_store %arg9[%c8_409, %c480_410], %264 {strides = array<i32>} : memref<64x512xf32, #tpu.memory_space<vmem>>, vector<8x32xf32>,
    %c298_411 = arith.constant 298 : index
    %c0_412 = arith.constant 0 : index
    %266 = vector.load %arg8[%c298_411, %c0_412] : memref<360x32xf32, #tpu.memory_space<vmem>>, vector<8x32xf32>
    %c16_413 = arith.constant 16 : index
    %c480_414 = arith.constant 480 : index
    %267 = vector.load %arg9[%c16_413, %c480_414] : memref<64x512xf32, #tpu.memory_space<vmem>>, vector<8x32xf32>
    tpu.vector_store %arg9[%c16_413, %c480_414], %266 {strides = array<i32>} : memref<64x512xf32, #tpu.memory_space<vmem>>, vector<8x32xf32>,
    %c307 = arith.constant 307 : index
    %c0_415 = arith.constant 0 : index
    %268 = vector.load %arg8[%c307, %c0_415] : memref<360x32xf32, #tpu.memory_space<vmem>>, vector<8x32xf32>
    %c24_416 = arith.constant 24 : index
    %c480_417 = arith.constant 480 : index
    %269 = vector.load %arg9[%c24_416, %c480_417] : memref<64x512xf32, #tpu.memory_space<vmem>>, vector<8x32xf32>
    tpu.vector_store %arg9[%c24_416, %c480_417], %268 {strides = array<i32>} : memref<64x512xf32, #tpu.memory_space<vmem>>, vector<8x32xf32>,
    %c325_418 = arith.constant 325 : index
    %c0_419 = arith.constant 0 : index
    %270 = vector.load %arg8[%c325_418, %c0_419] : memref<360x32xf32, #tpu.memory_space<vmem>>, vector<8x32xf32>
    %c32_420 = arith.constant 32 : index
    %c480_421 = arith.constant 480 : index
    %271 = vector.load %arg9[%c32_420, %c480_421] : memref<64x512xf32, #tpu.memory_space<vmem>>, vector<8x32xf32>
    tpu.vector_store %arg9[%c32_420, %c480_421], %270 {strides = array<i32>} : memref<64x512xf32, #tpu.memory_space<vmem>>, vector<8x32xf32>,
    %c334_422 = arith.constant 334 : index
    %c0_423 = arith.constant 0 : index
    %272 = vector.load %arg8[%c334_422, %c0_423] : memref<360x32xf32, #tpu.memory_space<vmem>>, vector<8x32xf32>
    %c40_424 = arith.constant 40 : index
    %c480_425 = arith.constant 480 : index
    %273 = vector.load %arg9[%c40_424, %c480_425] : memref<64x512xf32, #tpu.memory_space<vmem>>, vector<8x32xf32>
    tpu.vector_store %arg9[%c40_424, %c480_425], %272 {strides = array<i32>} : memref<64x512xf32, #tpu.memory_space<vmem>>, vector<8x32xf32>,
    %c343_426 = arith.constant 343 : index
    %c0_427 = arith.constant 0 : index
    %274 = vector.load %arg8[%c343_426, %c0_427] : memref<360x32xf32, #tpu.memory_space<vmem>>, vector<8x32xf32>
    %c48_428 = arith.constant 48 : index
    %c480_429 = arith.constant 480 : index
    %275 = vector.load %arg9[%c48_428, %c480_429] : memref<64x512xf32, #tpu.memory_space<vmem>>, vector<8x32xf32>
    tpu.vector_store %arg9[%c48_428, %c480_429], %274 {strides = array<i32>} : memref<64x512xf32, #tpu.memory_space<vmem>>, vector<8x32xf32>,
    %c352_430 = arith.constant 352 : index
    %c0_431 = arith.constant 0 : index
    %276 = vector.load %arg8[%c352_430, %c0_431] : memref<360x32xf32, #tpu.memory_space<vmem>>, vector<8x32xf32>
    %c56_432 = arith.constant 56 : index
    %c480_433 = arith.constant 480 : index
    %277 = vector.load %arg9[%c56_432, %c480_433] : memref<64x512xf32, #tpu.memory_space<vmem>>, vector<8x32xf32>
    tpu.vector_store %arg9[%c56_432, %c480_433], %276 {strides = array<i32>} : memref<64x512xf32, #tpu.memory_space<vmem>>, vector<8x32xf32>,
    %c0_434 = arith.constant 0 : index
    %c0_435 = arith.constant 0 : index
    %278 = vector.load %arg9[%c0_434, %c0_435] : memref<64x512xf32, #tpu.memory_space<vmem>>, vector<64x512xf32>
    %c0_436 = arith.constant 0 : index
    %c0_437 = arith.constant 0 : index
    %c0_438 = arith.constant 0 : index
    %279 = vector.load %arg3[%c0_436, %c0_437, %c0_438] : memref<4x512x32xf32, #tpu.memory_space<vmem>>, vector<1x512x32xf32>
    %280 = vector.shape_cast %279 : vector<1x512x32xf32> to vector<512x32xf32>
    %cst_439 = arith.constant dense<0.000000e+00> : vector<64x32xf32>
    %281 = tpu.matmul %278, %280, %cst_439 {dimension_numbers = #tpu.dot_dimension_numbers<[1], [0], [0], [1], [0, 0, 1, 1], [], []>} : vector<64x512xf32>, vector<512x32xf32>, vector<64x32xf32> -> vector<64x32xf32>
    %c1_440 = arith.constant 1 : index
    %c0_441 = arith.constant 0 : index
    %c0_442 = arith.constant 0 : index
    %282 = vector.load %arg3[%c1_440, %c0_441, %c0_442] : memref<4x512x32xf32, #tpu.memory_space<vmem>>, vector<1x512x32xf32>
    %283 = vector.shape_cast %282 : vector<1x512x32xf32> to vector<512x32xf32>
    %cst_443 = arith.constant dense<0.000000e+00> : vector<64x32xf32>
    %284 = tpu.matmul %278, %283, %cst_443 {dimension_numbers = #tpu.dot_dimension_numbers<[1], [0], [0], [1], [0, 0, 1, 1], [], []>} : vector<64x512xf32>, vector<512x32xf32>, vector<64x32xf32> -> vector<64x32xf32>
    %285 = arith.maximumf %281, %284 : vector<64x32xf32>
    %c2_444 = arith.constant 2 : index
    %c0_445 = arith.constant 0 : index
    %c0_446 = arith.constant 0 : index
    %286 = vector.load %arg3[%c2_444, %c0_445, %c0_446] : memref<4x512x32xf32, #tpu.memory_space<vmem>>, vector<1x512x32xf32>
    %287 = vector.shape_cast %286 : vector<1x512x32xf32> to vector<512x32xf32>
    %cst_447 = arith.constant dense<0.000000e+00> : vector<64x32xf32>
    %288 = tpu.matmul %278, %287, %cst_447 {dimension_numbers = #tpu.dot_dimension_numbers<[1], [0], [0], [1], [0, 0, 1, 1], [], []>} : vector<64x512xf32>, vector<512x32xf32>, vector<64x32xf32> -> vector<64x32xf32>
    %289 = arith.maximumf %285, %288 : vector<64x32xf32>
    %c3_448 = arith.constant 3 : index
    %c0_449 = arith.constant 0 : index
    %c0_450 = arith.constant 0 : index
    %290 = vector.load %arg3[%c3_448, %c0_449, %c0_450] : memref<4x512x32xf32, #tpu.memory_space<vmem>>, vector<1x512x32xf32>
    %291 = vector.shape_cast %290 : vector<1x512x32xf32> to vector<512x32xf32>
    %cst_451 = arith.constant dense<0.000000e+00> : vector<64x32xf32>
    %292 = tpu.matmul %278, %291, %cst_451 {dimension_numbers = #tpu.dot_dimension_numbers<[1], [0], [0], [1], [0, 0, 1, 1], [], []>} : vector<64x512xf32>, vector<512x32xf32>, vector<64x32xf32> -> vector<64x32xf32>
    %293 = arith.maximumf %289, %292 : vector<64x32xf32>
    %c0_452 = arith.constant 0 : index
    %c0_453 = arith.constant 0 : index
    %294 = vector.load %arg4[%c0_452, %c0_453] : memref<1x32xf32, #tpu.memory_space<vmem>>, vector<1x32xf32>
    %295 = vector.broadcast %294 : vector<1x32xf32> to vector<64x32xf32>
    %296 = arith.addf %293, %295 : vector<64x32xf32>
    %cst_454 = arith.constant 0.000000e+00 : f32
    %297 = vector.broadcast %cst_454 : f32 to vector<64x32xf32>
    %298 = arith.maximumf %296, %297 : vector<64x32xf32>
    %c0_455 = arith.constant 0 : index
    %c0_456 = arith.constant 0 : index
    %299 = vector.load %arg10[%c0_455, %c0_456] : memref<64x32xf32, #tpu.memory_space<vmem>>, vector<64x32xf32>
    tpu.vector_store %arg10[%c0_455, %c0_456], %298 {strides = array<i32>} : memref<64x32xf32, #tpu.memory_space<vmem>>, vector<64x32xf32>,
    %c0_457 = arith.constant 0 : index
    %c0_458 = arith.constant 0 : index
    %300 = vector.load %arg10[%c0_457, %c0_458] : memref<64x32xf32, #tpu.memory_space<vmem>>, vector<1x32xf32>
    %c0_459 = arith.constant 0 : index
    %c0_460 = arith.constant 0 : index
    %301 = vector.load %arg11[%c0_459, %c0_460] : memref<2x1024xf32, #tpu.memory_space<vmem>>, vector<1x32xf32>
    tpu.vector_store %arg11[%c0_459, %c0_460], %300 {strides = array<i32>} : memref<2x1024xf32, #tpu.memory_space<vmem>>, vector<1x32xf32>,
    %c1_461 = arith.constant 1 : index
    %c0_462 = arith.constant 0 : index
    %302 = vector.load %arg10[%c1_461, %c0_462] : memref<64x32xf32, #tpu.memory_space<vmem>>, vector<1x32xf32>
    %c0_463 = arith.constant 0 : index
    %c32_464 = arith.constant 32 : index
    %303 = vector.load %arg11[%c0_463, %c32_464] : memref<2x1024xf32, #tpu.memory_space<vmem>>, vector<1x32xf32>
    tpu.vector_store %arg11[%c0_463, %c32_464], %302 {strides = array<i32>} : memref<2x1024xf32, #tpu.memory_space<vmem>>, vector<1x32xf32>,
    %c2_465 = arith.constant 2 : index
    %c0_466 = arith.constant 0 : index
    %304 = vector.load %arg10[%c2_465, %c0_466] : memref<64x32xf32, #tpu.memory_space<vmem>>, vector<1x32xf32>
    %c0_467 = arith.constant 0 : index
    %c64_468 = arith.constant 64 : index
    %305 = vector.load %arg11[%c0_467, %c64_468] : memref<2x1024xf32, #tpu.memory_space<vmem>>, vector<1x32xf32>
    tpu.vector_store %arg11[%c0_467, %c64_468], %304 {strides = array<i32>} : memref<2x1024xf32, #tpu.memory_space<vmem>>, vector<1x32xf32>,
    %c3_469 = arith.constant 3 : index
    %c0_470 = arith.constant 0 : index
    %306 = vector.load %arg10[%c3_469, %c0_470] : memref<64x32xf32, #tpu.memory_space<vmem>>, vector<1x32xf32>
    %c0_471 = arith.constant 0 : index
    %c96_472 = arith.constant 96 : index
    %307 = vector.load %arg11[%c0_471, %c96_472] : memref<2x1024xf32, #tpu.memory_space<vmem>>, vector<1x32xf32>
    tpu.vector_store %arg11[%c0_471, %c96_472], %306 {strides = array<i32>} : memref<2x1024xf32, #tpu.memory_space<vmem>>, vector<1x32xf32>,
    %c4 = arith.constant 4 : index
    %c0_473 = arith.constant 0 : index
    %308 = vector.load %arg10[%c4, %c0_473] : memref<64x32xf32, #tpu.memory_space<vmem>>, vector<1x32xf32>
    %c0_474 = arith.constant 0 : index
    %c128_475 = arith.constant 128 : index
    %309 = vector.load %arg11[%c0_474, %c128_475] : memref<2x1024xf32, #tpu.memory_space<vmem>>, vector<1x32xf32>
    tpu.vector_store %arg11[%c0_474, %c128_475], %308 {strides = array<i32>} : memref<2x1024xf32, #tpu.memory_space<vmem>>, vector<1x32xf32>,
    %c5 = arith.constant 5 : index
    %c0_476 = arith.constant 0 : index
    %310 = vector.load %arg10[%c5, %c0_476] : memref<64x32xf32, #tpu.memory_space<vmem>>, vector<1x32xf32>
    %c0_477 = arith.constant 0 : index
    %c160_478 = arith.constant 160 : index
    %311 = vector.load %arg11[%c0_477, %c160_478] : memref<2x1024xf32, #tpu.memory_space<vmem>>, vector<1x32xf32>
    tpu.vector_store %arg11[%c0_477, %c160_478], %310 {strides = array<i32>} : memref<2x1024xf32, #tpu.memory_space<vmem>>, vector<1x32xf32>,
    %c6 = arith.constant 6 : index
    %c0_479 = arith.constant 0 : index
    %312 = vector.load %arg10[%c6, %c0_479] : memref<64x32xf32, #tpu.memory_space<vmem>>, vector<1x32xf32>
    %c0_480 = arith.constant 0 : index
    %c192_481 = arith.constant 192 : index
    %313 = vector.load %arg11[%c0_480, %c192_481] : memref<2x1024xf32, #tpu.memory_space<vmem>>, vector<1x32xf32>
    tpu.vector_store %arg11[%c0_480, %c192_481], %312 {strides = array<i32>} : memref<2x1024xf32, #tpu.memory_space<vmem>>, vector<1x32xf32>,
    %c7 = arith.constant 7 : index
    %c0_482 = arith.constant 0 : index
    %314 = vector.load %arg10[%c7, %c0_482] : memref<64x32xf32, #tpu.memory_space<vmem>>, vector<1x32xf32>
    %c0_483 = arith.constant 0 : index
    %c224_484 = arith.constant 224 : index
    %315 = vector.load %arg11[%c0_483, %c224_484] : memref<2x1024xf32, #tpu.memory_space<vmem>>, vector<1x32xf32>
    tpu.vector_store %arg11[%c0_483, %c224_484], %314 {strides = array<i32>} : memref<2x1024xf32, #tpu.memory_space<vmem>>, vector<1x32xf32>,
    %c8_485 = arith.constant 8 : index
    %c0_486 = arith.constant 0 : index
    %316 = vector.load %arg10[%c8_485, %c0_486] : memref<64x32xf32, #tpu.memory_space<vmem>>, vector<1x32xf32>
    %c0_487 = arith.constant 0 : index
    %c256_488 = arith.constant 256 : index
    %317 = vector.load %arg11[%c0_487, %c256_488] : memref<2x1024xf32, #tpu.memory_space<vmem>>, vector<1x32xf32>
    tpu.vector_store %arg11[%c0_487, %c256_488], %316 {strides = array<i32>} : memref<2x1024xf32, #tpu.memory_space<vmem>>, vector<1x32xf32>,
    %c9_489 = arith.constant 9 : index
    %c0_490 = arith.constant 0 : index
    %318 = vector.load %arg10[%c9_489, %c0_490] : memref<64x32xf32, #tpu.memory_space<vmem>>, vector<1x32xf32>
    %c0_491 = arith.constant 0 : index
    %c288_492 = arith.constant 288 : index
    %319 = vector.load %arg11[%c0_491, %c288_492] : memref<2x1024xf32, #tpu.memory_space<vmem>>, vector<1x32xf32>
    tpu.vector_store %arg11[%c0_491, %c288_492], %318 {strides = array<i32>} : memref<2x1024xf32, #tpu.memory_space<vmem>>, vector<1x32xf32>,
    %c10_493 = arith.constant 10 : index
    %c0_494 = arith.constant 0 : index
    %320 = vector.load %arg10[%c10_493, %c0_494] : memref<64x32xf32, #tpu.memory_space<vmem>>, vector<1x32xf32>
    %c0_495 = arith.constant 0 : index
    %c320_496 = arith.constant 320 : index
    %321 = vector.load %arg11[%c0_495, %c320_496] : memref<2x1024xf32, #tpu.memory_space<vmem>>, vector<1x32xf32>
    tpu.vector_store %arg11[%c0_495, %c320_496], %320 {strides = array<i32>} : memref<2x1024xf32, #tpu.memory_space<vmem>>, vector<1x32xf32>,
    %c11 = arith.constant 11 : index
    %c0_497 = arith.constant 0 : index
    %322 = vector.load %arg10[%c11, %c0_497] : memref<64x32xf32, #tpu.memory_space<vmem>>, vector<1x32xf32>
    %c0_498 = arith.constant 0 : index
    %c352_499 = arith.constant 352 : index
    %323 = vector.load %arg11[%c0_498, %c352_499] : memref<2x1024xf32, #tpu.memory_space<vmem>>, vector<1x32xf32>
    tpu.vector_store %arg11[%c0_498, %c352_499], %322 {strides = array<i32>} : memref<2x1024xf32, #tpu.memory_space<vmem>>, vector<1x32xf32>,
    %c12 = arith.constant 12 : index
    %c0_500 = arith.constant 0 : index
    %324 = vector.load %arg10[%c12, %c0_500] : memref<64x32xf32, #tpu.memory_space<vmem>>, vector<1x32xf32>
    %c0_501 = arith.constant 0 : index
    %c384_502 = arith.constant 384 : index
    %325 = vector.load %arg11[%c0_501, %c384_502] : memref<2x1024xf32, #tpu.memory_space<vmem>>, vector<1x32xf32>
    tpu.vector_store %arg11[%c0_501, %c384_502], %324 {strides = array<i32>} : memref<2x1024xf32, #tpu.memory_space<vmem>>, vector<1x32xf32>,
    %c13 = arith.constant 13 : index
    %c0_503 = arith.constant 0 : index
    %326 = vector.load %arg10[%c13, %c0_503] : memref<64x32xf32, #tpu.memory_space<vmem>>, vector<1x32xf32>
    %c0_504 = arith.constant 0 : index
    %c416_505 = arith.constant 416 : index
    %327 = vector.load %arg11[%c0_504, %c416_505] : memref<2x1024xf32, #tpu.memory_space<vmem>>, vector<1x32xf32>
    tpu.vector_store %arg11[%c0_504, %c416_505], %326 {strides = array<i32>} : memref<2x1024xf32, #tpu.memory_space<vmem>>, vector<1x32xf32>,
    %c14 = arith.constant 14 : index
    %c0_506 = arith.constant 0 : index
    %328 = vector.load %arg10[%c14, %c0_506] : memref<64x32xf32, #tpu.memory_space<vmem>>, vector<1x32xf32>
    %c0_507 = arith.constant 0 : index
    %c448_508 = arith.constant 448 : index
    %329 = vector.load %arg11[%c0_507, %c448_508] : memref<2x1024xf32, #tpu.memory_space<vmem>>, vector<1x32xf32>
    tpu.vector_store %arg11[%c0_507, %c448_508], %328 {strides = array<i32>} : memref<2x1024xf32, #tpu.memory_space<vmem>>, vector<1x32xf32>,
    %c15 = arith.constant 15 : index
    %c0_509 = arith.constant 0 : index
    %330 = vector.load %arg10[%c15, %c0_509] : memref<64x32xf32, #tpu.memory_space<vmem>>, vector<1x32xf32>
    %c0_510 = arith.constant 0 : index
    %c480_511 = arith.constant 480 : index
    %331 = vector.load %arg11[%c0_510, %c480_511] : memref<2x1024xf32, #tpu.memory_space<vmem>>, vector<1x32xf32>
    tpu.vector_store %arg11[%c0_510, %c480_511], %330 {strides = array<i32>} : memref<2x1024xf32, #tpu.memory_space<vmem>>, vector<1x32xf32>,
    %c16_512 = arith.constant 16 : index
    %c0_513 = arith.constant 0 : index
    %332 = vector.load %arg10[%c16_512, %c0_513] : memref<64x32xf32, #tpu.memory_space<vmem>>, vector<1x32xf32>
    %c0_514 = arith.constant 0 : index
    %c512 = arith.constant 512 : index
    %333 = vector.load %arg11[%c0_514, %c512] : memref<2x1024xf32, #tpu.memory_space<vmem>>, vector<1x32xf32>
    tpu.vector_store %arg11[%c0_514, %c512], %332 {strides = array<i32>} : memref<2x1024xf32, #tpu.memory_space<vmem>>, vector<1x32xf32>,
    %c17 = arith.constant 17 : index
    %c0_515 = arith.constant 0 : index
    %334 = vector.load %arg10[%c17, %c0_515] : memref<64x32xf32, #tpu.memory_space<vmem>>, vector<1x32xf32>
    %c0_516 = arith.constant 0 : index
    %c544 = arith.constant 544 : index
    %335 = vector.load %arg11[%c0_516, %c544] : memref<2x1024xf32, #tpu.memory_space<vmem>>, vector<1x32xf32>
    tpu.vector_store %arg11[%c0_516, %c544], %334 {strides = array<i32>} : memref<2x1024xf32, #tpu.memory_space<vmem>>, vector<1x32xf32>,
    %c18_517 = arith.constant 18 : index
    %c0_518 = arith.constant 0 : index
    %336 = vector.load %arg10[%c18_517, %c0_518] : memref<64x32xf32, #tpu.memory_space<vmem>>, vector<1x32xf32>
    %c0_519 = arith.constant 0 : index
    %c576 = arith.constant 576 : index
    %337 = vector.load %arg11[%c0_519, %c576] : memref<2x1024xf32, #tpu.memory_space<vmem>>, vector<1x32xf32>
    tpu.vector_store %arg11[%c0_519, %c576], %336 {strides = array<i32>} : memref<2x1024xf32, #tpu.memory_space<vmem>>, vector<1x32xf32>,
    %c19_520 = arith.constant 19 : index
    %c0_521 = arith.constant 0 : index
    %338 = vector.load %arg10[%c19_520, %c0_521] : memref<64x32xf32, #tpu.memory_space<vmem>>, vector<1x32xf32>
    %c0_522 = arith.constant 0 : index
    %c608 = arith.constant 608 : index
    %339 = vector.load %arg11[%c0_522, %c608] : memref<2x1024xf32, #tpu.memory_space<vmem>>, vector<1x32xf32>
    tpu.vector_store %arg11[%c0_522, %c608], %338 {strides = array<i32>} : memref<2x1024xf32, #tpu.memory_space<vmem>>, vector<1x32xf32>,
    %c20 = arith.constant 20 : index
    %c0_523 = arith.constant 0 : index
    %340 = vector.load %arg10[%c20, %c0_523] : memref<64x32xf32, #tpu.memory_space<vmem>>, vector<1x32xf32>
    %c0_524 = arith.constant 0 : index
    %c640 = arith.constant 640 : index
    %341 = vector.load %arg11[%c0_524, %c640] : memref<2x1024xf32, #tpu.memory_space<vmem>>, vector<1x32xf32>
    tpu.vector_store %arg11[%c0_524, %c640], %340 {strides = array<i32>} : memref<2x1024xf32, #tpu.memory_space<vmem>>, vector<1x32xf32>,
    %c21 = arith.constant 21 : index
    %c0_525 = arith.constant 0 : index
    %342 = vector.load %arg10[%c21, %c0_525] : memref<64x32xf32, #tpu.memory_space<vmem>>, vector<1x32xf32>
    %c0_526 = arith.constant 0 : index
    %c672 = arith.constant 672 : index
    %343 = vector.load %arg11[%c0_526, %c672] : memref<2x1024xf32, #tpu.memory_space<vmem>>, vector<1x32xf32>
    tpu.vector_store %arg11[%c0_526, %c672], %342 {strides = array<i32>} : memref<2x1024xf32, #tpu.memory_space<vmem>>, vector<1x32xf32>,
    %c22 = arith.constant 22 : index
    %c0_527 = arith.constant 0 : index
    %344 = vector.load %arg10[%c22, %c0_527] : memref<64x32xf32, #tpu.memory_space<vmem>>, vector<1x32xf32>
    %c0_528 = arith.constant 0 : index
    %c704 = arith.constant 704 : index
    %345 = vector.load %arg11[%c0_528, %c704] : memref<2x1024xf32, #tpu.memory_space<vmem>>, vector<1x32xf32>
    tpu.vector_store %arg11[%c0_528, %c704], %344 {strides = array<i32>} : memref<2x1024xf32, #tpu.memory_space<vmem>>, vector<1x32xf32>,
    %c23 = arith.constant 23 : index
    %c0_529 = arith.constant 0 : index
    %346 = vector.load %arg10[%c23, %c0_529] : memref<64x32xf32, #tpu.memory_space<vmem>>, vector<1x32xf32>
    %c0_530 = arith.constant 0 : index
    %c736 = arith.constant 736 : index
    %347 = vector.load %arg11[%c0_530, %c736] : memref<2x1024xf32, #tpu.memory_space<vmem>>, vector<1x32xf32>
    tpu.vector_store %arg11[%c0_530, %c736], %346 {strides = array<i32>} : memref<2x1024xf32, #tpu.memory_space<vmem>>, vector<1x32xf32>,
    %c24_531 = arith.constant 24 : index
    %c0_532 = arith.constant 0 : index
    %348 = vector.load %arg10[%c24_531, %c0_532] : memref<64x32xf32, #tpu.memory_space<vmem>>, vector<1x32xf32>
    %c0_533 = arith.constant 0 : index
    %c768 = arith.constant 768 : index
    %349 = vector.load %arg11[%c0_533, %c768] : memref<2x1024xf32, #tpu.memory_space<vmem>>, vector<1x32xf32>
    tpu.vector_store %arg11[%c0_533, %c768], %348 {strides = array<i32>} : memref<2x1024xf32, #tpu.memory_space<vmem>>, vector<1x32xf32>,
    %c25 = arith.constant 25 : index
    %c0_534 = arith.constant 0 : index
    %350 = vector.load %arg10[%c25, %c0_534] : memref<64x32xf32, #tpu.memory_space<vmem>>, vector<1x32xf32>
    %c0_535 = arith.constant 0 : index
    %c800 = arith.constant 800 : index
    %351 = vector.load %arg11[%c0_535, %c800] : memref<2x1024xf32, #tpu.memory_space<vmem>>, vector<1x32xf32>
    tpu.vector_store %arg11[%c0_535, %c800], %350 {strides = array<i32>} : memref<2x1024xf32, #tpu.memory_space<vmem>>, vector<1x32xf32>,
    %c26 = arith.constant 26 : index
    %c0_536 = arith.constant 0 : index
    %352 = vector.load %arg10[%c26, %c0_536] : memref<64x32xf32, #tpu.memory_space<vmem>>, vector<1x32xf32>
    %c0_537 = arith.constant 0 : index
    %c832 = arith.constant 832 : index
    %353 = vector.load %arg11[%c0_537, %c832] : memref<2x1024xf32, #tpu.memory_space<vmem>>, vector<1x32xf32>
    tpu.vector_store %arg11[%c0_537, %c832], %352 {strides = array<i32>} : memref<2x1024xf32, #tpu.memory_space<vmem>>, vector<1x32xf32>,
    %c27_538 = arith.constant 27 : index
    %c0_539 = arith.constant 0 : index
    %354 = vector.load %arg10[%c27_538, %c0_539] : memref<64x32xf32, #tpu.memory_space<vmem>>, vector<1x32xf32>
    %c0_540 = arith.constant 0 : index
    %c864 = arith.constant 864 : index
    %355 = vector.load %arg11[%c0_540, %c864] : memref<2x1024xf32, #tpu.memory_space<vmem>>, vector<1x32xf32>
    tpu.vector_store %arg11[%c0_540, %c864], %354 {strides = array<i32>} : memref<2x1024xf32, #tpu.memory_space<vmem>>, vector<1x32xf32>,
    %c28_541 = arith.constant 28 : index
    %c0_542 = arith.constant 0 : index
    %356 = vector.load %arg10[%c28_541, %c0_542] : memref<64x32xf32, #tpu.memory_space<vmem>>, vector<1x32xf32>
    %c0_543 = arith.constant 0 : index
    %c896 = arith.constant 896 : index
    %357 = vector.load %arg11[%c0_543, %c896] : memref<2x1024xf32, #tpu.memory_space<vmem>>, vector<1x32xf32>
    tpu.vector_store %arg11[%c0_543, %c896], %356 {strides = array<i32>} : memref<2x1024xf32, #tpu.memory_space<vmem>>, vector<1x32xf32>,
    %c29 = arith.constant 29 : index
    %c0_544 = arith.constant 0 : index
    %358 = vector.load %arg10[%c29, %c0_544] : memref<64x32xf32, #tpu.memory_space<vmem>>, vector<1x32xf32>
    %c0_545 = arith.constant 0 : index
    %c928 = arith.constant 928 : index
    %359 = vector.load %arg11[%c0_545, %c928] : memref<2x1024xf32, #tpu.memory_space<vmem>>, vector<1x32xf32>
    tpu.vector_store %arg11[%c0_545, %c928], %358 {strides = array<i32>} : memref<2x1024xf32, #tpu.memory_space<vmem>>, vector<1x32xf32>,
    %c30 = arith.constant 30 : index
    %c0_546 = arith.constant 0 : index
    %360 = vector.load %arg10[%c30, %c0_546] : memref<64x32xf32, #tpu.memory_space<vmem>>, vector<1x32xf32>
    %c0_547 = arith.constant 0 : index
    %c960 = arith.constant 960 : index
    %361 = vector.load %arg11[%c0_547, %c960] : memref<2x1024xf32, #tpu.memory_space<vmem>>, vector<1x32xf32>
    tpu.vector_store %arg11[%c0_547, %c960], %360 {strides = array<i32>} : memref<2x1024xf32, #tpu.memory_space<vmem>>, vector<1x32xf32>,
    %c31 = arith.constant 31 : index
    %c0_548 = arith.constant 0 : index
    %362 = vector.load %arg10[%c31, %c0_548] : memref<64x32xf32, #tpu.memory_space<vmem>>, vector<1x32xf32>
    %c0_549 = arith.constant 0 : index
    %c992 = arith.constant 992 : index
    %363 = vector.load %arg11[%c0_549, %c992] : memref<2x1024xf32, #tpu.memory_space<vmem>>, vector<1x32xf32>
    tpu.vector_store %arg11[%c0_549, %c992], %362 {strides = array<i32>} : memref<2x1024xf32, #tpu.memory_space<vmem>>, vector<1x32xf32>,
    %c32_550 = arith.constant 32 : index
    %c0_551 = arith.constant 0 : index
    %364 = vector.load %arg10[%c32_550, %c0_551] : memref<64x32xf32, #tpu.memory_space<vmem>>, vector<1x32xf32>
    %c1_552 = arith.constant 1 : index
    %c0_553 = arith.constant 0 : index
    %365 = vector.load %arg11[%c1_552, %c0_553] : memref<2x1024xf32, #tpu.memory_space<vmem>>, vector<1x32xf32>
    tpu.vector_store %arg11[%c1_552, %c0_553], %364 {strides = array<i32>} : memref<2x1024xf32, #tpu.memory_space<vmem>>, vector<1x32xf32>,
    %c33 = arith.constant 33 : index
    %c0_554 = arith.constant 0 : index
    %366 = vector.load %arg10[%c33, %c0_554] : memref<64x32xf32, #tpu.memory_space<vmem>>, vector<1x32xf32>
    %c1_555 = arith.constant 1 : index
    %c32_556 = arith.constant 32 : index
    %367 = vector.load %arg11[%c1_555, %c32_556] : memref<2x1024xf32, #tpu.memory_space<vmem>>, vector<1x32xf32>
    tpu.vector_store %arg11[%c1_555, %c32_556], %366 {strides = array<i32>} : memref<2x1024xf32, #tpu.memory_space<vmem>>, vector<1x32xf32>,
    %c34 = arith.constant 34 : index
    %c0_557 = arith.constant 0 : index
    %368 = vector.load %arg10[%c34, %c0_557] : memref<64x32xf32, #tpu.memory_space<vmem>>, vector<1x32xf32>
    %c1_558 = arith.constant 1 : index
    %c64_559 = arith.constant 64 : index
    %369 = vector.load %arg11[%c1_558, %c64_559] : memref<2x1024xf32, #tpu.memory_space<vmem>>, vector<1x32xf32>
    tpu.vector_store %arg11[%c1_558, %c64_559], %368 {strides = array<i32>} : memref<2x1024xf32, #tpu.memory_space<vmem>>, vector<1x32xf32>,
    %c35 = arith.constant 35 : index
    %c0_560 = arith.constant 0 : index
    %370 = vector.load %arg10[%c35, %c0_560] : memref<64x32xf32, #tpu.memory_space<vmem>>, vector<1x32xf32>
    %c1_561 = arith.constant 1 : index
    %c96_562 = arith.constant 96 : index
    %371 = vector.load %arg11[%c1_561, %c96_562] : memref<2x1024xf32, #tpu.memory_space<vmem>>, vector<1x32xf32>
    tpu.vector_store %arg11[%c1_561, %c96_562], %370 {strides = array<i32>} : memref<2x1024xf32, #tpu.memory_space<vmem>>, vector<1x32xf32>,
    %c36_563 = arith.constant 36 : index
    %c0_564 = arith.constant 0 : index
    %372 = vector.load %arg10[%c36_563, %c0_564] : memref<64x32xf32, #tpu.memory_space<vmem>>, vector<1x32xf32>
    %c1_565 = arith.constant 1 : index
    %c128_566 = arith.constant 128 : index
    %373 = vector.load %arg11[%c1_565, %c128_566] : memref<2x1024xf32, #tpu.memory_space<vmem>>, vector<1x32xf32>
    tpu.vector_store %arg11[%c1_565, %c128_566], %372 {strides = array<i32>} : memref<2x1024xf32, #tpu.memory_space<vmem>>, vector<1x32xf32>,
    %c37_567 = arith.constant 37 : index
    %c0_568 = arith.constant 0 : index
    %374 = vector.load %arg10[%c37_567, %c0_568] : memref<64x32xf32, #tpu.memory_space<vmem>>, vector<1x32xf32>
    %c1_569 = arith.constant 1 : index
    %c160_570 = arith.constant 160 : index
    %375 = vector.load %arg11[%c1_569, %c160_570] : memref<2x1024xf32, #tpu.memory_space<vmem>>, vector<1x32xf32>
    tpu.vector_store %arg11[%c1_569, %c160_570], %374 {strides = array<i32>} : memref<2x1024xf32, #tpu.memory_space<vmem>>, vector<1x32xf32>,
    %c38 = arith.constant 38 : index
    %c0_571 = arith.constant 0 : index
    %376 = vector.load %arg10[%c38, %c0_571] : memref<64x32xf32, #tpu.memory_space<vmem>>, vector<1x32xf32>
    %c1_572 = arith.constant 1 : index
    %c192_573 = arith.constant 192 : index
    %377 = vector.load %arg11[%c1_572, %c192_573] : memref<2x1024xf32, #tpu.memory_space<vmem>>, vector<1x32xf32>
    tpu.vector_store %arg11[%c1_572, %c192_573], %376 {strides = array<i32>} : memref<2x1024xf32, #tpu.memory_space<vmem>>, vector<1x32xf32>,
    %c39 = arith.constant 39 : index
    %c0_574 = arith.constant 0 : index
    %378 = vector.load %arg10[%c39, %c0_574] : memref<64x32xf32, #tpu.memory_space<vmem>>, vector<1x32xf32>
    %c1_575 = arith.constant 1 : index
    %c224_576 = arith.constant 224 : index
    %379 = vector.load %arg11[%c1_575, %c224_576] : memref<2x1024xf32, #tpu.memory_space<vmem>>, vector<1x32xf32>
    tpu.vector_store %arg11[%c1_575, %c224_576], %378 {strides = array<i32>} : memref<2x1024xf32, #tpu.memory_space<vmem>>, vector<1x32xf32>,
    %c40_577 = arith.constant 40 : index
    %c0_578 = arith.constant 0 : index
    %380 = vector.load %arg10[%c40_577, %c0_578] : memref<64x32xf32, #tpu.memory_space<vmem>>, vector<1x32xf32>
    %c1_579 = arith.constant 1 : index
    %c256_580 = arith.constant 256 : index
    %381 = vector.load %arg11[%c1_579, %c256_580] : memref<2x1024xf32, #tpu.memory_space<vmem>>, vector<1x32xf32>
    tpu.vector_store %arg11[%c1_579, %c256_580], %380 {strides = array<i32>} : memref<2x1024xf32, #tpu.memory_space<vmem>>, vector<1x32xf32>,
    %c41 = arith.constant 41 : index
    %c0_581 = arith.constant 0 : index
    %382 = vector.load %arg10[%c41, %c0_581] : memref<64x32xf32, #tpu.memory_space<vmem>>, vector<1x32xf32>
    %c1_582 = arith.constant 1 : index
    %c288_583 = arith.constant 288 : index
    %383 = vector.load %arg11[%c1_582, %c288_583] : memref<2x1024xf32, #tpu.memory_space<vmem>>, vector<1x32xf32>
    tpu.vector_store %arg11[%c1_582, %c288_583], %382 {strides = array<i32>} : memref<2x1024xf32, #tpu.memory_space<vmem>>, vector<1x32xf32>,
    %c42 = arith.constant 42 : index
    %c0_584 = arith.constant 0 : index
    %384 = vector.load %arg10[%c42, %c0_584] : memref<64x32xf32, #tpu.memory_space<vmem>>, vector<1x32xf32>
    %c1_585 = arith.constant 1 : index
    %c320_586 = arith.constant 320 : index
    %385 = vector.load %arg11[%c1_585, %c320_586] : memref<2x1024xf32, #tpu.memory_space<vmem>>, vector<1x32xf32>
    tpu.vector_store %arg11[%c1_585, %c320_586], %384 {strides = array<i32>} : memref<2x1024xf32, #tpu.memory_space<vmem>>, vector<1x32xf32>,
    %c43 = arith.constant 43 : index
    %c0_587 = arith.constant 0 : index
    %386 = vector.load %arg10[%c43, %c0_587] : memref<64x32xf32, #tpu.memory_space<vmem>>, vector<1x32xf32>
    %c1_588 = arith.constant 1 : index
    %c352_589 = arith.constant 352 : index
    %387 = vector.load %arg11[%c1_588, %c352_589] : memref<2x1024xf32, #tpu.memory_space<vmem>>, vector<1x32xf32>
    tpu.vector_store %arg11[%c1_588, %c352_589], %386 {strides = array<i32>} : memref<2x1024xf32, #tpu.memory_space<vmem>>, vector<1x32xf32>,
    %c44 = arith.constant 44 : index
    %c0_590 = arith.constant 0 : index
    %388 = vector.load %arg10[%c44, %c0_590] : memref<64x32xf32, #tpu.memory_space<vmem>>, vector<1x32xf32>
    %c1_591 = arith.constant 1 : index
    %c384_592 = arith.constant 384 : index
    %389 = vector.load %arg11[%c1_591, %c384_592] : memref<2x1024xf32, #tpu.memory_space<vmem>>, vector<1x32xf32>
    tpu.vector_store %arg11[%c1_591, %c384_592], %388 {strides = array<i32>} : memref<2x1024xf32, #tpu.memory_space<vmem>>, vector<1x32xf32>,
    %c45_593 = arith.constant 45 : index
    %c0_594 = arith.constant 0 : index
    %390 = vector.load %arg10[%c45_593, %c0_594] : memref<64x32xf32, #tpu.memory_space<vmem>>, vector<1x32xf32>
    %c1_595 = arith.constant 1 : index
    %c416_596 = arith.constant 416 : index
    %391 = vector.load %arg11[%c1_595, %c416_596] : memref<2x1024xf32, #tpu.memory_space<vmem>>, vector<1x32xf32>
    tpu.vector_store %arg11[%c1_595, %c416_596], %390 {strides = array<i32>} : memref<2x1024xf32, #tpu.memory_space<vmem>>, vector<1x32xf32>,
    %c46_597 = arith.constant 46 : index
    %c0_598 = arith.constant 0 : index
    %392 = vector.load %arg10[%c46_597, %c0_598] : memref<64x32xf32, #tpu.memory_space<vmem>>, vector<1x32xf32>
    %c1_599 = arith.constant 1 : index
    %c448_600 = arith.constant 448 : index
    %393 = vector.load %arg11[%c1_599, %c448_600] : memref<2x1024xf32, #tpu.memory_space<vmem>>, vector<1x32xf32>
    tpu.vector_store %arg11[%c1_599, %c448_600], %392 {strides = array<i32>} : memref<2x1024xf32, #tpu.memory_space<vmem>>, vector<1x32xf32>,
    %c47 = arith.constant 47 : index
    %c0_601 = arith.constant 0 : index
    %394 = vector.load %arg10[%c47, %c0_601] : memref<64x32xf32, #tpu.memory_space<vmem>>, vector<1x32xf32>
    %c1_602 = arith.constant 1 : index
    %c480_603 = arith.constant 480 : index
    %395 = vector.load %arg11[%c1_602, %c480_603] : memref<2x1024xf32, #tpu.memory_space<vmem>>, vector<1x32xf32>
    tpu.vector_store %arg11[%c1_602, %c480_603], %394 {strides = array<i32>} : memref<2x1024xf32, #tpu.memory_space<vmem>>, vector<1x32xf32>,
    %c48_604 = arith.constant 48 : index
    %c0_605 = arith.constant 0 : index
    %396 = vector.load %arg10[%c48_604, %c0_605] : memref<64x32xf32, #tpu.memory_space<vmem>>, vector<1x32xf32>
    %c1_606 = arith.constant 1 : index
    %c512_607 = arith.constant 512 : index
    %397 = vector.load %arg11[%c1_606, %c512_607] : memref<2x1024xf32, #tpu.memory_space<vmem>>, vector<1x32xf32>
    tpu.vector_store %arg11[%c1_606, %c512_607], %396 {strides = array<i32>} : memref<2x1024xf32, #tpu.memory_space<vmem>>, vector<1x32xf32>,
    %c49 = arith.constant 49 : index
    %c0_608 = arith.constant 0 : index
    %398 = vector.load %arg10[%c49, %c0_608] : memref<64x32xf32, #tpu.memory_space<vmem>>, vector<1x32xf32>
    %c1_609 = arith.constant 1 : index
    %c544_610 = arith.constant 544 : index
    %399 = vector.load %arg11[%c1_609, %c544_610] : memref<2x1024xf32, #tpu.memory_space<vmem>>, vector<1x32xf32>
    tpu.vector_store %arg11[%c1_609, %c544_610], %398 {strides = array<i32>} : memref<2x1024xf32, #tpu.memory_space<vmem>>, vector<1x32xf32>,
    %c50 = arith.constant 50 : index
    %c0_611 = arith.constant 0 : index
    %400 = vector.load %arg10[%c50, %c0_611] : memref<64x32xf32, #tpu.memory_space<vmem>>, vector<1x32xf32>
    %c1_612 = arith.constant 1 : index
    %c576_613 = arith.constant 576 : index
    %401 = vector.load %arg11[%c1_612, %c576_613] : memref<2x1024xf32, #tpu.memory_space<vmem>>, vector<1x32xf32>
    tpu.vector_store %arg11[%c1_612, %c576_613], %400 {strides = array<i32>} : memref<2x1024xf32, #tpu.memory_space<vmem>>, vector<1x32xf32>,
    %c51 = arith.constant 51 : index
    %c0_614 = arith.constant 0 : index
    %402 = vector.load %arg10[%c51, %c0_614] : memref<64x32xf32, #tpu.memory_space<vmem>>, vector<1x32xf32>
    %c1_615 = arith.constant 1 : index
    %c608_616 = arith.constant 608 : index
    %403 = vector.load %arg11[%c1_615, %c608_616] : memref<2x1024xf32, #tpu.memory_space<vmem>>, vector<1x32xf32>
    tpu.vector_store %arg11[%c1_615, %c608_616], %402 {strides = array<i32>} : memref<2x1024xf32, #tpu.memory_space<vmem>>, vector<1x32xf32>,
    %c52 = arith.constant 52 : index
    %c0_617 = arith.constant 0 : index
    %404 = vector.load %arg10[%c52, %c0_617] : memref<64x32xf32, #tpu.memory_space<vmem>>, vector<1x32xf32>
    %c1_618 = arith.constant 1 : index
    %c640_619 = arith.constant 640 : index
    %405 = vector.load %arg11[%c1_618, %c640_619] : memref<2x1024xf32, #tpu.memory_space<vmem>>, vector<1x32xf32>
    tpu.vector_store %arg11[%c1_618, %c640_619], %404 {strides = array<i32>} : memref<2x1024xf32, #tpu.memory_space<vmem>>, vector<1x32xf32>,
    %c53 = arith.constant 53 : index
    %c0_620 = arith.constant 0 : index
    %406 = vector.load %arg10[%c53, %c0_620] : memref<64x32xf32, #tpu.memory_space<vmem>>, vector<1x32xf32>
    %c1_621 = arith.constant 1 : index
    %c672_622 = arith.constant 672 : index
    %407 = vector.load %arg11[%c1_621, %c672_622] : memref<2x1024xf32, #tpu.memory_space<vmem>>, vector<1x32xf32>
    tpu.vector_store %arg11[%c1_621, %c672_622], %406 {strides = array<i32>} : memref<2x1024xf32, #tpu.memory_space<vmem>>, vector<1x32xf32>,
    %c54_623 = arith.constant 54 : index
    %c0_624 = arith.constant 0 : index
    %408 = vector.load %arg10[%c54_623, %c0_624] : memref<64x32xf32, #tpu.memory_space<vmem>>, vector<1x32xf32>
    %c1_625 = arith.constant 1 : index
    %c704_626 = arith.constant 704 : index
    %409 = vector.load %arg11[%c1_625, %c704_626] : memref<2x1024xf32, #tpu.memory_space<vmem>>, vector<1x32xf32>
    tpu.vector_store %arg11[%c1_625, %c704_626], %408 {strides = array<i32>} : memref<2x1024xf32, #tpu.memory_space<vmem>>, vector<1x32xf32>,
    %c55_627 = arith.constant 55 : index
    %c0_628 = arith.constant 0 : index
    %410 = vector.load %arg10[%c55_627, %c0_628] : memref<64x32xf32, #tpu.memory_space<vmem>>, vector<1x32xf32>
    %c1_629 = arith.constant 1 : index
    %c736_630 = arith.constant 736 : index
    %411 = vector.load %arg11[%c1_629, %c736_630] : memref<2x1024xf32, #tpu.memory_space<vmem>>, vector<1x32xf32>
    tpu.vector_store %arg11[%c1_629, %c736_630], %410 {strides = array<i32>} : memref<2x1024xf32, #tpu.memory_space<vmem>>, vector<1x32xf32>,
    %c56_631 = arith.constant 56 : index
    %c0_632 = arith.constant 0 : index
    %412 = vector.load %arg10[%c56_631, %c0_632] : memref<64x32xf32, #tpu.memory_space<vmem>>, vector<1x32xf32>
    %c1_633 = arith.constant 1 : index
    %c768_634 = arith.constant 768 : index
    %413 = vector.load %arg11[%c1_633, %c768_634] : memref<2x1024xf32, #tpu.memory_space<vmem>>, vector<1x32xf32>
    tpu.vector_store %arg11[%c1_633, %c768_634], %412 {strides = array<i32>} : memref<2x1024xf32, #tpu.memory_space<vmem>>, vector<1x32xf32>,
    %c57 = arith.constant 57 : index
    %c0_635 = arith.constant 0 : index
    %414 = vector.load %arg10[%c57, %c0_635] : memref<64x32xf32, #tpu.memory_space<vmem>>, vector<1x32xf32>
    %c1_636 = arith.constant 1 : index
    %c800_637 = arith.constant 800 : index
    %415 = vector.load %arg11[%c1_636, %c800_637] : memref<2x1024xf32, #tpu.memory_space<vmem>>, vector<1x32xf32>
    tpu.vector_store %arg11[%c1_636, %c800_637], %414 {strides = array<i32>} : memref<2x1024xf32, #tpu.memory_space<vmem>>, vector<1x32xf32>,
    %c58 = arith.constant 58 : index
    %c0_638 = arith.constant 0 : index
    %416 = vector.load %arg10[%c58, %c0_638] : memref<64x32xf32, #tpu.memory_space<vmem>>, vector<1x32xf32>
    %c1_639 = arith.constant 1 : index
    %c832_640 = arith.constant 832 : index
    %417 = vector.load %arg11[%c1_639, %c832_640] : memref<2x1024xf32, #tpu.memory_space<vmem>>, vector<1x32xf32>
    tpu.vector_store %arg11[%c1_639, %c832_640], %416 {strides = array<i32>} : memref<2x1024xf32, #tpu.memory_space<vmem>>, vector<1x32xf32>,
    %c59 = arith.constant 59 : index
    %c0_641 = arith.constant 0 : index
    %418 = vector.load %arg10[%c59, %c0_641] : memref<64x32xf32, #tpu.memory_space<vmem>>, vector<1x32xf32>
    %c1_642 = arith.constant 1 : index
    %c864_643 = arith.constant 864 : index
    %419 = vector.load %arg11[%c1_642, %c864_643] : memref<2x1024xf32, #tpu.memory_space<vmem>>, vector<1x32xf32>
    tpu.vector_store %arg11[%c1_642, %c864_643], %418 {strides = array<i32>} : memref<2x1024xf32, #tpu.memory_space<vmem>>, vector<1x32xf32>,
    %c60 = arith.constant 60 : index
    %c0_644 = arith.constant 0 : index
    %420 = vector.load %arg10[%c60, %c0_644] : memref<64x32xf32, #tpu.memory_space<vmem>>, vector<1x32xf32>
    %c1_645 = arith.constant 1 : index
    %c896_646 = arith.constant 896 : index
    %421 = vector.load %arg11[%c1_645, %c896_646] : memref<2x1024xf32, #tpu.memory_space<vmem>>, vector<1x32xf32>
    tpu.vector_store %arg11[%c1_645, %c896_646], %420 {strides = array<i32>} : memref<2x1024xf32, #tpu.memory_space<vmem>>, vector<1x32xf32>,
    %c61 = arith.constant 61 : index
    %c0_647 = arith.constant 0 : index
    %422 = vector.load %arg10[%c61, %c0_647] : memref<64x32xf32, #tpu.memory_space<vmem>>, vector<1x32xf32>
    %c1_648 = arith.constant 1 : index
    %c928_649 = arith.constant 928 : index
    %423 = vector.load %arg11[%c1_648, %c928_649] : memref<2x1024xf32, #tpu.memory_space<vmem>>, vector<1x32xf32>
    tpu.vector_store %arg11[%c1_648, %c928_649], %422 {strides = array<i32>} : memref<2x1024xf32, #tpu.memory_space<vmem>>, vector<1x32xf32>,
    %c62 = arith.constant 62 : index
    %c0_650 = arith.constant 0 : index
    %424 = vector.load %arg10[%c62, %c0_650] : memref<64x32xf32, #tpu.memory_space<vmem>>, vector<1x32xf32>
    %c1_651 = arith.constant 1 : index
    %c960_652 = arith.constant 960 : index
    %425 = vector.load %arg11[%c1_651, %c960_652] : memref<2x1024xf32, #tpu.memory_space<vmem>>, vector<1x32xf32>
    tpu.vector_store %arg11[%c1_651, %c960_652], %424 {strides = array<i32>} : memref<2x1024xf32, #tpu.memory_space<vmem>>, vector<1x32xf32>,
    %c63_653 = arith.constant 63 : index
    %c0_654 = arith.constant 0 : index
    %426 = vector.load %arg10[%c63_653, %c0_654] : memref<64x32xf32, #tpu.memory_space<vmem>>, vector<1x32xf32>
    %c1_655 = arith.constant 1 : index
    %c992_656 = arith.constant 992 : index
    %427 = vector.load %arg11[%c1_655, %c992_656] : memref<2x1024xf32, #tpu.memory_space<vmem>>, vector<1x32xf32>
    tpu.vector_store %arg11[%c1_655, %c992_656], %426 {strides = array<i32>} : memref<2x1024xf32, #tpu.memory_space<vmem>>, vector<1x32xf32>,
    %c0_657 = arith.constant 0 : index
    %c0_658 = arith.constant 0 : index
    %428 = vector.load %arg11[%c0_657, %c0_658] : memref<2x1024xf32, #tpu.memory_space<vmem>>, vector<2x1024xf32>
    %c0_659 = arith.constant 0 : index
    %c0_660 = arith.constant 0 : index
    %429 = vector.load %arg5[%c0_659, %c0_660] : memref<1024x128xf32, #tpu.memory_space<vmem>>, vector<1024x128xf32>
    %cst_661 = arith.constant dense<0.000000e+00> : vector<2x128xf32>
    %430 = tpu.matmul %428, %429, %cst_661 {dimension_numbers = #tpu.dot_dimension_numbers<[1], [0], [0], [1], [0, 0, 1, 1], [], []>} : vector<2x1024xf32>, vector<1024x128xf32>, vector<2x128xf32> -> vector<2x128xf32>
    %c0_662 = arith.constant 0 : index
    %c0_663 = arith.constant 0 : index
    %431 = vector.load %arg6[%c0_662, %c0_663] : memref<1x128xf32, #tpu.memory_space<vmem>>, vector<1x128xf32>
    %432 = vector.broadcast %431 : vector<1x128xf32> to vector<2x128xf32>
    %433 = arith.addf %430, %432 : vector<2x128xf32>
    %c0_664 = arith.constant 0 : index
    %c0_665 = arith.constant 0 : index
    %434 = vector.load %arg7[%c0_664, %c0_665] : memref<2x128xf32, #tpu.memory_space<vmem>>, vector<2x128xf32>
    tpu.vector_store %arg7[%c0_664, %c0_665], %433 {strides = array<i32>} : memref<2x128xf32, #tpu.memory_space<vmem>>, vector<2x128xf32>,
    return
  }
}

</mosaic_0001>

<bundles_post_ra>
// kernel: convnet_forward.1
= control target key start
LH: loop header
LB: loop body
LE: loop exit
PB: predicated region body
PF: predicated region fallthrough
CT: control target
= control target key end

     0   :  { %vm74_vm0 = vcmask 130048   ;;  %s6351_s0 = inlined_call_operand.vmem [shape: f32[360,16], index: 0, kind: input, shape index: {}]   ;;  %s6352_s1 = inlined_call_operand.vmem [shape: f32[4,16,32], index: 1, kind: input, shape index: {}]   ;;  %s6353_s2 = inlined_call_operand.vmem [shape: f32[1,32], index: 2, kind: input, shape index: {}]   ;;  %s6354_s3 = inlined_call_operand.vmem [shape: f32[4,512,32], index: 3, kind: input, shape index: {}]   ;;  %s6355_s4 = inlined_call_operand.vmem [shape: f32[1,32], index: 4, kind: input, shape index: {}]   ;;  %s6356_s5 = inlined_call_operand.vmem [shape: f32[1024,128], index: 5, kind: input, shape index: {}]   ;;  %s6357_s6 = inlined_call_operand.vmem [shape: f32[1,128], index: 6, kind: input, shape index: {}]   ;;  %s6358_s7 = inlined_call_operand.hbm [shape: f32[2,128], index: 7, kind: output, shape index: {}]  }
   0x1   :  { %v3493_v0 = vld [vmem:[%s6352_s1 + $0x28] sm:$0xff]  ;;  %v3492_v1 = vld [vmem:[%s6352_s1 + $0x20] sm:$0xff]  ;;  %v3540_v2 = vld [vmem:[%s6352_s1 + $0x38] sm:$0xff] }
   0x2   :  { %579 = vmatpush.msra.mxu2 %v3493_v0  ;;  %779 = vmatpush.msra.mxu3 %v3540_v2  ;;  %v27_v3 = vld [vmem:[%s6351_s0] sm:$0xff]  ;;  %v73_v4 = vld [vmem:[%s6352_s1 + $0x8] sm:$0xff]  ;;  %v3446_v5 = vld [vmem:[%s6352_s1 + $0x18] sm:$0xff] }
   0x3   :  { %224 = vmatpush.msra.mxu0 %v73_v4  ;;  %379 = vmatpush.msra.mxu1 %v3446_v5  ;;  %v3539_v6 = vld [vmem:[%s6352_s1 + $0x30] sm:$0xff]  ;;  %v72_v7 = vld [vmem:[%s6352_s1] sm:$0xff] }
   0x4   :  { %v3445_v8 = vld [vmem:[%s6352_s1 + $0x10] sm:$0xff]  ;;  %580 = vmatpush.msra.mxu2 %v3492_v1  ;;  %780 = vmatpush.msra.mxu3 %v3539_v6 }
   0x5   :  { %3494 = vmatmul.msk.f32.vlgmr.msra.gmra.mxu2 %vm74_vm0, %v27_v3  ;;  %3541 = vmatmul.msk.f32.vlgmr.msra.gmra.mxu3 %vm74_vm0, %v27_v3 }
   0x6   :  { %225 = vmatpush.msra.mxu0 %v72_v7  ;;  %380 = vmatpush.msra.mxu1 %v3445_v8 }
   0x7   :  { %12 = vsyncpa [#allocation7], 0  ;;  %3400 = vmatmul.msk.f32.vlgmr.msra.gmra.mxu0 %vm74_vm0, %v27_v3  ;;  %3447 = vmatmul.msk.f32.vlgmr.msra.gmra.mxu1 %vm74_vm0, %v27_v3  ;;  %v28_v9 = vld [vmem:[%s6351_s0 + $0x8] sm:$0xff]  ;;  %v29_v10 = vld [vmem:[%s6351_s0 + $0x10] sm:$0xff]  ;;  %vm1056_vm1 = vcmask 261120   ;;  %s3826_s11 = smov 64  }
   0x8   :  { %v30_v11 = vld [vmem:[%s6351_s0 + $0x18] sm:$0xff]  ;;  %v31_v12 = vld [vmem:[%s6351_s0 + $0x20] sm:$0xff]  ;;  %v32_v13 = vld [vmem:[%s6351_s0 + $0x28] sm:$0xff]  ;;  %s3827_s1 = smov 96   ;;  %s3828_s21 = smov 32   ;;  %vm1123_vm2 = vcmask 523520  }
   0x9   :  { %v33_v14 = vld [vmem:[%s6351_s0 + $0x30] sm:$0xff]  ;;  %v34_v15 = vld [vmem:[%s6351_s0 + $0x38] sm:$0xff]  ;;  %v35_v16 = vld [vmem:[%s6351_s0 + $0x40] sm:$0xff]  ;;  %vm1172_vm3 = vcmask 785920   ;;  %vm1221_vm4 = vcmask 1048320   ;;  %vm2745_vm5 = vcmask 253952  }
   0xa   :  { %v36_v17 = vld [vmem:[%s6351_s0 + $0x48] sm:$0xff]  ;;  %v37_v18 = vld [vmem:[%s6351_s0 + $0x50] sm:$0xff]  ;;  %v38_v19 = vld [vmem:[%s6351_s0 + $0x58] sm:$0xff]  ;;  %vm2752_vm6 = vcmask 516352   ;;  %vm2759_vm7 = vcmask 778752   ;;  %vm2766_vm8 = vcmask 1041152  }
   0xb   :  { %v39_v20 = vld [vmem:[%s6351_s0 + $0x60] sm:$0xff]  ;;  %v40_v21 = vld [vmem:[%s6351_s0 + $0x68] sm:$0xff]  ;;  %v41_v22 = vld [vmem:[%s6351_s0 + $0x70] sm:$0xff]  ;;  %s3829_s18 = smov [#allocation6]   ;;  %s3391_s23 = sshll.u32 %s6358_s7, 4  ;;  %s3392_s23 = int_to_ptr.hbm [resolvable:$true] %s3391_s23 }
   0xc   :  { %v42_v23 = vld [vmem:[%s6351_s0 + $0x78] sm:$0xff]  ;;  %v43_v24 = vld [vmem:[%s6351_s0 + $0x80] sm:$0xff]  ;;  %v44_v32 = vld [vmem:[%s6351_s0 + $0x88] sm:$0xff]  ;;  %s3389_s19 = sshll.u32 %s3829_s18, 4  ;;  %s3390_s19 = int_to_ptr.vmem [resolvable:$true] %s3389_s19 }
   0xd   :  { %3495 = vmatmul.msk.f32.gmra.mxu2 %vm74_vm0, %v28_v9  ;;  %3542 = vmatmul.msk.f32.gmra.mxu3 %vm74_vm0, %v28_v9  ;;  %v4016_v31 = vld [vmem:[%s6353_s2] ss:$0 sm:$0xff]  ;;  %v45_v42 = vld [vmem:[%s6351_s0 + $0x90] sm:$0xff]  ;;  %v46_v53 = vld [vmem:[%s6351_s0 + $0x98] sm:$0xff] }
   0xe   :  { %v47_v0 = vld [vmem:[%s6351_s0 + $0xa0] sm:$0xff] }
   0xf   :  { %3401 = vmatmul.msk.f32.gmra.mxu0 %vm74_vm0, %v28_v9  ;;  %3448 = vmatmul.msk.f32.gmra.mxu1 %vm74_vm0, %v28_v9 }
  0x15   :  { %3496 = vmatmul.msk.f32.gmra.mxu2 %vm74_vm0, %v29_v10  ;;  %3543 = vmatmul.msk.f32.gmra.mxu3 %vm74_vm0, %v29_v10 }
  0x17   :  { %3402 = vmatmul.msk.f32.gmra.mxu0 %vm74_vm0, %v29_v10  ;;  %3449 = vmatmul.msk.f32.gmra.mxu1 %vm74_vm0, %v29_v10 }
  0x1d   :  { %3497 = vmatmul.msk.f32.gmra.mxu2 %vm74_vm0, %v30_v11  ;;  %3544 = vmatmul.msk.f32.gmra.mxu3 %vm74_vm0, %v30_v11 }
  0x1f   :  { %3403 = vmatmul.msk.f32.gmra.mxu0 %vm74_vm0, %v30_v11  ;;  %3450 = vmatmul.msk.f32.gmra.mxu1 %vm74_vm0, %v30_v11 }
  0x25   :  { %3498 = vmatmul.msk.f32.gmra.mxu2 %vm74_vm0, %v31_v12  ;;  %3545 = vmatmul.msk.f32.gmra.mxu3 %vm74_vm0, %v31_v12 }
  0x27   :  { %3404 = vmatmul.msk.f32.gmra.mxu0 %vm74_vm0, %v31_v12  ;;  %3451 = vmatmul.msk.f32.gmra.mxu1 %vm74_vm0, %v31_v12  ;;  %v48_v12 = vld [vmem:[%s6351_s0 + $0xa8] sm:$0xff] }
  0x2d   :  { %3499 = vmatmul.msk.f32.gmra.mxu2 %vm74_vm0, %v32_v13  ;;  %3546 = vmatmul.msk.f32.gmra.mxu3 %vm74_vm0, %v32_v13 }
  0x2f   :  { %3405 = vmatmul.msk.f32.gmra.mxu0 %vm74_vm0, %v32_v13  ;;  %3452 = vmatmul.msk.f32.gmra.mxu1 %vm74_vm0, %v32_v13 }
  0x35   :  { %3500 = vmatmul.msk.f32.gmra.mxu2 %vm74_vm0, %v33_v14  ;;  %3547 = vmatmul.msk.f32.gmra.mxu3 %vm74_vm0, %v33_v14 }
  0x37   :  { %3406 = vmatmul.msk.f32.gmra.mxu0 %vm74_vm0, %v33_v14  ;;  %3453 = vmatmul.msk.f32.gmra.mxu1 %vm74_vm0, %v33_v14 }
  0x3d   :  { %3501 = vmatmul.msk.f32.gmra.mxu2 %vm74_vm0, %v34_v15  ;;  %3548 = vmatmul.msk.f32.gmra.mxu3 %vm74_vm0, %v34_v15 }
  0x3f   :  { %3407 = vmatmul.msk.f32.gmra.mxu0 %vm74_vm0, %v34_v15  ;;  %3454 = vmatmul.msk.f32.gmra.mxu1 %vm74_vm0, %v34_v15 }
  0x45   :  { %3502 = vmatmul.msk.f32.gmra.mxu2 %vm74_vm0, %v35_v16  ;;  %3549 = vmatmul.msk.f32.gmra.mxu3 %vm74_vm0, %v35_v16 }
  0x47   :  { %3408 = vmatmul.msk.f32.gmra.mxu0 %vm74_vm0, %v35_v16  ;;  %3455 = vmatmul.msk.f32.gmra.mxu1 %vm74_vm0, %v35_v16 }
  0x4d   :  { %3503 = vmatmul.msk.f32.gmra.mxu2 %vm74_vm0, %v36_v17  ;;  %3550 = vmatmul.msk.f32.gmra.mxu3 %vm74_vm0, %v36_v17 }
  0x4f   :  { %3409 = vmatmul.msk.f32.gmra.mxu0 %vm74_vm0, %v36_v17  ;;  %3456 = vmatmul.msk.f32.gmra.mxu1 %vm74_vm0, %v36_v17 }
  0x55   :  { %3504 = vmatmul.msk.f32.gmra.mxu2 %vm74_vm0, %v37_v18  ;;  %3551 = vmatmul.msk.f32.gmra.mxu3 %vm74_vm0, %v37_v18 }
  0x57   :  { %3410 = vmatmul.msk.f32.gmra.mxu0 %vm74_vm0, %v37_v18  ;;  %3457 = vmatmul.msk.f32.gmra.mxu1 %vm74_vm0, %v37_v18 }
  0x5d   :  { %3505 = vmatmul.msk.f32.gmra.mxu2 %vm74_vm0, %v38_v19  ;;  %3552 = vmatmul.msk.f32.gmra.mxu3 %vm74_vm0, %v38_v19 }
  0x5f   :  { %3411 = vmatmul.msk.f32.gmra.mxu0 %vm74_vm0, %v38_v19  ;;  %3458 = vmatmul.msk.f32.gmra.mxu1 %vm74_vm0, %v38_v19 }
  0x65   :  { %3506 = vmatmul.msk.f32.gmra.mxu2 %vm74_vm0, %v39_v20  ;;  %3553 = vmatmul.msk.f32.gmra.mxu3 %vm74_vm0, %v39_v20 }
  0x67   :  { %3412 = vmatmul.msk.f32.gmra.mxu0 %vm74_vm0, %v39_v20  ;;  %3459 = vmatmul.msk.f32.gmra.mxu1 %vm74_vm0, %v39_v20 }
  0x6d   :  { %3507 = vmatmul.msk.f32.gmra.mxu2 %vm74_vm0, %v40_v21  ;;  %3554 = vmatmul.msk.f32.gmra.mxu3 %vm74_vm0, %v40_v21 }
  0x6f   :  { %3413 = vmatmul.msk.f32.gmra.mxu0 %vm74_vm0, %v40_v21  ;;  %3460 = vmatmul.msk.f32.gmra.mxu1 %vm74_vm0, %v40_v21 }
  0x75   :  { %3508 = vmatmul.msk.f32.gmra.mxu2 %vm74_vm0, %v41_v22  ;;  %3555 = vmatmul.msk.f32.gmra.mxu3 %vm74_vm0, %v41_v22 }
  0x77   :  { %3414 = vmatmul.msk.f32.gmra.mxu0 %vm74_vm0, %v41_v22  ;;  %3461 = vmatmul.msk.f32.gmra.mxu1 %vm74_vm0, %v41_v22 }
  0x7d   :  { %3509 = vmatmul.msk.f32.gmra.mxu2 %vm74_vm0, %v42_v23  ;;  %3556 = vmatmul.msk.f32.gmra.mxu3 %vm74_vm0, %v42_v23 }
  0x7f   :  { %3415 = vmatmul.msk.f32.gmra.mxu0 %vm74_vm0, %v42_v23  ;;  %3462 = vmatmul.msk.f32.gmra.mxu1 %vm74_vm0, %v42_v23 }
  0x84   :  { %v227_v25 = vpop.f32.mrf.mxu0  ;;  %v382_v26 = vpop.f32.mrf.mxu1 }
  0x85   :  { %3510 = vmatmul.msk.f32.gmra.mxu2 %vm74_vm0, %v43_v24  ;;  %v517_v27 = vmax.f32 %v227_v25, %v382_v26  ;;  %3557 = vmatmul.msk.f32.gmra.mxu3 %vm74_vm0, %v43_v24 }
  0x87   :  { %3416 = vmatmul.msk.f32.gmra.mxu0 %vm74_vm0, %v43_v24  ;;  %3463 = vmatmul.msk.f32.gmra.mxu1 %vm74_vm0, %v43_v24  ;;  %v49_v24 = vld [vmem:[%s6351_s0 + $0xb0] sm:$0xff] }
  0x88   :  { %v582_v28 = vpop.f32.mrf.mxu2  ;;  %v782_v29 = vpop.f32.mrf.mxu3 }
  0x89   :  { %v717_v30 = vmax.f32 %v517_v27, %v582_v28 }
  0x8b   :  { %v917_v33 = vmax.f32 %v717_v30, %v782_v29 }
  0x8c   :  { %v230_v34 = vpop.f32.mrf.mxu0  ;;  %v385_v35 = vpop.f32.mrf.mxu1 }
  0x8d   :  { %v966_v36 = vadd.f32 %v4016_v31, %v917_v33  ;;  %3511 = vmatmul.msk.f32.gmra.mxu2 %vm74_vm0, %v44_v32  ;;  %v518_v37 = vmax.f32 %v230_v34, %v385_v35  ;;  %3558 = vmatmul.msk.f32.gmra.mxu3 %vm74_vm0, %v44_v32 }
  0x8f   :  { %v1011_v38 = vmax.f32 %v966_v36, 0.0  ;;  %3417 = vmatmul.msk.f32.gmra.mxu0 %vm74_vm0, %v44_v32  ;;  %3464 = vmatmul.msk.f32.gmra.mxu1 %vm74_vm0, %v44_v32 }
  0x90   :  { %v585_v39 = vpop.f32.mrf.mxu2  ;;  %v785_v40 = vpop.f32.mrf.mxu3 }
  0x91   :  { %1057 = vst.msk [vmem:[#allocation2] sm:$0xff] %vm1056_vm1, %v1011_v38  ;;  %v718_v41 = vmax.f32 %v518_v37, %v585_v39  ;;  %v50_v37 = vld [vmem:[%s6351_s0 + $0xb8] sm:$0xff] }
  0x93   :  { %v918_v43 = vmax.f32 %v718_v41, %v785_v40 }
  0x94   :  { %v233_v44 = vpop.f32.mrf.mxu0  ;;  %v388_v45 = vpop.f32.mrf.mxu1 }
  0x95   :  { %v967_v46 = vadd.f32 %v4016_v31, %v918_v43  ;;  %3512 = vmatmul.msk.f32.gmra.mxu2 %vm74_vm0, %v45_v42  ;;  %v519_v47 = vmax.f32 %v233_v44, %v388_v45  ;;  %3559 = vmatmul.msk.f32.gmra.mxu3 %vm74_vm0, %v45_v42 }
  0x97   :  { %v1012_v48 = vmax.f32 %v967_v46, 0.0  ;;  %3418 = vmatmul.msk.f32.gmra.mxu0 %vm74_vm0, %v45_v42  ;;  %3465 = vmatmul.msk.f32.gmra.mxu1 %vm74_vm0, %v45_v42 }
  0x98   :  { %v588_v49 = vpop.f32.mrf.mxu2  ;;  %v788_v50 = vpop.f32.mrf.mxu3  ;;  %v1102_v51 = vld [vmem:[#allocation2] sm:$0xff] }
  0x99   :  { %1058 = vst.msk [vmem:[#allocation2 + $0x8] sm:$0xff] %vm1056_vm1, %v1012_v48  ;;  %v719_v52 = vmax.f32 %v519_v47, %v588_v49  ;;  %v51_v49 = vld [vmem:[%s6351_s0 + $0xc0] sm:$0xff] }
  0x9a   :  { %1103 = vst.msk [vmem:[#allocation3] sm:$0xff] %vm1056_vm1, %v1102_v51 }
  0x9b   :  { %v919_v54 = vmax.f32 %v719_v52, %v788_v50 }
  0x9c   :  { %v236_v55 = vpop.f32.mrf.mxu0  ;;  %v391_v56 = vpop.f32.mrf.mxu1 }
  0x9d   :  { %v968_v57 = vadd.f32 %v4016_v31, %v919_v54  ;;  %3513 = vmatmul.msk.f32.gmra.mxu2 %vm74_vm0, %v46_v53  ;;  %v520_v58 = vmax.f32 %v236_v55, %v391_v56  ;;  %3560 = vmatmul.msk.f32.gmra.mxu3 %vm74_vm0, %v46_v53 }
  0x9f   :  { %v1013_v59 = vmax.f32 %v968_v57, 0.0  ;;  %3419 = vmatmul.msk.f32.gmra.mxu0 %vm74_vm0, %v46_v53  ;;  %3466 = vmatmul.msk.f32.gmra.mxu1 %vm74_vm0, %v46_v53 }
  0xa0   :  { %v591_v60 = vpop.f32.mrf.mxu2  ;;  %v1167_v61 = vld [vmem:[#allocation2 + $0x1] sm:$0xff]  ;;  %v791_v62 = vpop.f32.mrf.mxu3 }
  0xa1   :  { %1059 = vst.msk [vmem:[#allocation2 + $0x10] sm:$0xff] %vm1056_vm1, %v1013_v59  ;;  %v720_v63 = vmax.f32 %v520_v58, %v591_v60  ;;  %1169 = vrot.lane.b32.xlu2 %v1167_v61, %s3826_s11  ;;  %v52_v61 = vld [vmem:[%s6351_s0 + $0xc8] sm:$0xff] }
  0xa3   :  { %v920_v1 = vmax.f32 %v720_v63, %v791_v62 }
  0xa4   :  { %v239_v2 = vpop.f32.mrf.mxu0  ;;  %v394_v3 = vpop.f32.mrf.mxu1 }
  0xa5   :  { %v969_v4 = vadd.f32 %v4016_v31, %v920_v1  ;;  %3514 = vmatmul.msk.f32.gmra.mxu2 %vm74_vm0, %v47_v0  ;;  %v521_v5 = vmax.f32 %v239_v2, %v394_v3  ;;  %3561 = vmatmul.msk.f32.gmra.mxu3 %vm74_vm0, %v47_v0 }
  0xa7   :  { %v1014_v6 = vmax.f32 %v969_v4, 0.0  ;;  %3420 = vmatmul.msk.f32.gmra.mxu0 %vm74_vm0, %v47_v0  ;;  %3467 = vmatmul.msk.f32.gmra.mxu1 %vm74_vm0, %v47_v0 }
  0xa8   :  { %v594_v7 = vpop.f32.mrf.mxu2  ;;  %v1489_v8 = vld [vmem:[#allocation2 + $0xa] sm:$0xff]  ;;  %v794_v9 = vpop.f32.mrf.mxu3 }
  0xa9   :  { %v1104_v10 = vld [vmem:[#allocation2 + $0x9] sm:$0xff]  ;;  %1060 = vst.msk [vmem:[#allocation2 + $0x18] sm:$0xff] %vm1056_vm1, %v1014_v6  ;;  %v721_v11 = vmax.f32 %v521_v5, %v594_v7  ;;  %1491 = vrot.lane.b32.xlu0 %v1489_v8, %s3826_s11  ;;  %1176 = vrot.lane.b32.xlu2 %v1489_v8, %s3826_s11 }
  0xaa   :  { %1105 = vst.msk [vmem:[#allocation3 + $0x20] sm:$0xff] %vm1056_vm1, %v1104_v10 }
  0xab   :  { %v921_v13 = vmax.f32 %v721_v11, %v794_v9  ;;  %1426 = vst.msk [vmem:[#allocation3 + $0x10] sm:$0xff] %vm1056_vm1, %v1104_v10  ;;  %v53_v9 = vld [vmem:[%s6351_s0 + $0xd0] sm:$0xff] }
  0xac   :  { %v242_v14 = vpop.f32.mrf.mxu0  ;;  %v397_v15 = vpop.f32.mrf.mxu1 }
  0xad   :  { %v970_v16 = vadd.f32 %v4016_v31, %v921_v13  ;;  %3515 = vmatmul.msk.f32.gmra.mxu2 %vm74_vm0, %v48_v12  ;;  %v522_v17 = vmax.f32 %v242_v14, %v397_v15  ;;  %3562 = vmatmul.msk.f32.gmra.mxu3 %vm74_vm0, %v48_v12 }
  0xaf   :  { %v1015_v18 = vmax.f32 %v970_v16, 0.0  ;;  %3421 = vmatmul.msk.f32.gmra.mxu0 %vm74_vm0, %v48_v12  ;;  %3468 = vmatmul.msk.f32.gmra.mxu1 %vm74_vm0, %v48_v12 }
  0xb0   :  { %v597_v19 = vpop.f32.mrf.mxu2  ;;  %v1495_v20 = vld [vmem:[#allocation2 + $0x13] sm:$0xff]  ;;  %v797_v21 = vpop.f32.mrf.mxu3 }
  0xb1   :  { %v1106_v22 = vld [vmem:[#allocation2 + $0x12] sm:$0xff]  ;;  %1061 = vst.msk [vmem:[#allocation2 + $0x20] sm:$0xff] %vm1056_vm1, %v1015_v18  ;;  %v722_v23 = vmax.f32 %v522_v17, %v597_v19  ;;  %1497 = vrot.lane.b32.xlu1 %v1495_v20, %s3826_s11  ;;  %1182 = vrot.lane.b32.xlu2 %v1495_v20, %s3826_s11 }
  0xb2   :  { %1107 = vst.msk [vmem:[#allocation3 + $0x40] sm:$0xff] %vm1056_vm1, %v1106_v22 }
  0xb3   :  { %v922_v25 = vmax.f32 %v722_v23, %v797_v21  ;;  %1428 = vst.msk [vmem:[#allocation3 + $0x30] sm:$0xff] %vm1056_vm1, %v1106_v22  ;;  %v1824_v21 = vld [vmem:[%s6354_s3 + $0x178] sm:$0xff] }
  0xb4   :  { %v245_v26 = vpop.f32.mrf.mxu0  ;;  %v400_v27 = vpop.f32.mrf.mxu1  ;;  %v54_v22 = vld [vmem:[%s6351_s0 + $0xd8] sm:$0xff]  ;;  %1923 = vmatpush.msrb.mxu2 %v1824_v21 }
  0xb5   :  { %v971_v28 = vadd.f32 %v4016_v31, %v922_v25  ;;  %3516 = vmatmul.msk.f32.gmra.mxu2 %vm74_vm0, %v49_v24  ;;  %v523_v29 = vmax.f32 %v245_v26, %v400_v27  ;;  %3563 = vmatmul.msk.f32.gmra.mxu3 %vm74_vm0, %v49_v24 }
  0xb7   :  { %v1016_v30 = vmax.f32 %v971_v28, 0.0  ;;  %3422 = vmatmul.msk.f32.gmra.mxu0 %vm74_vm0, %v49_v24  ;;  %3469 = vmatmul.msk.f32.gmra.mxu1 %vm74_vm0, %v49_v24 }
  0xb8   :  { %v600_v32 = vpop.f32.mrf.mxu2  ;;  %v1501_v33 = vld [vmem:[#allocation2 + $0x1c] sm:$0xff]  ;;  %v800_v34 = vpop.f32.mrf.mxu3 }
  0xb9   :  { %v1108_v35 = vld [vmem:[#allocation2 + $0x1b] sm:$0xff]  ;;  %1062 = vst.msk [vmem:[#allocation2 + $0x28] sm:$0xff] %vm1056_vm1, %v1016_v30  ;;  %v723_v36 = vmax.f32 %v523_v29, %v600_v32  ;;  %1503 = vrot.lane.b32.xlu1 %v1501_v33, %s3826_s11  ;;  %1188 = vrot.lane.b32.xlu2 %v1501_v33, %s3826_s11 }
  0xba   :  { %1109 = vst.msk [vmem:[#allocation3 + $0x60] sm:$0xff] %vm1056_vm1, %v1108_v35 }
  0xbb   :  { %v923_v38 = vmax.f32 %v723_v36, %v800_v34  ;;  %1430 = vst.msk [vmem:[#allocation3 + $0x50] sm:$0xff] %vm1056_vm1, %v1108_v35  ;;  %v1840_v34 = vld [vmem:[%s6354_s3 + $0x1f8] sm:$0xff] }
  0xbc   :  { %v248_v39 = vpop.f32.mrf.mxu0  ;;  %v403_v40 = vpop.f32.mrf.mxu1  ;;  %v1792_v35 = vld [vmem:[%s6354_s3 + $0x78] sm:$0xff]  ;;  %1964 = vmatpush.msrb.mxu3 %v1840_v34 }
  0xbd   :  { %v972_v41 = vadd.f32 %v4016_v31, %v923_v38  ;;  %3517 = vmatmul.msk.f32.gmra.mxu2 %vm74_vm0, %v50_v37  ;;  %v524_v42 = vmax.f32 %v248_v39, %v403_v40  ;;  %3564 = vmatmul.msk.f32.gmra.mxu3 %vm74_vm0, %v50_v37  ;;  %v1808_v36 = vld [vmem:[%s6354_s3 + $0xf8] sm:$0xff] }
  0xbe   :  { %1841 = vmatpush.msrb.mxu0 %v1792_v35  ;;  %1882 = vmatpush.msrb.mxu1 %v1808_v36 }
  0xbf   :  { %v1017_v43 = vmax.f32 %v972_v41, 0.0  ;;  %3423 = vmatmul.msk.f32.gmra.mxu0 %vm74_vm0, %v50_v37  ;;  %3470 = vmatmul.msk.f32.gmra.mxu1 %vm74_vm0, %v50_v37  ;;  %v55_v37 = vld [vmem:[%s6351_s0 + $0xe0] sm:$0xff] }
  0xc0   :  { %v603_v44 = vpop.f32.mrf.mxu2  ;;  %v1507_v45 = vld [vmem:[#allocation2 + $0x25] sm:$0xff]  ;;  %v803_v46 = vpop.f32.mrf.mxu3 }
  0xc1   :  { %v1431_v47 = vld [vmem:[#allocation2 + $0x24] sm:$0xff]  ;;  %1063 = vst.msk [vmem:[#allocation2 + $0x30] sm:$0xff] %vm1056_vm1, %v1017_v43  ;;  %v724_v48 = vmax.f32 %v524_v42, %v603_v44  ;;  %1509 = vrot.lane.b32.xlu1 %v1507_v45, %s3826_s11 }
  0xc2   :  { %1432 = vst.msk [vmem:[#allocation3 + $0x70] sm:$0xff] %vm1056_vm1, %v1431_v47 }
  0xc3   :  { %v924_v50 = vmax.f32 %v724_v48, %v803_v46  ;;  %v56_v48 = vld [vmem:[%s6351_s0 + $0xe8] sm:$0xff] }
  0xc4   :  { %v251_v51 = vpop.f32.mrf.mxu0  ;;  %v406_v52 = vpop.f32.mrf.mxu1 }
  0xc5   :  { %v973_v53 = vadd.f32 %v4016_v31, %v924_v50  ;;  %3518 = vmatmul.msk.f32.gmra.mxu2 %vm74_vm0, %v51_v49  ;;  %v525_v54 = vmax.f32 %v251_v51, %v406_v52  ;;  %3565 = vmatmul.msk.f32.gmra.mxu3 %vm74_vm0, %v51_v49 }
  0xc7   :  { %v1018_v55 = vmax.f32 %v973_v53, 0.0  ;;  %3424 = vmatmul.msk.f32.gmra.mxu0 %vm74_vm0, %v51_v49  ;;  %3471 = vmatmul.msk.f32.gmra.mxu1 %vm74_vm0, %v51_v49 }
  0xc8   :  { %v606_v56 = vpop.f32.mrf.mxu2  ;;  %v1192_v57 = vld [vmem:[#allocation2 + $0x2e] sm:$0xff]  ;;  %v806_v58 = vpop.f32.mrf.mxu3 }
  0xc9   :  { %v1110_v59 = vld [vmem:[#allocation2 + $0x2d] sm:$0xff]  ;;  %1064 = vst.msk [vmem:[#allocation2 + $0x38] sm:$0xff] %vm1056_vm1, %v1018_v55  ;;  %v725_v60 = vmax.f32 %v525_v54, %v606_v56  ;;  %1194 = vrot.lane.b32.xlu2 %v1192_v57, %s3826_s11 }
  0xca   :  { %1111 = vst.msk [vmem:[#allocation3 + $0x80] sm:$0xff] %vm1056_vm1, %v1110_v59 }
  0xcb   :  { %v925_v62 = vmax.f32 %v725_v60, %v806_v58  ;;  %v1823_v60 = vld [vmem:[%s6354_s3 + $0x170] sm:$0xff] }
  0xcc   :  { %v254_v63 = vpop.f32.mrf.mxu0  ;;  %v409_v0 = vpop.f32.mrf.mxu1  ;;  %1924 = vmatpush.msrb.mxu2 %v1823_v60 }
  0xcd   :  { %v974_v1 = vadd.f32 %v4016_v31, %v925_v62  ;;  %3519 = vmatmul.msk.f32.gmra.mxu2 %vm74_vm0, %v52_v61  ;;  %v526_v2 = vmax.f32 %v254_v63, %v409_v0  ;;  %3566 = vmatmul.msk.f32.gmra.mxu3 %vm74_vm0, %v52_v61 }
  0xcf   :  { %v1019_v3 = vmax.f32 %v974_v1, 0.0  ;;  %3425 = vmatmul.msk.f32.gmra.mxu0 %vm74_vm0, %v52_v61  ;;  %3472 = vmatmul.msk.f32.gmra.mxu1 %vm74_vm0, %v52_v61  ;;  %v57_v61 = vld [vmem:[%s6351_s0 + $0xf0] sm:$0xff] }
  0xd0   :  { %v609_v4 = vpop.f32.mrf.mxu2  ;;  %v1513_v5 = vld [vmem:[#allocation2 + $0x37] sm:$0xff]  ;;  %v809_v6 = vpop.f32.mrf.mxu3 }
  0xd1   :  { %v1112_v7 = vld [vmem:[#allocation2 + $0x36] sm:$0xff]  ;;  %1065 = vst.msk [vmem:[#allocation2 + $0x40] sm:$0xff] %vm1056_vm1, %v1019_v3  ;;  %v726_v8 = vmax.f32 %v526_v2, %v609_v4  ;;  %1515 = vrot.lane.b32.xlu1 %v1513_v5, %s3826_s11  ;;  %1200 = vrot.lane.b32.xlu2 %v1513_v5, %s3826_s11 }
  0xd2   :  { %1113 = vst.msk [vmem:[#allocation3 + $0xa0] sm:$0xff] %vm1056_vm1, %v1112_v7 }
  0xd3   :  { %v926_v10 = vmax.f32 %v726_v8, %v809_v6  ;;  %1434 = vst.msk [vmem:[#allocation3 + $0x90] sm:$0xff] %vm1056_vm1, %v1112_v7 }
  0xd4   :  { %v257_v11 = vpop.f32.mrf.mxu0  ;;  %v412_v12 = vpop.f32.mrf.mxu1 }
  0xd5   :  { %v975_v13 = vadd.f32 %v4016_v31, %v926_v10  ;;  %3520 = vmatmul.msk.f32.gmra.mxu2 %vm74_vm0, %v53_v9  ;;  %v527_v14 = vmax.f32 %v257_v11, %v412_v12  ;;  %3567 = vmatmul.msk.f32.gmra.mxu3 %vm74_vm0, %v53_v9  ;;  %v1791_v10 = vld [vmem:[%s6354_s3 + $0x70] sm:$0xff]  ;;  %v58_v11 = vld [vmem:[%s6351_s0 + $0xf8] sm:$0xff] }
  0xd6   :  { %1842 = vmatpush.msrb.mxu0 %v1791_v10  ;;  %v1807_v12 = vld [vmem:[%s6354_s3 + $0xf0] sm:$0xff] }
  0xd7   :  { %v1020_v15 = vmax.f32 %v975_v13, 0.0  ;;  %3426 = vmatmul.msk.f32.gmra.mxu0 %vm74_vm0, %v53_v9  ;;  %3473 = vmatmul.msk.f32.gmra.mxu1 %vm74_vm0, %v53_v9  ;;  %v1839_v9 = vld [vmem:[%s6354_s3 + $0x1f0] sm:$0xff] }
  0xd8   :  { %v612_v16 = vpop.f32.mrf.mxu2  ;;  %v1519_v17 = vld [vmem:[#allocation2 + $0x40] sm:$0xff]  ;;  %v812_v18 = vpop.f32.mrf.mxu3  ;;  %1965 = vmatpush.msrb.mxu3 %v1839_v9  ;;  %1883 = vmatpush.msrb.mxu1 %v1807_v12 }
  0xd9   :  { %v1435_v19 = vld [vmem:[#allocation2 + $0x3f] sm:$0xff]  ;;  %1066 = vst.msk [vmem:[#allocation2 + $0x48] sm:$0xff] %vm1056_vm1, %v1020_v15  ;;  %v727_v20 = vmax.f32 %v527_v14, %v612_v16  ;;  %1521 = vrot.lane.b32.xlu1 %v1519_v17, %s3826_s11  ;;  %1206 = vrot.lane.b32.xlu2 %v1519_v17, %s3826_s11 }
  0xda   :  { %1436 = vst.msk [vmem:[#allocation3 + $0xb0] sm:$0xff] %vm1056_vm1, %v1435_v19 }
  0xdb   :  { %v927_v23 = vmax.f32 %v727_v20, %v812_v18  ;;  %1115 = vst.msk [vmem:[#allocation3 + $0xc0] sm:$0xff] %vm1056_vm1, %v1435_v19 }
  0xdc   :  { %v260_v24 = vpop.f32.mrf.mxu0  ;;  %v415_v25 = vpop.f32.mrf.mxu1 }
  0xdd   :  { %v976_v26 = vadd.f32 %v4016_v31, %v927_v23  ;;  %3521 = vmatmul.msk.f32.gmra.mxu2 %vm74_vm0, %v54_v22  ;;  %v528_v27 = vmax.f32 %v260_v24, %v415_v25  ;;  %3568 = vmatmul.msk.f32.gmra.mxu3 %vm74_vm0, %v54_v22  ;;  %v59_v24 = vld [vmem:[%s6351_s0 + $0x100] sm:$0xff] }
  0xdf   :  { %v1021_v28 = vmax.f32 %v976_v26, 0.0  ;;  %3427 = vmatmul.msk.f32.gmra.mxu0 %vm74_vm0, %v54_v22  ;;  %3474 = vmatmul.msk.f32.gmra.mxu1 %vm74_vm0, %v54_v22 }
  0xe0   :  { %v615_v29 = vpop.f32.mrf.mxu2  ;;  %v815_v30 = vpop.f32.mrf.mxu3  ;;  %v1437_v32 = vld [vmem:[#allocation2 + $0x48] sm:$0xff] }
  0xe1   :  { %1067 = vst.msk [vmem:[#allocation2 + $0x50] sm:$0xff] %vm1056_vm1, %v1021_v28  ;;  %v728_v33 = vmax.f32 %v528_v27, %v615_v29 }
  0xe2   :  { %1438 = vst.msk [vmem:[#allocation3 + $0xd0] sm:$0xff] %vm1056_vm1, %v1437_v32 }
  0xe3   :  { %v928_v38 = vmax.f32 %v728_v33, %v815_v30  ;;  %1117 = vst.msk [vmem:[#allocation3 + $0xe0] sm:$0xff] %vm1056_vm1, %v1437_v32 }
  0xe4   :  { %v263_v39 = vpop.f32.mrf.mxu0  ;;  %v418_v40 = vpop.f32.mrf.mxu1 }
  0xe5   :  { %v977_v41 = vadd.f32 %v4016_v31, %v928_v38  ;;  %3522 = vmatmul.msk.f32.gmra.mxu2 %vm74_vm0, %v55_v37  ;;  %v529_v42 = vmax.f32 %v263_v39, %v418_v40  ;;  %3569 = vmatmul.msk.f32.gmra.mxu3 %vm74_vm0, %v55_v37  ;;  %v1822_v38 = vld [vmem:[%s6354_s3 + $0x168] sm:$0xff] }
  0xe6   :  { %v1838_v39 = vld [vmem:[%s6354_s3 + $0x1e8] sm:$0xff]  ;;  %1925 = vmatpush.msrb.mxu2 %v1822_v38 }
  0xe7   :  { %v1022_v43 = vmax.f32 %v977_v41, 0.0  ;;  %3428 = vmatmul.msk.f32.gmra.mxu0 %vm74_vm0, %v55_v37  ;;  %3475 = vmatmul.msk.f32.gmra.mxu1 %vm74_vm0, %v55_v37  ;;  %v60_v40 = vld [vmem:[%s6351_s0 + $0x108] sm:$0xff] }
  0xe8   :  { %v618_v44 = vpop.f32.mrf.mxu2  ;;  %v1525_v45 = vld [vmem:[#allocation2 + $0x49] sm:$0xff]  ;;  %v818_v46 = vpop.f32.mrf.mxu3  ;;  %1966 = vmatpush.msrb.mxu3 %v1838_v39 }
  0xe9   :  { %1068 = vst.msk [vmem:[#allocation2 + $0x58] sm:$0xff] %vm1056_vm1, %v1022_v43  ;;  %v729_v47 = vmax.f32 %v529_v42, %v618_v44  ;;  %1527 = vrot.lane.b32.xlu1 %v1525_v45, %s3826_s11  ;;  %1212 = vrot.lane.b32.xlu2 %v1525_v45, %s3826_s11 }
  0xeb   :  { %v929_v49 = vmax.f32 %v729_v47, %v818_v46 }
  0xec   :  { %v266_v50 = vpop.f32.mrf.mxu0  ;;  %v421_v51 = vpop.f32.mrf.mxu1 }
  0xed   :  { %v978_v52 = vadd.f32 %v4016_v31, %v929_v49  ;;  %3523 = vmatmul.msk.f32.gmra.mxu2 %vm74_vm0, %v56_v48  ;;  %v530_v53 = vmax.f32 %v266_v50, %v421_v51  ;;  %3570 = vmatmul.msk.f32.gmra.mxu3 %vm74_vm0, %v56_v48  ;;  %v1790_v51 = vld [vmem:[%s6354_s3 + $0x68] sm:$0xff] }
  0xee   :  { %1843 = vmatpush.msrb.mxu0 %v1790_v51 }
  0xef   :  { %v1023_v54 = vmax.f32 %v978_v52, 0.0  ;;  %3429 = vmatmul.msk.f32.gmra.mxu0 %vm74_vm0, %v56_v48  ;;  %3476 = vmatmul.msk.f32.gmra.mxu1 %vm74_vm0, %v56_v48  ;;  %v1806_v52 = vld [vmem:[%s6354_s3 + $0xe8] sm:$0xff] }
  0xf0   :  { %v621_v55 = vpop.f32.mrf.mxu2  ;;  %v1531_v56 = vld [vmem:[#allocation2 + $0x52] sm:$0xff]  ;;  %v821_v57 = vpop.f32.mrf.mxu3  ;;  %1884 = vmatpush.msrb.mxu1 %v1806_v52 }
  0xf1   :  { %v1439_v58 = vld [vmem:[#allocation2 + $0x51] sm:$0xff]  ;;  %1069 = vst.msk [vmem:[#allocation2 + $0x60] sm:$0xff] %vm1056_vm1, %v1023_v54  ;;  %v730_v59 = vmax.f32 %v530_v53, %v621_v55  ;;  %1533 = vrot.lane.b32.xlu1 %v1531_v56, %s3826_s11  ;;  %v61_v53 = vld [vmem:[%s6351_s0 + $0x110] sm:$0xff] }
  0xf2   :  { %1440 = vst.msk [vmem:[#allocation3 + $0xf0] sm:$0xff] %vm1056_vm1, %v1439_v58 }
  0xf3   :  { %v930_v62 = vmax.f32 %v730_v59, %v821_v57 }
  0xf4   :  { %v269_v63 = vpop.f32.mrf.mxu0  ;;  %v424_v0 = vpop.f32.mrf.mxu1 }
  0xf5   :  { %v979_v1 = vadd.f32 %v4016_v31, %v930_v62  ;;  %3524 = vmatmul.msk.f32.gmra.mxu2 %vm74_vm0, %v57_v61  ;;  %v531_v2 = vmax.f32 %v269_v63, %v424_v0  ;;  %3571 = vmatmul.msk.f32.gmra.mxu3 %vm74_vm0, %v57_v61 }
  0xf7   :  { %v1024_v3 = vmax.f32 %v979_v1, 0.0  ;;  %3430 = vmatmul.msk.f32.gmra.mxu0 %vm74_vm0, %v57_v61  ;;  %3477 = vmatmul.msk.f32.gmra.mxu1 %vm74_vm0, %v57_v61 }
  0xf8   :  { %v624_v4 = vpop.f32.mrf.mxu2  ;;  %v1216_v5 = vld [vmem:[#allocation2 + $0x5b] sm:$0xff]  ;;  %v824_v7 = vpop.f32.mrf.mxu3 }
  0xf9   :  { %v1118_v6 = vld [vmem:[#allocation2 + $0x5a] sm:$0xff]  ;;  %1070 = vst.msk [vmem:[#allocation2 + $0x68] sm:$0xff] %vm1056_vm1, %v1024_v3  ;;  %v731_v8 = vmax.f32 %v531_v2, %v624_v4  ;;  %1218 = vrot.lane.b32.xlu1 %v1216_v5, %s3827_s1  ;;  %v62_v2 = vld [vmem:[%s6351_s0 + $0x118] sm:$0xff] }
  0xfa   :  { %1120 = vrot.lane.b32.xlu2 %v1118_v6, %s3828_s21 }
  0xfb   :  { %v931_v13 = vmax.f32 %v731_v8, %v824_v7  ;;  %v4222_v36 = vpop.permute.xlu2 %1169 }
  0xfc   :  { %v272_v14 = vpop.f32.mrf.mxu0  ;;  %v427_v15 = vpop.f32.mrf.mxu1 }
  0xfd   :  { %v980_v16 = vadd.f32 %v4016_v31, %v931_v13  ;;  %3525 = vmatmul.msk.f32.gmra.mxu2 %vm74_vm0, %v58_v11  ;;  %v532_v17 = vmax.f32 %v272_v14, %v427_v15  ;;  %3572 = vmatmul.msk.f32.gmra.mxu3 %vm74_vm0, %v58_v11  ;;  %v1821_v14 = vld [vmem:[%s6354_s3 + $0x160] sm:$0xff] }
  0xfe   :  { %v1837_v15 = vld [vmem:[%s6354_s3 + $0x1e0] sm:$0xff]  ;;  %1926 = vmatpush.msrb.mxu2 %v1821_v14 }
  0xff   :  { %v1025_v18 = vmax.f32 %v980_v16, 0.0  ;;  %3431 = vmatmul.msk.f32.gmra.mxu0 %vm74_vm0, %v58_v11  ;;  %3478 = vmatmul.msk.f32.gmra.mxu1 %vm74_vm0, %v58_v11  ;;  %v1789_v16 = vld [vmem:[%s6354_s3 + $0x60] sm:$0xff] }
 0x100   :  { %v627_v19 = vpop.f32.mrf.mxu2  ;;  %v1537_v20 = vld [vmem:[#allocation2 + $0x64] sm:$0xff]  ;;  %v827_v22 = vpop.f32.mrf.mxu3  ;;  %1967 = vmatpush.msrb.mxu3 %v1837_v15  ;;  %1844 = vmatpush.msrb.mxu0 %v1789_v16 }
 0x101   :  { %v1441_v21 = vld [vmem:[#allocation2 + $0x63] sm:$0xff]  ;;  %1071 = vst.msk [vmem:[#allocation2 + $0x70] sm:$0xff] %vm1056_vm1, %v1025_v18  ;;  %v732_v23 = vmax.f32 %v532_v17, %v627_v19  ;;  %1539 = vrot.lane.b32.xlu1 %v1537_v20, %s3827_s1  ;;  %v63_v17 = vld [vmem:[%s6351_s0 + $0x120] sm:$0xff] }
 0x102   :  { %1443 = vrot.lane.b32.xlu0 %v1441_v21, %s3828_s21  ;;  %1127 = vrot.lane.b32.xlu2 %v1441_v21, %s3828_s21  ;;  %v1805_v18 = vld [vmem:[%s6354_s3 + $0xe0] sm:$0xff]  ;;  %v1786_v16 = vld [vmem:[%s6354_s3 + $0x48] sm:$0xff] }
 0x103   :  { %v932_v25 = vmax.f32 %v732_v23, %v827_v22  ;;  %v4255_v54 = vpop.permute.xlu2 %1176  ;;  %1885 = vmatpush.msrb.mxu1 %v1805_v18 }
 0x104   :  { %v275_v26 = vpop.f32.mrf.mxu0  ;;  %v430_v27 = vpop.f32.mrf.mxu1 }
 0x105   :  { %v981_v28 = vadd.f32 %v4016_v31, %v932_v25  ;;  %3526 = vmatmul.msk.f32.gmra.mxu2 %vm74_vm0, %v59_v24  ;;  %v533_v29 = vmax.f32 %v275_v26, %v430_v27  ;;  %3573 = vmatmul.msk.f32.gmra.mxu3 %vm74_vm0, %v59_v24 }
 0x107   :  { %v1026_v30 = vmax.f32 %v981_v28, 0.0  ;;  %3432 = vmatmul.msk.f32.gmra.mxu0 %vm74_vm0, %v59_v24  ;;  %3479 = vmatmul.msk.f32.gmra.mxu1 %vm74_vm0, %v59_v24 }
 0x108   :  { %v630_v32 = vpop.f32.mrf.mxu2  ;;  %v1543_v33 = vld [vmem:[#allocation2 + $0x6d] sm:$0xff]  ;;  %v830_v35 = vpop.f32.mrf.mxu3 }
 0x109   :  { %v1447_v34 = vld [vmem:[#allocation2 + $0x6c] sm:$0xff]  ;;  %1072 = vst.msk [vmem:[#allocation2 + $0x78] sm:$0xff] %vm1056_vm1, %v1026_v30  ;;  %v733_v37 = vmax.f32 %v533_v29, %v630_v32  ;;  %1225 = vrot.lane.b32.xlu1 %v1537_v20, %s3827_s1  ;;  %v64_v32 = vld [vmem:[%s6351_s0 + $0x128] sm:$0xff] }
 0x10a   :  { %1449 = vrot.lane.b32.xlu0 %v1447_v34, %s3828_s21  ;;  %1545 = vrot.lane.b32.xlu2 %v1543_v33, %s3827_s1 }
 0x10b   :  { %v933_v41 = vmax.f32 %v733_v37, %v830_v35  ;;  %v4269_v6 = vpop.permute.xlu2 %1182 }
 0x10c   :  { %v278_v42 = vpop.f32.mrf.mxu0  ;;  %v433_v43 = vpop.f32.mrf.mxu1 }
 0x10d   :  { %v982_v44 = vadd.f32 %v4016_v31, %v933_v41  ;;  %3527 = vmatmul.msk.f32.gmra.mxu2 %vm74_vm0, %v60_v40  ;;  %v534_v45 = vmax.f32 %v278_v42, %v433_v43  ;;  %3574 = vmatmul.msk.f32.gmra.mxu3 %vm74_vm0, %v60_v40 }
 0x10f   :  { %v1027_v46 = vmax.f32 %v982_v44, 0.0  ;;  %3433 = vmatmul.msk.f32.gmra.mxu0 %vm74_vm0, %v60_v40  ;;  %3480 = vmatmul.msk.f32.gmra.mxu1 %vm74_vm0, %v60_v40 }
 0x110   :  { %v633_v47 = vpop.f32.mrf.mxu2  ;;  %v1453_v48 = vld [vmem:[#allocation2 + $0x75] sm:$0xff]  ;;  %v833_v49 = vpop.f32.mrf.mxu3 }
 0x111   :  { %1073 = vst.msk [vmem:[#allocation2 + $0x80] sm:$0xff] %vm1056_vm1, %v1027_v46  ;;  %v734_v50 = vmax.f32 %v534_v45, %v633_v47  ;;  %1231 = vrot.lane.b32.xlu1 %v1543_v33, %s3827_s1  ;;  %v1549_v62 = vld [vmem:[#allocation2 + $0x76] sm:$0xff]  ;;  %v65_v47 = vld [vmem:[%s6351_s0 + $0x130] sm:$0xff] }
 0x112   :  { %1455 = vrot.lane.b32.xlu0 %v1453_v48, %s3828_s21  ;;  %1133 = vrot.lane.b32.xlu2 %v1447_v34, %s3828_s21 }
 0x113   :  { %v934_v55 = vmax.f32 %v734_v50, %v833_v49  ;;  %v4297_v24 = vpop.permute.xlu2 %1188 }
 0x114   :  { %v281_v56 = vpop.f32.mrf.mxu0  ;;  %v436_v57 = vpop.f32.mrf.mxu1 }
 0x115   :  { %v983_v58 = vadd.f32 %v4016_v31, %v934_v55  ;;  %3528 = vmatmul.msk.f32.gmra.mxu2 %vm74_vm0, %v61_v53  ;;  %v535_v59 = vmax.f32 %v281_v56, %v436_v57  ;;  %3575 = vmatmul.msk.f32.gmra.mxu3 %vm74_vm0, %v61_v53 }
 0x117   :  { %v1028_v60 = vmax.f32 %v983_v58, 0.0  ;;  %3434 = vmatmul.msk.f32.gmra.mxu0 %vm74_vm0, %v61_v53  ;;  %3481 = vmatmul.msk.f32.gmra.mxu1 %vm74_vm0, %v61_v53 }
 0x118   :  { %v636_v61 = vpop.f32.mrf.mxu2  ;;  %v1459_v63 = vld [vmem:[#allocation2 + $0x7e] sm:$0xff]  ;;  %v836_v0 = vpop.f32.mrf.mxu3 }
 0x119   :  { %1074 = vst.msk [vmem:[#allocation2 + $0x88] sm:$0xff] %vm1056_vm1, %v1028_v60  ;;  %v735_v1 = vmax.f32 %v535_v59, %v636_v61  ;;  %1237 = vrot.lane.b32.xlu1 %v1549_v62, %s3827_s1  ;;  %v1555_v30 = vld [vmem:[#allocation2 + $0x7f] sm:$0xff] }
 0x11a   :  { %1461 = vrot.lane.b32.xlu0 %v1459_v63, %s3828_s21  ;;  %1551 = vrot.lane.b32.xlu2 %v1549_v62, %s3827_s1  ;;  %v1820_v62 = vld [vmem:[%s6354_s3 + $0x158] sm:$0xff] }
 0x11b   :  { %v935_v3 = vmax.f32 %v735_v1, %v836_v0  ;;  %v1836_v63 = vld [vmem:[%s6354_s3 + $0x1d8] sm:$0xff]  ;;  %1927 = vmatpush.msrb.mxu2 %v1820_v62 }
 0x11c   :  { %v284_v4 = vpop.f32.mrf.mxu0  ;;  %v439_v5 = vpop.f32.mrf.mxu1  ;;  %v66_v0 = vld [vmem:[%s6351_s0 + $0x138] sm:$0xff]  ;;  %1968 = vmatpush.msrb.mxu3 %v1836_v63  ;;  %v1835_v63 = vld [vmem:[%s6354_s3 + $0x1d0] sm:$0xff] }
 0x11d   :  { %v984_v7 = vadd.f32 %v4016_v31, %v935_v3  ;;  %3529 = vmatmul.msk.f32.gmra.mxu2 %vm74_vm0, %v62_v2  ;;  %v536_v8 = vmax.f32 %v284_v4, %v439_v5  ;;  %3576 = vmatmul.msk.f32.gmra.mxu3 %vm74_vm0, %v62_v2  ;;  %v1788_v1 = vld [vmem:[%s6354_s3 + $0x58] sm:$0xff] }
 0x11e   :  { %1845 = vmatpush.msrb.mxu0 %v1788_v1  ;;  %v1778_v1 = vld [vmem:[%s6354_s3 + $0x8] sm:$0xff]  ;;  %1969 = vmatpush.msrb.mxu3 %v1835_v63 }
 0x11f   :  { %v1029_v9 = vmax.f32 %v984_v7, 0.0  ;;  %3435 = vmatmul.msk.f32.gmra.mxu0 %vm74_vm0, %v62_v2  ;;  %3482 = vmatmul.msk.f32.gmra.mxu1 %vm74_vm0, %v62_v2  ;;  %v1804_v2 = vld [vmem:[%s6354_s3 + $0xd8] sm:$0xff] }
 0x120   :  { %v639_v10 = vpop.f32.mrf.mxu2  ;;  %v1241_v11 = vld [vmem:[#allocation2 + $0x88] sm:$0xff]  ;;  %v839_v12 = vpop.f32.mrf.mxu3  ;;  %1886 = vmatpush.msrb.mxu1 %v1804_v2 }
 0x121   :  { %1075 = vst.msk [vmem:[#allocation2 + $0x90] sm:$0xff] %vm1056_vm1, %v1029_v9  ;;  %v736_v13 = vmax.f32 %v536_v8, %v639_v10  ;;  %1243 = vrot.lane.b32.xlu1 %v1241_v11, %s3827_s1  ;;  %v1143_v46 = vld [vmem:[#allocation2 + $0x87] sm:$0xff] }
 0x122   :  { %1139 = vrot.lane.b32.xlu2 %v1453_v48, %s3828_s21  ;;  %v1787_v10 = vld [vmem:[%s6354_s3 + $0x50] sm:$0xff] }
 0x123   :  { %v936_v19 = vmax.f32 %v736_v13, %v839_v12  ;;  %v4307_v37 = vpop.permute.xlu1 %1497  ;;  %v4312_v40 = vpop.permute.xlu2 %1194  ;;  %1846 = vmatpush.msrb.mxu0 %v1787_v10  ;;  %v69_v2 = vld [vmem:[%s6351_s0 + $0x150] sm:$0xff] }
 0x124   :  { %v287_v20 = vpop.f32.mrf.mxu0  ;;  %v442_v21 = vpop.f32.mrf.mxu1 }
 0x125   :  { %v985_v22 = vadd.f32 %v4016_v31, %v936_v19  ;;  %3530 = vmatmul.msk.f32.gmra.mxu2 %vm74_vm0, %v63_v17  ;;  %v537_v23 = vmax.f32 %v287_v20, %v442_v21  ;;  %3577 = vmatmul.msk.f32.gmra.mxu3 %vm74_vm0, %v63_v17  ;;  %v1785_v20 = vld [vmem:[%s6354_s3 + $0x40] sm:$0xff] }
 0x126   :  { %1847 = vmatpush.msrb.mxu0 %v1786_v16  ;;  %v1813_v16 = vld [vmem:[%s6354_s3 + $0x120] sm:$0xff] }
 0x127   :  { %v1030_v25 = vmax.f32 %v985_v22, 0.0  ;;  %3436 = vmatmul.msk.f32.gmra.mxu0 %vm74_vm0, %v63_v17  ;;  %3483 = vmatmul.msk.f32.gmra.mxu1 %vm74_vm0, %v63_v17  ;;  %v67_v17 = vld [vmem:[%s6351_s0 + $0x140] sm:$0xff] }
 0x128   :  { %v642_v26 = vpop.f32.mrf.mxu2  ;;  %v1465_v27 = vld [vmem:[#allocation2 + $0x90] sm:$0xff]  ;;  %v842_v28 = vpop.f32.mrf.mxu3  ;;  %1848 = vmatpush.msrb.mxu0 %v1785_v20 }
 0x129   :  { %1076 = vst.msk [vmem:[#allocation2 + $0x98] sm:$0xff] %vm1056_vm1, %v1030_v25  ;;  %v737_v29 = vmax.f32 %v537_v23, %v642_v26  ;;  %1467 = vrot.lane.b32.xlu0 %v1465_v27, %s3828_s21  ;;  %v1784_v26 = vld [vmem:[%s6354_s3 + $0x38] sm:$0xff] }
 0x12a   :  { %1557 = vrot.lane.b32.xlu2 %v1555_v30, %s3827_s1  ;;  %1849 = vmatpush.msrb.mxu0 %v1784_v26 }
 0x12b   :  { %v937_v33 = vmax.f32 %v737_v29, %v842_v28  ;;  %v4325_v53 = vpop.permute.xlu1 %1503  ;;  %v4333_v60 = vpop.permute.xlu2 %1200  ;;  %v1783_v28 = vld [vmem:[%s6354_s3 + $0x30] sm:$0xff] }
 0x12c   :  { %v290_v34 = vpop.f32.mrf.mxu0  ;;  %v445_v35 = vpop.f32.mrf.mxu1  ;;  %1850 = vmatpush.msrb.mxu0 %v1783_v28  ;;  %v1811_v28 = vld [vmem:[%s6354_s3 + $0x110] sm:$0xff] }
 0x12d   :  { %v986_v38 = vadd.f32 %v4016_v31, %v937_v33  ;;  %3531 = vmatmul.msk.f32.gmra.mxu2 %vm74_vm0, %v64_v32  ;;  %v538_v39 = vmax.f32 %v290_v34, %v445_v35  ;;  %3578 = vmatmul.msk.f32.gmra.mxu3 %vm74_vm0, %v64_v32  ;;  %v1782_v34 = vld [vmem:[%s6354_s3 + $0x28] sm:$0xff]  ;;  %v1819_v35 = vld [vmem:[%s6354_s3 + $0x150] sm:$0xff] }
 0x12e   :  { %1851 = vmatpush.msrb.mxu0 %v1782_v34  ;;  %1928 = vmatpush.msrb.mxu2 %v1819_v35  ;;  %v1810_v34 = vld [vmem:[%s6354_s3 + $0x108] sm:$0xff] }
 0x12f   :  { %v1031_v41 = vmax.f32 %v986_v38, 0.0  ;;  %3437 = vmatmul.msk.f32.gmra.mxu0 %vm74_vm0, %v64_v32  ;;  %3484 = vmatmul.msk.f32.gmra.mxu1 %vm74_vm0, %v64_v32  ;;  %v68_v38 = vld [vmem:[%s6351_s0 + $0x148] sm:$0xff] }
 0x130   :  { %v645_v42 = vpop.f32.mrf.mxu2  ;;  %v1247_v43 = vld [vmem:[#allocation2 + $0x91] sm:$0xff]  ;;  %v845_v44 = vpop.f32.mrf.mxu3 }
 0x131   :  { %1077 = vst.msk [vmem:[#allocation2 + $0xa0] sm:$0xff] %vm1056_vm1, %v1031_v41  ;;  %v738_v45 = vmax.f32 %v538_v39, %v645_v42  ;;  %1249 = vrot.lane.b32.xlu1 %v1247_v43, %s3827_s1  ;;  %v1781_v42 = vld [vmem:[%s6354_s3 + $0x20] sm:$0xff] }
 0x132   :  { %1145 = vrot.lane.b32.xlu2 %v1143_v46, %s3828_s21  ;;  %1852 = vmatpush.msrb.mxu0 %v1781_v42  ;;  %v4420_v46 = vld [vmem:[%s6353_s2] ss:$0 sm:$0xff] }
 0x133   :  { %v938_v48 = vmax.f32 %v738_v45, %v845_v44  ;;  %v4366_v14 = vpop.permute.xlu1 %1509  ;;  %v4378_v18 = vpop.permute.xlu2 %1206 }
 0x134   :  { %v293_v49 = vpop.f32.mrf.mxu0  ;;  %v448_v50 = vpop.f32.mrf.mxu1 }
 0x135   :  { %v987_v51 = vadd.f32 %v4016_v31, %v938_v48  ;;  %3532 = vmatmul.msk.f32.gmra.mxu2 %vm74_vm0, %v65_v47  ;;  %v539_v52 = vmax.f32 %v293_v49, %v448_v50  ;;  %3579 = vmatmul.msk.f32.gmra.mxu3 %vm74_vm0, %v65_v47  ;;  %v1780_v49 = vld [vmem:[%s6354_s3 + $0x18] sm:$0xff]  ;;  %v1817_v50 = vld [vmem:[%s6354_s3 + $0x140] sm:$0xff] }
 0x136   :  { %1853 = vmatpush.msrb.mxu0 %v1780_v49 }
 0x137   :  { %v1032_v55 = vmax.f32 %v987_v51, 0.0  ;;  %3438 = vmatmul.msk.f32.gmra.mxu0 %vm74_vm0, %v65_v47  ;;  %3485 = vmatmul.msk.f32.gmra.mxu1 %vm74_vm0, %v65_v47 }
 0x138   :  { %v648_v56 = vpop.f32.mrf.mxu2  ;;  %v4329_v57 = vld [vmem:[#allocation2 + $0x99] sm:$0xff]  ;;  %v848_v59 = vpop.f32.mrf.mxu3 }
 0x139   :  { %v4331_v58 = vld [vmem:[#allocation2 + $0x9a] sm:$0xff]  ;;  %1078 = vst.msk [vmem:[#allocation2 + $0xa8] sm:$0xff] %vm1056_vm1, %v1032_v55  ;;  %v739_v61 = vmax.f32 %v539_v52, %v648_v56  ;;  %1473 = vrot.lane.b32.xlu0 %v4329_v57, %s3828_s21  ;;  %v1779_v52 = vld [vmem:[%s6354_s3 + $0x10] sm:$0xff] }
 0x13a   :  { %1255 = vrot.lane.b32.xlu1 %v4331_v58, %s3827_s1  ;;  %1151 = vrot.lane.b32.xlu2 %v1465_v27, %s3828_s21 }
 0x13b   :  { %v939_v3 = vmax.f32 %v739_v61, %v848_v59  ;;  %1854 = vmatpush.msrb.mxu0 %v1779_v52  ;;  %v1816_v59 = vld [vmem:[%s6354_s3 + $0x138] sm:$0xff] }
 0x13c   :  { %v296_v4 = vpop.f32.mrf.mxu0  ;;  %v451_v5 = vpop.f32.mrf.mxu1 }
 0x13d   :  { %v988_v7 = vadd.f32 %v4016_v31, %v939_v3  ;;  %3533 = vmatmul.msk.f32.gmra.mxu2 %vm74_vm0, %v66_v0  ;;  %v540_v8 = vmax.f32 %v296_v4, %v451_v5  ;;  %3580 = vmatmul.msk.f32.gmra.mxu3 %vm74_vm0, %v66_v0 }
 0x13e   :  { %1855 = vmatpush.msrb.mxu0 %v1778_v1  ;;  %v1834_v1 = vld [vmem:[%s6354_s3 + $0x1c8] sm:$0xff] }
 0x13f   :  { %v1033_v9 = vmax.f32 %v988_v7, 0.0  ;;  %3439 = vmatmul.msk.f32.gmra.mxu0 %vm74_vm0, %v66_v0  ;;  %3486 = vmatmul.msk.f32.gmra.mxu1 %vm74_vm0, %v66_v0  ;;  %v1803_v0 = vld [vmem:[%s6354_s3 + $0xd0] sm:$0xff] }
 0x140   :  { %v651_v11 = vpop.f32.mrf.mxu2  ;;  %v4364_v12 = vld [vmem:[#allocation2 + $0xa2] sm:$0xff]  ;;  %v851_v13 = vpop.f32.mrf.mxu3  ;;  %1887 = vmatpush.msrb.mxu1 %v1803_v0  ;;  %1970 = vmatpush.msrb.mxu3 %v1834_v1 }
 0x141   :  { %1079 = vst.msk [vmem:[#allocation2 + $0xb0] sm:$0xff] %vm1056_vm1, %v1033_v9  ;;  %v740_v15 = vmax.f32 %v540_v8, %v651_v11  ;;  %1479 = vrot.lane.b32.xlu0 %v4364_v12, %s3828_s21  ;;  %v1815_v7 = vld [vmem:[%s6354_s3 + $0x130] sm:$0xff] }
 0x142   :  { %1563 = vrot.lane.b32.xlu2 %v1247_v43, %s3827_s1  ;;  %v1818_v43 = vld [vmem:[%s6354_s3 + $0x148] sm:$0xff] }
 0x143   :  { %v940_v19 = vmax.f32 %v740_v15, %v851_v13  ;;  %v4395_v32 = vpop.permute.xlu1 %1515  ;;  %v4409_v39 = vpop.permute.xlu2 %1212  ;;  %1929 = vmatpush.msrb.mxu2 %v1818_v43  ;;  %v1814_v13 = vld [vmem:[%s6354_s3 + $0x128] sm:$0xff] }
 0x144   :  { %v299_v21 = vpop.f32.mrf.mxu0  ;;  %v454_v22 = vpop.f32.mrf.mxu1 }
 0x145   :  { %v989_v23 = vadd.f32 %v4016_v31, %v940_v19  ;;  %3534 = vmatmul.msk.f32.gmra.mxu2 %vm74_vm0, %v67_v17  ;;  %v541_v25 = vmax.f32 %v299_v21, %v454_v22  ;;  %3581 = vmatmul.msk.f32.gmra.mxu3 %vm74_vm0, %v67_v17  ;;  %v1573_v22 = vld [vmem:[#allocation2 + $0xa3] sm:$0xff] }
 0x146   :  { %1930 = vmatpush.msrb.mxu2 %v1817_v50 }
 0x147   :  { %v1034_v27 = vmax.f32 %v989_v23, 0.0  ;;  %3440 = vmatmul.msk.f32.gmra.mxu0 %vm74_vm0, %v67_v17  ;;  %3487 = vmatmul.msk.f32.gmra.mxu1 %vm74_vm0, %v67_v17  ;;  %v1812_v23 = vld [vmem:[%s6354_s3 + $0x118] sm:$0xff] }
 0x148   :  { %v654_v31 = vpop.f32.mrf.mxu2  ;;  %v1483_v29 = vld [vmem:[#allocation2 + $0xab] sm:$0xff]  ;;  %v854_v30 = vpop.f32.mrf.mxu3  ;;  %1931 = vmatpush.msrb.mxu2 %v1816_v59 }
 0x149   :  { %1080 = vst.msk [vmem:[#allocation2 + $0xb8] sm:$0xff] %vm1056_vm1, %v1034_v27  ;;  %v741_v33 = vmax.f32 %v541_v25, %v654_v31  ;;  %1485 = vrot.lane.b32.xlu0 %v1483_v29, %s3828_s21  ;;  %v70_v25 = vld [vmem:[%s6351_s0 + $0x158] sm:$0xff] }
 0x14a   :  { %1569 = vrot.lane.b32.xlu2 %v4331_v58, %s3827_s1  ;;  %1932 = vmatpush.msrb.mxu2 %v1815_v7  ;;  %v1579_v0 = vld [vmem:[#allocation2 + $0xac] sm:$0xff] }
 0x14b   :  { %v941_v41 = vmax.f32 %v741_v33, %v854_v30  ;;  %v4456_v3 = vpop.permute.xlu1 %1521 }
 0x14c   :  { %v302_v44 = vpop.f32.mrf.mxu0  ;;  %v457_v45 = vpop.f32.mrf.mxu1  ;;  %1933 = vmatpush.msrb.mxu2 %v1814_v13 }
 0x14d   :  { %v990_v47 = vadd.f32 %v4420_v46, %v941_v41  ;;  %3535 = vmatmul.msk.f32.gmra.mxu2 %vm74_vm0, %v68_v38  ;;  %v542_v48 = vmax.f32 %v302_v44, %v457_v45  ;;  %3582 = vmatmul.msk.f32.gmra.mxu3 %vm74_vm0, %v68_v38 }
 0x14e   :  { %1934 = vmatpush.msrb.mxu2 %v1813_v16 }
 0x14f   :  { %v1035_v51 = vmax.f32 %v990_v47, 0.0  ;;  %3441 = vmatmul.msk.f32.gmra.mxu0 %vm74_vm0, %v68_v38  ;;  %3488 = vmatmul.msk.f32.gmra.mxu1 %vm74_vm0, %v68_v38  ;;  %v71_v47 = vld [vmem:[%s6351_s0 + $0x160] sm:$0xff] }
 0x150   :  { %v657_v55 = vpop.f32.mrf.mxu2  ;;  %v1329_v56 = vld [vmem:[#allocation2 + $0xb5] sm:$0xff]  ;;  %v857_v58 = vpop.f32.mrf.mxu3  ;;  %1935 = vmatpush.msrb.mxu2 %v1812_v23 }
 0x151   :  { %v1265_v61 = vld [vmem:[#allocation2 + $0xb4] sm:$0xff]  ;;  %1081 = vst.msk [vmem:[#allocation2 + $0xc0] sm:$0xff] %vm1056_vm1, %v1035_v51  ;;  %v742_v62 = vmax.f32 %v542_v48, %v657_v55  ;;  %1331 = vrot.lane.b32.xlu0 %v1329_v56, %s3826_s11 }
 0x152   :  { %1157 = vrot.lane.b32.xlu2 %v4329_v57, %s3828_s21  ;;  %1266 = vst.msk [vmem:[#allocation3 + $0x8] sm:$0xff] %vm1056_vm1, %v1265_v61  ;;  %v1777_v57 = vld [vmem:[%s6354_s3] sm:$0xff]  ;;  %1936 = vmatpush.msrb.mxu2 %v1811_v28 }
 0x153   :  { %v942_v4 = vmax.f32 %v742_v62, %v857_v58  ;;  %1856 = vmatpush.msrb.mxu0 %v1777_v57 }
 0x154   :  { %v1121_v5 = vpop.permute.xlu2 %1120  ;;  %v305_v8 = vpop.f32.mrf.mxu0  ;;  %1937 = vmatpush.msrb.mxu2 %v1810_v34 }
 0x155   :  { %1124 = vst.msk [vmem:[#allocation3] sm:$0xff] %vm1123_vm2, %v1121_v5  ;;  %v460_v9 = vpop.f32.mrf.mxu1  ;;  %v991_v10 = vadd.f32 %v4420_v46, %v942_v4  ;;  %3536 = vmatmul.msk.f32.gmra.mxu2 %vm74_vm0, %v69_v2  ;;  %3583 = vmatmul.msk.f32.gmra.mxu3 %vm74_vm0, %v69_v2  ;;  %v1492_v4 = vpop.permute.xlu0 %1491 }
 0x156   :  { %v543_v11 = vmax.f32 %v305_v8, %v460_v9  ;;  %1173 = vst.msk [vmem:[#allocation3] sm:$0xff] %vm1172_vm3, %v4222_v36 }
 0x157   :  { %v1036_v15 = vmax.f32 %v991_v10, 0.0  ;;  %3442 = vmatmul.msk.f32.gmra.mxu0 %vm74_vm0, %v69_v2  ;;  %3489 = vmatmul.msk.f32.gmra.mxu1 %vm74_vm0, %v69_v2  ;;  %v1802_v2 = vld [vmem:[%s6354_s3 + $0xc8] sm:$0xff] }
 0x158   :  { %v660_v17 = vpop.f32.mrf.mxu2  ;;  %v4478_v19 = vld [vmem:[#allocation2 + $0xbe] sm:$0xff]  ;;  %v860_v20 = vpop.f32.mrf.mxu3  ;;  %1888 = vmatpush.msrb.mxu1 %v1802_v2 }
 0x159   :  { %v1585_v36 = vld [vmem:[#allocation2 + $0xbd] sm:$0xff]  ;;  %1082 = vst.msk [vmem:[#allocation2 + $0xc8] sm:$0xff] %vm1056_vm1, %v1036_v15  ;;  %v743_v21 = vmax.f32 %v543_v11, %v660_v17  ;;  %1337 = vrot.lane.b32.xlu0 %v4478_v19, %s3826_s11 }
 0x15a   :  { %1575 = vrot.lane.b32.xlu2 %v1573_v22, %s3827_s1  ;;  %1586 = vst.msk [vmem:[#allocation3 + $0x18] sm:$0xff] %vm1056_vm1, %v1585_v36 }
 0x15b   :  { %v943_v26 = vmax.f32 %v743_v21, %v860_v20  ;;  %v4491_v27 = vpop.permute.xlu1 %1527  ;;  %1268 = vst.msk [vmem:[#allocation3 + $0x28] sm:$0xff] %vm1056_vm1, %v1585_v36 }
 0x15c   :  { %v1128_v31 = vpop.permute.xlu2 %1127  ;;  %v308_v29 = vpop.f32.mrf.mxu0 }
 0x15d   :  { %v992_v30 = vadd.f32 %v4420_v46, %v943_v26  ;;  %1130 = vst.msk [vmem:[#allocation3 + $0x20] sm:$0xff] %vm1123_vm2, %v1128_v31  ;;  %3537 = vmatmul.msk.f32.gmra.mxu2 %vm74_vm0, %v70_v25  ;;  %v463_v33 = vpop.f32.mrf.mxu1  ;;  %3584 = vmatmul.msk.f32.gmra.mxu3 %vm74_vm0, %v70_v25 }
 0x15e   :  { %v544_v35 = vmax.f32 %v308_v29, %v463_v33  ;;  %1179 = vst.msk [vmem:[#allocation3 + $0x20] sm:$0xff] %vm1172_vm3, %v4255_v54  ;;  %v1809_v54 = vld [vmem:[%s6354_s3 + $0x100] sm:$0xff] }
 0x15f   :  { %v1037_v38 = vmax.f32 %v992_v30, 0.0  ;;  %3443 = vmatmul.msk.f32.gmra.mxu0 %vm74_vm0, %v70_v25  ;;  %3490 = vmatmul.msk.f32.gmra.mxu1 %vm74_vm0, %v70_v25 }
 0x160   :  { %v663_v41 = vpop.f32.mrf.mxu2  ;;  %v1655_v42 = vld [vmem:[#allocation2 + $0xc7] sm:$0xff]  ;;  %v863_v43 = vpop.f32.mrf.mxu3  ;;  %1938 = vmatpush.msrb.mxu2 %v1809_v54 }
 0x161   :  { %v1587_v44 = vld [vmem:[#allocation2 + $0xc6] sm:$0xff]  ;;  %1083 = vst.msk [vmem:[#allocation2 + $0xd0] sm:$0xff] %vm1056_vm1, %v1037_v38  ;;  %v744_v45 = vmax.f32 %v544_v35, %v663_v41  ;;  %1657 = vrot.lane.b32.xlu1 %v1655_v42, %s3826_s11  ;;  %1343 = vrot.lane.b32.xlu0 %v1655_v42, %s3826_s11  ;;  %v1833_v35 = vld [vmem:[%s6354_s3 + $0x1c0] sm:$0xff] }
 0x162   :  { %1163 = vrot.lane.b32.xlu2 %v4364_v12, %s3828_s21  ;;  %1588 = vst.msk [vmem:[#allocation3 + $0x38] sm:$0xff] %vm1056_vm1, %v1587_v44  ;;  %1971 = vmatpush.msrb.mxu3 %v1833_v35 }
 0x163   :  { %v944_v48 = vmax.f32 %v744_v45, %v863_v43  ;;  %v4520_v49 = vpop.permute.xlu1 %1533  ;;  %1270 = vst.msk [vmem:[#allocation3 + $0x48] sm:$0xff] %vm1056_vm1, %v1587_v44 }
 0x164   :  { %v4523_v50 = vpop.permute.xlu2 %1545  ;;  %v311_v51 = vpop.f32.mrf.mxu0 }
 0x165   :  { %v993_v52 = vadd.f32 %v4420_v46, %v944_v48  ;;  %3538 = vmatmul.msk.f32.gmra.mxu2 %vm74_vm0, %v71_v47  ;;  %v466_v12 = vpop.f32.mrf.mxu1  ;;  %3585 = vmatmul.msk.f32.gmra.mxu3 %vm74_vm0, %v71_v47 }
 0x166   :  { %v545_v55 = vmax.f32 %v311_v51, %v466_v12 }
 0x167   :  { %v1038_v56 = vmax.f32 %v993_v52, 0.0  ;;  %3444 = vmatmul.msk.f32.gmra.mxu0 %vm74_vm0, %v71_v47  ;;  %3491 = vmatmul.msk.f32.gmra.mxu1 %vm74_vm0, %v71_v47 }
 0x168   :  { %v666_v58 = vpop.f32.mrf.mxu2  ;;  %v1661_v59 = vld [vmem:[#allocation2 + $0xd0] sm:$0xff]  ;;  %v866_v61 = vpop.f32.mrf.mxu3 }
 0x169   :  { %v1589_v62 = vld [vmem:[#allocation2 + $0xcf] sm:$0xff]  ;;  %1084 = vst.msk [vmem:[#allocation2 + $0xd8] sm:$0xff] %vm1056_vm1, %v1038_v56  ;;  %v745_v63 = vmax.f32 %v545_v55, %v666_v58  ;;  %1663 = vrot.lane.b32.xlu1 %v1661_v59, %s3826_s11  ;;  %1349 = vrot.lane.b32.xlu0 %v1661_v59, %s3826_s11 }
 0x16a   :  { %1581 = vrot.lane.b32.xlu2 %v1579_v0, %s3827_s1  ;;  %1590 = vst.msk [vmem:[#allocation3 + $0x58] sm:$0xff] %vm1056_vm1, %v1589_v62 }
 0x16b   :  { %v945_v5 = vmax.f32 %v745_v63, %v866_v61  ;;  %v1219_v7 = vpop.permute.xlu1 %1218  ;;  %1272 = vst.msk [vmem:[#allocation3 + $0x68] sm:$0xff] %vm1056_vm1, %v1589_v62 }
 0x16c   :  { %1222 = vst.msk [vmem:[#allocation3] sm:$0xff] %vm1221_vm4, %v1219_v7  ;;  %v1134_v57 = vpop.permute.xlu2 %1133  ;;  %v314_v8 = vpop.f32.mrf.mxu0 }
 0x16d   :  { %v994_v9 = vadd.f32 %v4420_v46, %v945_v5  ;;  %1136 = vst.msk [vmem:[#allocation3 + $0x40] sm:$0xff] %vm1123_vm2, %v1134_v57  ;;  %v469_v10 = vpop.f32.mrf.mxu1 }
 0x16e   :  { %1185 = vst.msk [vmem:[#allocation3 + $0x40] sm:$0xff] %vm1172_vm3, %v4269_v6  ;;  %v546_v11 = vmax.f32 %v314_v8, %v469_v10 }
 0x16f   :  { %v1039_v13 = vmax.f32 %v994_v9, 0.0 }
 0x170   :  { %v669_v15 = vpop.f32.mrf.mxu2  ;;  %v869_v16 = vpop.f32.mrf.mxu3  ;;  %v1591_v17 = vld [vmem:[#allocation2 + $0xd8] sm:$0xff] }
 0x171   :  { %1085 = vst.msk [vmem:[#allocation2 + $0xe0] sm:$0xff] %vm1056_vm1, %v1039_v13  ;;  %v746_v20 = vmax.f32 %v546_v11, %v669_v15 }
 0x172   :  { %1651 = vrot.lane.b32.xlu2 %v4478_v19, %s3826_s11  ;;  %1592 = vst.msk [vmem:[#allocation3 + $0x78] sm:$0xff] %vm1056_vm1, %v1591_v17 }
 0x173   :  { %v946_v36 = vmax.f32 %v746_v20, %v869_v16  ;;  %v1540_v21 = vpop.permute.xlu1 %1539  ;;  %v1745_v23 = vld [vmem:[#allocation3] sm:$0xff] }
 0x174   :  { %v1444_v22 = vpop.permute.xlu0 %1443  ;;  %v1552_v6 = vpop.permute.xlu2 %1551  ;;  %1857 = vmatmul.f32.vlgmr.msrb.gmra.mxu0 %v1745_v23 }
 0x175   :  { %1446 = vst.msk [vmem:[#allocation3 + $0x10] sm:$0xff] %vm1123_vm2, %v1444_v22  ;;  %v317_v25 = vpop.f32.mrf.mxu0  ;;  %v995_v26 = vadd.f32 %v4420_v46, %v946_v36  ;;  %v472_v28 = vpop.f32.mrf.mxu1 }
 0x176   :  { %1494 = vst.msk [vmem:[#allocation3 + $0x10] sm:$0xff] %vm1172_vm3, %v1492_v4  ;;  %v547_v31 = vmax.f32 %v317_v25, %v472_v28 }
 0x177   :  { %1542 = vst.msk [vmem:[#allocation3 + $0x10] sm:$0xff] %vm1221_vm4, %v1540_v21  ;;  %v1040_v19 = vmax.f32 %v995_v26, 0.0 }
 0x178   :  { %v672_v29 = vpop.f32.mrf.mxu2  ;;  %v1667_v30 = vld [vmem:[#allocation2 + $0xd9] sm:$0xff]  ;;  %v872_v33 = vpop.f32.mrf.mxu3 }
 0x179   :  { %1086 = vst.msk [vmem:[#allocation2 + $0xe8] sm:$0xff] %vm1056_vm1, %v1040_v19  ;;  %v747_v34 = vmax.f32 %v547_v31, %v672_v29  ;;  %1669 = vrot.lane.b32.xlu1 %v1667_v30, %s3826_s11  ;;  %v1800_v19 = vld [vmem:[%s6354_s3 + $0xb8] sm:$0xff] }
 0x17b   :  { %v947_v38 = vmax.f32 %v747_v34, %v872_v33  ;;  %v1226_v41 = vpop.permute.xlu1 %1225 }
 0x17c   :  { %v1450_v42 = vpop.permute.xlu0 %1449  ;;  %1228 = vst.msk [vmem:[#allocation3 + $0x20] sm:$0xff] %vm1221_vm4, %v1226_v41  ;;  %v1140_v43 = vpop.permute.xlu2 %1139 }
 0x17d   :  { %v320_v44 = vpop.f32.mrf.mxu0  ;;  %v996_v45 = vadd.f32 %v4420_v46, %v947_v38  ;;  %1452 = vst.msk [vmem:[#allocation3 + $0x30] sm:$0xff] %vm1123_vm2, %v1450_v42  ;;  %v475_v54 = vpop.f32.mrf.mxu1 }
 0x17e   :  { %v4563_v47 = vld [vmem:[#allocation3 + $0x10] sm:$0xff]  ;;  %1500 = vst.msk [vmem:[#allocation3 + $0x30] sm:$0xff] %vm1172_vm3, %v4307_v37  ;;  %v548_v48 = vmax.f32 %v320_v44, %v475_v54 }
 0x17f   :  { %1939 = vmatmul.f32.vlgmr.msrb.gmra.mxu2 %v4563_v47  ;;  %v1041_v51 = vmax.f32 %v996_v45, 0.0  ;;  %1548 = vst.msk [vmem:[#allocation3 + $0x30] sm:$0xff] %vm1221_vm4, %v4523_v50  ;;  %v1801_v37 = vld [vmem:[%s6354_s3 + $0xc0] sm:$0xff] }
 0x180   :  { %1142 = vst.msk [vmem:[#allocation3 + $0x60] sm:$0xff] %vm1123_vm2, %v1140_v43  ;;  %v675_v52 = vpop.f32.mrf.mxu2  ;;  %v1353_v12 = vld [vmem:[#allocation2 + $0xe2] sm:$0xff]  ;;  %v875_v55 = vpop.f32.mrf.mxu3  ;;  %1889 = vmatpush.msrb.mxu1 %v1801_v37 }
 0x181   :  { %v1273_v56 = vld [vmem:[#allocation2 + $0xe1] sm:$0xff]  ;;  %1087 = vst.msk [vmem:[#allocation2 + $0xf0] sm:$0xff] %vm1056_vm1, %v1041_v51  ;;  %v748_v58 = vmax.f32 %v548_v48, %v675_v52  ;;  %1355 = vrot.lane.b32.xlu0 %v1353_v12, %s3826_s11 }
 0x182   :  { %1191 = vst.msk [vmem:[#allocation3 + $0x60] sm:$0xff] %vm1172_vm3, %v4297_v24  ;;  %1890 = vmatpush.msrb.mxu1 %v1800_v19  ;;  %v3632_v52 = vld [vmem:[%s6354_s3 + $0x370] sm:$0xff] }
 0x183   :  { %v948_v50 = vmax.f32 %v748_v58, %v875_v55  ;;  %v1232_v59 = vpop.permute.xlu1 %1231  ;;  %v1749_v62 = vld [vmem:[#allocation3 + $0x20] sm:$0xff]  ;;  %1274 = vst.msk [vmem:[#allocation3 + $0x88] sm:$0xff] %vm1056_vm1, %v1273_v56  ;;  %v3631_v58 = vld [vmem:[%s6354_s3 + $0x368] sm:$0xff] }
 0x184   :  { %v1456_v61 = vpop.permute.xlu0 %1455  ;;  %1234 = vst.msk [vmem:[#allocation3 + $0x40] sm:$0xff] %vm1221_vm4, %v1232_v59  ;;  %v1558_v63 = vpop.permute.xlu2 %1557  ;;  %1860 = vmatmul.f32.gmra.mxu0 %v1749_v62 }
 0x185   :  { %v323_v0 = vpop.f32.mrf.mxu0  ;;  %v997_v1 = vadd.f32 %v4420_v46, %v948_v50  ;;  %1458 = vst.msk [vmem:[#allocation3 + $0x50] sm:$0xff] %vm1123_vm2, %v1456_v61  ;;  %v478_v2 = vpop.f32.mrf.mxu1 }
 0x186   :  { %1506 = vst.msk [vmem:[#allocation3 + $0x50] sm:$0xff] %vm1172_vm3, %v4325_v53  ;;  %v549_v24 = vmax.f32 %v323_v0, %v478_v2  ;;  %v4584_v4 = vld [vmem:[#allocation3 + $0x30] sm:$0xff] }
 0x187   :  { %v1042_v5 = vmax.f32 %v997_v1, 0.0  ;;  %1554 = vst.msk [vmem:[#allocation3 + $0x50] sm:$0xff] %vm1221_vm4, %v1552_v6  ;;  %1942 = vmatmul.f32.gmra.mxu2 %v4584_v4  ;;  %v3630_v0 = vld [vmem:[%s6354_s3 + $0x360] sm:$0xff] }
 0x188   :  { %v678_v7 = vpop.f32.mrf.mxu2  ;;  %v1673_v57 = vld [vmem:[#allocation2 + $0xeb] sm:$0xff]  ;;  %v878_v8 = vpop.f32.mrf.mxu3 }
 0x189   :  { %v1593_v9 = vld [vmem:[#allocation2 + $0xea] sm:$0xff]  ;;  %1088 = vst.msk [vmem:[#allocation2 + $0xf8] sm:$0xff] %vm1056_vm1, %v1042_v5  ;;  %v749_v10 = vmax.f32 %v549_v24, %v678_v7  ;;  %1675 = vrot.lane.b32.xlu1 %v1673_v57, %s3826_s11  ;;  %1361 = vrot.lane.b32.xlu0 %v1673_v57, %s3826_s11 }
 0x18a   :  { %1594 = vst.msk [vmem:[#allocation3 + $0x98] sm:$0xff] %vm1056_vm1, %v1593_v9  ;;  %v3628_v57 = vld [vmem:[%s6354_s3 + $0x350] sm:$0xff] }
 0x18b   :  { %v949_v53 = vmax.f32 %v749_v10, %v878_v8  ;;  %v1238_v11 = vpop.permute.xlu1 %1237  ;;  %v1753_v15 = vld [vmem:[#allocation3 + $0x40] sm:$0xff]  ;;  %1276 = vst.msk [vmem:[#allocation3 + $0xa8] sm:$0xff] %vm1056_vm1, %v1593_v9 }
 0x18c   :  { %v1462_v13 = vpop.permute.xlu0 %1461  ;;  %1240 = vst.msk [vmem:[#allocation3 + $0x60] sm:$0xff] %vm1221_vm4, %v1238_v11  ;;  %v1146_v16 = vpop.permute.xlu2 %1145  ;;  %1863 = vmatmul.f32.gmra.mxu0 %v1753_v15  ;;  %v3627_v11 = vld [vmem:[%s6354_s3 + $0x348] sm:$0xff] }
 0x18d   :  { %v326_v17 = vpop.f32.mrf.mxu0  ;;  %v998_v20 = vadd.f32 %v4420_v46, %v949_v53  ;;  %1464 = vst.msk [vmem:[#allocation3 + $0x70] sm:$0xff] %vm1123_vm2, %v1462_v13  ;;  %v481_v36 = vpop.f32.mrf.mxu1 }
 0x18e   :  { %1512 = vst.msk [vmem:[#allocation3 + $0x70] sm:$0xff] %vm1172_vm3, %v4366_v14  ;;  %v550_v21 = vmax.f32 %v326_v17, %v481_v36  ;;  %v4598_v22 = vld [vmem:[#allocation3 + $0x50] sm:$0xff]  ;;  %v1832_v14 = vld [vmem:[%s6354_s3 + $0x1b8] sm:$0xff] }
 0x18f   :  { %v1043_v23 = vmax.f32 %v998_v20, 0.0  ;;  %1560 = vst.msk [vmem:[#allocation3 + $0x70] sm:$0xff] %vm1221_vm4, %v1558_v63  ;;  %1945 = vmatmul.f32.gmra.mxu2 %v4598_v22  ;;  %1972 = vmatpush.msrb.mxu3 %v1832_v14  ;;  %v3626_v36 = vld [vmem:[%s6354_s3 + $0x340] sm:$0xff]  ;;  %v1799_v14 = vld [vmem:[%s6354_s3 + $0xb0] sm:$0xff] }
 0x190   :  { %1148 = vst.msk [vmem:[#allocation3 + $0x80] sm:$0xff] %vm1123_vm2, %v1146_v16  ;;  %v681_v6 = vpop.f32.mrf.mxu2  ;;  %v1679_v25 = vld [vmem:[#allocation2 + $0xf4] sm:$0xff]  ;;  %v881_v26 = vpop.f32.mrf.mxu3  ;;  %1891 = vmatpush.msrb.mxu1 %v1799_v14 }
 0x191   :  { %v1595_v28 = vld [vmem:[#allocation2 + $0xf3] sm:$0xff]  ;;  %1089 = vst.msk [vmem:[#allocation2 + $0x100] sm:$0xff] %vm1056_vm1, %v1043_v23  ;;  %v750_v31 = vmax.f32 %v550_v21, %v681_v6  ;;  %1681 = vrot.lane.b32.xlu1 %v1679_v25, %s3826_s11  ;;  %1367 = vrot.lane.b32.xlu0 %v1679_v25, %s3826_s11 }
 0x192   :  { %1197 = vst.msk [vmem:[#allocation3 + $0x80] sm:$0xff] %vm1172_vm3, %v4312_v40 }
 0x193   :  { %v950_v29 = vmax.f32 %v750_v31, %v881_v26  ;;  %v1244_v30 = vpop.permute.xlu1 %1243  ;;  %v1757_v33 = vld [vmem:[#allocation3 + $0x60] sm:$0xff]  ;;  %1596 = vst.msk [vmem:[#allocation3 + $0xb8] sm:$0xff] %vm1056_vm1, %v1595_v28 }
 0x194   :  { %1246 = vst.msk [vmem:[#allocation3 + $0x80] sm:$0xff] %vm1221_vm4, %v1244_v30  ;;  %v1152_v34 = vpop.permute.xlu2 %1151  ;;  %1866 = vmatmul.f32.gmra.mxu0 %v1757_v33  ;;  %v1831_v31 = vld [vmem:[%s6354_s3 + $0x1b0] sm:$0xff] }
 0x195   :  { %v329_v40 = vpop.f32.mrf.mxu0  ;;  %v999_v35 = vadd.f32 %v4420_v46, %v950_v29  ;;  %1154 = vst.msk [vmem:[#allocation3 + $0xa0] sm:$0xff] %vm1123_vm2, %v1152_v34  ;;  %v484_v38 = vpop.f32.mrf.mxu1  ;;  %1973 = vmatpush.msrb.mxu3 %v1831_v31  ;;  %v3624_v33 = vld [vmem:[%s6354_s3 + $0x330] sm:$0xff] }
 0x196   :  { %1203 = vst.msk [vmem:[#allocation3 + $0xa0] sm:$0xff] %vm1172_vm3, %v4333_v60  ;;  %v551_v41 = vmax.f32 %v329_v40, %v484_v38  ;;  %v4620_v42 = vld [vmem:[#allocation3 + $0x70] sm:$0xff]  ;;  %v3633_v60 = vld [vmem:[%s6354_s3 + $0x378] sm:$0xff] }
 0x197   :  { %v1044_v43 = vmax.f32 %v999_v35, 0.0  ;;  %1948 = vmatmul.f32.gmra.mxu2 %v4620_v42  ;;  %1278 = vst.msk [vmem:[#allocation3 + $0xc8] sm:$0xff] %vm1056_vm1, %v1595_v28  ;;  %v3625_v28 = vld [vmem:[%s6354_s3 + $0x338] sm:$0xff] }
 0x198   :  { %v684_v44 = vpop.f32.mrf.mxu2  ;;  %v4624_v45 = vld [vmem:[#allocation2 + $0xfd] sm:$0xff]  ;;  %v884_v54 = vpop.f32.mrf.mxu3  ;;  %2152 = vmatpush.msra.mxu2 %v3633_v60 }
 0x199   :  { %v1597_v48 = vld [vmem:[#allocation2 + $0xfc] sm:$0xff]  ;;  %1090 = vst.msk [vmem:[#allocation2 + $0x108] sm:$0xff] %vm1056_vm1, %v1044_v43  ;;  %v751_v51 = vmax.f32 %v551_v41, %v684_v44  ;;  %1687 = vrot.lane.b32.xlu1 %v4624_v45, %s3826_s11 }
 0x19a   :  { %1598 = vst.msk [vmem:[#allocation3 + $0xd8] sm:$0xff] %vm1056_vm1, %v1597_v48  ;;  %2153 = vmatpush.msra.mxu2 %v3632_v52  ;;  %v3623_v41 = vld [vmem:[%s6354_s3 + $0x328] sm:$0xff] }
 0x19b   :  { %v951_v12 = vmax.f32 %v751_v51, %v884_v54  ;;  %v1468_v55 = vpop.permute.xlu0 %1467  ;;  %v1761_v56 = vld [vmem:[#allocation3 + $0x80] sm:$0xff]  ;;  %1280 = vst.msk [vmem:[#allocation3 + $0xe8] sm:$0xff] %vm1056_vm1, %v1597_v48  ;;  %v3622_v54 = vld [vmem:[%s6354_s3 + $0x320] sm:$0xff] }
 0x19c   :  { %1470 = vst.msk [vmem:[#allocation3 + $0x90] sm:$0xff] %vm1123_vm2, %v1468_v55  ;;  %v1564_v37 = vpop.permute.xlu2 %1563  ;;  %1869 = vmatmul.f32.gmra.mxu0 %v1761_v56  ;;  %2154 = vmatpush.msra.mxu2 %v3631_v58  ;;  %v3621_v55 = vld [vmem:[%s6354_s3 + $0x318] sm:$0xff] }
 0x19d   :  { %v332_v50 = vpop.f32.mrf.mxu0  ;;  %v1000_v59 = vadd.f32 %v4420_v46, %v951_v12  ;;  %1518 = vst.msk [vmem:[#allocation3 + $0x90] sm:$0xff] %vm1172_vm3, %v4395_v32  ;;  %v487_v61 = vpop.f32.mrf.mxu1  ;;  %v3629_v32 = vld [vmem:[%s6354_s3 + $0x358] sm:$0xff] }
 0x19e   :  { %1566 = vst.msk [vmem:[#allocation3 + $0x90] sm:$0xff] %vm1221_vm4, %v1564_v37  ;;  %v552_v62 = vmax.f32 %v332_v50, %v487_v61  ;;  %2155 = vmatpush.msra.mxu2 %v3630_v0  ;;  %v3620_v50 = vld [vmem:[%s6354_s3 + $0x310] sm:$0xff]  ;;  %v3619_v0 = vld [vmem:[%s6354_s3 + $0x308] sm:$0xff] }
 0x19f   :  { %v1045_v63 = vmax.f32 %v1000_v59, 0.0 }
 0x1a0   :  { %v687_v1 = vpop.f32.mrf.mxu2  ;;  %v1691_v2 = vld [vmem:[#allocation2 + $0x106] sm:$0xff]  ;;  %v887_v24 = vpop.f32.mrf.mxu3  ;;  %2156 = vmatpush.msra.mxu2 %v3629_v32 }
 0x1a1   :  { %v1599_v5 = vld [vmem:[#allocation2 + $0x105] sm:$0xff]  ;;  %1091 = vst.msk [vmem:[#allocation2 + $0x110] sm:$0xff] %vm1056_vm1, %v1045_v63  ;;  %v752_v7 = vmax.f32 %v552_v62, %v687_v1  ;;  %1693 = vrot.lane.b32.xlu1 %v1691_v2, %s3826_s11 }
 0x1a2   :  { %1600 = vst.msk [vmem:[#allocation3 + $0xf8] sm:$0xff] %vm1056_vm1, %v1599_v5  ;;  %2157 = vmatpush.msra.mxu2 %v3628_v57 }
 0x1a3   :  { %v952_v8 = vmax.f32 %v752_v7, %v887_v24  ;;  %v1250_v9 = vpop.permute.xlu1 %1249 }
 0x1a4   :  { %1252 = vst.msk [vmem:[#allocation3 + $0xa0] sm:$0xff] %vm1221_vm4, %v1250_v9  ;;  %v1570_v10 = vpop.permute.xlu2 %1569  ;;  %2158 = vmatpush.msra.mxu2 %v3627_v11 }
 0x1a5   :  { %v335_v53 = vpop.f32.mrf.mxu0  ;;  %v1001_v13 = vadd.f32 %v4420_v46, %v952_v8  ;;  %v490_v15 = vpop.f32.mrf.mxu1  ;;  %v4662_v16 = vld [vmem:[#allocation3 + $0x90] sm:$0xff] }
 0x1a6   :  { %v553_v17 = vmax.f32 %v335_v53, %v490_v15  ;;  %1951 = vmatmul.f32.gmra.mxu2 %v4662_v16 }
 0x1a7   :  { %v1046_v20 = vmax.f32 %v1001_v13, 0.0  ;;  %2159 = vmatpush.msra.mxu2 %v3626_v36 }
 0x1a8   :  { %v690_v21 = vpop.f32.mrf.mxu2  ;;  %v1377_v23 = vld [vmem:[#allocation2 + $0x10f] sm:$0xff]  ;;  %v890_v25 = vpop.f32.mrf.mxu3 }
 0x1a9   :  { %v1281_v6 = vld [vmem:[#allocation2 + $0x10e] sm:$0xff]  ;;  %1092 = vst.msk [vmem:[#allocation2 + $0x118] sm:$0xff] %vm1056_vm1, %v1046_v20  ;;  %v753_v26 = vmax.f32 %v553_v17, %v690_v21  ;;  %1379 = vrot.lane.b32.xlu2 %v1377_v23, %s3827_s1  ;;  %2160 = vmatpush.msra.mxu2 %v3625_v28 }
 0x1aa   :  { %1283 = vrot.lane.b32.xlu0 %v1281_v6, %s3828_s21  ;;  %v1798_v6 = vld [vmem:[%s6354_s3 + $0xa8] sm:$0xff] }
 0x1ab   :  { %v953_v19 = vmax.f32 %v753_v26, %v890_v25  ;;  %v1474_v29 = vpop.permute.xlu0 %1473  ;;  %v1765_v30 = vld [vmem:[#allocation3 + $0xa0] sm:$0xff]  ;;  %2161 = vmatpush.msra.mxu2 %v3624_v33  ;;  %1892 = vmatpush.msrb.mxu1 %v1798_v6  ;;  %v3690_v6 = vld [vmem:[%s6354_s3 + $0x540] sm:$0xff] }
 0x1ac   :  { %1476 = vst.msk [vmem:[#allocation3 + $0xb0] sm:$0xff] %vm1123_vm2, %v1474_v29  ;;  %v1158_v34 = vpop.permute.xlu2 %1157  ;;  %1872 = vmatmul.f32.gmra.mxu0 %v1765_v30  ;;  %v1256_v52 = vpop.permute.xlu1 %1255 }
 0x1ad   :  { %v338_v40 = vpop.f32.mrf.mxu0  ;;  %v1002_v35 = vadd.f32 %v4420_v46, %v953_v19  ;;  %1524 = vst.msk [vmem:[#allocation3 + $0xb0] sm:$0xff] %vm1172_vm3, %v4456_v3  ;;  %v493_v38 = vpop.f32.mrf.mxu1  ;;  %2162 = vmatpush.msra.mxu2 %v3623_v41 }
 0x1ae   :  { %1572 = vst.msk [vmem:[#allocation3 + $0xb0] sm:$0xff] %vm1221_vm4, %v1570_v10  ;;  %v554_v43 = vmax.f32 %v338_v40, %v493_v38 }
 0x1af   :  { %v1047_v44 = vmax.f32 %v1002_v35, 0.0  ;;  %1160 = vst.msk [vmem:[#allocation3 + $0xc0] sm:$0xff] %vm1123_vm2, %v1158_v34  ;;  %2163 = vmatpush.msra.mxu2 %v3622_v54 }
 0x1b0   :  { %1209 = vst.msk [vmem:[#allocation3 + $0xc0] sm:$0xff] %vm1172_vm3, %v4378_v18  ;;  %v693_v3 = vpop.f32.mrf.mxu2  ;;  %v1601_v48 = vld [vmem:[#allocation2 + $0x117] sm:$0xff]  ;;  %v893_v60 = vpop.f32.mrf.mxu3 }
 0x1b1   :  { %v1383_v51 = vld [vmem:[#allocation2 + $0x118] sm:$0xff]  ;;  %1093 = vst.msk [vmem:[#allocation2 + $0x120] sm:$0xff] %vm1056_vm1, %v1047_v44  ;;  %v754_v12 = vmax.f32 %v554_v43, %v693_v3  ;;  %1603 = vrot.lane.b32.xlu1 %v1601_v48, %s3828_s21  ;;  %2164 = vmatpush.msra.mxu2 %v3621_v55 }
 0x1b2   :  { %1385 = vrot.lane.b32.xlu2 %v1383_v51, %s3827_s1  ;;  %1258 = vst.msk [vmem:[#allocation3 + $0xc0] sm:$0xff] %vm1221_vm4, %v1256_v52  ;;  %1289 = vrot.lane.b32.xlu0 %v1601_v48, %s3828_s21 }
 0x1b3   :  { %v954_v18 = vmax.f32 %v754_v12, %v893_v60  ;;  %v1480_v56 = vpop.permute.xlu0 %1479  ;;  %2165 = vmatpush.msra.mxu2 %v3620_v50  ;;  %v1829_v12 = vld [vmem:[%s6354_s3 + $0x1a0] sm:$0xff]  ;;  %v3697_v50 = vld [vmem:[%s6354_s3 + $0x578] sm:$0xff] }
 0x1b4   :  { %v1576_v58 = vpop.permute.xlu2 %1575  ;;  %1482 = vst.msk [vmem:[#allocation3 + $0xd0] sm:$0xff] %vm1123_vm2, %v1480_v56 }
 0x1b5   :  { %v341_v37 = vpop.f32.mrf.mxu0  ;;  %v1003_v59 = vadd.f32 %v4420_v46, %v954_v18  ;;  %1530 = vst.msk [vmem:[#allocation3 + $0xd0] sm:$0xff] %vm1172_vm3, %v4491_v27  ;;  %v496_v61 = vpop.f32.mrf.mxu1  ;;  %v4712_v62 = vld [vmem:[#allocation3 + $0xb0] sm:$0xff]  ;;  %2166 = vmatpush.msra.mxu2 %v3619_v0  ;;  %v3695_v0 = vld [vmem:[%s6354_s3 + $0x568] sm:$0xff] }
 0x1b6   :  { %1578 = vst.msk [vmem:[#allocation3 + $0xd0] sm:$0xff] %vm1221_vm4, %v1576_v58  ;;  %v555_v63 = vmax.f32 %v341_v37, %v496_v61  ;;  %1954 = vmatmul.f32.gmra.mxu2 %v4712_v62  ;;  %v3618_v27 = vld [vmem:[%s6354_s3 + $0x300] sm:$0xff] }
 0x1b7   :  { %v1048_v1 = vmax.f32 %v1003_v59, 0.0  ;;  %2167 = vmatpush.msra.mxu2 %v3618_v27  ;;  %v1797_v37 = vld [vmem:[%s6354_s3 + $0xa0] sm:$0xff]  ;;  %v3696_v59 = vld [vmem:[%s6354_s3 + $0x570] sm:$0xff] }
 0x1b8   :  { %v696_v2 = vpop.f32.mrf.mxu2  ;;  %v1607_v24 = vld [vmem:[#allocation2 + $0x120] sm:$0xff]  ;;  %v896_v5 = vpop.f32.mrf.mxu3  ;;  %1893 = vmatpush.msrb.mxu1 %v1797_v37 }
 0x1b9   :  { %1094 = vst.msk [vmem:[#allocation2 + $0x128] sm:$0xff] %vm1056_vm1, %v1048_v1  ;;  %v1769_v7 = vld [vmem:[#allocation3 + $0xc0] sm:$0xff]  ;;  %v755_v32 = vmax.f32 %v555_v63, %v696_v2  ;;  %1699 = vrot.lane.b32.xlu1 %v1383_v51, %s3827_s1  ;;  %2389 = vmatpush.msrb.mxu2 %v3697_v50  ;;  %v3683_v50 = vld [vmem:[%s6354_s3 + $0x508] sm:$0xff] }
 0x1ba   :  { %1875 = vmatmul.f32.gmra.mxu0 %v1769_v7  ;;  %1609 = vrot.lane.b32.xlu0 %v1607_v24, %s3828_s21 }
 0x1bb   :  { %v955_v57 = vmax.f32 %v755_v32, %v896_v5  ;;  %v1486_v8 = vpop.permute.xlu0 %1485  ;;  %2390 = vmatpush.msrb.mxu2 %v3696_v59  ;;  %v3694_v32 = vld [vmem:[%s6354_s3 + $0x560] sm:$0xff] }
 0x1bc   :  { %v1164_v9 = vpop.permute.xlu2 %1163  ;;  %1488 = vst.msk [vmem:[#allocation3 + $0xf0] sm:$0xff] %vm1123_vm2, %v1486_v8  ;;  %v3682_v59 = vld [vmem:[%s6354_s3 + $0x500] sm:$0xff] }
 0x1bd   :  { %v344_v10 = vpop.f32.mrf.mxu0  ;;  %v1004_v53 = vadd.f32 %v4420_v46, %v955_v57  ;;  %1166 = vst.msk [vmem:[#allocation3 + $0xe0] sm:$0xff] %vm1123_vm2, %v1164_v9  ;;  %v499_v11 = vpop.f32.mrf.mxu1  ;;  %v4728_v13 = vld [vmem:[#allocation3 + $0xd0] sm:$0xff]  ;;  %2391 = vmatpush.msrb.mxu2 %v3695_v0 }
 0x1be   :  { %1215 = vst.msk [vmem:[#allocation3 + $0xe0] sm:$0xff] %vm1172_vm3, %v4409_v39  ;;  %v556_v15 = vmax.f32 %v344_v10, %v499_v11  ;;  %1957 = vmatmul.f32.gmra.mxu2 %v4728_v13  ;;  %v1830_v39 = vld [vmem:[%s6354_s3 + $0x1a8] sm:$0xff]  ;;  %v3692_v11 = vld [vmem:[%s6354_s3 + $0x550] sm:$0xff] }
 0x1bf   :  { %v1049_v17 = vmax.f32 %v1004_v53, 0.0  ;;  %1536 = vst.msk [vmem:[#allocation3 + $0xf0] sm:$0xff] %vm1172_vm3, %v4520_v49  ;;  %1974 = vmatpush.msrb.mxu3 %v1830_v39  ;;  %2392 = vmatpush.msrb.mxu2 %v3694_v32  ;;  %v3693_v53 = vld [vmem:[%s6354_s3 + $0x558] sm:$0xff]  ;;  %v3691_v39 = vld [vmem:[%s6354_s3 + $0x548] sm:$0xff] }
 0x1c0   :  { %v699_v20 = vpop.f32.mrf.mxu2  ;;  %v1703_v36 = vld [vmem:[#allocation2 + $0x121] sm:$0xff]  ;;  %v899_v21 = vpop.f32.mrf.mxu3 }
 0x1c1   :  { %1095 = vst.msk [vmem:[#allocation2 + $0x130] sm:$0xff] %vm1056_vm1, %v1049_v17  ;;  %v756_v23 = vmax.f32 %v556_v15, %v699_v20  ;;  %1705 = vrot.lane.b32.xlu1 %v1703_v36, %s3827_s1  ;;  %1391 = vrot.lane.b32.xlu2 %v1703_v36, %s3827_s1  ;;  %v1259_v32 = vld [vmem:[#allocation2 + $0xa3] sm:$0xff] }
 0x1c2   :  { %1295 = vrot.lane.b32.xlu0 %v1607_v24, %s3828_s21  ;;  %1975 = vmatpush.msrb.mxu3 %v1829_v12 }
 0x1c3   :  { %v956_v49 = vmax.f32 %v756_v23, %v899_v21  ;;  %v4775_v5 = vpop.permute.xlu0 %1331  ;;  %2393 = vmatpush.msrb.mxu2 %v3693_v53 }
 0x1c4   :  { %v1582_v25 = vpop.permute.xlu2 %1581 }
 0x1c5   :  { %v347_v26 = vpop.f32.mrf.mxu0  ;;  %v1005_v28 = vadd.f32 %v4420_v46, %v956_v49  ;;  %1584 = vst.msk [vmem:[#allocation3 + $0xf0] sm:$0xff] %vm1221_vm4, %v1582_v25  ;;  %v502_v31 = vpop.f32.mrf.mxu1  ;;  %2394 = vmatpush.msrb.mxu2 %v3692_v11  ;;  %v1826_v11 = vld [vmem:[%s6354_s3 + $0x188] sm:$0xff] }
 0x1c6   :  { %v557_v14 = vmax.f32 %v347_v26, %v502_v31  ;;  %v3786_v31 = vld [vmem:[%s6353_s2] ss:$0 sm:$0xff] }
 0x1c7   :  { %v1050_v19 = vmax.f32 %v1005_v28, 0.0  ;;  %2395 = vmatpush.msrb.mxu2 %v3691_v39  ;;  %v3759_v39 = vld [vmem:[%s6354_s3 + $0x768] sm:$0xff] }
 0x1c8   :  { %v702_v29 = vpop.f32.mrf.mxu2  ;;  %v1709_v30 = vld [vmem:[#allocation2 + $0x12a] sm:$0xff]  ;;  %v902_v34 = vpop.f32.mrf.mxu3 }
 0x1c9   :  { %v1613_v33 = vld [vmem:[#allocation2 + $0x129] sm:$0xff]  ;;  %1096 = vst.msk [vmem:[#allocation2 + $0x138] sm:$0xff] %vm1056_vm1, %v1050_v19  ;;  %v757_v40 = vmax.f32 %v557_v14, %v702_v29  ;;  %1711 = vrot.lane.b32.xlu1 %v1709_v30, %s3827_s1  ;;  %1397 = vrot.lane.b32.xlu2 %v1709_v30, %s3827_s1 }
 0x1ca   :  { %1615 = vrot.lane.b32.xlu0 %v1613_v33, %s3828_s21  ;;  %2396 = vmatpush.msrb.mxu2 %v3690_v6  ;;  %v3689_v29 = vld [vmem:[%s6354_s3 + $0x538] sm:$0xff]  ;;  %v3688_v30 = vld [vmem:[%s6354_s3 + $0x530] sm:$0xff] }
 0x1cb   :  { %v957_v35 = vmax.f32 %v757_v40, %v902_v34  ;;  %v4801_v49 = vpop.permute.xlu0 %1337 }
 0x1cc   :  { %v4751_v38 = vld [vmem:[#allocation3 + $0xf0] sm:$0xff]  ;;  %2397 = vmatpush.msrb.mxu2 %v3689_v29 }
 0x1cd   :  { %v350_v41 = vpop.f32.mrf.mxu0  ;;  %v1006_v43 = vadd.f32 %v4420_v46, %v957_v35  ;;  %1960 = vmatmul.f32.gmra.mxu2 %v4751_v38  ;;  %v505_v44 = vpop.f32.mrf.mxu1 }
 0x1ce   :  { %v558_v54 = vmax.f32 %v350_v41, %v505_v44  ;;  %2398 = vmatpush.msrb.mxu2 %v3688_v30 }
 0x1cf   :  { %v1051_v3 = vmax.f32 %v1006_v43, 0.0 }
 0x1d0   :  { %v705_v48 = vpop.f32.mrf.mxu2  ;;  %v1715_v51 = vld [vmem:[#allocation2 + $0x133] sm:$0xff]  ;;  %v905_v60 = vpop.f32.mrf.mxu3 }
 0x1d1   :  { %1097 = vst.msk [vmem:[#allocation2 + $0x140] sm:$0xff] %vm1056_vm1, %v1051_v3  ;;  %v758_v52 = vmax.f32 %v558_v54, %v705_v48  ;;  %1717 = vrot.lane.b32.xlu1 %v1715_v51, %s3827_s1  ;;  %v1619_v7 = vld [vmem:[#allocation2 + $0x132] sm:$0xff]  ;;  %v3687_v3 = vld [vmem:[%s6354_s3 + $0x528] sm:$0xff] }
 0x1d2   :  { %1301 = vrot.lane.b32.xlu0 %v1613_v33, %s3828_s21  ;;  %v1828_v54 = vld [vmem:[%s6354_s3 + $0x198] sm:$0xff]  ;;  %2399 = vmatpush.msrb.mxu2 %v3687_v3  ;;  %v3746_v3 = vld [vmem:[%s6354_s3 + $0x700] sm:$0xff] }
 0x1d3   :  { %v958_v55 = vmax.f32 %v758_v52, %v905_v60  ;;  %v4803_v25 = vpop.permute.xlu1 %1657  ;;  %v1796_v48 = vld [vmem:[%s6354_s3 + $0x98] sm:$0xff]  ;;  %1976 = vmatpush.msrb.mxu3 %v1828_v54  ;;  %v3686_v60 = vld [vmem:[%s6354_s3 + $0x520] sm:$0xff]  ;;  %v4831_v52 = vpop.permute.xlu0 %1343 }
 0x1d4   :  { %1894 = vmatpush.msrb.mxu1 %v1796_v48  ;;  %2400 = vmatpush.msrb.mxu2 %v3686_v60 }
 0x1d5   :  { %v353_v18 = vpop.f32.mrf.mxu0  ;;  %v1007_v56 = vadd.f32 %v4420_v46, %v958_v55  ;;  %2168 = vmatmul.f32.vlgmr.msra.gmra.mxu2 %v4563_v47  ;;  %v508_v58 = vpop.f32.mrf.mxu1 }
 0x1d6   :  { %v559_v61 = vmax.f32 %v353_v18, %v508_v58  ;;  %v3685_v18 = vld [vmem:[%s6354_s3 + $0x518] sm:$0xff]  ;;  %v3684_v58 = vld [vmem:[%s6354_s3 + $0x510] sm:$0xff] }
 0x1d7   :  { %v1052_v63 = vmax.f32 %v1007_v56, 0.0  ;;  %2401 = vmatpush.msrb.mxu2 %v3685_v18 }
 0x1d8   :  { %v708_v1 = vpop.f32.mrf.mxu2  ;;  %v1401_v2 = vld [vmem:[#allocation2 + $0x13c] sm:$0xff]  ;;  %v908_v24 = vpop.f32.mrf.mxu3 }
 0x1d9   :  { %1098 = vst.msk [vmem:[#allocation2 + $0x148] sm:$0xff] %vm1056_vm1, %v1052_v63  ;;  %v759_v27 = vmax.f32 %v559_v61, %v708_v1  ;;  %1403 = vrot.lane.b32.xlu2 %v1401_v2, %s3827_s1  ;;  %v1305_v23 = vld [vmem:[#allocation2 + $0x13b] sm:$0xff]  ;;  %2402 = vmatpush.msrb.mxu2 %v3684_v58 }
 0x1da   :  { %1621 = vrot.lane.b32.xlu0 %v1619_v7, %s3828_s21 }
 0x1db   :  { %v959_v57 = vmax.f32 %v759_v27, %v908_v24  ;;  %v4833_v12 = vpop.permute.xlu1 %1663  ;;  %2403 = vmatpush.msrb.mxu2 %v3683_v50  ;;  %v4855_v63 = vpop.permute.xlu0 %1349  ;;  %v1827_v24 = vld [vmem:[%s6354_s3 + $0x190] sm:$0xff]  ;;  %v3601_v50 = vld [vmem:[%s6354_s3 + $0x278] sm:$0xff] }
 0x1dc   :  { %v1795_v27 = vld [vmem:[%s6354_s3 + $0x90] sm:$0xff]  ;;  %1977 = vmatpush.msrb.mxu3 %v1827_v24  ;;  %2070 = vmatpush.msra.mxu0 %v3601_v50  ;;  %v3599_v24 = vld [vmem:[%s6354_s3 + $0x268] sm:$0xff]  ;;  %v3789_v50 = vld [vmem:[#allocation3 + $0x50] sm:$0xff] }
 0x1dd   :  { %v356_v8 = vpop.f32.mrf.mxu0  ;;  %v1008_v9 = vadd.f32 %v4420_v46, %v959_v57  ;;  %2171 = vmatmul.f32.gmra.mxu2 %v4584_v4  ;;  %v511_v10 = vpop.f32.mrf.mxu1  ;;  %1895 = vmatpush.msrb.mxu1 %v1795_v27  ;;  %v1794_v57 = vld [vmem:[%s6354_s3 + $0x88] sm:$0xff] }
 0x1de   :  { %v560_v15 = vmax.f32 %v356_v8, %v511_v10  ;;  %2404 = vmatpush.msrb.mxu2 %v3682_v59  ;;  %1978 = vmatpush.msrb.mxu3 %v1826_v11  ;;  %v3617_v59 = vld [vmem:[%s6354_s3 + $0x2f8] sm:$0xff]  ;;  %v3647_v27 = vld [vmem:[%s6354_s3 + $0x3e8] sm:$0xff] }
 0x1df   :  { %v1053_v17 = vmax.f32 %v1008_v9, 0.0  ;;  %1896 = vmatpush.msrb.mxu1 %v1794_v57  ;;  %v1793_v9 = vld [vmem:[%s6354_s3 + $0x80] sm:$0xff] }
 0x1e0   :  { %v711_v20 = vpop.f32.mrf.mxu2  ;;  %v1721_v36 = vld [vmem:[#allocation2 + $0x145] sm:$0xff]  ;;  %v911_v21 = vpop.f32.mrf.mxu3  ;;  %v3598_v57 = vld [vmem:[%s6354_s3 + $0x260] sm:$0xff] }
 0x1e1   :  { %1099 = vst.msk [vmem:[#allocation2 + $0x150] sm:$0xff] %vm1056_vm1, %v1053_v17  ;;  %v760_v46 = vmax.f32 %v560_v15, %v711_v20  ;;  %1723 = vrot.lane.b32.xlu1 %v1721_v36, %s3827_s1  ;;  %1409 = vrot.lane.b32.xlu2 %v1721_v36, %s3827_s1  ;;  %v1625_v44 = vld [vmem:[#allocation2 + $0x144] sm:$0xff]  ;;  %v1825_v15 = vld [vmem:[%s6354_s3 + $0x180] sm:$0xff]  ;;  %v1652_v36 = vpop.permute.xlu2 %1651 }
 0x1e2   :  { %1307 = vrot.lane.b32.xlu0 %v1305_v23, %s3828_s21  ;;  %1897 = vmatpush.msrb.mxu1 %v1793_v9 }
 0x1e3   :  { %v960_v26 = vmax.f32 %v760_v46, %v911_v21  ;;  %1979 = vmatpush.msrb.mxu3 %v1825_v15  ;;  %v3761_v21 = vld [vmem:[%s6354_s3 + $0x778] sm:$0xff]  ;;  %v3760_v46 = vld [vmem:[%s6354_s3 + $0x770] sm:$0xff] }
 0x1e4   :  { %2626 = vmatpush.msra.mxu2 %v3761_v21  ;;  %2111 = vmatpush.msra.mxu1 %v3617_v59  ;;  %v3597_v15 = vld [vmem:[%s6354_s3 + $0x258] sm:$0xff]  ;;  %v3596_v21 = vld [vmem:[%s6354_s3 + $0x250] sm:$0xff] }
 0x1e5   :  { %v359_v28 = vpop.f32.mrf.mxu0  ;;  %v1009_v14 = vadd.f32 %v3786_v31, %v960_v26  ;;  %2174 = vmatmul.f32.gmra.mxu2 %v4598_v22  ;;  %v514_v19 = vpop.f32.mrf.mxu1  ;;  %v3758_v26 = vld [vmem:[%s6354_s3 + $0x760] sm:$0xff]  ;;  %v3609_v59 = vld [vmem:[%s6354_s3 + $0x2b8] sm:$0xff] }
 0x1e6   :  { %v561_v33 = vmax.f32 %v359_v28, %v514_v19  ;;  %2627 = vmatpush.msra.mxu2 %v3760_v46  ;;  %v3755_v19 = vld [vmem:[%s6354_s3 + $0x748] sm:$0xff]  ;;  %v3614_v46 = vld [vmem:[%s6354_s3 + $0x2e0] sm:$0xff] }
 0x1e7   :  { %v1054_v34 = vmax.f32 %v1009_v14, 0.0  ;;  %v3756_v14 = vld [vmem:[%s6354_s3 + $0x750] sm:$0xff] }
 0x1e8   :  { %v714_v40 = vpop.f32.mrf.mxu2  ;;  %v1727_v35 = vld [vmem:[#allocation2 + $0x14e] sm:$0xff]  ;;  %v914_v41 = vpop.f32.mrf.mxu3  ;;  %2628 = vmatpush.msra.mxu2 %v3759_v39 }
 0x1e9   :  { %1100 = vst.msk [vmem:[#allocation2 + $0x158] sm:$0xff] %vm1056_vm1, %v1054_v34  ;;  %v761_v43 = vmax.f32 %v561_v33, %v714_v40  ;;  %1729 = vrot.lane.b32.xlu1 %v1727_v35, %s3827_s1  ;;  %1415 = vrot.lane.b32.xlu2 %v1727_v35, %s3827_s1  ;;  %v1631_v1 = vld [vmem:[#allocation2 + $0x14d] sm:$0xff] }
 0x1ea   :  { %1627 = vrot.lane.b32.xlu0 %v1625_v44, %s3828_s21  ;;  %2629 = vmatpush.msra.mxu2 %v3758_v26  ;;  %v3753_v33 = vld [vmem:[%s6354_s3 + $0x738] sm:$0xff]  ;;  %v3752_v34 = vld [vmem:[%s6354_s3 + $0x730] sm:$0xff]  ;;  %v3594_v26 = vld [vmem:[%s6354_s3 + $0x240] sm:$0xff] }
 0x1eb   :  { %v961_v51 = vmax.f32 %v761_v43, %v914_v41  ;;  %v4852_v61 = vpop.permute.xlu1 %1669  ;;  %v3749_v43 = vld [vmem:[%s6354_s3 + $0x718] sm:$0xff] }
 0x1ec   :  { %v3645_v39 = vld [vmem:[%s6354_s3 + $0x3d8] sm:$0xff] }
 0x1ed   :  { %v1010_v55 = vadd.f32 %v3786_v31, %v961_v51  ;;  %2177 = vmatmul.f32.gmra.mxu2 %v4620_v42  ;;  %v3757_v31 = vld [vmem:[%s6354_s3 + $0x758] sm:$0xff] }
 0x1ee   :  { %2630 = vmatpush.msra.mxu2 %v3757_v31  ;;  %v3787_v31 = vld [vmem:[#allocation3 + $0x10] sm:$0xff] }
 0x1ef   :  { %v1055_v56 = vmax.f32 %v1010_v55, 0.0 }
 0x1f0   :  { %v1733_v37 = vld [vmem:[#allocation2 + $0x157] sm:$0xff]  ;;  %2631 = vmatpush.msra.mxu2 %v3756_v14 }
 0x1f1   :  { %1101 = vst.msk [vmem:[#allocation2 + $0x160] sm:$0xff] %vm1056_vm1, %v1055_v56  ;;  %1735 = vrot.lane.b32.xlu1 %v1733_v37, %s3827_s1  ;;  %1421 = vrot.lane.b32.xlu2 %v1733_v37, %s3827_s1  ;;  %v1637_v53 = vld [vmem:[#allocation2 + $0x156] sm:$0xff] }
 0x1f2   :  { %1313 = vrot.lane.b32.xlu0 %v1625_v44, %s3828_s21  ;;  %2632 = vmatpush.msra.mxu2 %v3755_v19  ;;  %v3748_v44 = vld [vmem:[%s6354_s3 + $0x710] sm:$0xff] }
 0x1f3   :  { %v4868_v7 = vpop.permute.xlu0 %1355 }
 0x1f5   :  { %2180 = vmatmul.f32.gmra.mxu2 %v4662_v16 }
 0x1f8   :  { %v1739_v0 = vld [vmem:[#allocation2 + $0x160] sm:$0xff] }
 0x1f9   :  { %1741 = vrot.lane.b32.xlu1 %v1739_v0, %s3827_s1  ;;  %v1643_v23 = vld [vmem:[#allocation2 + $0x15f] sm:$0xff]  ;;  %v3600_v0 = vld [vmem:[%s6354_s3 + $0x270] sm:$0xff] }
 0x1fa   :  { %1633 = vrot.lane.b32.xlu0 %v1631_v1, %s3828_s21  ;;  %2071 = vmatpush.msra.mxu0 %v3600_v0 }
 0x1fb   :  { %v4859_v2 = vpop.permute.xlu1 %1675  ;;  %v4881_v10 = vpop.permute.xlu0 %1361 }
 0x1fc   :  { %2072 = vmatpush.msra.mxu0 %v3599_v24  ;;  %v3608_v24 = vld [vmem:[%s6354_s3 + $0x2b0] sm:$0xff] }
 0x1fd   :  { %2183 = vmatmul.f32.gmra.mxu2 %v4712_v62 }
 0x1fe   :  { %2073 = vmatpush.msra.mxu0 %v3598_v57 }
 0x200   :  { %2074 = vmatpush.msra.mxu0 %v3597_v15 }
 0x201   :  { %1261 = vrot.lane.b32.xlu1 %v1259_v32, %s3827_s1 }
 0x202   :  { %1319 = vrot.lane.b32.xlu0 %v1631_v1, %s3828_s21  ;;  %v3616_v1 = vld [vmem:[%s6354_s3 + $0x2f0] sm:$0xff]  ;;  %2075 = vmatpush.msra.mxu0 %v3596_v21  ;;  %v3638_v21 = vld [vmem:[%s6354_s3 + $0x3a0] sm:$0xff] }
 0x203   :  { %v4876_v8 = vpop.permute.xlu1 %1681  ;;  %v4894_v20 = vpop.permute.xlu0 %1367  ;;  %2112 = vmatpush.msra.mxu1 %v3616_v1  ;;  %v3640_v1 = vld [vmem:[%s6354_s3 + $0x3b0] sm:$0xff] }
 0x204   :  { %v1380_v28 = vpop.permute.xlu2 %1379 }
 0x205   :  { %2186 = vmatmul.f32.gmra.mxu2 %v4728_v13 }
 0x20a   :  { %1639 = vrot.lane.b32.xlu0 %v1637_v53, %s3828_s21 }
 0x20b   :  { %v4891_v17 = vpop.permute.xlu1 %1687 }
 0x20d   :  { %2189 = vmatmul.f32.gmra.mxu2 %v4751_v38 }
 0x212   :  { %1325 = vrot.lane.b32.xlu0 %v1637_v53, %s3828_s21  ;;  %v5028_v53 = vpop.f32.mrf.mxu2 }
 0x213   :  { %v4907_v6 = vpop.permute.xlu1 %1693 }
 0x215   :  { %2405 = vmatmul.f32.vlgmr.msrb.gmra.mxu2 %v4563_v47 }
 0x21a   :  { %1645 = vrot.lane.b32.xlu0 %v1643_v23, %s3828_s21  ;;  %v3595_v23 = vld [vmem:[%s6354_s3 + $0x248] sm:$0xff] }
 0x21b   :  { %2076 = vmatpush.msra.mxu0 %v3595_v23 }
 0x21c   :  { %v1284_v47 = vpop.permute.xlu0 %1283 }
 0x21d   :  { %1286 = vst.msk [vmem:[#allocation3 + $0x8] sm:$0xff] %vm1123_vm2, %v1284_v47  ;;  %2408 = vmatmul.f32.gmra.mxu2 %v4584_v4  ;;  %2077 = vmatpush.msra.mxu0 %v3594_v26 }
 0x21e   :  { %1334 = vst.msk [vmem:[#allocation3 + $0x8] sm:$0xff] %vm1172_vm3, %v4775_v5  ;;  %v3754_v5 = vld [vmem:[%s6354_s3 + $0x740] sm:$0xff] }
 0x21f   :  { %1382 = vst.msk [vmem:[#allocation3 + $0x8] sm:$0xff] %vm1221_vm4, %v1380_v28  ;;  %2633 = vmatpush.msra.mxu2 %v3754_v5  ;;  %v3593_v5 = vld [vmem:[%s6354_s3 + $0x238] sm:$0xff] }
 0x220   :  { %2078 = vmatpush.msra.mxu0 %v3593_v5 }
 0x221   :  { %2634 = vmatpush.msra.mxu2 %v3753_v33  ;;  %v3612_v33 = vld [vmem:[%s6354_s3 + $0x2d0] sm:$0xff] }
 0x222   :  { %1373 = vrot.lane.b32.xlu0 %v4624_v45, %s3826_s11  ;;  %v1386_v45 = vpop.permute.xlu2 %1385 }
 0x223   :  { %v1604_v4 = vpop.permute.xlu1 %1603  ;;  %2635 = vmatpush.msra.mxu2 %v3752_v34  ;;  %v3591_v34 = vld [vmem:[%s6354_s3 + $0x228] sm:$0xff] }
 0x224   :  { %1606 = vst.msk [vmem:[#allocation3 + $0x18] sm:$0xff] %vm1123_vm2, %v1604_v4  ;;  %v1290_v29 = vpop.permute.xlu0 %1289  ;;  %v5067_v4 = vpop.f32.mrf.mxu2 }
 0x225   :  { %1654 = vst.msk [vmem:[#allocation3 + $0x18] sm:$0xff] %vm1172_vm3, %v1652_v36  ;;  %2411 = vmatmul.f32.gmra.mxu2 %v4598_v22  ;;  %v3751_v22 = vld [vmem:[%s6354_s3 + $0x728] sm:$0xff] }
 0x226   :  { %v4934_v30 = vld [vmem:[#allocation3 + $0x8] sm:$0xff]  ;;  %1292 = vst.msk [vmem:[#allocation3 + $0x28] sm:$0xff] %vm1123_vm2, %v1290_v29  ;;  %2636 = vmatpush.msra.mxu2 %v3751_v22  ;;  %v3615_v36 = vld [vmem:[%s6354_s3 + $0x2e8] sm:$0xff] }
 0x227   :  { %1898 = vmatmul.f32.vlgmr.msrb.gmra.mxu1 %v4934_v30  ;;  %1340 = vst.msk [vmem:[#allocation3 + $0x28] sm:$0xff] %vm1172_vm3, %v4801_v49  ;;  %v3750_v49 = vld [vmem:[%s6354_s3 + $0x720] sm:$0xff]  ;;  %v3613_v29 = vld [vmem:[%s6354_s3 + $0x2d8] sm:$0xff]  ;;  %v3643_v22 = vld [vmem:[%s6354_s3 + $0x3c8] sm:$0xff] }
 0x228   :  { %1388 = vst.msk [vmem:[#allocation3 + $0x28] sm:$0xff] %vm1221_vm4, %v1386_v45  ;;  %2637 = vmatpush.msra.mxu2 %v3750_v49  ;;  %2113 = vmatpush.msra.mxu1 %v3615_v36  ;;  %v3644_v45 = vld [vmem:[%s6354_s3 + $0x3d0] sm:$0xff]  ;;  %v3590_v49 = vld [vmem:[%s6354_s3 + $0x220] sm:$0xff]  ;;  %v3607_v36 = vld [vmem:[%s6354_s3 + $0x2a8] sm:$0xff] }
 0x22a   :  { %2638 = vmatpush.msra.mxu2 %v3749_v43  ;;  %v1392_v51 = vpop.permute.xlu2 %1391  ;;  %2114 = vmatpush.msra.mxu1 %v3614_v46  ;;  %v3788_v43 = vld [vmem:[#allocation3 + $0x30] sm:$0xff] }
 0x22b   :  { %v1700_v40 = vpop.permute.xlu1 %1699 }
 0x22c   :  { %1702 = vst.msk [vmem:[#allocation3 + $0x18] sm:$0xff] %vm1221_vm4, %v1700_v40  ;;  %v1610_v35 = vpop.permute.xlu0 %1609  ;;  %2639 = vmatpush.msra.mxu2 %v3748_v44  ;;  %2115 = vmatpush.msra.mxu1 %v3613_v29 }
 0x22d   :  { %1612 = vst.msk [vmem:[#allocation3 + $0x38] sm:$0xff] %vm1123_vm2, %v1610_v35  ;;  %2414 = vmatmul.f32.gmra.mxu2 %v4620_v42  ;;  %v3747_v42 = vld [vmem:[%s6354_s3 + $0x708] sm:$0xff] }
 0x22e   :  { %1660 = vst.msk [vmem:[#allocation3 + $0x38] sm:$0xff] %vm1172_vm3, %v4803_v25  ;;  %2640 = vmatpush.msra.mxu2 %v3747_v42  ;;  %2116 = vmatpush.msra.mxu1 %v3612_v33  ;;  %v3589_v42 = vld [vmem:[%s6354_s3 + $0x218] sm:$0xff]  ;;  %v3634_v33 = vld [vmem:[%s6354_s3 + $0x380] sm:$0xff] }
 0x22f   :  { %v4958_v41 = vld [vmem:[#allocation3 + $0x28] sm:$0xff] }
 0x230   :  { %1901 = vmatmul.f32.gmra.mxu1 %v4958_v41  ;;  %2641 = vmatpush.msra.mxu2 %v3746_v3  ;;  %v3588_v3 = vld [vmem:[%s6354_s3 + $0x210] sm:$0xff] }
 0x232   :  { %v1398_v37 = vpop.permute.xlu2 %1397 }
 0x233   :  { %v1706_v25 = vpop.permute.xlu1 %1705  ;;  %v4970_v54 = vld [vmem:[#allocation3 + $0x18] sm:$0xff] }
 0x234   :  { %v1296_v48 = vpop.permute.xlu0 %1295  ;;  %1708 = vst.msk [vmem:[#allocation3 + $0x38] sm:$0xff] %vm1221_vm4, %v1706_v25  ;;  %1980 = vmatmul.f32.vlgmr.msrb.gmra.mxu3 %v4970_v54  ;;  %v3611_v25 = vld [vmem:[%s6354_s3 + $0x2c8] sm:$0xff] }
 0x235   :  { %1298 = vst.msk [vmem:[#allocation3 + $0x48] sm:$0xff] %vm1123_vm2, %v1296_v48  ;;  %2417 = vmatmul.f32.gmra.mxu2 %v4662_v16  ;;  %2117 = vmatpush.msra.mxu1 %v3611_v25  ;;  %v3610_v48 = vld [vmem:[%s6354_s3 + $0x2c0] sm:$0xff]  ;;  %v3663_v25 = vld [vmem:[%s6354_s3 + $0x468] sm:$0xff] }
 0x236   :  { %1346 = vst.msk [vmem:[#allocation3 + $0x48] sm:$0xff] %vm1172_vm3, %v4831_v52  ;;  %v3649_v52 = vld [vmem:[%s6354_s3 + $0x3f8] sm:$0xff] }
 0x237   :  { %1394 = vst.msk [vmem:[#allocation3 + $0x48] sm:$0xff] %vm1221_vm4, %v1392_v51  ;;  %2193 = vmatpush.msra.mxu3 %v3649_v52  ;;  %v5117_v51 = vpop.f32.mrf.mxu2  ;;  %2118 = vmatpush.msra.mxu1 %v3610_v48  ;;  %v5249_v48 = vld [vmem:[#allocation3 + $0x20] sm:$0xff] }
 0x239   :  { %2119 = vmatpush.msra.mxu1 %v3609_v59  ;;  %v3709_v59 = vld [vmem:[%s6354_s3 + $0x5d8] sm:$0xff] }
 0x23a   :  { %v1404_v14 = vpop.permute.xlu2 %1403 }
 0x23b   :  { %v4982_v60 = vld [vmem:[#allocation3 + $0x38] sm:$0xff]  ;;  %v1712_v18 = vpop.permute.xlu1 %1711  ;;  %2120 = vmatpush.msra.mxu1 %v3608_v24  ;;  %v5287_v24 = vld [vmem:[#allocation3 + $0x40] sm:$0xff] }
 0x23c   :  { %v1616_v55 = vpop.permute.xlu0 %1615  ;;  %1983 = vmatmul.f32.gmra.mxu3 %v4982_v60 }
 0x23d   :  { %1618 = vst.msk [vmem:[#allocation3 + $0x58] sm:$0xff] %vm1123_vm2, %v1616_v55  ;;  %2420 = vmatmul.f32.gmra.mxu2 %v4712_v62  ;;  %v3587_v55 = vld [vmem:[%s6354_s3 + $0x208] sm:$0xff]  ;;  %2121 = vmatpush.msra.mxu1 %v3607_v36  ;;  %v3677_v36 = vld [vmem:[%s6354_s3 + $0x4d8] sm:$0xff] }
 0x23e   :  { %1666 = vst.msk [vmem:[#allocation3 + $0x58] sm:$0xff] %vm1172_vm3, %v4833_v12  ;;  %v4989_v56 = vld [vmem:[#allocation3 + $0x48] sm:$0xff] }
 0x23f   :  { %1714 = vst.msk [vmem:[#allocation3 + $0x58] sm:$0xff] %vm1221_vm4, %v1712_v18  ;;  %1904 = vmatmul.f32.gmra.mxu1 %v4989_v56  ;;  %v3641_v18 = vld [vmem:[%s6354_s3 + $0x3b8] sm:$0xff] }
 0x242   :  { %v1410_v0 = vpop.permute.xlu2 %1409 }
 0x243   :  { %v1718_v32 = vpop.permute.xlu1 %1717 }
 0x244   :  { %v1302_v58 = vpop.permute.xlu0 %1301 }
 0x245   :  { %1304 = vst.msk [vmem:[#allocation3 + $0x68] sm:$0xff] %vm1123_vm2, %v1302_v58  ;;  %2423 = vmatmul.f32.gmra.mxu2 %v4728_v13  ;;  %v3586_v58 = vld [vmem:[%s6354_s3 + $0x200] sm:$0xff] }
 0x246   :  { %1352 = vst.msk [vmem:[#allocation3 + $0x68] sm:$0xff] %vm1172_vm3, %v4855_v63  ;;  %v5000_v12 = vld [vmem:[#allocation3 + $0x58] sm:$0xff]  ;;  %v3648_v63 = vld [vmem:[%s6354_s3 + $0x3f0] sm:$0xff] }
 0x247   :  { %1400 = vst.msk [vmem:[#allocation3 + $0x68] sm:$0xff] %vm1221_vm4, %v1398_v37  ;;  %1986 = vmatmul.f32.gmra.mxu3 %v5000_v12 }
 0x248   :  { %2194 = vmatpush.msra.mxu3 %v3648_v63 }
 0x24a   :  { %2195 = vmatpush.msra.mxu3 %v3647_v27  ;;  %v5149_v27 = vpop.f32.mrf.mxu2 }
 0x24c   :  { %v1622_v9 = vpop.permute.xlu0 %1621 }
 0x24d   :  { %1624 = vst.msk [vmem:[#allocation3 + $0x78] sm:$0xff] %vm1123_vm2, %v1622_v9  ;;  %2426 = vmatmul.f32.gmra.mxu2 %v4751_v38  ;;  %v3790_v9 = vld [vmem:[#allocation3 + $0x70] sm:$0xff] }
 0x24e   :  { %1672 = vst.msk [vmem:[#allocation3 + $0x78] sm:$0xff] %vm1172_vm3, %v4852_v61  ;;  %v5034_v11 = vld [vmem:[#allocation3 + $0x68] sm:$0xff]  ;;  %v3646_v61 = vld [vmem:[%s6354_s3 + $0x3e0] sm:$0xff] }
 0x24f   :  { %1720 = vst.msk [vmem:[#allocation3 + $0x78] sm:$0xff] %vm1221_vm4, %v1718_v32  ;;  %1907 = vmatmul.f32.gmra.mxu1 %v5034_v11  ;;  %2196 = vmatpush.msra.mxu3 %v3646_v61  ;;  %v3606_v61 = vld [vmem:[%s6354_s3 + $0x2a0] sm:$0xff] }
 0x250   :  { %2122 = vmatpush.msra.mxu1 %v3606_v61  ;;  %v3708_v61 = vld [vmem:[%s6354_s3 + $0x5d0] sm:$0xff] }
 0x251   :  { %2197 = vmatpush.msra.mxu3 %v3645_v39 }
 0x252   :  { %v5172_v46 = vpop.f32.mrf.mxu2 }
 0x253   :  { %v1724_v47 = vpop.permute.xlu1 %1723  ;;  %2198 = vmatpush.msra.mxu3 %v3644_v45  ;;  %6363 = vst [vmem:[#allocation9_spill] sm:$0xff] %v5172_v46  ;;  %v3603_v45 = vld [vmem:[%s6354_s3 + $0x288] sm:$0xff] }
 0x254   :  { %v1308_v28 = vpop.permute.xlu0 %1307 }
 0x255   :  { %1310 = vst.msk [vmem:[#allocation3 + $0x88] sm:$0xff] %vm1123_vm2, %v1308_v28  ;;  %2642 = vmatmul.f32.vlgmr.msra.gmra.mxu2 %v3787_v31  ;;  %2199 = vmatpush.msra.mxu3 %v3643_v22  ;;  %v3605_v28 = vld [vmem:[%s6354_s3 + $0x298] sm:$0xff]  ;;  %v3636_v31 = vld [vmem:[%s6354_s3 + $0x390] sm:$0xff] }
 0x256   :  { %1358 = vst.msk [vmem:[#allocation3 + $0x88] sm:$0xff] %vm1172_vm3, %v4868_v7  ;;  %v5065_v19 = vld [vmem:[#allocation3 + $0x78] sm:$0xff]  ;;  %v3592_v7 = vld [vmem:[%s6354_s3 + $0x230] sm:$0xff]  ;;  %2123 = vmatpush.msra.mxu1 %v3605_v28  ;;  %v3713_v22 = vld [vmem:[%s6354_s3 + $0x5f8] sm:$0xff] }
 0x257   :  { %1406 = vst.msk [vmem:[#allocation3 + $0x88] sm:$0xff] %vm1221_vm4, %v1404_v14  ;;  %1989 = vmatmul.f32.gmra.mxu3 %v5065_v19  ;;  %2079 = vmatpush.msra.mxu0 %v3592_v7  ;;  %v3654_v28 = vld [vmem:[%s6354_s3 + $0x420] sm:$0xff] }
 0x259   :  { %2080 = vmatpush.msra.mxu0 %v3591_v34  ;;  %v5218_v34 = vld [vmem:[#allocation3] sm:$0xff] }
 0x25a   :  { %v5195_v14 = vpop.f32.mrf.mxu2 }
 0x25b   :  { %v1730_v40 = vpop.permute.xlu1 %1729  ;;  %2081 = vmatpush.msra.mxu0 %v3590_v49  ;;  %6364 = vst [vmem:[#allocation10_spill] sm:$0xff] %v5195_v14 }
 0x25c   :  { %v1628_v35 = vpop.permute.xlu0 %1627 }
 0x25d   :  { %1630 = vst.msk [vmem:[#allocation3 + $0x98] sm:$0xff] %vm1123_vm2, %v1628_v35  ;;  %2645 = vmatmul.f32.gmra.mxu2 %v3788_v43  ;;  %2082 = vmatpush.msra.mxu0 %v3589_v42  ;;  %v3665_v35 = vld [vmem:[%s6354_s3 + $0x478] sm:$0xff]  ;;  %v3664_v42 = vld [vmem:[%s6354_s3 + $0x470] sm:$0xff] }
 0x25e   :  { %1678 = vst.msk [vmem:[#allocation3 + $0x98] sm:$0xff] %vm1172_vm3, %v4859_v2  ;;  %v5098_v44 = vld [vmem:[#allocation3 + $0x88] sm:$0xff]  ;;  %v3642_v2 = vld [vmem:[%s6354_s3 + $0x3c0] sm:$0xff] }
 0x25f   :  { %1726 = vst.msk [vmem:[#allocation3 + $0x98] sm:$0xff] %vm1221_vm4, %v1724_v47  ;;  %1910 = vmatmul.f32.gmra.mxu1 %v5098_v44  ;;  %2200 = vmatpush.msra.mxu3 %v3642_v2  ;;  %v1416_v47 = vpop.permute.xlu2 %1415  ;;  %v3681_v43 = vld [vmem:[%s6354_s3 + $0x4f8] sm:$0xff] }
 0x260   :  { %2083 = vmatpush.msra.mxu0 %v3588_v3  ;;  %v3680_v3 = vld [vmem:[%s6354_s3 + $0x4f0] sm:$0xff] }
 0x261   :  { %2201 = vmatpush.msra.mxu3 %v3641_v18  ;;  %v3662_v18 = vld [vmem:[%s6354_s3 + $0x460] sm:$0xff] }
 0x262   :  { %2084 = vmatpush.msra.mxu0 %v3587_v55 }
 0x263   :  { %v5125_v52 = vpop.permute.xlu1 %1735  ;;  %2202 = vmatpush.msra.mxu3 %v3640_v1 }
 0x264   :  { %v1314_v37 = vpop.permute.xlu0 %1313  ;;  %2085 = vmatpush.msra.mxu0 %v3586_v58  ;;  %v3661_v58 = vld [vmem:[%s6354_s3 + $0x458] sm:$0xff] }
 0x265   :  { %1316 = vst.msk [vmem:[#allocation3 + $0xa8] sm:$0xff] %vm1123_vm2, %v1314_v37  ;;  %2648 = vmatmul.f32.gmra.mxu2 %v3789_v50  ;;  %v3710_v37 = vld [vmem:[%s6354_s3 + $0x5e0] sm:$0xff] }
 0x266   :  { %1364 = vst.msk [vmem:[#allocation3 + $0xa8] sm:$0xff] %vm1172_vm3, %v4881_v10  ;;  %v5136_v63 = vld [vmem:[#allocation3 + $0x98] sm:$0xff]  ;;  %2307 = vmatpush.msrb.mxu0 %v3665_v35  ;;  %v3678_v50 = vld [vmem:[%s6354_s3 + $0x4e0] sm:$0xff] }
 0x267   :  { %1412 = vst.msk [vmem:[#allocation3 + $0xa8] sm:$0xff] %vm1221_vm4, %v1410_v0  ;;  %1992 = vmatmul.f32.gmra.mxu3 %v5136_v63  ;;  %v3639_v10 = vld [vmem:[%s6354_s3 + $0x3a8] sm:$0xff]  ;;  %v3650_v35 = vld [vmem:[%s6354_s3 + $0x400] sm:$0xff] }
 0x268   :  { %2203 = vmatpush.msra.mxu3 %v3639_v10  ;;  %2308 = vmatpush.msrb.mxu0 %v3664_v42  ;;  %v3659_v0 = vld [vmem:[%s6354_s3 + $0x448] sm:$0xff]  ;;  %v3658_v10 = vld [vmem:[%s6354_s3 + $0x440] sm:$0xff]  ;;  %v3704_v42 = vld [vmem:[%s6354_s3 + $0x5b0] sm:$0xff] }
 0x26a   :  { %2204 = vmatpush.msra.mxu3 %v3638_v21  ;;  %2309 = vmatpush.msrb.mxu0 %v3663_v25  ;;  %v3656_v21 = vld [vmem:[%s6354_s3 + $0x430] sm:$0xff] }
 0x26b   :  { %v5151_v32 = vpop.permute.xlu1 %1741  ;;  %v5367_v25 = vld [vmem:[#allocation3 + $0xa0] sm:$0xff] }
 0x26c   :  { %v1634_v57 = vpop.permute.xlu0 %1633  ;;  %2310 = vmatpush.msrb.mxu0 %v3662_v18  ;;  %v3702_v18 = vld [vmem:[%s6354_s3 + $0x5a0] sm:$0xff] }
 0x26d   :  { %1636 = vst.msk [vmem:[#allocation3 + $0xb8] sm:$0xff] %vm1123_vm2, %v1634_v57  ;;  %2651 = vmatmul.f32.gmra.mxu2 %v3790_v9  ;;  %v3657_v9 = vld [vmem:[%s6354_s3 + $0x438] sm:$0xff] }
 0x26e   :  { %1684 = vst.msk [vmem:[#allocation3 + $0xb8] sm:$0xff] %vm1172_vm3, %v4876_v8  ;;  %v5156_v15 = vld [vmem:[#allocation3 + $0xa8] sm:$0xff]  ;;  %2311 = vmatpush.msrb.mxu0 %v3661_v58 }
 0x26f   :  { %1732 = vst.msk [vmem:[#allocation3 + $0xb8] sm:$0xff] %vm1221_vm4, %v1730_v40  ;;  %1913 = vmatmul.f32.gmra.mxu1 %v5156_v15  ;;  %v3637_v8 = vld [vmem:[%s6354_s3 + $0x398] sm:$0xff]  ;;  %v5224_v40 = vpop.f32.mrf.mxu2 }
 0x270   :  { %2205 = vmatpush.msra.mxu3 %v3637_v8  ;;  %v3676_v8 = vld [vmem:[%s6354_s3 + $0x4d0] sm:$0xff]  ;;  %v3701_v58 = vld [vmem:[%s6354_s3 + $0x598] sm:$0xff] }
 0x272   :  { %2206 = vmatpush.msra.mxu3 %v3636_v31  ;;  %v3707_v31 = vld [vmem:[%s6354_s3 + $0x5c8] sm:$0xff] }
 0x273   :  { %v1262_v23 = vpop.permute.xlu1 %1261 }
 0x274   :  { %v1320_v39 = vpop.permute.xlu0 %1319  ;;  %1264 = vst.msk [vmem:[#allocation3 + $0xe0] sm:$0xff] %vm1221_vm4, %v1262_v23  ;;  %v3655_v23 = vld [vmem:[%s6354_s3 + $0x428] sm:$0xff] }
 0x275   :  { %1322 = vst.msk [vmem:[#allocation3 + $0xc8] sm:$0xff] %vm1123_vm2, %v1320_v39  ;;  %2654 = vmatmul.f32.gmra.mxu2 %v4662_v16  ;;  %v3604_v16 = vld [vmem:[%s6354_s3 + $0x290] sm:$0xff] }
 0x276   :  { %1370 = vst.msk [vmem:[#allocation3 + $0xc8] sm:$0xff] %vm1172_vm3, %v4894_v20  ;;  %v5179_v26 = vld [vmem:[#allocation3 + $0xb8] sm:$0xff]  ;;  %2124 = vmatpush.msra.mxu1 %v3604_v16  ;;  %v5316_v39 = vld [vmem:[#allocation3 + $0x60] sm:$0xff]  ;;  %v3653_v16 = vld [vmem:[%s6354_s3 + $0x418] sm:$0xff] }
 0x277   :  { %1418 = vst.msk [vmem:[#allocation3 + $0xc8] sm:$0xff] %vm1221_vm4, %v1416_v47  ;;  %1995 = vmatmul.f32.gmra.mxu3 %v5179_v26  ;;  %v3635_v20 = vld [vmem:[%s6354_s3 + $0x388] sm:$0xff]  ;;  %v5252_v55 = vpop.f32.mrf.mxu2 }
 0x278   :  { %2207 = vmatpush.msra.mxu3 %v3635_v20  ;;  %2125 = vmatpush.msra.mxu1 %v3603_v45  ;;  %v3675_v20 = vld [vmem:[%s6354_s3 + $0x4c8] sm:$0xff]  ;;  %v3706_v45 = vld [vmem:[%s6354_s3 + $0x5c0] sm:$0xff] }
 0x27a   :  { %2208 = vmatpush.msra.mxu3 %v3634_v33  ;;  %v3674_v33 = vld [vmem:[%s6354_s3 + $0x4c0] sm:$0xff] }
 0x27b   :  { %v5197_v5 = vld [vmem:[#allocation3 + $0xe0] sm:$0xff] }
 0x27c   :  { %v1640_v29 = vpop.permute.xlu0 %1639  ;;  %1878 = vmatmul.f32.gmra.mxu0 %v5197_v5  ;;  %2430 = vmatpush.msrb.mxu3 %v3713_v22  ;;  %v5350_v22 = vld [vmem:[#allocation3 + $0x80] sm:$0xff] }
 0x27d   :  { %1642 = vst.msk [vmem:[#allocation3 + $0xd8] sm:$0xff] %vm1123_vm2, %v1640_v29  ;;  %2657 = vmatmul.f32.gmra.mxu2 %v4712_v62  ;;  %v3602_v62 = vld [vmem:[%s6354_s3 + $0x280] sm:$0xff]  ;;  %v3652_v29 = vld [vmem:[%s6354_s3 + $0x410] sm:$0xff] }
 0x27e   :  { %1690 = vst.msk [vmem:[#allocation3 + $0xd8] sm:$0xff] %vm1172_vm3, %v4891_v17  ;;  %v5204_v7 = vld [vmem:[#allocation3 + $0xc8] sm:$0xff]  ;;  %2126 = vmatpush.msra.mxu1 %v3602_v62 }
 0x27f   :  { %1738 = vst.msk [vmem:[#allocation3 + $0xd8] sm:$0xff] %vm1221_vm4, %v5125_v52  ;;  %1916 = vmatmul.f32.gmra.mxu1 %v5204_v7  ;;  %v3711_v52 = vld [vmem:[%s6354_s3 + $0x5e8] sm:$0xff]  ;;  %v3705_v62 = vld [vmem:[%s6354_s3 + $0x5b8] sm:$0xff] }
 0x280   :  { %2348 = vmatpush.msrb.mxu1 %v3681_v43  ;;  %v3673_v43 = vld [vmem:[%s6354_s3 + $0x4b8] sm:$0xff] }
 0x282   :  { %2349 = vmatpush.msrb.mxu1 %v3680_v3  ;;  %v3703_v3 = vld [vmem:[%s6354_s3 + $0x5a8] sm:$0xff] }
 0x284   :  { %v1326_v17 = vpop.permute.xlu0 %1325  ;;  %2086 = vmatmul.f32.vlgmr.msra.gmra.mxu0 %v5218_v34 }
 0x285   :  { %1328 = vst.msk [vmem:[#allocation3 + $0xe8] sm:$0xff] %vm1123_vm2, %v1326_v17  ;;  %2660 = vmatmul.f32.gmra.mxu2 %v4728_v13  ;;  %v3712_v13 = vld [vmem:[%s6354_s3 + $0x5f0] sm:$0xff]  ;;  %v3651_v17 = vld [vmem:[%s6354_s3 + $0x408] sm:$0xff] }
 0x286   :  { %v5228_v49 = vld [vmem:[#allocation3 + $0xd8] sm:$0xff]  ;;  %2431 = vmatpush.msrb.mxu3 %v3712_v13  ;;  %v3672_v13 = vld [vmem:[%s6354_s3 + $0x4b0] sm:$0xff] }
 0x287   :  { %1998 = vmatmul.f32.gmra.mxu3 %v5228_v49 }
 0x288   :  { %2432 = vmatpush.msrb.mxu3 %v3711_v52  ;;  %v3670_v52 = vld [vmem:[%s6354_s3 + $0x4a0] sm:$0xff] }
 0x28a   :  { %2433 = vmatpush.msrb.mxu3 %v3710_v37  ;;  %v3700_v37 = vld [vmem:[%s6354_s3 + $0x590] sm:$0xff] }
 0x28c   :  { %v1646_v2 = vpop.permute.xlu0 %1645  ;;  %2089 = vmatmul.f32.gmra.mxu0 %v5249_v48  ;;  %2434 = vmatpush.msrb.mxu3 %v3709_v59  ;;  %v3668_v59 = vld [vmem:[%s6354_s3 + $0x490] sm:$0xff] }
 0x28d   :  { %1648 = vst.msk [vmem:[#allocation3 + $0xf8] sm:$0xff] %vm1123_vm2, %v1646_v2  ;;  %2663 = vmatmul.f32.gmra.mxu2 %v4751_v38  ;;  %v3679_v38 = vld [vmem:[%s6354_s3 + $0x4e8] sm:$0xff] }
 0x28e   :  { %1696 = vst.msk [vmem:[#allocation3 + $0xf8] sm:$0xff] %vm1172_vm3, %v4907_v6  ;;  %2350 = vmatpush.msrb.mxu1 %v3679_v38  ;;  %v3660_v6 = vld [vmem:[%s6354_s3 + $0x450] sm:$0xff]  ;;  %2435 = vmatpush.msrb.mxu3 %v3708_v61  ;;  %v3671_v2 = vld [vmem:[%s6354_s3 + $0x4a8] sm:$0xff]  ;;  %v3745_v61 = vld [vmem:[%s6354_s3 + $0x6f8] sm:$0xff] }
 0x28f   :  { %1744 = vst.msk [vmem:[#allocation3 + $0xf8] sm:$0xff] %vm1221_vm4, %v5151_v32  ;;  %2312 = vmatpush.msrb.mxu0 %v3660_v6  ;;  %v1422_v32 = vpop.permute.xlu2 %1421  ;;  %v5387_v38 = vld [vmem:[#allocation3 + $0xc0] sm:$0xff]  ;;  %v3669_v6 = vld [vmem:[%s6354_s3 + $0x498] sm:$0xff] }
 0x290   :  { %2351 = vmatpush.msrb.mxu1 %v3678_v50  ;;  %2436 = vmatpush.msrb.mxu3 %v3707_v31  ;;  %v5398_v50 = vpop.f32.mrf.mxu0  ;;  %v3744_v31 = vld [vmem:[%s6354_s3 + $0x6f0] sm:$0xff] }
 0x291   :  { %2313 = vmatpush.msrb.mxu0 %v3659_v0  ;;  %v3699_v0 = vld [vmem:[%s6354_s3 + $0x588] sm:$0xff] }
 0x292   :  { %2352 = vmatpush.msrb.mxu1 %v3677_v36  ;;  %2437 = vmatpush.msrb.mxu3 %v3706_v45  ;;  %v3725_v45 = vld [vmem:[%s6354_s3 + $0x658] sm:$0xff] }
 0x293   :  { %2314 = vmatpush.msrb.mxu0 %v3658_v10  ;;  %v3698_v10 = vld [vmem:[%s6354_s3 + $0x580] sm:$0xff] }
 0x294   :  { %v1374_v1 = vpop.permute.xlu0 %1373  ;;  %2092 = vmatmul.f32.gmra.mxu0 %v5287_v24  ;;  %2353 = vmatpush.msrb.mxu1 %v3676_v8  ;;  %v3728_v8 = vld [vmem:[%s6354_s3 + $0x670] sm:$0xff] }
 0x295   :  { %1376 = vst.msk [vmem:[#allocation3 + $0xe8] sm:$0xff] %vm1172_vm3, %v1374_v1  ;;  %2315 = vmatpush.msrb.mxu0 %v3657_v9  ;;  %2438 = vmatpush.msrb.mxu3 %v3705_v62  ;;  %v3667_v1 = vld [vmem:[%s6354_s3 + $0x488] sm:$0xff]  ;;  %v3777_v9 = vld [vmem:[%s6354_s3 + $0x7f8] sm:$0xff]  ;;  %v3724_v62 = vld [vmem:[%s6354_s3 + $0x650] sm:$0xff] }
 0x296   :  { %1424 = vst.msk [vmem:[#allocation3 + $0xe8] sm:$0xff] %vm1221_vm4, %v1422_v32  ;;  %v5295_v57 = vld [vmem:[#allocation3 + $0xf8] sm:$0xff]  ;;  %2354 = vmatpush.msrb.mxu1 %v3675_v20  ;;  %v3666_v32 = vld [vmem:[%s6354_s3 + $0x480] sm:$0xff] }
 0x297   :  { %2001 = vmatmul.f32.gmra.mxu3 %v5295_v57  ;;  %2316 = vmatpush.msrb.mxu0 %v3656_v21  ;;  %v3729_v21 = vld [vmem:[%s6354_s3 + $0x678] sm:$0xff]  ;;  %v3726_v20 = vld [vmem:[%s6354_s3 + $0x660] sm:$0xff] }
 0x298   :  { %2355 = vmatpush.msrb.mxu1 %v3674_v33  ;;  %2439 = vmatpush.msrb.mxu3 %v3704_v42  ;;  %v5421_v36 = vpop.f32.mrf.mxu0  ;;  %v3743_v33 = vld [vmem:[%s6354_s3 + $0x6e8] sm:$0xff] }
 0x299   :  { %2317 = vmatpush.msrb.mxu0 %v3655_v23  ;;  %v3776_v23 = vld [vmem:[%s6354_s3 + $0x7f0] sm:$0xff]  ;;  %v3723_v42 = vld [vmem:[%s6354_s3 + $0x648] sm:$0xff] }
 0x29a   :  { %2356 = vmatpush.msrb.mxu1 %v3673_v43  ;;  %2440 = vmatpush.msrb.mxu3 %v3703_v3  ;;  %v3773_v43 = vld [vmem:[%s6354_s3 + $0x7d8] sm:$0xff] }
 0x29b   :  { %2318 = vmatpush.msrb.mxu0 %v3654_v28  ;;  %v3727_v28 = vld [vmem:[%s6354_s3 + $0x668] sm:$0xff]  ;;  %v3721_v3 = vld [vmem:[%s6354_s3 + $0x638] sm:$0xff] }
 0x29c   :  { %2095 = vmatmul.f32.gmra.mxu0 %v5316_v39  ;;  %2357 = vmatpush.msrb.mxu1 %v3672_v13  ;;  %v3722_v13 = vld [vmem:[%s6354_s3 + $0x640] sm:$0xff] }
 0x29d   :  { %v5319_v47 = vld [vmem:[#allocation3 + $0xe8] sm:$0xff]  ;;  %2319 = vmatpush.msrb.mxu0 %v3653_v16  ;;  %2441 = vmatpush.msrb.mxu3 %v3702_v18 }
 0x29e   :  { %1919 = vmatmul.f32.gmra.mxu1 %v5319_v47 }
 0x29f   :  { %2209 = vmatmul.f32.vlgmr.msra.gmra.mxu3 %v4970_v54  ;;  %2320 = vmatpush.msrb.mxu0 %v3652_v29  ;;  %v3775_v29 = vld [vmem:[%s6354_s3 + $0x7e8] sm:$0xff] }
 0x2a0   :  { %2358 = vmatpush.msrb.mxu1 %v3671_v2  ;;  %2442 = vmatpush.msrb.mxu3 %v3701_v58  ;;  %v5445_v16 = vpop.f32.mrf.mxu0  ;;  %v3741_v2 = vld [vmem:[%s6354_s3 + $0x6d8] sm:$0xff]  ;;  %v3772_v58 = vld [vmem:[%s6354_s3 + $0x7d0] sm:$0xff] }
 0x2a1   :  { %2321 = vmatpush.msrb.mxu0 %v3651_v17  ;;  %v3774_v17 = vld [vmem:[%s6354_s3 + $0x7e0] sm:$0xff] }
 0x2a2   :  { %2359 = vmatpush.msrb.mxu1 %v3670_v52  ;;  %2443 = vmatpush.msrb.mxu3 %v3700_v37  ;;  %v3720_v52 = vld [vmem:[%s6354_s3 + $0x630] sm:$0xff] }
 0x2a3   :  { %2322 = vmatpush.msrb.mxu0 %v3650_v35  ;;  %v3742_v35 = vld [vmem:[%s6354_s3 + $0x6e0] sm:$0xff]  ;;  %v3740_v37 = vld [vmem:[%s6354_s3 + $0x6d0] sm:$0xff] }
 0x2a4   :  { %2098 = vmatmul.f32.gmra.mxu0 %v5350_v22  ;;  %2360 = vmatpush.msrb.mxu1 %v3669_v6  ;;  %v3719_v6 = vld [vmem:[%s6354_s3 + $0x628] sm:$0xff] }
 0x2a5   :  { %2444 = vmatpush.msrb.mxu3 %v3699_v0  ;;  %2544 = vmatpush.msra.mxu0 %v3729_v21  ;;  %v3771_v0 = vld [vmem:[%s6354_s3 + $0x7c8] sm:$0xff]  ;;  %v3770_v21 = vld [vmem:[%s6354_s3 + $0x7c0] sm:$0xff] }
 0x2a6   :  { %2127 = vmatmul.f32.vlgmr.msra.gmra.mxu1 %v4934_v30 }
 0x2a7   :  { %2212 = vmatmul.f32.gmra.mxu3 %v4982_v60  ;;  %2361 = vmatpush.msrb.mxu1 %v3668_v59  ;;  %v3718_v59 = vld [vmem:[%s6354_s3 + $0x620] sm:$0xff] }
 0x2a8   :  { %2445 = vmatpush.msrb.mxu3 %v3698_v10  ;;  %2545 = vmatpush.msra.mxu0 %v3728_v8  ;;  %v5487_v18 = vpop.f32.mrf.mxu0  ;;  %v3739_v10 = vld [vmem:[%s6354_s3 + $0x6c8] sm:$0xff]  ;;  %v5527_v8 = vpop.f32.mrf.mxu1 }
 0x2a9   :  { %2362 = vmatpush.msrb.mxu1 %v3667_v1  ;;  %v3717_v1 = vld [vmem:[%s6354_s3 + $0x618] sm:$0xff] }
 0x2aa   :  { %2667 = vmatpush.msra.mxu3 %v3777_v9  ;;  %2546 = vmatpush.msra.mxu0 %v3727_v28  ;;  %v3716_v9 = vld [vmem:[%s6354_s3 + $0x610] sm:$0xff]  ;;  %v3715_v28 = vld [vmem:[%s6354_s3 + $0x608] sm:$0xff] }
 0x2ab   :  { %2363 = vmatpush.msrb.mxu1 %v3666_v32 }
 0x2ac   :  { %2101 = vmatmul.f32.gmra.mxu0 %v5367_v25  ;;  %2668 = vmatpush.msra.mxu3 %v3776_v23  ;;  %v3738_v23 = vld [vmem:[%s6354_s3 + $0x6c0] sm:$0xff] }
 0x2ad   :  { %2585 = vmatpush.msra.mxu1 %v3745_v61  ;;  %2547 = vmatpush.msra.mxu0 %v3726_v20  ;;  %v3714_v20 = vld [vmem:[%s6354_s3 + $0x600] sm:$0xff] }
 0x2ae   :  { %2130 = vmatmul.f32.gmra.mxu1 %v4958_v41  ;;  %2669 = vmatpush.msra.mxu3 %v3775_v29  ;;  %v3737_v29 = vld [vmem:[%s6354_s3 + $0x6b8] sm:$0xff] }
 0x2af   :  { %2215 = vmatmul.f32.gmra.mxu3 %v5000_v12  ;;  %2586 = vmatpush.msra.mxu1 %v3744_v31  ;;  %v3769_v31 = vld [vmem:[%s6354_s3 + $0x7b8] sm:$0xff] }
 0x2b0   :  { %2548 = vmatpush.msra.mxu0 %v3725_v45  ;;  %2670 = vmatpush.msra.mxu3 %v3774_v17  ;;  %v5525_v61 = vpop.f32.mrf.mxu0  ;;  %v3768_v45 = vld [vmem:[%s6354_s3 + $0x7b0] sm:$0xff]  ;;  %v5554_v17 = vpop.f32.mrf.mxu1 }
 0x2b1   :  { %2587 = vmatpush.msra.mxu1 %v3743_v33 }
 0x2b2   :  { %2549 = vmatpush.msra.mxu0 %v3724_v62  ;;  %2671 = vmatpush.msra.mxu3 %v3773_v43  ;;  %v3735_v43 = vld [vmem:[%s6354_s3 + $0x6a8] sm:$0xff] }
 0x2b3   :  { %2588 = vmatpush.msra.mxu1 %v3742_v35  ;;  %v3767_v35 = vld [vmem:[%s6354_s3 + $0x7a8] sm:$0xff] }
 0x2b4   :  { %2104 = vmatmul.f32.gmra.mxu0 %v5387_v38  ;;  %2672 = vmatpush.msra.mxu3 %v3772_v58  ;;  %v3733_v58 = vld [vmem:[%s6354_s3 + $0x698] sm:$0xff] }
 0x2b5   :  { %2550 = vmatpush.msra.mxu0 %v3723_v42  ;;  %2589 = vmatpush.msra.mxu1 %v3741_v2  ;;  %v3766_v42 = vld [vmem:[%s6354_s3 + $0x7a0] sm:$0xff] }
 0x2b6   :  { %2133 = vmatmul.f32.gmra.mxu1 %v4989_v56  ;;  %2673 = vmatpush.msra.mxu3 %v3771_v0 }
 0x2b7   :  { %2218 = vmatmul.f32.gmra.mxu3 %v5065_v19  ;;  %2551 = vmatpush.msra.mxu0 %v3722_v13  ;;  %v5517_v32 = vpop.f32.mrf.mxu3 }
 0x2b8   :  { %2590 = vmatpush.msra.mxu1 %v3740_v37  ;;  %2674 = vmatpush.msra.mxu3 %v3770_v21  ;;  %v5550_v33 = vpop.f32.mrf.mxu0  ;;  %v3764_v37 = vld [vmem:[%s6354_s3 + $0x790] sm:$0xff]  ;;  %v3731_v21 = vld [vmem:[%s6354_s3 + $0x688] sm:$0xff] }
 0x2b9   :  { %2552 = vmatpush.msra.mxu0 %v3721_v3  ;;  %6365 = vst [vmem:[#allocation11_spill] sm:$0xff] %v5550_v33  ;;  %v3734_v3 = vld [vmem:[%s6354_s3 + $0x6a0] sm:$0xff] }
 0x2ba   :  { %2591 = vmatpush.msra.mxu1 %v3739_v10  ;;  %2675 = vmatpush.msra.mxu3 %v3769_v31 }
 0x2bb   :  { %2553 = vmatpush.msra.mxu0 %v3720_v52 }
 0x2bc   :  { %2107 = vmatmul.f32.gmra.mxu0 %v5197_v5  ;;  %2592 = vmatpush.msra.mxu1 %v3738_v23  ;;  %v5581_v52 = vpop.f32.mrf.mxu1  ;;  %v3762_v23 = vld [vmem:[%s6354_s3 + $0x780] sm:$0xff] }
 0x2bd   :  { %2554 = vmatpush.msra.mxu0 %v3719_v6  ;;  %2676 = vmatpush.msra.mxu3 %v3768_v45  ;;  %v5588_v6 = vpop.f32.mrf.mxu2 }
 0x2be   :  { %2136 = vmatmul.f32.gmra.mxu1 %v5034_v11 }
 0x2bf   :  { %2221 = vmatmul.f32.gmra.mxu3 %v5136_v63  ;;  %2555 = vmatpush.msra.mxu0 %v3718_v59  ;;  %v5552_v62 = vpop.f32.mrf.mxu3 }
 0x2c0   :  { %2593 = vmatpush.msra.mxu1 %v3737_v29  ;;  %2677 = vmatpush.msra.mxu3 %v3767_v35  ;;  %v5571_v13 = vpop.f32.mrf.mxu0  ;;  %v3730_v29 = vld [vmem:[%s6354_s3 + $0x680] sm:$0xff] }
 0x2c1   :  { %2556 = vmatpush.msra.mxu0 %v3717_v1  ;;  %v3732_v1 = vld [vmem:[%s6354_s3 + $0x690] sm:$0xff] }
 0x2c2   :  { %2678 = vmatpush.msra.mxu3 %v3766_v42 }
 0x2c3   :  { %2557 = vmatpush.msra.mxu0 %v3716_v9  ;;  %v3763_v9 = vld [vmem:[%s6354_s3 + $0x788] sm:$0xff] }
 0x2c4   :  { %2323 = vmatmul.f32.vlgmr.msrb.gmra.mxu0 %v5218_v34 }
 0x2c5   :  { %2558 = vmatpush.msra.mxu0 %v3715_v28  ;;  %v5613_v28 = vpop.f32.mrf.mxu2 }
 0x2c6   :  { %2139 = vmatmul.f32.gmra.mxu1 %v5098_v44 }
 0x2c7   :  { %2224 = vmatmul.f32.gmra.mxu3 %v5179_v26  ;;  %2559 = vmatpush.msra.mxu0 %v3714_v20 }
 0x2ca   :  { %v5579_v2 = vpop.f32.mrf.mxu3 }
 0x2cc   :  { %2326 = vmatmul.f32.gmra.mxu0 %v5249_v48  ;;  %v5599_v10 = vpop.f32.mrf.mxu1 }
 0x2ce   :  { %2142 = vmatmul.f32.gmra.mxu1 %v5156_v15 }
 0x2cf   :  { %2227 = vmatmul.f32.gmra.mxu3 %v5228_v49 }
 0x2d4   :  { %2329 = vmatmul.f32.gmra.mxu0 %v5287_v24 }
 0x2d6   :  { %2145 = vmatmul.f32.gmra.mxu1 %v5204_v7 }
 0x2d7   :  { %2230 = vmatmul.f32.gmra.mxu3 %v5295_v57 }
 0x2da   :  { %v5594_v0 = vpop.f32.mrf.mxu3 }
 0x2dc   :  { %2332 = vmatmul.f32.gmra.mxu0 %v5316_v39  ;;  %v5622_v45 = vpop.f32.mrf.mxu1 }
 0x2dd   :  { %6367 = vst [vmem:[#allocation13_spill] sm:$0xff] %v5622_v45 }
 0x2de   :  { %2148 = vmatmul.f32.gmra.mxu1 %v5319_v47 }
 0x2df   :  { %2446 = vmatmul.f32.vlgmr.msrb.gmra.mxu3 %v4970_v54 }
 0x2e4   :  { %2335 = vmatmul.f32.gmra.mxu0 %v5350_v22 }
 0x2e6   :  { %2364 = vmatmul.f32.vlgmr.msrb.gmra.mxu1 %v4934_v30  ;;  %v3736_v30 = vld [vmem:[%s6354_s3 + $0x6b0] sm:$0xff] }
 0x2e7   :  { %2449 = vmatmul.f32.gmra.mxu3 %v4982_v60  ;;  %2594 = vmatpush.msra.mxu1 %v3736_v30 }
 0x2e9   :  { %2595 = vmatpush.msra.mxu1 %v3735_v43  ;;  %v2175_v43 = vpop.f32.mrf.mxu2 }
 0x2ea   :  { %v5617_v20 = vpop.f32.mrf.mxu3 }
 0x2eb   :  { %2596 = vmatpush.msra.mxu1 %v3734_v3  ;;  %6366 = vst [vmem:[#allocation12_spill] sm:$0xff] %v5617_v20 }
 0x2ec   :  { %2338 = vmatmul.f32.gmra.mxu0 %v5367_v25  ;;  %v5631_v42 = vpop.f32.mrf.mxu1 }
 0x2ed   :  { %2597 = vmatpush.msra.mxu1 %v3733_v58  ;;  %6369 = vst [vmem:[#allocation15_spill] sm:$0xff] %v5631_v42  ;;  %v3798_v42 = vld [vmem:[#allocation3 + $0x8] sm:$0xff] }
 0x2ee   :  { %2367 = vmatmul.f32.gmra.mxu1 %v4958_v41  ;;  %v3765_v41 = vld [vmem:[%s6354_s3 + $0x798] sm:$0xff] }
 0x2ef   :  { %2452 = vmatmul.f32.gmra.mxu3 %v5000_v12  ;;  %2598 = vmatpush.msra.mxu1 %v3732_v1 }
 0x2f0   :  { %2679 = vmatpush.msra.mxu3 %v3765_v41 }
 0x2f1   :  { %2599 = vmatpush.msra.mxu1 %v3731_v21  ;;  %v2178_v58 = vpop.f32.mrf.mxu2 }
 0x2f2   :  { %2680 = vmatpush.msra.mxu3 %v3764_v37 }
 0x2f3   :  { %2600 = vmatpush.msra.mxu1 %v3730_v29 }
 0x2f4   :  { %2341 = vmatmul.f32.gmra.mxu0 %v5387_v38  ;;  %2681 = vmatpush.msra.mxu3 %v3763_v9 }
 0x2f6   :  { %2370 = vmatmul.f32.gmra.mxu1 %v4989_v56  ;;  %2682 = vmatpush.msra.mxu3 %v3762_v23 }
 0x2f7   :  { %2455 = vmatmul.f32.gmra.mxu3 %v5065_v19 }
 0x2f9   :  { %v1879_v59 = vpop.f32.mrf.mxu0  ;;  %v2181_v23 = vpop.f32.mrf.mxu2 }
 0x2fa   :  { %v5629_v35 = vpop.f32.mrf.mxu3 }
 0x2fb   :  { %6368 = vst [vmem:[#allocation14_spill] sm:$0xff] %v5629_v35 }
 0x2fc   :  { %2344 = vmatmul.f32.gmra.mxu0 %v5197_v5 }
 0x2fe   :  { %2373 = vmatmul.f32.gmra.mxu1 %v5034_v11 }
 0x2ff   :  { %2458 = vmatmul.f32.gmra.mxu3 %v5136_v63 }
 0x301   :  { %v5615_v31 = vpop.f32.mrf.mxu0 }
 0x304   :  { %2560 = vmatmul.f32.vlgmr.msra.gmra.mxu0 %v5218_v34  ;;  %v5638_v34 = vpop.f32.mrf.mxu1 }
 0x306   :  { %2376 = vmatmul.f32.gmra.mxu1 %v5098_v44 }
 0x307   :  { %2461 = vmatmul.f32.gmra.mxu3 %v5179_v26 }
 0x309   :  { %v5627_v30 = vpop.f32.mrf.mxu0 }
 0x30a   :  { %v5636_v41 = vpop.f32.mrf.mxu3 }
 0x30c   :  { %2563 = vmatmul.f32.gmra.mxu0 %v5249_v48 }
 0x30e   :  { %2379 = vmatmul.f32.gmra.mxu1 %v5156_v15 }
 0x30f   :  { %2464 = vmatmul.f32.gmra.mxu3 %v5228_v49 }
 0x311   :  { %v2093_v3 = vpop.f32.mrf.mxu0 }
 0x314   :  { %2566 = vmatmul.f32.gmra.mxu0 %v5287_v24 }
 0x316   :  { %2382 = vmatmul.f32.gmra.mxu1 %v5204_v7 }
 0x317   :  { %2467 = vmatmul.f32.gmra.mxu3 %v5295_v57 }
 0x319   :  { %v2096_v37 = vpop.f32.mrf.mxu0 }
 0x31a   :  { %v2002_v1 = vpop.f32.mrf.mxu3 }
 0x31b   :  { %v1920_v9 = vpop.f32.mrf.mxu1 }
 0x31c   :  { %v1921_v48 = vadd.f32 %v1920_v9, %v1879_v59  ;;  %2569 = vmatmul.f32.gmra.mxu0 %v5316_v39  ;;  %v2184_v39 = vpop.f32.mrf.mxu2 }
 0x31e   :  { %v1962_v21 = vadd.f32 %v5252_v55, %v1921_v48  ;;  %2385 = vmatmul.f32.gmra.mxu1 %v5319_v47 }
 0x31f   :  { %2683 = vmatmul.f32.vlgmr.msra.gmra.mxu3 %v4970_v54  ;;  %v3799_v54 = vld [vmem:[#allocation3 + $0x28] sm:$0xff] }
 0x320   :  { %v5647_v29 = vadd.f32 %v2002_v1, %v1962_v21 }
 0x321   :  { %v2099_v24 = vpop.f32.mrf.mxu0 }
 0x322   :  { %6370 = vst [vmem:[#allocation16_spill] sm:$0xff] %v5647_v29  ;;  %v5649_v35 = vpop.f32.mrf.mxu3 }
 0x323   :  { %v5651_v14 = vpop.f32.mrf.mxu1 }
 0x324   :  { %2572 = vmatmul.f32.gmra.mxu0 %v5350_v22  ;;  %v2187_v21 = vpop.f32.mrf.mxu2  ;;  %v2129_v29 = vadd.f32 %v5651_v14, %v5615_v31 }
 0x326   :  { %2601 = vmatmul.f32.vlgmr.msra.gmra.mxu1 %v3798_v42 }
 0x327   :  { %2686 = vmatmul.f32.gmra.mxu3 %v4982_v60 }
 0x329   :  { %v2102_v55 = vpop.f32.mrf.mxu0 }
 0x32a   :  { %v5655_v59 = vpop.f32.mrf.mxu3 }
 0x32b   :  { %v5657_v9 = vpop.f32.mrf.mxu1 }
 0x32c   :  { %2575 = vmatmul.f32.gmra.mxu0 %v5367_v25  ;;  %v2132_v14 = vadd.f32 %v5657_v9, %v5627_v30  ;;  %v5770_v30 = vld [vmem:[%s6355_s4] ss:$0 sm:$0xff] }
 0x32e   :  { %2604 = vmatmul.f32.gmra.mxu1 %v3799_v54 }
 0x32f   :  { %2689 = vmatmul.f32.gmra.mxu3 %v5000_v12  ;;  %v2190_v12 = vpop.f32.mrf.mxu2 }
 0x331   :  { %v2105_v1 = vpop.f32.mrf.mxu0 }
 0x332   :  { %v2216_v48 = vpop.f32.mrf.mxu3 }
 0x333   :  { %v2134_v22 = vpop.f32.mrf.mxu1 }
 0x334   :  { %v2135_v33 = vadd.f32 %v2134_v22, %v2093_v3  ;;  %2578 = vmatmul.f32.gmra.mxu0 %v5387_v38 }
 0x336   :  { %v2176_v60 = vadd.f32 %v2175_v43, %v2135_v33  ;;  %2607 = vmatmul.f32.gmra.mxu1 %v4989_v56 }
 0x337   :  { %2692 = vmatmul.f32.gmra.mxu3 %v5065_v19 }
 0x338   :  { %v5664_v42 = vadd.f32 %v2216_v48, %v2176_v60  ;;  %v5674_v48 = vpop.f32.mrf.mxu2 }
 0x339   :  { %v2108_v25 = vpop.f32.mrf.mxu0 }
 0x33a   :  { %v2219_v20 = vpop.f32.mrf.mxu3 }
 0x33b   :  { %v2137_v46 = vpop.f32.mrf.mxu1 }
 0x33c   :  { %v2138_v54 = vadd.f32 %v2137_v46, %v2096_v37  ;;  %2581 = vmatmul.f32.gmra.mxu0 %v5197_v5 }
 0x33e   :  { %v2179_v45 = vadd.f32 %v2178_v58, %v2138_v54  ;;  %2610 = vmatmul.f32.gmra.mxu1 %v5034_v11 }
 0x33f   :  { %2695 = vmatmul.f32.gmra.mxu3 %v5136_v63 }
 0x340   :  { %v5669_v38 = vadd.f32 %v2219_v20, %v2179_v45  ;;  %v5685_v37 = vpop.f32.mrf.mxu2 }
 0x341   :  { %v5671_v19 = vpop.f32.mrf.mxu0 }
 0x342   :  { %v2222_v33 = vpop.f32.mrf.mxu3 }
 0x343   :  { %v2140_v56 = vpop.f32.mrf.mxu1 }
 0x344   :  { %v2141_v43 = vadd.f32 %v2140_v56, %v2099_v24 }
 0x346   :  { %v2182_v3 = vadd.f32 %v2181_v23, %v2141_v43  ;;  %2613 = vmatmul.f32.gmra.mxu1 %v5098_v44  ;;  %v1918_v44 = vadd.f32 %v5638_v34, %v5571_v13 }
 0x347   :  { %2698 = vmatmul.f32.gmra.mxu3 %v5179_v26 }
 0x348   :  { %v5677_v46 = vadd.f32 %v2222_v33, %v2182_v3  ;;  %v1959_v22 = vadd.f32 %v5224_v40, %v1918_v44  ;;  %v5701_v60 = vpop.f32.mrf.mxu2 }
 0x349   :  { %v5680_v20 = vpop.f32.mrf.mxu0 }
 0x34a   :  { %v2225_v5 = vpop.f32.mrf.mxu3 }
 0x34b   :  { %v2143_v11 = vpop.f32.mrf.mxu1 }
 0x34c   :  { %v2144_v58 = vadd.f32 %v2143_v11, %v2102_v55 }
 0x34e   :  { %v2185_v63 = vadd.f32 %v2184_v39, %v2144_v58  ;;  %2616 = vmatmul.f32.gmra.mxu1 %v5156_v15  ;;  %v5693_v15 = vadd.f32 %v5636_v41, %v1959_v22 }
 0x34f   :  { %2701 = vmatmul.f32.gmra.mxu3 %v5228_v49 }
 0x350   :  { %v5683_v45 = vadd.f32 %v2225_v5, %v2185_v63  ;;  %6372 = vst [vmem:[#allocation18_spill] sm:$0xff] %v5693_v15  ;;  %v5710_v56 = vpop.f32.mrf.mxu2 }
 0x351   :  { %v5697_v39 = vpop.f32.mrf.mxu0 }
 0x352   :  { %6371 = vst [vmem:[#allocation17_spill] sm:$0xff] %v5683_v45  ;;  %v2228_v26 = vpop.f32.mrf.mxu3 }
 0x353   :  { %v2146_v23 = vpop.f32.mrf.mxu1 }
 0x354   :  { %v2147_v24 = vadd.f32 %v2146_v23, %v2105_v1 }
 0x356   :  { %v2188_v55 = vadd.f32 %v2187_v21, %v2147_v24  ;;  %2619 = vmatmul.f32.gmra.mxu1 %v5204_v7 }
 0x357   :  { %2704 = vmatmul.f32.gmra.mxu3 %v5295_v57 }
 0x358   :  { %v5695_v49 = vadd.f32 %v2228_v26, %v2188_v55  ;;  %v5714_v11 = vpop.f32.mrf.mxu2 }
 0x359   :  { %v5708_v54 = vpop.f32.mrf.mxu0 }
 0x35a   :  { %6373 = vst [vmem:[#allocation19_spill] sm:$0xff] %v5695_v49  ;;  %v2231_v34 = vpop.f32.mrf.mxu3 }
 0x35b   :  { %v2149_v1 = vpop.f32.mrf.mxu1 }
 0x35c   :  { %v2150_v40 = vadd.f32 %v2149_v1, %v2108_v25 }
 0x35e   :  { %v2191_v21 = vadd.f32 %v2190_v12, %v2150_v40  ;;  %2622 = vmatmul.f32.gmra.mxu1 %v5319_v47 }
 0x360   :  { %v5704_v7 = vadd.f32 %v2231_v34, %v2191_v21  ;;  %v5720_v58 = vpop.f32.mrf.mxu2 }
 0x361   :  { %v5712_v5 = vpop.f32.mrf.mxu0 }
 0x362   :  { %6374 = vst [vmem:[#allocation20_spill] sm:$0xff] %v5704_v7  ;;  %v2447_v41 = vpop.f32.mrf.mxu3 }
 0x363   :  { %v2365_v33 = vpop.f32.mrf.mxu1 }
 0x368   :  { %v5730_v24 = vpop.f32.mrf.mxu2 }
 0x369   :  { %v5718_v12 = vpop.f32.mrf.mxu0  ;;  %6376 = vst [vmem:[#allocation22_spill] sm:$0xff] %v5730_v24  ;;  %v2366_v24 = vadd.f32 %v2365_v33, %v5671_v19 }
 0x36a   :  { %v2450_v43 = vpop.f32.mrf.mxu3 }
 0x36b   :  { %v2368_v3 = vpop.f32.mrf.mxu1 }
 0x370   :  { %v5740_v40 = vpop.f32.mrf.mxu2 }
 0x371   :  { %v5726_v26 = vpop.f32.mrf.mxu0  ;;  %6379 = vst [vmem:[#allocation25_spill] sm:$0xff] %v5740_v40  ;;  %v2170_v40 = vadd.f32 %v5588_v6, %v2129_v29  ;;  %v1903_v6 = vadd.f32 %v5554_v17, %v5421_v36 }
 0x372   :  { %v5716_v25 = vpop.f32.mrf.mxu3  ;;  %6375 = vst [vmem:[#allocation21_spill] sm:$0xff] %v5726_v26 }
 0x373   :  { %v2371_v47 = vpop.f32.mrf.mxu1 }
 0x378   :  { %v2643_v7 = vpop.f32.mrf.mxu2 }
 0x379   :  { %v5736_v34 = vpop.f32.mrf.mxu0 }
 0x37a   :  { %v5722_v63 = vpop.f32.mrf.mxu3  ;;  %6378 = vst [vmem:[#allocation24_spill] sm:$0xff] %v5736_v34  ;;  %v1900_v34 = vadd.f32 %v5527_v8, %v5398_v50  ;;  %v2369_v50 = vadd.f32 %v2368_v3, %v5680_v20 }
 0x37b   :  { %v5724_v44 = vpop.f32.mrf.mxu1 }
 0x37c   :  { %v1941_v26 = vadd.f32 %v5028_v53, %v1900_v34 }
 0x37e   :  { %v1982_v19 = vadd.f32 %v5517_v32, %v1941_v26  ;;  %v1944_v32 = vadd.f32 %v5067_v4, %v1903_v6  ;;  %v1906_v26 = vadd.f32 %v5581_v52, %v5445_v16  ;;  %v2375_v16 = vadd.f32 %v5724_v44, %v5708_v54 }
 0x380   :  { %v1985_v17 = vadd.f32 %v5552_v62, %v1944_v32 }
 0x381   :  { %v2561_v13 = vpop.f32.mrf.mxu0 }
 0x382   :  { %v5728_v23 = vpop.f32.mrf.mxu3 }
 0x383   :  { %v5732_v22 = vpop.f32.mrf.mxu1 }
 0x389   :  { %v2564_v45 = vpop.f32.mrf.mxu0 }
 0x38a   :  { %v5734_v55 = vpop.f32.mrf.mxu3 }
 0x38b   :  { %6377 = vst [vmem:[#allocation23_spill] sm:$0xff] %v5734_v55  ;;  %v5738_v1 = vpop.f32.mrf.mxu1  ;;  %v2211_v55 = vadd.f32 %v5649_v35, %v2170_v40  ;;  %v2410_v35 = vadd.f32 %v5685_v37, %v2369_v50  ;;  %v2372_v37 = vadd.f32 %v2371_v47, %v5697_v39 }
 0x38d   :  { %v2234_v29 = vmax.f32 %v1982_v19, %v2211_v55 }
 0x391   :  { %v2567_v9 = vpop.f32.mrf.mxu0 }
 0x392   :  { %v5742_v21 = vpop.f32.mrf.mxu3 }
 0x393   :  { %6380 = vst [vmem:[#allocation26_spill] sm:$0xff] %v5742_v21  ;;  %v5744_v57 = vpop.f32.mrf.mxu1  ;;  %v2407_v21 = vadd.f32 %v5674_v48, %v2366_v24  ;;  %v2173_v48 = vadd.f32 %v5613_v28, %v2132_v14  ;;  %v1947_v14 = vadd.f32 %v5117_v51, %v1906_v26 }
 0x394   :  { %6381 = vst [vmem:[#allocation27_spill] sm:$0xff] %v5744_v57  ;;  %v2646_v57 = vpop.f32.mrf.mxu2 }
 0x395   :  { %v2448_v33 = vadd.f32 %v2447_v41, %v2407_v21  ;;  %v2214_v20 = vadd.f32 %v5655_v59, %v2173_v48  ;;  %v2413_v59 = vadd.f32 %v5701_v60, %v2372_v37  ;;  %v1988_v39 = vadd.f32 %v5579_v2, %v1947_v14 }
 0x396   :  { %v1909_v60 = vadd.f32 %v5599_v10, %v5487_v18 }
 0x397   :  { %v2471_v24 = vmax.f32 %v2234_v29, %v2448_v33  ;;  %v2235_v55 = vmax.f32 %v1985_v17, %v2214_v20  ;;  %v2454_v19 = vadd.f32 %v5716_v25, %v2413_v59  ;;  %v2236_v51 = vmax.f32 %v1988_v39, %v5664_v42 }
 0x398   :  { %v2416_v25 = vadd.f32 %v5710_v56, %v2375_v16  ;;  %v1950_v18 = vadd.f32 %v5149_v27, %v1909_v60  ;;  %v2381_v59 = vadd.f32 %v5738_v1, %v5718_v12  ;;  %v6388_v1 = vld [vmem:[#allocation10_spill] sm:$0xff] }
 0x399   :  { %v2570_v47 = vpop.f32.mrf.mxu0  ;;  %v2473_v48 = vmax.f32 %v2236_v51, %v2454_v19 }
 0x39a   :  { %v5748_v49 = vpop.f32.mrf.mxu3 }
 0x39b   :  { %6382 = vst [vmem:[#allocation28_spill] sm:$0xff] %v5748_v49  ;;  %v5750_v15 = vpop.f32.mrf.mxu1 }
 0x39c   :  { %v2649_v28 = vpop.f32.mrf.mxu2 }
 0x3a2   :  { %v2684_v31 = vpop.f32.mrf.mxu3 }
 0x3a3   :  { %v2602_v49 = vpop.f32.mrf.mxu1 }
 0x3a4   :  { %v2603_v8 = vadd.f32 %v2602_v49, %v2561_v13  ;;  %v2652_v33 = vpop.f32.mrf.mxu2 }
 0x3a6   :  { %v2644_v53 = vadd.f32 %v2643_v7, %v2603_v8  ;;  %v2451_v7 = vadd.f32 %v2450_v43, %v2410_v35  ;;  %v2457_v35 = vadd.f32 %v5722_v63, %v2416_v25  ;;  %v6390_v25 = vld [vmem:[#allocation23_spill] sm:$0xff] }
 0x3a8   :  { %v2685_v34 = vadd.f32 %v2684_v31, %v2644_v53  ;;  %v2472_v21 = vmax.f32 %v2235_v55, %v2451_v7 }
 0x3aa   :  { %v2708_v49 = vmax.f32 %v2471_v24, %v2685_v34  ;;  %v2687_v36 = vpop.f32.mrf.mxu3  ;;  %v1991_v24 = vadd.f32 %v5594_v0, %v1950_v18  ;;  %v2378_v34 = vadd.f32 %v5732_v22, %v5712_v5  ;;  %v6391_v18 = vld [vmem:[#allocation21_spill] sm:$0xff] }
 0x3ab   :  { %v2605_v13 = vpop.f32.mrf.mxu1 }
 0x3ac   :  { %v2720_v41 = vadd.f32 %v5770_v30, %v2708_v49  ;;  %v2606_v3 = vadd.f32 %v2605_v13, %v2564_v45  ;;  %v2573_v49 = vpop.f32.mrf.mxu0  ;;  %v2655_v0 = vpop.f32.mrf.mxu2  ;;  %v2419_v63 = vadd.f32 %v5714_v11, %v2378_v34 }
 0x3ae   :  { %v2728_v4 = vmax.f32 %v2720_v41, 0.0  ;;  %v2647_v40 = vadd.f32 %v2646_v57, %v2606_v3 }
 0x3b0   :  { %2736 = vst.msk [vmem:[#allocation4] sm:$0xff] %vm1056_vm1, %v2728_v4  ;;  %v2688_v62 = vadd.f32 %v2687_v36, %v2647_v40  ;;  %v2237_v36 = vmax.f32 %v1991_v24, %v5669_v38  ;;  %v6385_v4 = vld [vmem:[#allocation12_spill] sm:$0xff]  ;;  %v6393_v24 = vld [vmem:[#allocation17_spill] sm:$0xff] }
 0x3b2   :  { %v2709_v43 = vmax.f32 %v2472_v21, %v2688_v62  ;;  %v2690_v31 = vpop.f32.mrf.mxu3  ;;  %v2474_v37 = vmax.f32 %v2237_v36, %v2457_v35  ;;  %v2460_v21 = vadd.f32 %v5728_v23, %v2419_v63 }
 0x3b3   :  { %v2608_v45 = vpop.f32.mrf.mxu1 }
 0x3b4   :  { %v2721_v52 = vadd.f32 %v5770_v30, %v2709_v43  ;;  %v2609_v57 = vadd.f32 %v2608_v45, %v2567_v9  ;;  %v6383_v9 = vld [vmem:[#allocation13_spill] sm:$0xff]  ;;  %v6386_v43 = vld [vmem:[#allocation11_spill] sm:$0xff]  ;;  %v2576_v16 = vpop.f32.mrf.mxu0 }
 0x3b5   :  { %v1912_v20 = vadd.f32 %v6383_v9, %v5525_v61  ;;  %v6384_v61 = vld [vmem:[#allocation9_spill] sm:$0xff] }
 0x3b6   :  { %v2729_v50 = vmax.f32 %v2721_v52, 0.0  ;;  %v2650_v8 = vadd.f32 %v2649_v28, %v2609_v57 }
 0x3b7   :  { %v2770_v2 = vld [vmem:[#allocation4 + $0x5] sm:$0x1]  ;;  %v2754_v6 = vld [vmem:[#allocation4 + $0x2] sm:$0x1]  ;;  %v2747_v29 = vld [vmem:[#allocation4 + $0x1] sm:$0x1]  ;;  %v1953_v41 = vadd.f32 %v6384_v61, %v1912_v20 }
 0x3b8   :  { %2737 = vst.msk [vmem:[#allocation4 + $0x8] sm:$0xff] %vm1056_vm1, %v2729_v50  ;;  %v2691_v54 = vadd.f32 %v2690_v31, %v2650_v8  ;;  %2772 = vrot.lane.b32.xlu1 %v2770_v2, %s3828_s21  ;;  %2756 = vrot.lane.b32.xlu2 %v2754_v6, %s3826_s11  ;;  %v2768_v10 = vld [vmem:[#allocation4 + $0x4] sm:$0x1]  ;;  %v2744_v42 = vld [vmem:[#allocation4] sm:$0x1]  ;;  %v2658_v50 = vpop.f32.mrf.mxu2  ;;  %v6396_v61 = vld [vmem:[#allocation24_spill] sm:$0xff] }
 0x3b9   :  { %2749 = vrot.lane.b32.xlu0 %v2747_v29, %s3828_s21  ;;  %2769 = vst.msk [vmem:[#allocation5 + $0x2] sm:$0x1] %vm2745_vm5, %v2768_v10  ;;  %v2761_v13 = vld [vmem:[#allocation4 + $0x3] sm:$0x1]  ;;  %v2782_v7 = vld [vmem:[#allocation4 + $0x7] sm:$0x1]  ;;  %v1994_v11 = vadd.f32 %v6385_v4, %v1953_v41  ;;  %v2387_v41 = vadd.f32 %v5750_v15, %v6396_v61 }
 0x3ba   :  { %v2710_v44 = vmax.f32 %v2473_v48, %v2691_v54  ;;  %v2693_v53 = vpop.f32.mrf.mxu3  ;;  %2746 = vst.msk [vmem:[#allocation5] sm:$0x1] %vm2745_vm5, %v2744_v42  ;;  %v2776_v22 = vld [vmem:[#allocation4 + $0x6] sm:$0x1]  ;;  %v6389_v6 = vld [vmem:[#allocation14_spill] sm:$0xff] }
 0x3bb   :  { %v2611_v56 = vpop.f32.mrf.mxu1  ;;  %v6387_v31 = vld [vmem:[#allocation15_spill] sm:$0xff]  ;;  %v6394_v20 = vld [vmem:[#allocation22_spill] sm:$0xff] }
 0x3bc   :  { %v2722_v27 = vadd.f32 %v5770_v30, %v2710_v44  ;;  %v2612_v32 = vadd.f32 %v2611_v56, %v2570_v47  ;;  %v1915_v39 = vadd.f32 %v6387_v31, %v6386_v43  ;;  %v2238_v47 = vmax.f32 %v1994_v11, %v5677_v46  ;;  %v6392_v10 = vld [vmem:[#allocation27_spill] sm:$0xff]  ;;  %v6400_v43 = vld [vmem:[#allocation25_spill] sm:$0xff] }
 0x3bd   :  { %v2384_v42 = vadd.f32 %v6392_v10, %v6391_v18  ;;  %v2428_v31 = vadd.f32 %v6400_v43, %v2387_v41 }
 0x3be   :  { %v2730_v17 = vmax.f32 %v2722_v27, 0.0  ;;  %v2653_v28 = vadd.f32 %v2652_v33, %v2612_v32  ;;  %v2475_v60 = vmax.f32 %v2238_v47, %v2460_v21  ;;  %v2422_v33 = vadd.f32 %v5720_v58, %v2381_v59  ;;  %v6397_v21 = vld [vmem:[#allocation18_spill] sm:$0xff]  ;;  %v6398_v59 = vld [vmem:[#allocation19_spill] sm:$0xff] }
 0x3bf   :  { %v2788_v38 = vld [vmem:[#allocation4 + $0x8] sm:$0x1]  ;;  %v2808_v3 = vld [vmem:[#allocation4 + $0xc] sm:$0x1]  ;;  %v2796_v52 = vld [vmem:[#allocation4 + $0xa] sm:$0x1]  ;;  %v1956_v51 = vadd.f32 %v6388_v1, %v1915_v39 }
 0x3c0   :  { %2738 = vst.msk [vmem:[#allocation4 + $0x10] sm:$0xff] %vm1056_vm1, %v2730_v17  ;;  %v2694_v5 = vadd.f32 %v2693_v53, %v2653_v28  ;;  %2763 = vrot.lane.b32.xlu1 %v2761_v13, %s3827_s1  ;;  %2784 = vrot.lane.b32.xlu2 %v2782_v7, %s3827_s1  ;;  %v2790_v57 = vld [vmem:[#allocation4 + $0x9] sm:$0x1]  ;;  %v2810_v12 = vld [vmem:[#allocation4 + $0xd] sm:$0x1]  ;;  %v2463_v54 = vadd.f32 %v6390_v25, %v2422_v33  ;;  %v2579_v28 = vpop.f32.mrf.mxu0 }
 0x3c1   :  { %2778 = vrot.lane.b32.xlu0 %v2776_v22, %s3826_s11  ;;  %2789 = vst.msk [vmem:[#allocation5 + $0x4] sm:$0x1] %vm2745_vm5, %v2788_v38  ;;  %v1997_v58 = vadd.f32 %v6389_v6, %v1956_v51  ;;  %v2822_v27 = vld [vmem:[#allocation4 + $0xf] sm:$0x1]  ;;  %v2816_v32 = vld [vmem:[#allocation4 + $0xe] sm:$0x1] }
 0x3c2   :  { %v2711_v26 = vmax.f32 %v2474_v37, %v2694_v5  ;;  %v2696_v55 = vpop.f32.mrf.mxu3  ;;  %2809 = vst.msk [vmem:[#allocation5 + $0x6] sm:$0x1] %vm2745_vm5, %v2808_v3  ;;  %v2802_v17 = vld [vmem:[#allocation4 + $0xb] sm:$0x1]  ;;  %v2661_v37 = vpop.f32.mrf.mxu2  ;;  %v6395_v5 = vld [vmem:[#allocation26_spill] sm:$0xff] }
 0x3c3   :  { %v2614_v40 = vpop.f32.mrf.mxu1  ;;  %v2239_v56 = vmax.f32 %v1997_v58, %v6393_v24  ;;  %v6403_v6 = vld [vmem:[#allocation20_spill] sm:$0xff] }
 0x3c4   :  { %v2723_v62 = vadd.f32 %v5770_v30, %v2711_v26  ;;  %v2615_v14 = vadd.f32 %v2614_v40, %v2573_v49  ;;  %v2425_v49 = vadd.f32 %v6394_v20, %v2384_v42 }
 0x3c5   :  { %v2476_v9 = vmax.f32 %v2239_v56, %v2463_v54 }
 0x3c6   :  { %v2731_v45 = vmax.f32 %v2723_v62, 0.0  ;;  %v2656_v19 = vadd.f32 %v2655_v0, %v2615_v14  ;;  %v2466_v22 = vadd.f32 %v6395_v5, %v2425_v49  ;;  %v6399_v62 = vmax.f32 %v6397_v21, %v6398_v59 }
 0x3c7   :  { %v2848_v46 = vld [vmem:[#allocation4 + $0x14] sm:$0x1]  ;;  %v2828_v8 = vld [vmem:[#allocation4 + $0x10] sm:$0x1]  ;;  %v2850_v11 = vld [vmem:[#allocation4 + $0x15] sm:$0x1] }
 0x3c8   :  { %2739 = vst.msk [vmem:[#allocation4 + $0x18] sm:$0xff] %vm1056_vm1, %v2731_v45  ;;  %v2697_v23 = vadd.f32 %v2696_v55, %v2656_v19  ;;  %2798 = vrot.lane.b32.xlu1 %v2796_v52, %s3826_s11  ;;  %2792 = vrot.lane.b32.xlu2 %v2790_v57, %s3828_s21  ;;  %v2836_v40 = vld [vmem:[#allocation4 + $0x12] sm:$0x1]  ;;  %v2477_v14 = vmax.f32 %v6399_v62, %v2466_v22  ;;  %v2830_v15 = vld [vmem:[#allocation4 + $0x11] sm:$0x1] }
 0x3c9   :  { %2812 = vrot.lane.b32.xlu0 %v2810_v12, %s3828_s21  ;;  %2849 = vst.msk [vmem:[#allocation5 + $0xa] sm:$0x1] %vm2745_vm5, %v2848_v46  ;;  %v6401_v57 = vld [vmem:[#allocation28_spill] sm:$0xff]  ;;  %v2842_v46 = vld [vmem:[#allocation4 + $0x13] sm:$0x1] }
 0x3ca   :  { %v2712_v2 = vmax.f32 %v2475_v60, %v2697_v23  ;;  %v2699_v29 = vpop.f32.mrf.mxu3  ;;  %2829 = vst.msk [vmem:[#allocation5 + $0x8] sm:$0x1] %vm2745_vm5, %v2828_v8  ;;  %v2469_v60 = vadd.f32 %v6401_v57, %v2428_v31  ;;  %v2664_v12 = vpop.f32.mrf.mxu2  ;;  %v2862_v8 = vld [vmem:[#allocation4 + $0x17] sm:$0x1]  ;;  %v2856_v25 = vld [vmem:[#allocation4 + $0x16] sm:$0x1] }
 0x3cb   :  { %v2617_v48 = vpop.f32.mrf.mxu1 }
 0x3cc   :  { %v2724_v44 = vadd.f32 %v5770_v30, %v2712_v2  ;;  %v2618_v53 = vadd.f32 %v2617_v48, %v2576_v16  ;;  %v2582_v16 = vpop.f32.mrf.mxu0  ;;  %v6402_v2 = vld [vmem:[#allocation16_spill] sm:$0xff] }
 0x3cd   :  { %v6404_v58 = vmax.f32 %v6402_v2, %v6403_v6  ;;  %v3085_v2 = vld [vmem:[%s6356_s5 + $0x78] sm:$0xff] }
 0x3ce   :  { %v2732_v35 = vmax.f32 %v2724_v44, 0.0  ;;  %v2659_v34 = vadd.f32 %v2658_v50, %v2618_v53  ;;  %v3133_v6 = vld [vmem:[%s6356_s5 + $0x1f8] sm:$0xff]  ;;  %3223 = vmatpush.msrb.mxu0 %v3085_v2  ;;  %v3088_v2 = vld [vmem:[%s6356_s5 + $0x90] sm:$0xff] }
 0x3cf   :  { %v2868_v0 = vld [vmem:[#allocation4 + $0x18] sm:$0x1]  ;;  %v2888_v13 = vld [vmem:[#allocation4 + $0x1c] sm:$0x1]  ;;  %v2876_v53 = vld [vmem:[#allocation4 + $0x1a] sm:$0x1]  ;;  %3283 = vmatpush.msrb.mxu3 %v3133_v6 }
 0x3d0   :  { %2740 = vst.msk [vmem:[#allocation4 + $0x20] sm:$0xff] %vm1056_vm1, %v2732_v35  ;;  %v2700_v36 = vadd.f32 %v2699_v29, %v2659_v34  ;;  %2824 = vrot.lane.b32.xlu1 %v2822_v27, %s3827_s1  ;;  %2818 = vrot.lane.b32.xlu2 %v2816_v32, %s3826_s11  ;;  %v2478_v29 = vmax.f32 %v6404_v58, %v2469_v60  ;;  %v2870_v24 = vld [vmem:[#allocation4 + $0x19] sm:$0x1]  ;;  %v2890_v56 = vld [vmem:[#allocation4 + $0x1d] sm:$0x1]  ;;  %v3101_v58 = vld [vmem:[%s6356_s5 + $0xf8] sm:$0xff] }
 0x3d1   :  { %2804 = vrot.lane.b32.xlu0 %v2802_v17, %s3827_s1  ;;  %2869 = vst.msk [vmem:[#allocation5 + $0xc] sm:$0x1] %vm2745_vm5, %v2868_v0  ;;  %v2902_v27 = vld [vmem:[#allocation4 + $0x1f] sm:$0x1]  ;;  %v2882_v32 = vld [vmem:[#allocation4 + $0x1b] sm:$0x1]  ;;  %3243 = vmatpush.msrb.mxu1 %v3101_v58 }
 0x3d2   :  { %v2713_v7 = vmax.f32 %v2476_v9, %v2700_v36  ;;  %2889 = vst.msk [vmem:[#allocation5 + $0xe] sm:$0x1] %vm2745_vm5, %v2888_v13  ;;  %v2702_v26 = vpop.f32.mrf.mxu3 }
 0x3d3   :  { %v2620_v63 = vpop.f32.mrf.mxu1 }
 0x3d4   :  { %v2725_v38 = vadd.f32 %v5770_v30, %v2713_v7  ;;  %v2621_v3 = vadd.f32 %v2620_v63, %v2579_v28 }
 0x3d6   :  { %v2733_v55 = vmax.f32 %v2725_v38, 0.0  ;;  %v2662_v4 = vadd.f32 %v2661_v37, %v2621_v3 }
 0x3d7   :  { %v2928_v47 = vld [vmem:[#allocation4 + $0x24] sm:$0x1]  ;;  %v2908_v45 = vld [vmem:[#allocation4 + $0x20] sm:$0x1]  ;;  %v2910_v49 = vld [vmem:[#allocation4 + $0x21] sm:$0x1] }
 0x3d8   :  { %2741 = vst.msk [vmem:[#allocation4 + $0x28] sm:$0xff] %vm1056_vm1, %v2733_v55  ;;  %v2703_v39 = vadd.f32 %v2702_v26, %v2662_v4  ;;  %2852 = vrot.lane.b32.xlu1 %v2850_v11, %s3828_s21  ;;  %2838 = vrot.lane.b32.xlu2 %v2836_v40, %s3826_s11  ;;  %v2930_v36 = vld [vmem:[#allocation4 + $0x25] sm:$0x1]  ;;  %v2916_v17 = vld [vmem:[#allocation4 + $0x22] sm:$0x1] }
 0x3d9   :  { %2832 = vrot.lane.b32.xlu0 %v2830_v15, %s3828_s21  ;;  %2929 = vst.msk [vmem:[#allocation5 + $0x3] sm:$0x1] %vm2745_vm5, %v2928_v47  ;;  %v2936_v28 = vld [vmem:[#allocation4 + $0x26] sm:$0x1]  ;;  %v2922_v0 = vld [vmem:[#allocation4 + $0x23] sm:$0x1] }
 0x3da   :  { %v2714_v19 = vmax.f32 %v2477_v14, %v2703_v39  ;;  %2909 = vst.msk [vmem:[#allocation5 + $0x1] sm:$0x1] %vm2745_vm5, %v2908_v45  ;;  %v2705_v50 = vpop.f32.mrf.mxu3  ;;  %v2942_v13 = vld [vmem:[#allocation4 + $0x27] sm:$0x1] }
 0x3db   :  { %v2623_v52 = vpop.f32.mrf.mxu1 }
 0x3dc   :  { %v2726_v33 = vadd.f32 %v5770_v30, %v2714_v19  ;;  %v2624_v23 = vadd.f32 %v2623_v52, %v2582_v16 }
 0x3de   :  { %v2734_v1 = vmax.f32 %v2726_v33, 0.0  ;;  %v2665_v51 = vadd.f32 %v2664_v12, %v2624_v23 }
 0x3df   :  { %v2968_v54 = vld [vmem:[#allocation4 + $0x2c] sm:$0x1]  ;;  %v2948_v18 = vld [vmem:[#allocation4 + $0x28] sm:$0x1]  ;;  %v2970_v7 = vld [vmem:[#allocation4 + $0x2d] sm:$0x1] }
 0x3e0   :  { %2742 = vst.msk [vmem:[#allocation4 + $0x30] sm:$0xff] %vm1056_vm1, %v2734_v1  ;;  %v2706_v48 = vadd.f32 %v2705_v50, %v2665_v51  ;;  %2844 = vrot.lane.b32.xlu1 %v2842_v46, %s3827_s1  ;;  %2864 = vrot.lane.b32.xlu2 %v2862_v8, %s3827_s1  ;;  %v2956_v37 = vld [vmem:[#allocation4 + $0x2a] sm:$0x1]  ;;  %v2950_v63 = vld [vmem:[#allocation4 + $0x29] sm:$0x1] }
 0x3e1   :  { %2858 = vrot.lane.b32.xlu0 %v2856_v25, %s3826_s11  ;;  %2969 = vst.msk [vmem:[#allocation5 + $0x7] sm:$0x1] %vm2745_vm5, %v2968_v54  ;;  %v2962_v5 = vld [vmem:[#allocation4 + $0x2b] sm:$0x1]  ;;  %v2982_v22 = vld [vmem:[#allocation4 + $0x2f] sm:$0x1] }
 0x3e2   :  { %v2715_v10 = vmax.f32 %v2478_v29, %v2706_v48  ;;  %2949 = vst.msk [vmem:[#allocation5 + $0x5] sm:$0x1] %vm2745_vm5, %v2948_v18  ;;  %v2976_v61 = vld [vmem:[#allocation4 + $0x2e] sm:$0x1]  ;;  %v3116_v29 = vld [vmem:[%s6356_s5 + $0x170] sm:$0xff] }
 0x3e3   :  { %v3117_v8 = vld [vmem:[%s6356_s5 + $0x178] sm:$0xff]  ;;  %v3084_v48 = vld [vmem:[%s6356_s5 + $0x70] sm:$0xff] }
 0x3e4   :  { %v2727_v42 = vadd.f32 %v5770_v30, %v2715_v10  ;;  %v2896_v30 = vld [vmem:[#allocation4 + $0x1e] sm:$0x1]  ;;  %3263 = vmatpush.msrb.mxu2 %v3117_v8  ;;  %v3132_v25 = vld [vmem:[%s6356_s5 + $0x1f0] sm:$0xff]  ;;  %3224 = vmatpush.msrb.mxu0 %v3084_v48 }
 0x3e5   :  { %3284 = vmatpush.msrb.mxu3 %v3132_v25  ;;  %v3072_v8 = vld [vmem:[%s6356_s5 + $0x10] sm:$0xff] }
 0x3e6   :  { %v2735_v44 = vmax.f32 %v2727_v42, 0.0  ;;  %3264 = vmatpush.msrb.mxu2 %v3116_v29  ;;  %v3100_v42 = vld [vmem:[%s6356_s5 + $0xf0] sm:$0xff] }
 0x3e7   :  { %v3008_v35 = vld [vmem:[#allocation4 + $0x34] sm:$0x1]  ;;  %v2988_v34 = vld [vmem:[#allocation4 + $0x30] sm:$0x1]  ;;  %v2990_v38 = vld [vmem:[#allocation4 + $0x31] sm:$0x1]  ;;  %3244 = vmatpush.msrb.mxu1 %v3100_v42 }
 0x3e8   :  { %2743 = vst.msk [vmem:[#allocation4 + $0x38] sm:$0xff] %vm1056_vm1, %v2735_v44  ;;  %2878 = vrot.lane.b32.xlu1 %v2876_v53, %s3826_s11  ;;  %2872 = vrot.lane.b32.xlu2 %v2870_v24, %s3828_s21  ;;  %v3010_v3 = vld [vmem:[#allocation4 + $0x35] sm:$0x1]  ;;  %v2996_v26 = vld [vmem:[#allocation4 + $0x32] sm:$0x1]  ;;  %v3115_v44 = vld [vmem:[%s6356_s5 + $0x168] sm:$0xff] }
 0x3e9   :  { %2892 = vrot.lane.b32.xlu0 %v2890_v56, %s3828_s21  ;;  %3009 = vst.msk [vmem:[#allocation5 + $0xb] sm:$0x1] %vm2745_vm5, %v3008_v35  ;;  %v3016_v4 = vld [vmem:[#allocation4 + $0x36] sm:$0x1]  ;;  %v3002_v11 = vld [vmem:[#allocation4 + $0x33] sm:$0x1]  ;;  %3265 = vmatpush.msrb.mxu2 %v3115_v44 }
 0x3ea   :  { %2989 = vst.msk [vmem:[#allocation5 + $0x9] sm:$0x1] %vm2745_vm5, %v2988_v34  ;;  %v3022_v45 = vld [vmem:[#allocation4 + $0x37] sm:$0x1]  ;;  %v3083_v53 = vld [vmem:[%s6356_s5 + $0x68] sm:$0xff]  ;;  %v3104_v29 = vld [vmem:[%s6356_s5 + $0x110] sm:$0xff] }
 0x3eb   :  { %v3131_v24 = vld [vmem:[%s6356_s5 + $0x1e8] sm:$0xff]  ;;  %v3114_v35 = vld [vmem:[%s6356_s5 + $0x160] sm:$0xff]  ;;  %3225 = vmatpush.msrb.mxu0 %v3083_v53  ;;  %v3120_v48 = vld [vmem:[%s6356_s5 + $0x190] sm:$0xff] }
 0x3ec   :  { %v3099_v56 = vld [vmem:[%s6356_s5 + $0xe8] sm:$0xff]  ;;  %3285 = vmatpush.msrb.mxu3 %v3131_v24  ;;  %v3082_v34 = vld [vmem:[%s6356_s5 + $0x60] sm:$0xff]  ;;  %3266 = vmatpush.msrb.mxu2 %v3114_v35  ;;  %v3149_v35 = vld [vmem:[%s6356_s5 + $0x278] sm:$0xff] }
 0x3ed   :  { %3245 = vmatpush.msrb.mxu1 %v3099_v56  ;;  %3226 = vmatpush.msrb.mxu0 %v3082_v34  ;;  %v3119_v42 = vld [vmem:[%s6356_s5 + $0x188] sm:$0xff]  ;;  %v3070_v44 = vld [vmem:[%s6356_s5] sm:$0xff]  ;;  %v3165_v34 = vld [vmem:[%s6356_s5 + $0x2f8] sm:$0xff] }
 0x3ee   :  { %v3086_v53 = vld [vmem:[%s6356_s5 + $0x80] sm:$0xff] }
 0x3ef   :  { %v3028_v9 = vld [vmem:[#allocation4 + $0x38] sm:$0x1]  ;;  %v3048_v20 = vld [vmem:[#allocation4 + $0x3c] sm:$0x1]  ;;  %v3030_v40 = vld [vmem:[#allocation4 + $0x39] sm:$0x1] }
 0x3f0   :  { %2904 = vrot.lane.b32.xlu1 %v2902_v27, %s3827_s1  ;;  %2898 = vrot.lane.b32.xlu2 %v2896_v30, %s3826_s11  ;;  %3029 = vst.msk [vmem:[#allocation5 + $0xd] sm:$0x1] %vm2745_vm5, %v3028_v9  ;;  %v3050_v59 = vld [vmem:[#allocation4 + $0x3d] sm:$0x1]  ;;  %v3036_v62 = vld [vmem:[#allocation4 + $0x3a] sm:$0x1] }
 0x3f1   :  { %2884 = vrot.lane.b32.xlu0 %v2882_v32, %s3827_s1  ;;  %3049 = vst.msk [vmem:[#allocation5 + $0xf] sm:$0x1] %vm2745_vm5, %v3048_v20  ;;  %v3056_v14 = vld [vmem:[#allocation4 + $0x3e] sm:$0x1]  ;;  %v3042_v15 = vld [vmem:[#allocation4 + $0x3b] sm:$0x1] }
 0x3f2   :  { %v3062_v47 = vld [vmem:[#allocation4 + $0x3f] sm:$0x1]  ;;  %v3130_v27 = vld [vmem:[%s6356_s5 + $0x1e0] sm:$0xff] }
 0x3f3   :  { %3286 = vmatpush.msrb.mxu3 %v3130_v27  ;;  %v3098_v20 = vld [vmem:[%s6356_s5 + $0xe0] sm:$0xff]  ;;  %v3181_v27 = vld [vmem:[%s6356_s5 + $0x378] sm:$0xff] }
 0x3f4   :  { %3246 = vmatpush.msrb.mxu1 %v3098_v20  ;;  %v3102_v24 = vld [vmem:[%s6356_s5 + $0x100] sm:$0xff] }
 0x3f5   :  { %v3118_v56 = vld [vmem:[%s6356_s5 + $0x180] sm:$0xff] }
 0x3f8   :  { %2912 = vrot.lane.b32.xlu1 %v2910_v49, %s3828_s21  ;;  %2932 = vrot.lane.b32.xlu2 %v2930_v36, %s3828_s21  ;;  %v3113_v49 = vld [vmem:[%s6356_s5 + $0x158] sm:$0xff] }
 0x3f9   :  { %2918 = vrot.lane.b32.xlu0 %v2916_v17, %s3826_s11  ;;  %v3081_v36 = vld [vmem:[%s6356_s5 + $0x58] sm:$0xff]  ;;  %3267 = vmatpush.msrb.mxu2 %v3113_v49  ;;  %v3180_v49 = vld [vmem:[%s6356_s5 + $0x370] sm:$0xff] }
 0x3fa   :  { %v3097_v17 = vld [vmem:[%s6356_s5 + $0xd8] sm:$0xff]  ;;  %3227 = vmatpush.msrb.mxu0 %v3081_v36  ;;  %v3196_v36 = vld [vmem:[%s6356_s5 + $0x3f0] sm:$0xff] }
 0x3fb   :  { %3247 = vmatpush.msrb.mxu1 %v3097_v17 }
 0x400   :  { %2938 = vrot.lane.b32.xlu1 %v2936_v28, %s3826_s11  ;;  %2924 = vrot.lane.b32.xlu2 %v2922_v0, %s3827_s1  ;;  %v3129_v28 = vld [vmem:[%s6356_s5 + $0x1d8] sm:$0xff]  ;;  %v3080_v0 = vld [vmem:[%s6356_s5 + $0x50] sm:$0xff] }
 0x401   :  { %2944 = vrot.lane.b32.xlu0 %v2942_v13, %s3827_s1  ;;  %3287 = vmatpush.msrb.mxu3 %v3129_v28  ;;  %v3096_v13 = vld [vmem:[%s6356_s5 + $0xd0] sm:$0xff]  ;;  %v3147_v28 = vld [vmem:[%s6356_s5 + $0x268] sm:$0xff] }
 0x402   :  { %3228 = vmatpush.msrb.mxu0 %v3080_v0  ;;  %3248 = vmatpush.msrb.mxu1 %v3096_v13  ;;  %v3163_v0 = vld [vmem:[%s6356_s5 + $0x2e8] sm:$0xff] }
 0x403   :  { %v3179_v13 = vld [vmem:[%s6356_s5 + $0x368] sm:$0xff] }
 0x408   :  { %2972 = vrot.lane.b32.xlu1 %v2970_v7, %s3828_s21  ;;  %2958 = vrot.lane.b32.xlu2 %v2956_v37, %s3826_s11  ;;  %v3112_v7 = vld [vmem:[%s6356_s5 + $0x150] sm:$0xff] }
 0x409   :  { %2952 = vrot.lane.b32.xlu0 %v2950_v63, %s3828_s21  ;;  %v3128_v37 = vld [vmem:[%s6356_s5 + $0x1d0] sm:$0xff]  ;;  %3268 = vmatpush.msrb.mxu2 %v3112_v7  ;;  %v3079_v63 = vld [vmem:[%s6356_s5 + $0x48] sm:$0xff] }
 0x40a   :  { %3288 = vmatpush.msrb.mxu3 %v3128_v37  ;;  %3229 = vmatpush.msrb.mxu0 %v3079_v63  ;;  %v3195_v7 = vld [vmem:[%s6356_s5 + $0x3e8] sm:$0xff]  ;;  %v3146_v37 = vld [vmem:[%s6356_s5 + $0x260] sm:$0xff] }
 0x40b   :  { %v3162_v63 = vld [vmem:[%s6356_s5 + $0x2e0] sm:$0xff] }
 0x410   :  { %2964 = vrot.lane.b32.xlu1 %v2962_v5, %s3827_s1  ;;  %2984 = vrot.lane.b32.xlu2 %v2982_v22, %s3827_s1  ;;  %v3111_v5 = vld [vmem:[%s6356_s5 + $0x148] sm:$0xff] }
 0x411   :  { %2978 = vrot.lane.b32.xlu0 %v2976_v61, %s3826_s11  ;;  %v3095_v22 = vld [vmem:[%s6356_s5 + $0xc8] sm:$0xff]  ;;  %3269 = vmatpush.msrb.mxu2 %v3111_v5  ;;  %v3178_v5 = vld [vmem:[%s6356_s5 + $0x360] sm:$0xff] }
 0x412   :  { %v2757_v41 = vpop.permute.xlu2 %2756  ;;  %v3127_v61 = vld [vmem:[%s6356_s5 + $0x1c8] sm:$0xff]  ;;  %3249 = vmatpush.msrb.mxu1 %v3095_v22  ;;  %v3194_v22 = vld [vmem:[%s6356_s5 + $0x3e0] sm:$0xff] }
 0x413   :  { %3289 = vmatpush.msrb.mxu3 %v3127_v61  ;;  %v3145_v61 = vld [vmem:[%s6356_s5 + $0x258] sm:$0xff] }
 0x418   :  { %2992 = vrot.lane.b32.xlu1 %v2990_v38, %s3828_s21  ;;  %3012 = vrot.lane.b32.xlu2 %v3010_v3, %s3828_s21 }
 0x419   :  { %2998 = vrot.lane.b32.xlu0 %v2996_v26, %s3826_s11  ;;  %v3078_v26 = vld [vmem:[%s6356_s5 + $0x40] sm:$0xff] }
 0x41a   :  { %v2785_v55 = vpop.permute.xlu2 %2784  ;;  %3230 = vmatpush.msrb.mxu0 %v3078_v26  ;;  %v3144_v26 = vld [vmem:[%s6356_s5 + $0x250] sm:$0xff] }
 0x420   :  { %3018 = vrot.lane.b32.xlu1 %v3016_v4, %s3826_s11  ;;  %3004 = vrot.lane.b32.xlu2 %v3002_v11, %s3827_s1  ;;  %v3110_v4 = vld [vmem:[%s6356_s5 + $0x140] sm:$0xff] }
 0x421   :  { %3032 = vrot.lane.b32.xlu0 %v3030_v40, %s3828_s21  ;;  %v3126_v11 = vld [vmem:[%s6356_s5 + $0x1c0] sm:$0xff]  ;;  %3270 = vmatpush.msrb.mxu2 %v3110_v4  ;;  %v3077_v40 = vld [vmem:[%s6356_s5 + $0x38] sm:$0xff] }
 0x422   :  { %v2793_v21 = vpop.permute.xlu2 %2792  ;;  %3290 = vmatpush.msrb.mxu3 %v3126_v11  ;;  %3231 = vmatpush.msrb.mxu0 %v3077_v40  ;;  %v3176_v11 = vld [vmem:[%s6356_s5 + $0x350] sm:$0xff] }
 0x423   :  { %2795 = vst.msk [vmem:[#allocation5 + $0x4] sm:$0x1] %vm2752_vm6, %v2793_v21  ;;  %v3093_v21 = vld [vmem:[%s6356_s5 + $0xb8] sm:$0xff]  ;;  %v3192_v40 = vld [vmem:[%s6356_s5 + $0x3d0] sm:$0xff] }
 0x428   :  { %3052 = vrot.lane.b32.xlu1 %v3050_v59, %s3828_s21  ;;  %3038 = vrot.lane.b32.xlu2 %v3036_v62, %s3826_s11  ;;  %v3109_v59 = vld [vmem:[%s6356_s5 + $0x138] sm:$0xff] }
 0x429   :  { %3058 = vrot.lane.b32.xlu0 %v3056_v14, %s3826_s11  ;;  %3271 = vmatpush.msrb.mxu2 %v3109_v59  ;;  %v3143_v59 = vld [vmem:[%s6356_s5 + $0x248] sm:$0xff] }
 0x42a   :  { %v2773_v43 = vpop.permute.xlu1 %2772  ;;  %v2819_v31 = vpop.permute.xlu2 %2818 }
 0x42b   :  { %2775 = vst.msk [vmem:[#allocation5 + $0x2] sm:$0x1] %vm2752_vm6, %v2773_v43  ;;  %v2750_v39 = vpop.permute.xlu0 %2749  ;;  %v3125_v43 = vld [vmem:[%s6356_s5 + $0x1b8] sm:$0xff] }
 0x42c   :  { %2753 = vst.msk [vmem:[#allocation5] sm:$0x1] %vm2752_vm6, %v2750_v39  ;;  %3291 = vmatpush.msrb.mxu3 %v3125_v43  ;;  %v3076_v39 = vld [vmem:[%s6356_s5 + $0x30] sm:$0xff]  ;;  %v3175_v43 = vld [vmem:[%s6356_s5 + $0x348] sm:$0xff] }
 0x42d   :  { %2760 = vst.msk [vmem:[#allocation5] sm:$0x1] %vm2759_vm7, %v2757_v41  ;;  %3232 = vmatpush.msrb.mxu0 %v3076_v39  ;;  %v3142_v39 = vld [vmem:[%s6356_s5 + $0x240] sm:$0xff] }
 0x430   :  { %3044 = vrot.lane.b32.xlu1 %v3042_v15, %s3827_s1  ;;  %3064 = vrot.lane.b32.xlu2 %v3062_v47, %s3827_s1  ;;  %v3092_v15 = vld [vmem:[%s6356_s5 + $0xb0] sm:$0xff] }
 0x431   :  { %3024 = vrot.lane.b32.xlu0 %v3022_v45, %s3827_s1  ;;  %v3108_v47 = vld [vmem:[%s6356_s5 + $0x130] sm:$0xff] }
 0x432   :  { %v2764_v19 = vpop.permute.xlu1 %2763  ;;  %v2839_v16 = vpop.permute.xlu2 %2838  ;;  %v3124_v45 = vld [vmem:[%s6356_s5 + $0x1b0] sm:$0xff]  ;;  %3272 = vmatpush.msrb.mxu2 %v3108_v47  ;;  %v3174_v47 = vld [vmem:[%s6356_s5 + $0x340] sm:$0xff] }
 0x433   :  { %2767 = vst.msk [vmem:[#allocation5] sm:$0x1] %vm2766_vm8, %v2764_v19  ;;  %v2779_v52 = vpop.permute.xlu0 %2778  ;;  %3292 = vmatpush.msrb.mxu3 %v3124_v45  ;;  %v3075_v19 = vld [vmem:[%s6356_s5 + $0x28] sm:$0xff] }
 0x434   :  { %2781 = vst.msk [vmem:[#allocation5 + $0x2] sm:$0x1] %vm2759_vm7, %v2779_v52  ;;  %v3107_v52 = vld [vmem:[%s6356_s5 + $0x128] sm:$0xff]  ;;  %3233 = vmatpush.msrb.mxu0 %v3075_v19  ;;  %v3141_v19 = vld [vmem:[%s6356_s5 + $0x238] sm:$0xff] }
 0x435   :  { %2787 = vst.msk [vmem:[#allocation5 + $0x2] sm:$0x1] %vm2766_vm8, %v2785_v55  ;;  %v3094_v55 = vld [vmem:[%s6356_s5 + $0xc0] sm:$0xff]  ;;  %3273 = vmatpush.msrb.mxu2 %v3107_v52  ;;  %v3173_v52 = vld [vmem:[%s6356_s5 + $0x338] sm:$0xff] }
 0x436   :  { %3250 = vmatpush.msrb.mxu1 %v3094_v55  ;;  %v3160_v55 = vld [vmem:[%s6356_s5 + $0x2d0] sm:$0xff] }
 0x438   :  { %3251 = vmatpush.msrb.mxu1 %v3093_v21 }
 0x43a   :  { %v2799_v57 = vpop.permute.xlu1 %2798  ;;  %v2865_v60 = vpop.permute.xlu2 %2864  ;;  %3252 = vmatpush.msrb.mxu1 %v3092_v15  ;;  %v3158_v15 = vld [vmem:[%s6356_s5 + $0x2c0] sm:$0xff] }
 0x43b   :  { %2801 = vst.msk [vmem:[#allocation5 + $0x4] sm:$0x1] %vm2759_vm7, %v2799_v57  ;;  %v2813_v33 = vpop.permute.xlu0 %2812  ;;  %v3123_v57 = vld [vmem:[%s6356_s5 + $0x1a8] sm:$0xff] }
 0x43c   :  { %2815 = vst.msk [vmem:[#allocation5 + $0x6] sm:$0x1] %vm2752_vm6, %v2813_v33  ;;  %v3090_v33 = vld [vmem:[%s6356_s5 + $0xa0] sm:$0xff]  ;;  %3293 = vmatpush.msrb.mxu3 %v3123_v57  ;;  %v3189_v57 = vld [vmem:[%s6356_s5 + $0x3b8] sm:$0xff] }
 0x43d   :  { %2821 = vst.msk [vmem:[#allocation5 + $0x6] sm:$0x1] %vm2759_vm7, %v2819_v31 }
 0x442   :  { %v2825_v23 = vpop.permute.xlu1 %2824  ;;  %v2873_v12 = vpop.permute.xlu2 %2872 }
 0x443   :  { %2827 = vst.msk [vmem:[#allocation5 + $0x6] sm:$0x1] %vm2766_vm8, %v2825_v23  ;;  %v2805_v1 = vpop.permute.xlu0 %2804  ;;  %v3106_v23 = vld [vmem:[%s6356_s5 + $0x120] sm:$0xff] }
 0x444   :  { %2875 = vst.msk [vmem:[#allocation5 + $0xc] sm:$0x1] %vm2752_vm6, %v2873_v12  ;;  %v3122_v12 = vld [vmem:[%s6356_s5 + $0x1a0] sm:$0xff]  ;;  %3274 = vmatpush.msrb.mxu2 %v3106_v23  ;;  %v3156_v23 = vld [vmem:[%s6356_s5 + $0x2b0] sm:$0xff] }
 0x445   :  { %2807 = vst.msk [vmem:[#allocation5 + $0x4] sm:$0x1] %vm2766_vm8, %v2805_v1  ;;  %v3073_v1 = vld [vmem:[%s6356_s5 + $0x18] sm:$0xff]  ;;  %3294 = vmatpush.msrb.mxu3 %v3122_v12  ;;  %v3172_v12 = vld [vmem:[%s6356_s5 + $0x330] sm:$0xff] }
 0x44a   :  { %v2853_v51 = vpop.permute.xlu1 %2852  ;;  %v2899_v50 = vpop.permute.xlu2 %2898 }
 0x44b   :  { %2855 = vst.msk [vmem:[#allocation5 + $0xa] sm:$0x1] %vm2752_vm6, %v2853_v51  ;;  %v2833_v46 = vpop.permute.xlu0 %2832  ;;  %v3089_v51 = vld [vmem:[%s6356_s5 + $0x98] sm:$0xff] }
 0x44c   :  { %2835 = vst.msk [vmem:[#allocation5 + $0x8] sm:$0x1] %vm2752_vm6, %v2833_v46  ;;  %v3121_v46 = vld [vmem:[%s6356_s5 + $0x198] sm:$0xff] }
 0x44d   :  { %2841 = vst.msk [vmem:[#allocation5 + $0x8] sm:$0x1] %vm2759_vm7, %v2839_v16  ;;  %v3091_v16 = vld [vmem:[%s6356_s5 + $0xa8] sm:$0xff]  ;;  %3295 = vmatpush.msrb.mxu3 %v3121_v46 }
 0x44e   :  { %3253 = vmatpush.msrb.mxu1 %v3091_v16  ;;  %v3157_v16 = vld [vmem:[%s6356_s5 + $0x2b8] sm:$0xff]  ;;  %v3139_v46 = vld [vmem:[%s6356_s5 + $0x228] sm:$0xff] }
 0x44f   :  { %3296 = vmatpush.msrb.mxu3 %v3120_v48  ;;  %v3170_v48 = vld [vmem:[%s6356_s5 + $0x320] sm:$0xff] }
 0x450   :  { %3254 = vmatpush.msrb.mxu1 %v3090_v33  ;;  %v3140_v33 = vld [vmem:[%s6356_s5 + $0x230] sm:$0xff] }
 0x451   :  { %3297 = vmatpush.msrb.mxu3 %v3119_v42  ;;  %v3185_v42 = vld [vmem:[%s6356_s5 + $0x398] sm:$0xff] }
 0x452   :  { %v2845_v54 = vpop.permute.xlu1 %2844  ;;  %v2933_v18 = vpop.permute.xlu2 %2932  ;;  %3255 = vmatpush.msrb.mxu1 %v3089_v51  ;;  %v3188_v51 = vld [vmem:[%s6356_s5 + $0x3b0] sm:$0xff] }
 0x453   :  { %2847 = vst.msk [vmem:[#allocation5 + $0x8] sm:$0x1] %vm2766_vm8, %v2845_v54  ;;  %v2859_v10 = vpop.permute.xlu0 %2858  ;;  %v3071_v54 = vld [vmem:[%s6356_s5 + $0x8] sm:$0xff]  ;;  %3298 = vmatpush.msrb.mxu3 %v3118_v56 }
 0x454   :  { %2935 = vst.msk [vmem:[#allocation5 + $0x3] sm:$0x1] %vm2752_vm6, %v2933_v18  ;;  %v3087_v18 = vld [vmem:[%s6356_s5 + $0x88] sm:$0xff]  ;;  %3256 = vmatpush.msrb.mxu1 %v3088_v2 }
 0x455   :  { %2861 = vst.msk [vmem:[#allocation5 + $0xa] sm:$0x1] %vm2759_vm7, %v2859_v10  ;;  %v3103_v10 = vld [vmem:[%s6356_s5 + $0x108] sm:$0xff] }
 0x456   :  { %2867 = vst.msk [vmem:[#allocation5 + $0xa] sm:$0x1] %vm2766_vm8, %v2865_v60  ;;  %v3074_v60 = vld [vmem:[%s6356_s5 + $0x20] sm:$0xff]  ;;  %3257 = vmatpush.msrb.mxu1 %v3087_v18  ;;  %v3171_v2 = vld [vmem:[%s6356_s5 + $0x328] sm:$0xff]  ;;  %v3153_v18 = vld [vmem:[%s6356_s5 + $0x298] sm:$0xff] }
 0x457   :  { %3234 = vmatpush.msrb.mxu0 %v3074_v60 }
 0x458   :  { %3258 = vmatpush.msrb.mxu1 %v3086_v53  ;;  %v3152_v53 = vld [vmem:[%s6356_s5 + $0x290] sm:$0xff] }
 0x459   :  { %3235 = vmatpush.msrb.mxu0 %v3073_v1 }
 0x45a   :  { %v2879_v30 = vpop.permute.xlu1 %2878  ;;  %v5969_v32 = vpop.permute.xlu2 %2924  ;;  %3323 = vmatpush.msra.mxu1 %v3165_v34 }
 0x45b   :  { %2881 = vst.msk [vmem:[#allocation5 + $0xc] sm:$0x1] %vm2759_vm7, %v2879_v30  ;;  %v2893_v9 = vpop.permute.xlu0 %2892  ;;  %3236 = vmatpush.msrb.mxu0 %v3072_v8  ;;  %v3197_v30 = vld [vmem:[%s6356_s5 + $0x3f8] sm:$0xff]  ;;  %v3155_v8 = vld [vmem:[%s6356_s5 + $0x2a8] sm:$0xff] }
 0x45c   :  { %2895 = vst.msk [vmem:[#allocation5 + $0xe] sm:$0x1] %vm2752_vm6, %v2893_v9  ;;  %v3164_v9 = vld [vmem:[%s6356_s5 + $0x2f0] sm:$0xff]  ;;  %3363 = vmatpush.msra.mxu3 %v3197_v30  ;;  %v3135_v30 = vld [vmem:[%s6356_s5 + $0x208] sm:$0xff] }
 0x45d   :  { %2901 = vst.msk [vmem:[#allocation5 + $0xe] sm:$0x1] %vm2759_vm7, %v2899_v50  ;;  %v3105_v50 = vld [vmem:[%s6356_s5 + $0x118] sm:$0xff]  ;;  %3237 = vmatpush.msrb.mxu0 %v3071_v54  ;;  %3324 = vmatpush.msra.mxu1 %v3164_v9 }
 0x45e   :  { %3275 = vmatpush.msrb.mxu2 %v3105_v50  ;;  %3364 = vmatpush.msra.mxu3 %v3196_v36  ;;  %v3137_v54 = vld [vmem:[%s6356_s5 + $0x218] sm:$0xff]  ;;  %v3183_v36 = vld [vmem:[%s6356_s5 + $0x388] sm:$0xff] }
 0x45f   :  { %3238 = vmatpush.msrb.mxu0 %v3070_v44  ;;  %3325 = vmatpush.msra.mxu1 %v3163_v0  ;;  %v3136_v44 = vld [vmem:[%s6356_s5 + $0x210] sm:$0xff]  ;;  %v3134_v0 = vld [vmem:[%s6356_s5 + $0x200] sm:$0xff] }
 0x460   :  { %3276 = vmatpush.msrb.mxu2 %v3104_v29  ;;  %3365 = vmatpush.msra.mxu3 %v3195_v7  ;;  %v3154_v29 = vld [vmem:[%s6356_s5 + $0x2a0] sm:$0xff] }
 0x461   :  { %3303 = vmatpush.msra.mxu0 %v3149_v35  ;;  %3326 = vmatpush.msra.mxu1 %v3162_v63  ;;  %v3168_v35 = vld [vmem:[%s6356_s5 + $0x310] sm:$0xff]  ;;  %v3166_v7 = vld [vmem:[%s6356_s5 + $0x300] sm:$0xff] }
 0x462   :  { %v2905_v41 = vpop.permute.xlu1 %2904  ;;  %v6013_v38 = vpop.permute.xlu2 %2958  ;;  %3277 = vmatpush.msrb.mxu2 %v3103_v10  ;;  %3366 = vmatpush.msra.mxu3 %v3194_v22  ;;  %v3169_v10 = vld [vmem:[%s6356_s5 + $0x318] sm:$0xff] }
 0x463   :  { %2907 = vst.msk [vmem:[#allocation5 + $0xe] sm:$0x1] %vm2766_vm8, %v2905_v41  ;;  %v2885_v3 = vpop.permute.xlu0 %2884  ;;  %v3161_v41 = vld [vmem:[%s6356_s5 + $0x2d8] sm:$0xff] }
 0x464   :  { %2887 = vst.msk [vmem:[#allocation5 + $0xc] sm:$0x1] %vm2766_vm8, %v2885_v3  ;;  %3278 = vmatpush.msrb.mxu2 %v3102_v24  ;;  %v3193_v3 = vld [vmem:[%s6356_s5 + $0x3d8] sm:$0xff]  ;;  %3327 = vmatpush.msra.mxu1 %v3161_v41 }
 0x465   :  { %3367 = vmatpush.msra.mxu3 %v3193_v3 }
 0x466   :  { %3343 = vmatpush.msra.mxu2 %v3181_v27  ;;  %3328 = vmatpush.msra.mxu1 %v3160_v55  ;;  %v3184_v27 = vld [vmem:[%s6356_s5 + $0x390] sm:$0xff] }
 0x467   :  { %3368 = vmatpush.msra.mxu3 %v3192_v40 }
 0x468   :  { %3344 = vmatpush.msra.mxu2 %v3180_v49 }
 0x46a   :  { %v2913_v62 = vpop.permute.xlu1 %2912  ;;  %v6038_v14 = vpop.permute.xlu2 %2984  ;;  %3345 = vmatpush.msra.mxu2 %v3179_v13  ;;  %v3150_v13 = vld [vmem:[%s6356_s5 + $0x280] sm:$0xff] }
 0x46b   :  { %2915 = vst.msk [vmem:[#allocation5 + $0x1] sm:$0x1] %vm2752_vm6, %v2913_v62  ;;  %v2919_v31 = vpop.permute.xlu0 %2918  ;;  %v3159_v62 = vld [vmem:[%s6356_s5 + $0x2c8] sm:$0xff] }
 0x46c   :  { %2921 = vst.msk [vmem:[#allocation5 + $0x1] sm:$0x1] %vm2759_vm7, %v2919_v31  ;;  %3346 = vmatpush.msra.mxu2 %v3178_v5  ;;  %v3191_v31 = vld [vmem:[%s6356_s5 + $0x3c8] sm:$0xff]  ;;  %3329 = vmatpush.msra.mxu1 %v3159_v62 }
 0x46d   :  { %2927 = vst.msk [vmem:[#allocation5 + $0x1] sm:$0x1] %vm2766_vm8, %v5969_v32  ;;  %v3148_v32 = vld [vmem:[%s6356_s5 + $0x270] sm:$0xff]  ;;  %3369 = vmatpush.msra.mxu3 %v3191_v31 }
 0x46e   :  { %3304 = vmatpush.msra.mxu0 %v3148_v32  ;;  %3330 = vmatpush.msra.mxu1 %v3158_v15  ;;  %v3151_v32 = vld [vmem:[%s6356_s5 + $0x288] sm:$0xff] }
 0x470   :  { %3305 = vmatpush.msra.mxu0 %v3147_v28  ;;  %3331 = vmatpush.msra.mxu1 %v3157_v16 }
 0x472   :  { %v2939_v6 = vpop.permute.xlu1 %2938  ;;  %v3013_v58 = vpop.permute.xlu2 %3012  ;;  %3306 = vmatpush.msra.mxu0 %v3146_v37  ;;  %3332 = vmatpush.msra.mxu1 %v3156_v23  ;;  %v3182_v37 = vld [vmem:[%s6356_s5 + $0x380] sm:$0xff] }
 0x473   :  { %2941 = vst.msk [vmem:[#allocation5 + $0x3] sm:$0x1] %vm2759_vm7, %v2939_v6  ;;  %v2945_v25 = vpop.permute.xlu0 %2944  ;;  %v3187_v6 = vld [vmem:[%s6356_s5 + $0x3a8] sm:$0xff] }
 0x474   :  { %3015 = vst.msk [vmem:[#allocation5 + $0xb] sm:$0x1] %vm2752_vm6, %v3013_v58  ;;  %3307 = vmatpush.msra.mxu0 %v3145_v61  ;;  %v3138_v58 = vld [vmem:[%s6356_s5 + $0x220] sm:$0xff]  ;;  %3333 = vmatpush.msra.mxu1 %v3155_v8 }
 0x475   :  { %2947 = vst.msk [vmem:[#allocation5 + $0x3] sm:$0x1] %vm2766_vm8, %v2945_v25  ;;  %v3186_v25 = vld [vmem:[%s6356_s5 + $0x3a0] sm:$0xff] }
 0x476   :  { %3308 = vmatpush.msra.mxu0 %v3144_v26  ;;  %3334 = vmatpush.msra.mxu1 %v3154_v29 }
 0x478   :  { %3309 = vmatpush.msra.mxu0 %v3143_v59  ;;  %3335 = vmatpush.msra.mxu1 %v3153_v18 }
 0x47a   :  { %v2973_v20 = vpop.permute.xlu1 %2972  ;;  %v3005_v45 = vpop.permute.xlu2 %3004  ;;  %3310 = vmatpush.msra.mxu0 %v3142_v39  ;;  %3336 = vmatpush.msra.mxu1 %v3152_v53 }
 0x47b   :  { %2975 = vst.msk [vmem:[#allocation5 + $0x7] sm:$0x1] %vm2752_vm6, %v2973_v20  ;;  %v2953_v17 = vpop.permute.xlu0 %2952  ;;  %v3167_v20 = vld [vmem:[%s6356_s5 + $0x308] sm:$0xff] }
 0x47c   :  { %2955 = vst.msk [vmem:[#allocation5 + $0x5] sm:$0x1] %vm2752_vm6, %v2953_v17  ;;  %3311 = vmatpush.msra.mxu0 %v3141_v19  ;;  %3337 = vmatpush.msra.mxu1 %v3151_v32 }
 0x47d   :  { %2961 = vst.msk [vmem:[#allocation5 + $0x5] sm:$0x1] %vm2759_vm7, %v6013_v38  ;;  %v3177_v38 = vld [vmem:[%s6356_s5 + $0x358] sm:$0xff] }
 0x47e   :  { %3347 = vmatpush.msra.mxu2 %v3177_v38  ;;  %3312 = vmatpush.msra.mxu0 %v3140_v33 }
 0x47f   :  { %3338 = vmatpush.msra.mxu1 %v3150_v13 }
 0x480   :  { %3348 = vmatpush.msra.mxu2 %v3176_v11  ;;  %3313 = vmatpush.msra.mxu0 %v3139_v46  ;;  %v3784_v11 = vld [vmem:[%s6357_s6] ss:$0 sm:$0xff] }
 0x482   :  { %v2965_v4 = vpop.permute.xlu1 %2964  ;;  %3349 = vmatpush.msra.mxu2 %v3175_v43  ;;  %3314 = vmatpush.msra.mxu0 %v3138_v58  ;;  %v3039_v24 = vpop.permute.xlu2 %3038 }
 0x483   :  { %2967 = vst.msk [vmem:[#allocation5 + $0x5] sm:$0x1] %vm2766_vm8, %v2965_v4  ;;  %v2979_v21 = vpop.permute.xlu0 %2978 }
 0x484   :  { %2981 = vst.msk [vmem:[#allocation5 + $0x7] sm:$0x1] %vm2759_vm7, %v2979_v21  ;;  %3350 = vmatpush.msra.mxu2 %v3174_v47  ;;  %3315 = vmatpush.msra.mxu0 %v3137_v54 }
 0x485   :  { %2987 = vst.msk [vmem:[#allocation5 + $0x7] sm:$0x1] %vm2766_vm8, %v6038_v14  ;;  %v3190_v14 = vld [vmem:[%s6356_s5 + $0x3c0] sm:$0xff] }
 0x486   :  { %3370 = vmatpush.msra.mxu3 %v3190_v14  ;;  %3351 = vmatpush.msra.mxu2 %v3173_v52 }
 0x487   :  { %3316 = vmatpush.msra.mxu0 %v3136_v44 }
 0x488   :  { %3371 = vmatpush.msra.mxu3 %v3189_v57  ;;  %3352 = vmatpush.msra.mxu2 %v3172_v12 }
 0x489   :  { %3317 = vmatpush.msra.mxu0 %v3135_v30 }
 0x48a   :  { %v2993_v60 = vpop.permute.xlu1 %2992  ;;  %3372 = vmatpush.msra.mxu3 %v3188_v51  ;;  %3353 = vmatpush.msra.mxu2 %v3171_v2  ;;  %v3065_v22 = vpop.permute.xlu2 %3064 }
 0x48b   :  { %2995 = vst.msk [vmem:[#allocation5 + $0x9] sm:$0x1] %vm2752_vm6, %v2993_v60  ;;  %v2999_v1 = vpop.permute.xlu0 %2998  ;;  %3318 = vmatpush.msra.mxu0 %v3134_v0 }
 0x48c   :  { %v3068_v50 = vld [vmem:[#allocation5] sm:$0xff]  ;;  %3001 = vst.msk [vmem:[#allocation5 + $0x9] sm:$0x1] %vm2759_vm7, %v2999_v1  ;;  %3373 = vmatpush.msra.mxu3 %v3187_v6  ;;  %3354 = vmatpush.msra.mxu2 %v3170_v48 }
 0x48d   :  { %3204 = vst [vmem:[#allocation1] ss:$4 sm:$0xff] %v3068_v50 }
 0x48e   :  { %3007 = vst.msk [vmem:[#allocation5 + $0x9] sm:$0x1] %vm2766_vm8, %v3005_v45  ;;  %3374 = vmatpush.msra.mxu3 %v3186_v25  ;;  %3355 = vmatpush.msra.mxu2 %v3169_v10 }
 0x490   :  { %3375 = vmatpush.msra.mxu3 %v3185_v42  ;;  %3356 = vmatpush.msra.mxu2 %v3168_v35 }
 0x492   :  { %v3019_v56 = vpop.permute.xlu1 %3018  ;;  %3376 = vmatpush.msra.mxu3 %v3184_v27  ;;  %3357 = vmatpush.msra.mxu2 %v3167_v20 }
 0x493   :  { %3021 = vst.msk [vmem:[#allocation5 + $0xb] sm:$0x1] %vm2759_vm7, %v3019_v56  ;;  %v3033_v34 = vpop.permute.xlu0 %3032 }
 0x494   :  { %3035 = vst.msk [vmem:[#allocation5 + $0xd] sm:$0x1] %vm2752_vm6, %v3033_v34  ;;  %v3207_v9 = vld.sshfl [vmem:[#allocation1] sm:$0xff pattern:$0x73625140]  ;;  %3377 = vmatpush.msra.mxu3 %v3183_v36  ;;  %3358 = vmatpush.msra.mxu2 %v3166_v7 }
 0x495   :  { %3041 = vst.msk [vmem:[#allocation5 + $0xd] sm:$0x1] %vm2759_vm7, %v3039_v24  ;;  %3239 = vmatmul.f32.vlgmr.msrb.gmra.mxu0 %v3207_v9  ;;  %v3208_v49 = vld.sshfl [vmem:[#allocation1 + $0x8] sm:$0xff pattern:$0x73625140] }
 0x496   :  { %3259 = vmatmul.f32.vlgmr.msrb.gmra.mxu1 %v3208_v49  ;;  %v3209_v17 = vld.sshfl [vmem:[#allocation1 + $0x10] sm:$0xff pattern:$0x73625140]  ;;  %v3210_v28 = vld.sshfl [vmem:[#allocation1 + $0x18] sm:$0xff pattern:$0x73625140]  ;;  %3378 = vmatpush.msra.mxu3 %v3182_v37 }
 0x497   :  { %3279 = vmatmul.f32.vlgmr.msrb.gmra.mxu2 %v3209_v17  ;;  %3299 = vmatmul.f32.vlgmr.msrb.gmra.mxu3 %v3210_v28 }
 0x49a   :  { %v3053_v63 = vpop.permute.xlu1 %3052 }
 0x49b   :  { %3055 = vst.msk [vmem:[#allocation5 + $0xf] sm:$0x1] %vm2752_vm6, %v3053_v63  ;;  %v3059_v5 = vpop.permute.xlu0 %3058 }
 0x49c   :  { %3061 = vst.msk [vmem:[#allocation5 + $0xf] sm:$0x1] %vm2759_vm7, %v3059_v5 }
 0x49d   :  { %3067 = vst.msk [vmem:[#allocation5 + $0xf] sm:$0x1] %vm2766_vm8, %v3065_v22 }
 0x4a2   :  { %v3045_v61 = vpop.permute.xlu1 %3044 }
 0x4a3   :  { %3047 = vst.msk [vmem:[#allocation5 + $0xd] sm:$0x1] %vm2766_vm8, %v3045_v61  ;;  %v3025_v41 = vpop.permute.xlu0 %3024 }
 0x4a4   :  { %3027 = vst.msk [vmem:[#allocation5 + $0xb] sm:$0x1] %vm2766_vm8, %v3025_v41 }
 0x4ab   :  { %v3069_v38 = vld [vmem:[#allocation5 + $0x8] sm:$0xff] }
 0x4ac   :  { %3206 = vst [vmem:[#allocation1 + $0x20] ss:$4 sm:$0xff] %v3069_v38 }
 0x4b3   :  { %v3211_v3 = vld.sshfl [vmem:[#allocation1 + $0x20] sm:$0xff pattern:$0x73625140]  ;;  %v3212_v26 = vld.sshfl [vmem:[#allocation1 + $0x28] sm:$0xff pattern:$0x73625140] }
 0x4b4   :  { %3319 = vmatmul.f32.vlgmr.msra.gmra.mxu0 %v3211_v3  ;;  %3339 = vmatmul.f32.vlgmr.msra.gmra.mxu1 %v3212_v26  ;;  %v3213_v55 = vld.sshfl [vmem:[#allocation1 + $0x30] sm:$0xff pattern:$0x73625140]  ;;  %v3214_v4 = vld.sshfl [vmem:[#allocation1 + $0x38] sm:$0xff pattern:$0x73625140] }
 0x4b5   :  { %3359 = vmatmul.f32.vlgmr.msra.gmra.mxu2 %v3213_v55  ;;  %3379 = vmatmul.f32.vlgmr.msra.gmra.mxu3 %v3214_v4 }
 0x512   :  { %v3240_v40 = vpop.f32.mrf.mxu0 }
 0x513   :  { %v3241_v21 = vadd.f32 %v3784_v11, %v3240_v40  ;;  %v3260_v59 = vpop.f32.mrf.mxu1 }
 0x515   :  { %v3261_v43 = vadd.f32 %v3260_v59, %v3241_v21 }
 0x51a   :  { %v3280_v62 = vpop.f32.mrf.mxu2  ;;  %v3300_v39 = vpop.f32.mrf.mxu3 }
 0x51b   :  { %v3281_v31 = vadd.f32 %v3280_v62, %v3261_v43 }
 0x51d   :  { %v3301_v15 = vadd.f32 %v3300_v39, %v3281_v31 }
 0x531   :  { %v3320_v47 = vpop.f32.mrf.mxu0  ;;  %v3340_v45 = vpop.f32.mrf.mxu1 }
 0x532   :  { %v3321_v14 = vadd.f32 %v3320_v47, %v3301_v15 }
 0x534   :  { %v3341_v19 = vadd.f32 %v3340_v45, %v3321_v14 }
 0x538   :  { %v3360_v16 = vpop.f32.mrf.mxu2  ;;  %v3380_v57 = vpop.f32.mrf.mxu3 }
 0x539   :  { %v3361_v52 = vadd.f32 %v3360_v16, %v3341_v19 }
 0x53b   :  { %v3381_v60 = vadd.f32 %v3380_v57, %v3361_v52 }
 0x53d   :  { %3383 = vst [vmem:[#allocation6] sm:$0x3] %v3381_v60 }
 0x53e   :  { %3394 = dma.vmem_to_hbm [thread:$0]  %s3390_s19, 32, %s3392_s23, [#allocation7]  }
 0x53f   :  { %3824 = dma.done.wait [#allocation7], 32  }
 0x540   :  { %3825 = vsyncadd [#allocation7], 4294967264 }
 0x541   :  { %3399 = vsyncpa [#allocation7], 1 }

</bundles_post_ra>
